<compile_context>
chip_gen: v7x
topology: tpu7x:2x2x1
jax: 0.10.0
libtpu: 0.0.40
codegen_flags: <defaults>
</compile_context>

<pallas_src>
import functools
import math

import jax
import jax.numpy as jnp
from jax.experimental import pallas as pl
from jax.experimental.pallas import tpu as pltpu

# Stand-in for the module's `config` dict.
CONFIG = {
    "embedding_dim": 128,
    "context_length": 128,
    "blocks": {"default": {"hidden_dim": 128, "nb_of_attention_heads": 4}},
}


def _layer_norm(x, gamma, beta, eps=1e-5):
    """torch.nn.LayerNorm over the last axis (biased variance, eps=1e-5)."""
    mean = jnp.mean(x, axis=-1, keepdims=True)
    xc = x - mean
    var = jnp.mean(xc * xc, axis=-1, keepdims=True)
    return xc * jax.lax.rsqrt(var + eps) * gamma + beta


def _gelu_tanh(x):
    # TODO(synk): nn.GELU() defaults to the exact erf formulation; lax.erf
    # lowering is not guaranteed in Mosaic, so we use the tanh approximation
    # (max abs deviation ~1e-3 from the erf variant).
    c = math.sqrt(2.0 / math.pi)
    return 0.5 * x * (1.0 + jnp.tanh(c * (x + 0.044715 * x * x * x)))


def _block_kernel(x_ref, wq_ref, bq_ref, wk_ref, bk_ref, wv_ref, bv_ref,
                  g1_ref, be1_ref, w1_ref, b1_ref, w2_ref, b2_ref,
                  g2_ref, be2_ref, o_ref, *, num_heads):
    # x_ref: (TN, D) f32 tile of flattened (batch*seq) tokens.
    x = x_ref[...]
    d = x.shape[-1]
    dh = d // num_heads
    scale = 1.0 / math.sqrt(dh)

    # --- Q / K / V projections (MXU, f32 accumulation) --------------------
    q = jnp.dot(x, wq_ref[...], preferred_element_type=jnp.float32) + bq_ref[...]
    k = jnp.dot(x, wk_ref[...], preferred_element_type=jnp.float32) + bk_ref[...]
    v = jnp.dot(x, wv_ref[...], preferred_element_type=jnp.float32) + bv_ref[...]

    # --- the module's per-token attention over heads -----------------------
    # scores[n, h1, h2] = <q[n, h1, :], k[n, h2, :]> / sqrt(Dh); softmax over h2;
    # out[n, h1, :] = sum_h2 attn[n, h1, h2] * v[n, h2, :].
    # num_heads is small (4) so the loops are fully unrolled at trace time and
    # stay on the VPU/XLU (elementwise mul + lane reductions) — no tiny matmuls.
    head_outs = []
    for h1 in range(num_heads):
        qh = q[:, h1 * dh:(h1 + 1) * dh]                               # (TN, Dh)
        logits = [
            jnp.sum(qh * k[:, h2 * dh:(h2 + 1) * dh], axis=-1, keepdims=True) * scale
            for h2 in range(num_heads)                                  # (TN, 1) each
        ]
        m = logits[0]
        for l in logits[1:]:
            m = jnp.maximum(m, l)
        exps = [jnp.exp(l - m) for l in logits]
        denom = exps[0]
        for e in exps[1:]:
            denom = denom + e
        inv = 1.0 / denom
        oh = (exps[0] * inv) * v[:, 0:dh]
        for h2 in range(1, num_heads):
            oh = oh + (exps[h2] * inv) * v[:, h2 * dh:(h2 + 1) * dh]
        head_outs.append(oh)                                            # (TN, Dh)
    y = jnp.concatenate(head_outs, axis=-1)                             # (TN, D)

    # --- residual + LayerNorm 1 --------------------------------------------
    r = _layer_norm(x + y, g1_ref[...], be1_ref[...])

    # --- FeedForward: Linear -> GELU -> Linear ------------------------------
    h = jnp.dot(r, w1_ref[...], preferred_element_type=jnp.float32) + b1_ref[...]
    h = _gelu_tanh(h)
    y2 = jnp.dot(h, w2_ref[...], preferred_element_type=jnp.float32) + b2_ref[...]

    # --- residual + LayerNorm 2 --------------------------------------------
    out = _layer_norm(r + y2, g2_ref[...], be2_ref[...])
    o_ref[...] = out.astype(o_ref.dtype)


_PARAM_ORDER = ("wq", "bq", "wk", "bk", "wv", "bv",
                "g1", "be1", "w1", "b1", "w2", "b2", "g2", "be2")


def block_forward(X, params, *, num_heads, tn=128):
    """X: (B, S, D) f32 -> (B, S, D) f32, exact Block.forward semantics."""
    B, S, D = X.shape
    N = B * S
    if N < tn:
        tn = N
    assert N % tn == 0, "token count must be divisible by the token tile"
    assert D % num_heads == 0

    x2 = X.reshape(N, D)

    weight_args, weight_specs = [], []
    for name in _PARAM_ORDER:
        p = params[name]
        if p.ndim == 1:
            p = p.reshape(1, -1)          # lane-dense 2-D layout for VMEM
        weight_args.append(p)
        # Constant block index -> stays resident, not re-fetched per step.
        weight_specs.append(pl.BlockSpec(p.shape, lambda i: (0, 0)))

    kernel = functools.partial(_block_kernel, num_heads=num_heads)

    out = pl.pallas_call(
        kernel,
        out_shape=jax.ShapeDtypeStruct((N, D), X.dtype),
        grid_spec=pltpu.PrefetchScalarGridSpec(
            num_scalar_prefetch=0,
            grid=(N // tn,),
            in_specs=[pl.BlockSpec((tn, D), lambda i: (i, 0))] + weight_specs,
            out_specs=pl.BlockSpec((tn, D), lambda i: (i, 0)),
        ),
        compiler_params=pltpu.CompilerParams(
            dimension_semantics=("parallel",),
        ),
    )(x2, *weight_args)
    return out.reshape(B, S, D)


def block_reference(X, params, *, num_heads):
    """Pure-JAX reference with the same math (HIGHEST precision matmuls)."""
    P = jax.lax.Precision.HIGHEST
    B, S, D = X.shape
    dh = D // num_heads
    q = (jnp.dot(X, params["wq"], precision=P) + params["bq"]).reshape(B, S, num_heads, dh)
    k = (jnp.dot(X, params["wk"], precision=P) + params["bk"]).reshape(B, S, num_heads, dh)
    v = (jnp.dot(X, params["wv"], precision=P) + params["bv"]).reshape(B, S, num_heads, dh)
    att = jnp.einsum("bshd,bsgd->bshg", q, k, precision=P) / math.sqrt(dh)
    att = jax.nn.softmax(att, axis=-1)
    y = jnp.einsum("bshg,bsgd->bshd", att, v, precision=P).reshape(B, S, D)
    r = _layer_norm(X + y, params["g1"], params["be1"])
    h = _gelu_tanh(jnp.dot(r, params["w1"], precision=P) + params["b1"])
    y2 = jnp.dot(h, params["w2"], precision=P) + params["b2"]
    return _layer_norm(r + y2, params["g2"], params["be2"])


if __name__ == "__main__":
    key = jax.random.PRNGKey(0)
    ks = jax.random.split(key, 8)

    D = CONFIG["embedding_dim"]
    HID = CONFIG["blocks"]["default"]["hidden_dim"]       # == D (required by residuals)
    H = CONFIG["blocks"]["default"]["nb_of_attention_heads"]
    B, S = 2, CONFIG["context_length"]

    def linear_init(k, fan_in, fan_out):
        # nn.Linear default init; weight stored pre-transposed as (in, out).
        kw, kb = jax.random.split(k)
        bound = 1.0 / math.sqrt(fan_in)
        w = jax.random.uniform(kw, (fan_in, fan_out), jnp.float32, -bound, bound)
        b = jax.random.uniform(kb, (fan_out,), jnp.float32, -bound, bound)
        return w, b

    wq, bq = linear_init(ks[0], D, HID)
    wk, bk = linear_init(ks[1], D, HID)
    wv, bv = linear_init(ks[2], D, HID)
    w1, b1 = linear_init(ks[3], D, HID)
    w2, b2 = linear_init(ks[4], HID, D)

    params = dict(
        wq=wq, bq=bq, wk=wk, bk=bk, wv=wv, bv=bv,
        g1=jnp.ones((D,), jnp.float32), be1=jnp.zeros((D,), jnp.float32),
        w1=w1, b1=b1, w2=w2, b2=b2,
        g2=jnp.ones((D,), jnp.float32), be2=jnp.zeros((D,), jnp.float32),
    )

    X = jax.random.normal(ks[5], (B, S, D), dtype=jnp.float32)

    out = block_forward(X, params, num_heads=H)
    out = jax.block_until_ready(out)

    ref = block_reference(X, params, num_heads=H)
    assert out.shape == (B, S, D)
    assert jnp.allclose(out, ref, atol=3e-2, rtol=3e-2), "Pallas Block mismatch vs reference"

    print("KERNEL_OK")
</pallas_src>

<mosaic_0001>
module attributes {stable_mosaic.version = 11 : i64} {
  func.func @_block_kernel(%arg0: i32, %arg1: memref<128x128xf32, #tpu.memory_space<vmem>>, %arg2: memref<128x128xf32, #tpu.memory_space<vmem>>, %arg3: memref<1x128xf32, #tpu.memory_space<vmem>>, %arg4: memref<128x128xf32, #tpu.memory_space<vmem>>, %arg5: memref<1x128xf32, #tpu.memory_space<vmem>>, %arg6: memref<128x128xf32, #tpu.memory_space<vmem>>, %arg7: memref<1x128xf32, #tpu.memory_space<vmem>>, %arg8: memref<1x128xf32, #tpu.memory_space<vmem>>, %arg9: memref<1x128xf32, #tpu.memory_space<vmem>>, %arg10: memref<128x128xf32, #tpu.memory_space<vmem>>, %arg11: memref<1x128xf32, #tpu.memory_space<vmem>>, %arg12: memref<128x128xf32, #tpu.memory_space<vmem>>, %arg13: memref<1x128xf32, #tpu.memory_space<vmem>>, %arg14: memref<1x128xf32, #tpu.memory_space<vmem>>, %arg15: memref<1x128xf32, #tpu.memory_space<vmem>>, %arg16: memref<128x128xf32, #tpu.memory_space<vmem>>) attributes {dimension_semantics = [#tpu.dimension_semantics<parallel>], iteration_bounds = array<i64: 2>, scalar_prefetch = 0 : i64, scratch_operands = 0 : i64, tpu.core_type = #tpu.core_type<tc>, window_params = [{transform_indices = @transform_0, window_bounds = array<i64: 128, 128>}, {pipeline_mode = #tpu.pipeline_mode<synchronous>, transform_indices = @transform_1, window_bounds = array<i64: 128, 128>}, {pipeline_mode = #tpu.pipeline_mode<synchronous>, transform_indices = @transform_2, window_bounds = array<i64: 1, 128>}, {pipeline_mode = #tpu.pipeline_mode<synchronous>, transform_indices = @transform_3, window_bounds = array<i64: 128, 128>}, {pipeline_mode = #tpu.pipeline_mode<synchronous>, transform_indices = @transform_4, window_bounds = array<i64: 1, 128>}, {pipeline_mode = #tpu.pipeline_mode<synchronous>, transform_indices = @transform_5, window_bounds = array<i64: 128, 128>}, {pipeline_mode = #tpu.pipeline_mode<synchronous>, transform_indices = @transform_6, window_bounds = array<i64: 1, 128>}, {pipeline_mode = #tpu.pipeline_mode<synchronous>, transform_indices = @transform_7, window_bounds = array<i64: 1, 128>}, {pipeline_mode = #tpu.pipeline_mode<synchronous>, transform_indices = @transform_8, window_bounds = array<i64: 1, 128>}, {pipeline_mode = #tpu.pipeline_mode<synchronous>, transform_indices = @transform_9, window_bounds = array<i64: 128, 128>}, {pipeline_mode = #tpu.pipeline_mode<synchronous>, transform_indices = @transform_10, window_bounds = array<i64: 1, 128>}, {pipeline_mode = #tpu.pipeline_mode<synchronous>, transform_indices = @transform_11, window_bounds = array<i64: 128, 128>}, {pipeline_mode = #tpu.pipeline_mode<synchronous>, transform_indices = @transform_12, window_bounds = array<i64: 1, 128>}, {pipeline_mode = #tpu.pipeline_mode<synchronous>, transform_indices = @transform_13, window_bounds = array<i64: 1, 128>}, {pipeline_mode = #tpu.pipeline_mode<synchronous>, transform_indices = @transform_14, window_bounds = array<i64: 1, 128>}, {transform_indices = @transform_15, window_bounds = array<i64: 128, 128>}]} {
    %c0 = arith.constant 0 : index
    %c0_0 = arith.constant 0 : index
    %0 = vector.load %arg1[%c0, %c0_0] : memref<128x128xf32, #tpu.memory_space<vmem>>, vector<128x128xf32>
    %c0_1 = arith.constant 0 : index
    %c0_2 = arith.constant 0 : index
    %1 = vector.load %arg2[%c0_1, %c0_2] : memref<128x128xf32, #tpu.memory_space<vmem>>, vector<128x128xf32>
    %cst = arith.constant dense<0.000000e+00> : vector<128x128xf32>
    %2 = tpu.matmul %0, %1, %cst {dimension_numbers = #tpu.dot_dimension_numbers<[1], [0], [0], [1], [0, 0, 1, 1], [], []>} : vector<128x128xf32>, vector<128x128xf32>, vector<128x128xf32> -> vector<128x128xf32>
    %c0_3 = arith.constant 0 : index
    %c0_4 = arith.constant 0 : index
    %3 = vector.load %arg3[%c0_3, %c0_4] : memref<1x128xf32, #tpu.memory_space<vmem>>, vector<1x128xf32>
    %4 = vector.broadcast %3 : vector<1x128xf32> to vector<128x128xf32>
    %5 = arith.addf %2, %4 : vector<128x128xf32>
    %c0_5 = arith.constant 0 : index
    %c0_6 = arith.constant 0 : index
    %6 = vector.load %arg4[%c0_5, %c0_6] : memref<128x128xf32, #tpu.memory_space<vmem>>, vector<128x128xf32>
    %cst_7 = arith.constant dense<0.000000e+00> : vector<128x128xf32>
    %7 = tpu.matmul %0, %6, %cst_7 {dimension_numbers = #tpu.dot_dimension_numbers<[1], [0], [0], [1], [0, 0, 1, 1], [], []>} : vector<128x128xf32>, vector<128x128xf32>, vector<128x128xf32> -> vector<128x128xf32>
    %c0_8 = arith.constant 0 : index
    %c0_9 = arith.constant 0 : index
    %8 = vector.load %arg5[%c0_8, %c0_9] : memref<1x128xf32, #tpu.memory_space<vmem>>, vector<1x128xf32>
    %9 = vector.broadcast %8 : vector<1x128xf32> to vector<128x128xf32>
    %10 = arith.addf %7, %9 : vector<128x128xf32>
    %c0_10 = arith.constant 0 : index
    %c0_11 = arith.constant 0 : index
    %11 = vector.load %arg6[%c0_10, %c0_11] : memref<128x128xf32, #tpu.memory_space<vmem>>, vector<128x128xf32>
    %cst_12 = arith.constant dense<0.000000e+00> : vector<128x128xf32>
    %12 = tpu.matmul %0, %11, %cst_12 {dimension_numbers = #tpu.dot_dimension_numbers<[1], [0], [0], [1], [0, 0, 1, 1], [], []>} : vector<128x128xf32>, vector<128x128xf32>, vector<128x128xf32> -> vector<128x128xf32>
    %c0_13 = arith.constant 0 : index
    %c0_14 = arith.constant 0 : index
    %13 = vector.load %arg7[%c0_13, %c0_14] : memref<1x128xf32, #tpu.memory_space<vmem>>, vector<1x128xf32>
    %14 = vector.broadcast %13 : vector<1x128xf32> to vector<128x128xf32>
    %15 = arith.addf %12, %14 : vector<128x128xf32>
    %16 = vector.extract_strided_slice %5 {offsets = [0, 0], sizes = [128, 32], strides = [1, 1]} : vector<128x128xf32> to vector<128x32xf32>
    %17 = vector.extract_strided_slice %10 {offsets = [0, 0], sizes = [128, 32], strides = [1, 1]} : vector<128x128xf32> to vector<128x32xf32>
    %18 = arith.mulf %16, %17 : vector<128x32xf32>
    %cst_15 = arith.constant dense<0.000000e+00> : vector<128xf32>
    %19 = vector.multi_reduction <add>, %18, %cst_15 [1] : vector<128x32xf32> to vector<128xf32>
    %20 = vector.shape_cast %19 : vector<128xf32> to vector<128x1xf32>
    %cst_16 = arith.constant 0.176776692 : f32
    %21 = vector.broadcast %cst_16 : f32 to vector<128x1xf32>
    %22 = arith.mulf %20, %21 : vector<128x1xf32>
    %23 = vector.extract_strided_slice %10 {offsets = [0, 32], sizes = [128, 32], strides = [1, 1]} : vector<128x128xf32> to vector<128x32xf32>
    %24 = arith.mulf %16, %23 : vector<128x32xf32>
    %cst_17 = arith.constant dense<0.000000e+00> : vector<128xf32>
    %25 = vector.multi_reduction <add>, %24, %cst_17 [1] : vector<128x32xf32> to vector<128xf32>
    %26 = vector.shape_cast %25 : vector<128xf32> to vector<128x1xf32>
    %cst_18 = arith.constant 0.176776692 : f32
    %27 = vector.broadcast %cst_18 : f32 to vector<128x1xf32>
    %28 = arith.mulf %26, %27 : vector<128x1xf32>
    %29 = vector.extract_strided_slice %10 {offsets = [0, 64], sizes = [128, 32], strides = [1, 1]} : vector<128x128xf32> to vector<128x32xf32>
    %30 = arith.mulf %16, %29 : vector<128x32xf32>
    %cst_19 = arith.constant dense<0.000000e+00> : vector<128xf32>
    %31 = vector.multi_reduction <add>, %30, %cst_19 [1] : vector<128x32xf32> to vector<128xf32>
    %32 = vector.shape_cast %31 : vector<128xf32> to vector<128x1xf32>
    %cst_20 = arith.constant 0.176776692 : f32
    %33 = vector.broadcast %cst_20 : f32 to vector<128x1xf32>
    %34 = arith.mulf %32, %33 : vector<128x1xf32>
    %35 = vector.extract_strided_slice %10 {offsets = [0, 96], sizes = [128, 32], strides = [1, 1]} : vector<128x128xf32> to vector<128x32xf32>
    %36 = arith.mulf %16, %35 : vector<128x32xf32>
    %cst_21 = arith.constant dense<0.000000e+00> : vector<128xf32>
    %37 = vector.multi_reduction <add>, %36, %cst_21 [1] : vector<128x32xf32> to vector<128xf32>
    %38 = vector.shape_cast %37 : vector<128xf32> to vector<128x1xf32>
    %cst_22 = arith.constant 0.176776692 : f32
    %39 = vector.broadcast %cst_22 : f32 to vector<128x1xf32>
    %40 = arith.mulf %38, %39 : vector<128x1xf32>
    %41 = arith.maximumf %22, %28 : vector<128x1xf32>
    %42 = arith.maximumf %41, %34 : vector<128x1xf32>
    %43 = arith.maximumf %42, %40 : vector<128x1xf32>
    %44 = arith.subf %22, %43 : vector<128x1xf32>
    %45 = math.exp %44 : vector<128x1xf32>
    %46 = arith.subf %28, %43 : vector<128x1xf32>
    %47 = math.exp %46 : vector<128x1xf32>
    %48 = arith.subf %34, %43 : vector<128x1xf32>
    %49 = math.exp %48 : vector<128x1xf32>
    %50 = arith.subf %40, %43 : vector<128x1xf32>
    %51 = math.exp %50 : vector<128x1xf32>
    %52 = arith.addf %45, %47 : vector<128x1xf32>
    %53 = arith.addf %52, %49 : vector<128x1xf32>
    %54 = arith.addf %53, %51 : vector<128x1xf32>
    %cst_23 = arith.constant 1.000000e+00 : f32
    %55 = vector.broadcast %cst_23 : f32 to vector<128x1xf32>
    %56 = arith.divf %55, %54 : vector<128x1xf32>
    %57 = arith.mulf %45, %56 : vector<128x1xf32>
    %58 = vector.extract_strided_slice %15 {offsets = [0, 0], sizes = [128, 32], strides = [1, 1]} : vector<128x128xf32> to vector<128x32xf32>
    %59 = vector.broadcast %57 : vector<128x1xf32> to vector<128x32xf32>
    %60 = arith.mulf %59, %58 : vector<128x32xf32>
    %61 = arith.mulf %47, %56 : vector<128x1xf32>
    %62 = vector.extract_strided_slice %15 {offsets = [0, 32], sizes = [128, 32], strides = [1, 1]} : vector<128x128xf32> to vector<128x32xf32>
    %63 = vector.broadcast %61 : vector<128x1xf32> to vector<128x32xf32>
    %64 = arith.mulf %63, %62 : vector<128x32xf32>
    %65 = arith.addf %60, %64 : vector<128x32xf32>
    %66 = arith.mulf %49, %56 : vector<128x1xf32>
    %67 = vector.extract_strided_slice %15 {offsets = [0, 64], sizes = [128, 32], strides = [1, 1]} : vector<128x128xf32> to vector<128x32xf32>
    %68 = vector.broadcast %66 : vector<128x1xf32> to vector<128x32xf32>
    %69 = arith.mulf %68, %67 : vector<128x32xf32>
    %70 = arith.addf %65, %69 : vector<128x32xf32>
    %71 = arith.mulf %51, %56 : vector<128x1xf32>
    %72 = vector.extract_strided_slice %15 {offsets = [0, 96], sizes = [128, 32], strides = [1, 1]} : vector<128x128xf32> to vector<128x32xf32>
    %73 = vector.broadcast %71 : vector<128x1xf32> to vector<128x32xf32>
    %74 = arith.mulf %73, %72 : vector<128x32xf32>
    %75 = arith.addf %70, %74 : vector<128x32xf32>
    %76 = vector.extract_strided_slice %5 {offsets = [0, 32], sizes = [128, 32], strides = [1, 1]} : vector<128x128xf32> to vector<128x32xf32>
    %77 = vector.extract_strided_slice %10 {offsets = [0, 0], sizes = [128, 32], strides = [1, 1]} : vector<128x128xf32> to vector<128x32xf32>
    %78 = arith.mulf %76, %77 : vector<128x32xf32>
    %cst_24 = arith.constant dense<0.000000e+00> : vector<128xf32>
    %79 = vector.multi_reduction <add>, %78, %cst_24 [1] : vector<128x32xf32> to vector<128xf32>
    %80 = vector.shape_cast %79 : vector<128xf32> to vector<128x1xf32>
    %cst_25 = arith.constant 0.176776692 : f32
    %81 = vector.broadcast %cst_25 : f32 to vector<128x1xf32>
    %82 = arith.mulf %80, %81 : vector<128x1xf32>
    %83 = vector.extract_strided_slice %10 {offsets = [0, 32], sizes = [128, 32], strides = [1, 1]} : vector<128x128xf32> to vector<128x32xf32>
    %84 = arith.mulf %76, %83 : vector<128x32xf32>
    %cst_26 = arith.constant dense<0.000000e+00> : vector<128xf32>
    %85 = vector.multi_reduction <add>, %84, %cst_26 [1] : vector<128x32xf32> to vector<128xf32>
    %86 = vector.shape_cast %85 : vector<128xf32> to vector<128x1xf32>
    %cst_27 = arith.constant 0.176776692 : f32
    %87 = vector.broadcast %cst_27 : f32 to vector<128x1xf32>
    %88 = arith.mulf %86, %87 : vector<128x1xf32>
    %89 = vector.extract_strided_slice %10 {offsets = [0, 64], sizes = [128, 32], strides = [1, 1]} : vector<128x128xf32> to vector<128x32xf32>
    %90 = arith.mulf %76, %89 : vector<128x32xf32>
    %cst_28 = arith.constant dense<0.000000e+00> : vector<128xf32>
    %91 = vector.multi_reduction <add>, %90, %cst_28 [1] : vector<128x32xf32> to vector<128xf32>
    %92 = vector.shape_cast %91 : vector<128xf32> to vector<128x1xf32>
    %cst_29 = arith.constant 0.176776692 : f32
    %93 = vector.broadcast %cst_29 : f32 to vector<128x1xf32>
    %94 = arith.mulf %92, %93 : vector<128x1xf32>
    %95 = vector.extract_strided_slice %10 {offsets = [0, 96], sizes = [128, 32], strides = [1, 1]} : vector<128x128xf32> to vector<128x32xf32>
    %96 = arith.mulf %76, %95 : vector<128x32xf32>
    %cst_30 = arith.constant dense<0.000000e+00> : vector<128xf32>
    %97 = vector.multi_reduction <add>, %96, %cst_30 [1] : vector<128x32xf32> to vector<128xf32>
    %98 = vector.shape_cast %97 : vector<128xf32> to vector<128x1xf32>
    %cst_31 = arith.constant 0.176776692 : f32
    %99 = vector.broadcast %cst_31 : f32 to vector<128x1xf32>
    %100 = arith.mulf %98, %99 : vector<128x1xf32>
    %101 = arith.maximumf %82, %88 : vector<128x1xf32>
    %102 = arith.maximumf %101, %94 : vector<128x1xf32>
    %103 = arith.maximumf %102, %100 : vector<128x1xf32>
    %104 = arith.subf %82, %103 : vector<128x1xf32>
    %105 = math.exp %104 : vector<128x1xf32>
    %106 = arith.subf %88, %103 : vector<128x1xf32>
    %107 = math.exp %106 : vector<128x1xf32>
    %108 = arith.subf %94, %103 : vector<128x1xf32>
    %109 = math.exp %108 : vector<128x1xf32>
    %110 = arith.subf %100, %103 : vector<128x1xf32>
    %111 = math.exp %110 : vector<128x1xf32>
    %112 = arith.addf %105, %107 : vector<128x1xf32>
    %113 = arith.addf %112, %109 : vector<128x1xf32>
    %114 = arith.addf %113, %111 : vector<128x1xf32>
    %cst_32 = arith.constant 1.000000e+00 : f32
    %115 = vector.broadcast %cst_32 : f32 to vector<128x1xf32>
    %116 = arith.divf %115, %114 : vector<128x1xf32>
    %117 = arith.mulf %105, %116 : vector<128x1xf32>
    %118 = vector.extract_strided_slice %15 {offsets = [0, 0], sizes = [128, 32], strides = [1, 1]} : vector<128x128xf32> to vector<128x32xf32>
    %119 = vector.broadcast %117 : vector<128x1xf32> to vector<128x32xf32>
    %120 = arith.mulf %119, %118 : vector<128x32xf32>
    %121 = arith.mulf %107, %116 : vector<128x1xf32>
    %122 = vector.extract_strided_slice %15 {offsets = [0, 32], sizes = [128, 32], strides = [1, 1]} : vector<128x128xf32> to vector<128x32xf32>
    %123 = vector.broadcast %121 : vector<128x1xf32> to vector<128x32xf32>
    %124 = arith.mulf %123, %122 : vector<128x32xf32>
    %125 = arith.addf %120, %124 : vector<128x32xf32>
    %126 = arith.mulf %109, %116 : vector<128x1xf32>
    %127 = vector.extract_strided_slice %15 {offsets = [0, 64], sizes = [128, 32], strides = [1, 1]} : vector<128x128xf32> to vector<128x32xf32>
    %128 = vector.broadcast %126 : vector<128x1xf32> to vector<128x32xf32>
    %129 = arith.mulf %128, %127 : vector<128x32xf32>
    %130 = arith.addf %125, %129 : vector<128x32xf32>
    %131 = arith.mulf %111, %116 : vector<128x1xf32>
    %132 = vector.extract_strided_slice %15 {offsets = [0, 96], sizes = [128, 32], strides = [1, 1]} : vector<128x128xf32> to vector<128x32xf32>
    %133 = vector.broadcast %131 : vector<128x1xf32> to vector<128x32xf32>
    %134 = arith.mulf %133, %132 : vector<128x32xf32>
    %135 = arith.addf %130, %134 : vector<128x32xf32>
    %136 = vector.extract_strided_slice %5 {offsets = [0, 64], sizes = [128, 32], strides = [1, 1]} : vector<128x128xf32> to vector<128x32xf32>
    %137 = vector.extract_strided_slice %10 {offsets = [0, 0], sizes = [128, 32], strides = [1, 1]} : vector<128x128xf32> to vector<128x32xf32>
    %138 = arith.mulf %136, %137 : vector<128x32xf32>
    %cst_33 = arith.constant dense<0.000000e+00> : vector<128xf32>
    %139 = vector.multi_reduction <add>, %138, %cst_33 [1] : vector<128x32xf32> to vector<128xf32>
    %140 = vector.shape_cast %139 : vector<128xf32> to vector<128x1xf32>
    %cst_34 = arith.constant 0.176776692 : f32
    %141 = vector.broadcast %cst_34 : f32 to vector<128x1xf32>
    %142 = arith.mulf %140, %141 : vector<128x1xf32>
    %143 = vector.extract_strided_slice %10 {offsets = [0, 32], sizes = [128, 32], strides = [1, 1]} : vector<128x128xf32> to vector<128x32xf32>
    %144 = arith.mulf %136, %143 : vector<128x32xf32>
    %cst_35 = arith.constant dense<0.000000e+00> : vector<128xf32>
    %145 = vector.multi_reduction <add>, %144, %cst_35 [1] : vector<128x32xf32> to vector<128xf32>
    %146 = vector.shape_cast %145 : vector<128xf32> to vector<128x1xf32>
    %cst_36 = arith.constant 0.176776692 : f32
    %147 = vector.broadcast %cst_36 : f32 to vector<128x1xf32>
    %148 = arith.mulf %146, %147 : vector<128x1xf32>
    %149 = vector.extract_strided_slice %10 {offsets = [0, 64], sizes = [128, 32], strides = [1, 1]} : vector<128x128xf32> to vector<128x32xf32>
    %150 = arith.mulf %136, %149 : vector<128x32xf32>
    %cst_37 = arith.constant dense<0.000000e+00> : vector<128xf32>
    %151 = vector.multi_reduction <add>, %150, %cst_37 [1] : vector<128x32xf32> to vector<128xf32>
    %152 = vector.shape_cast %151 : vector<128xf32> to vector<128x1xf32>
    %cst_38 = arith.constant 0.176776692 : f32
    %153 = vector.broadcast %cst_38 : f32 to vector<128x1xf32>
    %154 = arith.mulf %152, %153 : vector<128x1xf32>
    %155 = vector.extract_strided_slice %10 {offsets = [0, 96], sizes = [128, 32], strides = [1, 1]} : vector<128x128xf32> to vector<128x32xf32>
    %156 = arith.mulf %136, %155 : vector<128x32xf32>
    %cst_39 = arith.constant dense<0.000000e+00> : vector<128xf32>
    %157 = vector.multi_reduction <add>, %156, %cst_39 [1] : vector<128x32xf32> to vector<128xf32>
    %158 = vector.shape_cast %157 : vector<128xf32> to vector<128x1xf32>
    %cst_40 = arith.constant 0.176776692 : f32
    %159 = vector.broadcast %cst_40 : f32 to vector<128x1xf32>
    %160 = arith.mulf %158, %159 : vector<128x1xf32>
    %161 = arith.maximumf %142, %148 : vector<128x1xf32>
    %162 = arith.maximumf %161, %154 : vector<128x1xf32>
    %163 = arith.maximumf %162, %160 : vector<128x1xf32>
    %164 = arith.subf %142, %163 : vector<128x1xf32>
    %165 = math.exp %164 : vector<128x1xf32>
    %166 = arith.subf %148, %163 : vector<128x1xf32>
    %167 = math.exp %166 : vector<128x1xf32>
    %168 = arith.subf %154, %163 : vector<128x1xf32>
    %169 = math.exp %168 : vector<128x1xf32>
    %170 = arith.subf %160, %163 : vector<128x1xf32>
    %171 = math.exp %170 : vector<128x1xf32>
    %172 = arith.addf %165, %167 : vector<128x1xf32>
    %173 = arith.addf %172, %169 : vector<128x1xf32>
    %174 = arith.addf %173, %171 : vector<128x1xf32>
    %cst_41 = arith.constant 1.000000e+00 : f32
    %175 = vector.broadcast %cst_41 : f32 to vector<128x1xf32>
    %176 = arith.divf %175, %174 : vector<128x1xf32>
    %177 = arith.mulf %165, %176 : vector<128x1xf32>
    %178 = vector.extract_strided_slice %15 {offsets = [0, 0], sizes = [128, 32], strides = [1, 1]} : vector<128x128xf32> to vector<128x32xf32>
    %179 = vector.broadcast %177 : vector<128x1xf32> to vector<128x32xf32>
    %180 = arith.mulf %179, %178 : vector<128x32xf32>
    %181 = arith.mulf %167, %176 : vector<128x1xf32>
    %182 = vector.extract_strided_slice %15 {offsets = [0, 32], sizes = [128, 32], strides = [1, 1]} : vector<128x128xf32> to vector<128x32xf32>
    %183 = vector.broadcast %181 : vector<128x1xf32> to vector<128x32xf32>
    %184 = arith.mulf %183, %182 : vector<128x32xf32>
    %185 = arith.addf %180, %184 : vector<128x32xf32>
    %186 = arith.mulf %169, %176 : vector<128x1xf32>
    %187 = vector.extract_strided_slice %15 {offsets = [0, 64], sizes = [128, 32], strides = [1, 1]} : vector<128x128xf32> to vector<128x32xf32>
    %188 = vector.broadcast %186 : vector<128x1xf32> to vector<128x32xf32>
    %189 = arith.mulf %188, %187 : vector<128x32xf32>
    %190 = arith.addf %185, %189 : vector<128x32xf32>
    %191 = arith.mulf %171, %176 : vector<128x1xf32>
    %192 = vector.extract_strided_slice %15 {offsets = [0, 96], sizes = [128, 32], strides = [1, 1]} : vector<128x128xf32> to vector<128x32xf32>
    %193 = vector.broadcast %191 : vector<128x1xf32> to vector<128x32xf32>
    %194 = arith.mulf %193, %192 : vector<128x32xf32>
    %195 = arith.addf %190, %194 : vector<128x32xf32>
    %196 = vector.extract_strided_slice %5 {offsets = [0, 96], sizes = [128, 32], strides = [1, 1]} : vector<128x128xf32> to vector<128x32xf32>
    %197 = vector.extract_strided_slice %10 {offsets = [0, 0], sizes = [128, 32], strides = [1, 1]} : vector<128x128xf32> to vector<128x32xf32>
    %198 = arith.mulf %196, %197 : vector<128x32xf32>
    %cst_42 = arith.constant dense<0.000000e+00> : vector<128xf32>
    %199 = vector.multi_reduction <add>, %198, %cst_42 [1] : vector<128x32xf32> to vector<128xf32>
    %200 = vector.shape_cast %199 : vector<128xf32> to vector<128x1xf32>
    %cst_43 = arith.constant 0.176776692 : f32
    %201 = vector.broadcast %cst_43 : f32 to vector<128x1xf32>
    %202 = arith.mulf %200, %201 : vector<128x1xf32>
    %203 = vector.extract_strided_slice %10 {offsets = [0, 32], sizes = [128, 32], strides = [1, 1]} : vector<128x128xf32> to vector<128x32xf32>
    %204 = arith.mulf %196, %203 : vector<128x32xf32>
    %cst_44 = arith.constant dense<0.000000e+00> : vector<128xf32>
    %205 = vector.multi_reduction <add>, %204, %cst_44 [1] : vector<128x32xf32> to vector<128xf32>
    %206 = vector.shape_cast %205 : vector<128xf32> to vector<128x1xf32>
    %cst_45 = arith.constant 0.176776692 : f32
    %207 = vector.broadcast %cst_45 : f32 to vector<128x1xf32>
    %208 = arith.mulf %206, %207 : vector<128x1xf32>
    %209 = vector.extract_strided_slice %10 {offsets = [0, 64], sizes = [128, 32], strides = [1, 1]} : vector<128x128xf32> to vector<128x32xf32>
    %210 = arith.mulf %196, %209 : vector<128x32xf32>
    %cst_46 = arith.constant dense<0.000000e+00> : vector<128xf32>
    %211 = vector.multi_reduction <add>, %210, %cst_46 [1] : vector<128x32xf32> to vector<128xf32>
    %212 = vector.shape_cast %211 : vector<128xf32> to vector<128x1xf32>
    %cst_47 = arith.constant 0.176776692 : f32
    %213 = vector.broadcast %cst_47 : f32 to vector<128x1xf32>
    %214 = arith.mulf %212, %213 : vector<128x1xf32>
    %215 = vector.extract_strided_slice %10 {offsets = [0, 96], sizes = [128, 32], strides = [1, 1]} : vector<128x128xf32> to vector<128x32xf32>
    %216 = arith.mulf %196, %215 : vector<128x32xf32>
    %cst_48 = arith.constant dense<0.000000e+00> : vector<128xf32>
    %217 = vector.multi_reduction <add>, %216, %cst_48 [1] : vector<128x32xf32> to vector<128xf32>
    %218 = vector.shape_cast %217 : vector<128xf32> to vector<128x1xf32>
    %cst_49 = arith.constant 0.176776692 : f32
    %219 = vector.broadcast %cst_49 : f32 to vector<128x1xf32>
    %220 = arith.mulf %218, %219 : vector<128x1xf32>
    %221 = arith.maximumf %202, %208 : vector<128x1xf32>
    %222 = arith.maximumf %221, %214 : vector<128x1xf32>
    %223 = arith.maximumf %222, %220 : vector<128x1xf32>
    %224 = arith.subf %202, %223 : vector<128x1xf32>
    %225 = math.exp %224 : vector<128x1xf32>
    %226 = arith.subf %208, %223 : vector<128x1xf32>
    %227 = math.exp %226 : vector<128x1xf32>
    %228 = arith.subf %214, %223 : vector<128x1xf32>
    %229 = math.exp %228 : vector<128x1xf32>
    %230 = arith.subf %220, %223 : vector<128x1xf32>
    %231 = math.exp %230 : vector<128x1xf32>
    %232 = arith.addf %225, %227 : vector<128x1xf32>
    %233 = arith.addf %232, %229 : vector<128x1xf32>
    %234 = arith.addf %233, %231 : vector<128x1xf32>
    %cst_50 = arith.constant 1.000000e+00 : f32
    %235 = vector.broadcast %cst_50 : f32 to vector<128x1xf32>
    %236 = arith.divf %235, %234 : vector<128x1xf32>
    %237 = arith.mulf %225, %236 : vector<128x1xf32>
    %238 = vector.extract_strided_slice %15 {offsets = [0, 0], sizes = [128, 32], strides = [1, 1]} : vector<128x128xf32> to vector<128x32xf32>
    %239 = vector.broadcast %237 : vector<128x1xf32> to vector<128x32xf32>
    %240 = arith.mulf %239, %238 : vector<128x32xf32>
    %241 = arith.mulf %227, %236 : vector<128x1xf32>
    %242 = vector.extract_strided_slice %15 {offsets = [0, 32], sizes = [128, 32], strides = [1, 1]} : vector<128x128xf32> to vector<128x32xf32>
    %243 = vector.broadcast %241 : vector<128x1xf32> to vector<128x32xf32>
    %244 = arith.mulf %243, %242 : vector<128x32xf32>
    %245 = arith.addf %240, %244 : vector<128x32xf32>
    %246 = arith.mulf %229, %236 : vector<128x1xf32>
    %247 = vector.extract_strided_slice %15 {offsets = [0, 64], sizes = [128, 32], strides = [1, 1]} : vector<128x128xf32> to vector<128x32xf32>
    %248 = vector.broadcast %246 : vector<128x1xf32> to vector<128x32xf32>
    %249 = arith.mulf %248, %247 : vector<128x32xf32>
    %250 = arith.addf %245, %249 : vector<128x32xf32>
    %251 = arith.mulf %231, %236 : vector<128x1xf32>
    %252 = vector.extract_strided_slice %15 {offsets = [0, 96], sizes = [128, 32], strides = [1, 1]} : vector<128x128xf32> to vector<128x32xf32>
    %253 = vector.broadcast %251 : vector<128x1xf32> to vector<128x32xf32>
    %254 = arith.mulf %253, %252 : vector<128x32xf32>
    %255 = arith.addf %250, %254 : vector<128x32xf32>
    %256 = tpu.concatenate %75, %135, %195, %255 in 1 : vector<128x32xf32>, vector<128x32xf32>, vector<128x32xf32>, vector<128x32xf32> -> vector<128x128xf32>
    %257 = arith.addf %0, %256 : vector<128x128xf32>
    %c0_51 = arith.constant 0 : index
    %c0_52 = arith.constant 0 : index
    %258 = vector.load %arg8[%c0_51, %c0_52] : memref<1x128xf32, #tpu.memory_space<vmem>>, vector<1x128xf32>
    %c0_53 = arith.constant 0 : index
    %c0_54 = arith.constant 0 : index
    %259 = vector.load %arg9[%c0_53, %c0_54] : memref<1x128xf32, #tpu.memory_space<vmem>>, vector<1x128xf32>
    %cst_55 = arith.constant dense<0.000000e+00> : vector<128xf32>
    %260 = vector.multi_reduction <add>, %257, %cst_55 [1] : vector<128x128xf32> to vector<128xf32>
    %261 = vector.shape_cast %260 : vector<128xf32> to vector<128x1xf32>
    %cst_56 = arith.constant 1.280000e+02 : f32
    %262 = vector.broadcast %cst_56 : f32 to vector<128x1xf32>
    %263 = arith.divf %261, %262 : vector<128x1xf32>
    %264 = vector.broadcast %263 : vector<128x1xf32> to vector<128x128xf32>
    %265 = arith.subf %257, %264 : vector<128x128xf32>
    %266 = arith.mulf %265, %265 : vector<128x128xf32>
    %cst_57 = arith.constant dense<0.000000e+00> : vector<128xf32>
    %267 = vector.multi_reduction <add>, %266, %cst_57 [1] : vector<128x128xf32> to vector<128xf32>
    %268 = vector.shape_cast %267 : vector<128xf32> to vector<128x1xf32>
    %cst_58 = arith.constant 1.280000e+02 : f32
    %269 = vector.broadcast %cst_58 : f32 to vector<128x1xf32>
    %270 = arith.divf %268, %269 : vector<128x1xf32>
    %cst_59 = arith.constant 9.99999974E-6 : f32
    %271 = vector.broadcast %cst_59 : f32 to vector<128x1xf32>
    %272 = arith.addf %270, %271 : vector<128x1xf32>
    %273 = math.rsqrt %272 : vector<128x1xf32>
    %274 = vector.broadcast %273 : vector<128x1xf32> to vector<128x128xf32>
    %275 = arith.mulf %265, %274 : vector<128x128xf32>
    %276 = vector.broadcast %258 : vector<1x128xf32> to vector<128x128xf32>
    %277 = arith.mulf %275, %276 : vector<128x128xf32>
    %278 = vector.broadcast %259 : vector<1x128xf32> to vector<128x128xf32>
    %279 = arith.addf %277, %278 : vector<128x128xf32>
    %c0_60 = arith.constant 0 : index
    %c0_61 = arith.constant 0 : index
    %280 = vector.load %arg10[%c0_60, %c0_61] : memref<128x128xf32, #tpu.memory_space<vmem>>, vector<128x128xf32>
    %cst_62 = arith.constant dense<0.000000e+00> : vector<128x128xf32>
    %281 = tpu.matmul %279, %280, %cst_62 {dimension_numbers = #tpu.dot_dimension_numbers<[1], [0], [0], [1], [0, 0, 1, 1], [], []>} : vector<128x128xf32>, vector<128x128xf32>, vector<128x128xf32> -> vector<128x128xf32>
    %c0_63 = arith.constant 0 : index
    %c0_64 = arith.constant 0 : index
    %282 = vector.load %arg11[%c0_63, %c0_64] : memref<1x128xf32, #tpu.memory_space<vmem>>, vector<1x128xf32>
    %283 = vector.broadcast %282 : vector<1x128xf32> to vector<128x128xf32>
    %284 = arith.addf %281, %283 : vector<128x128xf32>
    %cst_65 = arith.constant 5.000000e-01 : f32
    %285 = vector.broadcast %cst_65 : f32 to vector<128x128xf32>
    %286 = arith.mulf %285, %284 : vector<128x128xf32>
    %cst_66 = arith.constant 4.471500e-02 : f32
    %287 = vector.broadcast %cst_66 : f32 to vector<128x128xf32>
    %288 = arith.mulf %287, %284 : vector<128x128xf32>
    %289 = arith.mulf %288, %284 : vector<128x128xf32>
    %290 = arith.mulf %289, %284 : vector<128x128xf32>
    %291 = arith.addf %284, %290 : vector<128x128xf32>
    %cst_67 = arith.constant 0.797884583 : f32
    %292 = vector.broadcast %cst_67 : f32 to vector<128x128xf32>
    %293 = arith.mulf %292, %291 : vector<128x128xf32>
    %294 = math.tanh %293 : vector<128x128xf32>
    %cst_68 = arith.constant 1.000000e+00 : f32
    %295 = vector.broadcast %cst_68 : f32 to vector<128x128xf32>
    %296 = arith.addf %295, %294 : vector<128x128xf32>
    %297 = arith.mulf %286, %296 : vector<128x128xf32>
    %c0_69 = arith.constant 0 : index
    %c0_70 = arith.constant 0 : index
    %298 = vector.load %arg12[%c0_69, %c0_70] : memref<128x128xf32, #tpu.memory_space<vmem>>, vector<128x128xf32>
    %cst_71 = arith.constant dense<0.000000e+00> : vector<128x128xf32>
    %299 = tpu.matmul %297, %298, %cst_71 {dimension_numbers = #tpu.dot_dimension_numbers<[1], [0], [0], [1], [0, 0, 1, 1], [], []>} : vector<128x128xf32>, vector<128x128xf32>, vector<128x128xf32> -> vector<128x128xf32>
    %c0_72 = arith.constant 0 : index
    %c0_73 = arith.constant 0 : index
    %300 = vector.load %arg13[%c0_72, %c0_73] : memref<1x128xf32, #tpu.memory_space<vmem>>, vector<1x128xf32>
    %301 = vector.broadcast %300 : vector<1x128xf32> to vector<128x128xf32>
    %302 = arith.addf %299, %301 : vector<128x128xf32>
    %303 = arith.addf %279, %302 : vector<128x128xf32>
    %c0_74 = arith.constant 0 : index
    %c0_75 = arith.constant 0 : index
    %304 = vector.load %arg14[%c0_74, %c0_75] : memref<1x128xf32, #tpu.memory_space<vmem>>, vector<1x128xf32>
    %c0_76 = arith.constant 0 : index
    %c0_77 = arith.constant 0 : index
    %305 = vector.load %arg15[%c0_76, %c0_77] : memref<1x128xf32, #tpu.memory_space<vmem>>, vector<1x128xf32>
    %cst_78 = arith.constant dense<0.000000e+00> : vector<128xf32>
    %306 = vector.multi_reduction <add>, %303, %cst_78 [1] : vector<128x128xf32> to vector<128xf32>
    %307 = vector.shape_cast %306 : vector<128xf32> to vector<128x1xf32>
    %cst_79 = arith.constant 1.280000e+02 : f32
    %308 = vector.broadcast %cst_79 : f32 to vector<128x1xf32>
    %309 = arith.divf %307, %308 : vector<128x1xf32>
    %310 = vector.broadcast %309 : vector<128x1xf32> to vector<128x128xf32>
    %311 = arith.subf %303, %310 : vector<128x128xf32>
    %312 = arith.mulf %311, %311 : vector<128x128xf32>
    %cst_80 = arith.constant dense<0.000000e+00> : vector<128xf32>
    %313 = vector.multi_reduction <add>, %312, %cst_80 [1] : vector<128x128xf32> to vector<128xf32>
    %314 = vector.shape_cast %313 : vector<128xf32> to vector<128x1xf32>
    %cst_81 = arith.constant 1.280000e+02 : f32
    %315 = vector.broadcast %cst_81 : f32 to vector<128x1xf32>
    %316 = arith.divf %314, %315 : vector<128x1xf32>
    %cst_82 = arith.constant 9.99999974E-6 : f32
    %317 = vector.broadcast %cst_82 : f32 to vector<128x1xf32>
    %318 = arith.addf %316, %317 : vector<128x1xf32>
    %319 = math.rsqrt %318 : vector<128x1xf32>
    %320 = vector.broadcast %319 : vector<128x1xf32> to vector<128x128xf32>
    %321 = arith.mulf %311, %320 : vector<128x128xf32>
    %322 = vector.broadcast %304 : vector<1x128xf32> to vector<128x128xf32>
    %323 = arith.mulf %321, %322 : vector<128x128xf32>
    %324 = vector.broadcast %305 : vector<1x128xf32> to vector<128x128xf32>
    %325 = arith.addf %323, %324 : vector<128x128xf32>
    %c0_83 = arith.constant 0 : index
    %c0_84 = arith.constant 0 : index
    %326 = vector.load %arg16[%c0_83, %c0_84] : memref<128x128xf32, #tpu.memory_space<vmem>>, vector<128x128xf32>
    tpu.vector_store %arg16[%c0_83, %c0_84], %325 {strides = array<i32>} : memref<128x128xf32, #tpu.memory_space<vmem>>, vector<128x128xf32>,
    return
  }
  func.func @transform_0(%arg0: i32) -> (i32, i32) {
    %c0_i32 = arith.constant 0 : i32
    %c0_i32_0 = arith.constant 0 : i32
    return %arg0, %c0_i32 : i32, i32
  }
  func.func @transform_1(%arg0: i32) -> (i32, i32) {
    %c0_i32 = arith.constant 0 : i32
    %c0_i32_0 = arith.constant 0 : i32
    %c0_i32_1 = arith.constant 0 : i32
    return %c0_i32, %c0_i32_0 : i32, i32
  }
  func.func @transform_2(%arg0: i32) -> (i32, i32) {
    %c0_i32 = arith.constant 0 : i32
    %c0_i32_0 = arith.constant 0 : i32
    %c0_i32_1 = arith.constant 0 : i32
    return %c0_i32, %c0_i32_0 : i32, i32
  }
  func.func @transform_3(%arg0: i32) -> (i32, i32) {
    %c0_i32 = arith.constant 0 : i32
    %c0_i32_0 = arith.constant 0 : i32
    %c0_i32_1 = arith.constant 0 : i32
    return %c0_i32, %c0_i32_0 : i32, i32
  }
  func.func @transform_4(%arg0: i32) -> (i32, i32) {
    %c0_i32 = arith.constant 0 : i32
    %c0_i32_0 = arith.constant 0 : i32
    %c0_i32_1 = arith.constant 0 : i32
    return %c0_i32, %c0_i32_0 : i32, i32
  }
  func.func @transform_5(%arg0: i32) -> (i32, i32) {
    %c0_i32 = arith.constant 0 : i32
    %c0_i32_0 = arith.constant 0 : i32
    %c0_i32_1 = arith.constant 0 : i32
    return %c0_i32, %c0_i32_0 : i32, i32
  }
  func.func @transform_6(%arg0: i32) -> (i32, i32) {
    %c0_i32 = arith.constant 0 : i32
    %c0_i32_0 = arith.constant 0 : i32
    %c0_i32_1 = arith.constant 0 : i32
    return %c0_i32, %c0_i32_0 : i32, i32
  }
  func.func @transform_7(%arg0: i32) -> (i32, i32) {
    %c0_i32 = arith.constant 0 : i32
    %c0_i32_0 = arith.constant 0 : i32
    %c0_i32_1 = arith.constant 0 : i32
    return %c0_i32, %c0_i32_0 : i32, i32
  }
  func.func @transform_8(%arg0: i32) -> (i32, i32) {
    %c0_i32 = arith.constant 0 : i32
    %c0_i32_0 = arith.constant 0 : i32
    %c0_i32_1 = arith.constant 0 : i32
    return %c0_i32, %c0_i32_0 : i32, i32
  }
  func.func @transform_9(%arg0: i32) -> (i32, i32) {
    %c0_i32 = arith.constant 0 : i32
    %c0_i32_0 = arith.constant 0 : i32
    %c0_i32_1 = arith.constant 0 : i32
    return %c0_i32, %c0_i32_0 : i32, i32
  }
  func.func @transform_10(%arg0: i32) -> (i32, i32) {
    %c0_i32 = arith.constant 0 : i32
    %c0_i32_0 = arith.constant 0 : i32
    %c0_i32_1 = arith.constant 0 : i32
    return %c0_i32, %c0_i32_0 : i32, i32
  }
  func.func @transform_11(%arg0: i32) -> (i32, i32) {
    %c0_i32 = arith.constant 0 : i32
    %c0_i32_0 = arith.constant 0 : i32
    %c0_i32_1 = arith.constant 0 : i32
    return %c0_i32, %c0_i32_0 : i32, i32
  }
  func.func @transform_12(%arg0: i32) -> (i32, i32) {
    %c0_i32 = arith.constant 0 : i32
    %c0_i32_0 = arith.constant 0 : i32
    %c0_i32_1 = arith.constant 0 : i32
    return %c0_i32, %c0_i32_0 : i32, i32
  }
  func.func @transform_13(%arg0: i32) -> (i32, i32) {
    %c0_i32 = arith.constant 0 : i32
    %c0_i32_0 = arith.constant 0 : i32
    %c0_i32_1 = arith.constant 0 : i32
    return %c0_i32, %c0_i32_0 : i32, i32
  }
  func.func @transform_14(%arg0: i32) -> (i32, i32) {
    %c0_i32 = arith.constant 0 : i32
    %c0_i32_0 = arith.constant 0 : i32
    %c0_i32_1 = arith.constant 0 : i32
    return %c0_i32, %c0_i32_0 : i32, i32
  }
  func.func @transform_15(%arg0: i32) -> (i32, i32) {
    %c0_i32 = arith.constant 0 : i32
    %c0_i32_0 = arith.constant 0 : i32
    return %arg0, %c0_i32 : i32, i32
  }
}

</mosaic_0001>

<bundles_post_ra>
// kernel: tpu_custom_call.1
= control target key start
LH: loop header
LB: loop body
LE: loop exit
PB: predicated region body
PF: predicated region fallthrough
CT: control target
= control target key end

     0   :  { %s15362_s0 = inlined_call_operand.hbm [shape: f32[256,128], index: 0, kind: input, shape index: {}]   ;;  %s15363_s1 = inlined_call_operand.hbm [shape: f32[128,128], index: 1, kind: input, shape index: {}]   ;;  %s15364_s2 = inlined_call_operand.vmem [shape: f32[1,128], index: 2, kind: input, shape index: {}]   ;;  %s15365_s3 = inlined_call_operand.hbm [shape: f32[128,128], index: 3, kind: input, shape index: {}]   ;;  %s15366_s4 = inlined_call_operand.vmem [shape: f32[1,128], index: 4, kind: input, shape index: {}]   ;;  %s15367_s5 = inlined_call_operand.hbm [shape: f32[128,128], index: 5, kind: input, shape index: {}]   ;;  %s15368_s6 = inlined_call_operand.vmem [shape: f32[1,128], index: 6, kind: input, shape index: {}]   ;;  %s15369_s7 = inlined_call_operand.vmem [shape: f32[1,128], index: 7, kind: input, shape index: {}]   ;;  %s15370_s8 = inlined_call_operand.vmem [shape: f32[1,128], index: 8, kind: input, shape index: {}]   ;;  %s15371_s9 = inlined_call_operand.hbm [shape: f32[128,128], index: 9, kind: input, shape index: {}]   ;;  %s15372_s10 = inlined_call_operand.vmem [shape: f32[1,128], index: 10, kind: input, shape index: {}]   ;;  %s15373_s11 = inlined_call_operand.hbm [shape: f32[128,128], index: 11, kind: input, shape index: {}]   ;;  %s15374_s12 = inlined_call_operand.vmem [shape: f32[1,128], index: 12, kind: input, shape index: {}]   ;;  %s15375_s13 = inlined_call_operand.vmem [shape: f32[1,128], index: 13, kind: input, shape index: {}]   ;;  %s15376_s14 = inlined_call_operand.vmem [shape: f32[1,128], index: 14, kind: input, shape index: {}]   ;;  %s15377_s15 = inlined_call_operand.hbm [shape: f32[256,128], index: 15, kind: output, shape index: {}]  }
   0x1   :  { %15622 = sst [smem:[#allocation203_spill]] %s15363_s1 }
   0x2   :  { %15623 = sst [smem:[#allocation204_spill]] %s15369_s7 }
   0x3   :  { %15624 = sst [smem:[#allocation205_spill]] %s15370_s8 }
   0x4   :  { %15625 = sst [smem:[#allocation206_spill]] %s15372_s10 }
   0x5   :  { %15626 = sst [smem:[#allocation207_spill]] %s15374_s12 }
   0x6   :  { %15627 = sst [smem:[#allocation208_spill]] %s15375_s13 }
   0x7   :  { %15628 = sst [smem:[#allocation209_spill]] %s15376_s14 }
   0x8   :  { %15629 = sst [smem:[#allocation210_spill]] %s15377_s15 }
   0x9   :  { %20 = vsyncpa [#allocation3], 0 }
   0xa   :  { %22 = vsyncpa [#allocation3 + $0x1], 0 }
   0xb   :  { %23 = vsyncpa [#allocation6], 0 }
   0xc   :  { %24 = vsyncpa [#allocation9], 0 }
   0xd   :  { %25 = vsyncpa [#allocation12], 0 }
   0xe   :  { %26 = vsyncpa [#allocation4], 0 }
   0xf   :  { %28 = vsyncpa [#allocation4 + $0x1], 0  ;;  %s8950_s18 = smov 0   ;;  %s8952_s19 = smov 0  }
  0x10   :  { %s8954_s20 = smov 0   ;;  %s8956_s21 = smov 0  }
  0x11 LB: > { %s8856_s22 = smov [#allocation5]   ;;  %s8971_s24 = sadd.s32 4294967295, %s8854_s21   ;;  %s8854_s21 = sphi %s8956_s21, %s16442_s21   ;;  %s8850_s20 = sphi %s8954_s20, %s16441_s20   ;;  %s8846_s19 = sphi %s8952_s19, %s16440_s19   ;;  %s8842_s18 = sphi %s8950_s18, %s16439_s18  }
  0x12   : > { %s397_s23 = sshll.u32 %s8856_s22, 4  ;;  %p7100_p0 = scmp.ge.s32.totalorder %s8854_s21, 1  ;;  %s8976_s23 = int_to_ptr.vmem [resolvable:$true] %s397_s23 }
  0x13   : > { %p15379_p1 = scmp.eq.s32.totalorder %s8971_s24, 0  ;;  %p385_p2 = scmp.lt.s32.totalorder %s8854_s21, 3 }
  0x14   : > { %s8857_s26 = smov [#allocation8]   ;;  %s8858_s29 = smov [#allocation7]  }
  0x15   : > { %p8978_p3 = pnand %p7100_p0, %p385_p2  ;;  %s429_s27 = sshll.u32 %s8857_s26, 4  ;;  %s8991_s27 = int_to_ptr.vmem [resolvable:$true] %s429_s27 }
  0x16   : > { %s413_s30 = sshll.u32 %s8858_s29, 4  ;;  %s15632_s1 = sld [smem:[#allocation203_spill]]  ;;  %s8993_s30 = int_to_ptr.vmem [resolvable:$true] %s413_s30 }
  0x17   : > { %s15630_s25 = scalar_select %p8978_p3, 1, 0 }
  0x18   : > { %p7774_p5 = pneg %p8978_p3 }
  0x1a   : > { %p8987_p6 = pnand %p7774_p5, %p15379_p1 }
  0x1c   : > { %s8606_s22 = scalar_lea.hbm %s15632_s1, 2048  ;;  %p9003_p8 = pneg %p8987_p6 }
  0x1d   : > { %p8607_p7 = scmp.ne.s32.totalorder %s15632_s1, %s8606_s22  ;;  %p8613_p11 = scmp.lt.u32.totalorder %s8606_s22, %s15632_s1 }
  0x1f   : > { %p8609_p9 = pnand %p9003_p8, %p8607_p7 }
  0x21   : > { %p8610_p10 = pneg %p8609_p9 }
  0x23   : > { %p8615_p12 = pnand %p8613_p11, %p8610_p10 }
  0x25   : > { %8618 = shalt.err (!%p8615_p12)
}
  0x26   : > { %s8619_s14 = scalar_lea.vmem %s8976_s23, 2048  ;;  %p8627_p5 = scmp.lt.s32.totalorder %s8976_s23, %s8976_s23 }
  0x27   : > { %p8620_p13 = scmp.ne.s32.totalorder %s8976_s23, %s8619_s14  ;;  %p8628_p4 = scmp.lt.s32.totalorder %s8619_s14, %s8619_s14 }
  0x29   : > { %p8622_p0 = pnand %p8620_p13, %p9003_p8  ;;  %p8629_p7 = por %p8628_p4, %p8627_p5 }
  0x2b   : > { %p8623_p2 = pneg %p8622_p0 }
  0x2d   : > { %p8630_p9 = pnand %p8629_p7, %p8623_p2 }
  0x2f   : > { %8633 = shalt.err (!%p8630_p9)
}
  0x30   : > { %s15381_s15 = smov 128   ;;  %s8860_s13 = smov 8  }
  0x31   : > { %7777 = dma.hbm_to_vmem [thread:$0]  (!%p8987_p6), %s15632_s1, 2048, %s8976_s23, [#allocation6], %s15381_s15, %s15381_s15, %s8860_s13  }
  0x32   : > { %s8634_s14 = scalar_lea.hbm %s15367_s5, 2048 }
  0x33   : > { %p8635_p4 = scmp.ne.s32.totalorder %s15367_s5, %s8634_s14  ;;  %p8641_p12 = scmp.lt.u32.totalorder %s8634_s14, %s15367_s5 }
  0x35   : > { %p8637_p10 = pnand %p8635_p4, %p9003_p8 }
  0x37   : > { %p8638_p11 = pneg %p8637_p10 }
  0x39   : > { %p8643_p13 = pnand %p8641_p12, %p8638_p11 }
  0x3b   : > { %8646 = shalt.err (!%p8643_p13)
}
  0x3c   : > { %s8647_s23 = scalar_lea.vmem %s8991_s27, 2048  ;;  %p8655_p7 = scmp.lt.s32.totalorder %s8991_s27, %s8991_s27 }
  0x3d   : > { %p8648_p0 = scmp.ne.s32.totalorder %s8991_s27, %s8647_s23  ;;  %p8656_p9 = scmp.lt.s32.totalorder %s8647_s23, %s8647_s23 }
  0x3f   : > { %p8650_p2 = pnand %p8648_p0, %p9003_p8  ;;  %p8657_p4 = por %p8656_p9, %p8655_p7 }
  0x41   : > { %p8651_p5 = pneg %p8650_p2 }
  0x43   : > { %p8658_p10 = pnand %p8657_p4, %p8651_p5 }
  0x45   : > { %8661 = shalt.err (!%p8658_p10)
}
  0x46   : > { %7783 = dma.hbm_to_vmem [thread:$0]  (!%p8987_p6), %s15367_s5, 2048, %s8991_s27, [#allocation9], %s15381_s15, %s15381_s15, %s8860_s13  }
  0x47   : > { %s8662_s16 = scalar_lea.hbm %s15365_s3, 2048 }
  0x48   : > { %p8663_p11 = scmp.ne.s32.totalorder %s15365_s3, %s8662_s16  ;;  %p8669_p0 = scmp.lt.u32.totalorder %s8662_s16, %s15365_s3 }
  0x4a   : > { %p8665_p12 = pnand %p8663_p11, %p9003_p8 }
  0x4c   : > { %p8666_p13 = pneg %p8665_p12 }
  0x4e   : > { %p8671_p2 = pnand %p8669_p0, %p8666_p13 }
  0x50   : > { %8674 = shalt.err (!%p8671_p2)
}
  0x51   : > { %s8675_s27 = scalar_lea.vmem %s8993_s30, 2048  ;;  %p8683_p4 = scmp.lt.s32.totalorder %s8993_s30, %s8993_s30 }
  0x52   : > { %p8676_p5 = scmp.ne.s32.totalorder %s8993_s30, %s8675_s27  ;;  %p8684_p10 = scmp.lt.s32.totalorder %s8675_s27, %s8675_s27 }
  0x54   : > { %p8678_p7 = pnand %p8676_p5, %p9003_p8  ;;  %p8685_p11 = por %p8684_p10, %p8683_p4 }
  0x56   : > { %p8679_p9 = pneg %p8678_p7 }
  0x58   : > { %p8686_p12 = pnand %p8685_p11, %p8679_p9 }
  0x5a   : > { %8689 = shalt.err (!%p8686_p12)
}
  0x5b   : > { %7780 = dma.hbm_to_vmem [thread:$0]  (!%p8987_p6), %s15365_s3, 2048, %s8993_s30, [#allocation6], %s15381_s15, %s15381_s15, %s8860_s13  }
  0x5c   : > { %s8861_s8 = smov [#allocation10]   ;;  %s8862_s12 = smov [#allocation11]  }
  0x5d   : > { %s451_s10 = sshll.u32 %s8861_s8, 4  ;;  %s467_s16 = sshll.u32 %s8862_s12, 4  ;;  %s452_s10 = int_to_ptr.vmem [resolvable:$true] %s451_s10  ;;  %s468_s16 = int_to_ptr.vmem [resolvable:$true] %s467_s16 }
  0x5e   : > { %s8690_s29 = scalar_lea.hbm %s15371_s9, 2048 }
  0x5f   : > { %p8691_p13 = scmp.ne.s32.totalorder %s15371_s9, %s8690_s29  ;;  %p8697_p5 = scmp.lt.u32.totalorder %s8690_s29, %s15371_s9 }
  0x61   : > { %p8693_p0 = pnand %p8691_p13, %p9003_p8 }
  0x63   : > { %p8694_p2 = pneg %p8693_p0 }
  0x65   : > { %p8699_p7 = pnand %p8697_p5, %p8694_p2 }
  0x67   : > { %8702 = shalt.err (!%p8699_p7)
}
  0x68   : > { %s8703_s30 = scalar_lea.vmem %s452_s10, 2048  ;;  %p8711_p11 = scmp.lt.s32.totalorder %s452_s10, %s452_s10 }
  0x69   : > { %p8704_p9 = scmp.ne.s32.totalorder %s452_s10, %s8703_s30  ;;  %p8712_p12 = scmp.lt.s32.totalorder %s8703_s30, %s8703_s30 }
  0x6b   : > { %p8706_p4 = pnand %p8704_p9, %p9003_p8  ;;  %p8713_p1 = por %p8712_p12, %p8711_p11 }
  0x6d   : > { %p8707_p10 = pneg %p8706_p4 }
  0x6f   : > { %p8714_p3 = pnand %p8713_p1, %p8707_p10 }
  0x71   : > { %8717 = shalt.err (!%p8714_p3)
}
  0x72   : > { %7786 = dma.hbm_to_vmem [thread:$0]  (!%p8987_p6), %s15371_s9, 2048, %s452_s10, [#allocation9], %s15381_s15, %s15381_s15, %s8860_s13  }
  0x73   : > { %s8718_s17 = scalar_lea.hbm %s15373_s11, 2048 }
  0x74   : > { %p8719_p1 = scmp.ne.s32.totalorder %s15373_s11, %s8718_s17  ;;  %p8725_p0 = scmp.lt.u32.totalorder %s8718_s17, %s15373_s11 }
  0x76   : > { %p8721_p3 = pnand %p8719_p1, %p9003_p8 }
  0x78   : > { %p8722_p13 = pneg %p8721_p3 }
  0x7a   : > { %p8727_p2 = pnand %p8725_p0, %p8722_p13 }
  0x7c   : > { %8730 = shalt.err (!%p8727_p2)
}
  0x7d   : > { %s8731_s23 = scalar_lea.vmem %s468_s16, 2048  ;;  %p8739_p4 = scmp.lt.s32.totalorder %s468_s16, %s468_s16 }
  0x7e   : > { %p8732_p5 = scmp.ne.s32.totalorder %s468_s16, %s8731_s23  ;;  %p8740_p10 = scmp.lt.s32.totalorder %s8731_s23, %s8731_s23 }
  0x80   : > { %p8734_p7 = pnand %p8732_p5, %p9003_p8  ;;  %p8741_p11 = por %p8740_p10, %p8739_p4 }
  0x82   : > { %p8735_p9 = pneg %p8734_p7 }
  0x84   : > { %p8742_p12 = pnand %p8741_p11, %p8735_p9 }
  0x86   : > { %8745 = shalt.err (!%p8742_p12)
}
  0x87   : > { %7789 = dma.hbm_to_vmem [thread:$0]  (!%p8987_p6), %s15373_s11, 2048, %s468_s16, [#allocation12], %s15381_s15, %s15381_s15, %s8860_s13  }
  0x88   : > { %s7099_s28 = sadd.s32 4294967294, %s8854_s21   ;;  %s9123_s26 = sadd.s32 1, %s8854_s21  }
  0x89   : > { %s41_s1 = sadd.s32 1, %s8850_s20  ;;  %s38_s7 = ssub.s32 %s8854_s21, %s9123_s26 }
  0x8a   : > { %p48_p8 = scmp.ne.s32.totalorder %s8850_s20, %s8846_s19  ;;  %p39_p1 = scmp.eq.s32.totalorder %s38_s7, 0 }
  0x8b   : > { %p49_p3 = scmp.eq.s32.totalorder %s8854_s21, 0  ;;  %p54_p13 = scmp.ne.s32.totalorder %s8846_s19, %s8842_s18 }
  0x8c   : > { %p372_p0 = scmp.eq.s32.totalorder %s8971_s24, 1  ;;  %p15634_p5 = scmp.eq.s32.totalorder %s8971_s24, 0 }
  0x8d   : > { %s9135_s8 = scalar_select %p39_p1, %s8850_s20, %s41_s1  }
  0x8e   : > { %p50_p2 = por %p49_p3, %p48_p8  ;;  %p9139_p7 = por %p15634_p5, %p54_p13 }
  0x8f   : > { %p9143_p6 = por %p372_p0, %p48_p8  ;;  %p378_p9 = scmp.eq.s32.totalorder %s7099_s28, 1 }
  0x90   : > { %p7803_p4 = scmp.lt.s32.totalorder %s8854_s21, 2  ;;  %s490_s17 = sand.u32 1, %s8850_s20  }
  0x91   : > { %s15636_s16 = scalar_select %p9143_p6, 1, 0 }
  0x92   : > { %p9149_p10 = por %p378_p9, %p54_p13  ;;  %s7107_s29 = sshll.u32 %s490_s17, 7 }
  0x93   : > { %s7132_s14 = sshll.u32 %s8854_s21, 11  ;;  %s494_s30 = scalar_lea.vmem [#allocation2], %s7107_s29 }
  0x94   : > { %s15637_s22 = scalar_select %p9149_p10, 1, 0 }
  0x95   : > { %s9157_s10 = scalar_lea.hbm %s15362_s0, %s7132_s14  ;;  %s501_s1 = sshll.u32 %s494_s30, 4  ;;  %s9163_s1 = int_to_ptr.vmem [resolvable:$true] %s501_s1 }
  0x96   : > { %p9159_p11 = pnand %p7803_p4, %p50_p2  ;;  %s9165_s7 = scalar_lea.sflag [#allocation3], %s490_s17 }
  0x97   : > { %s8746_s15 = scalar_lea.hbm %s9157_s10, 2048  ;;  %s8751_s27 = scalar_lea.hbm %s15362_s0, 4096 }
  0x98   : > { %p8747_p12 = scmp.ne.s32.totalorder %s9157_s10, %s8746_s15  ;;  %p8748_p8 = pneg %p9159_p11 }
  0x99   : > { %p8752_p13 = scmp.lt.u32.totalorder %s9157_s10, %s15362_s0  ;;  %p8753_p0 = scmp.lt.u32.totalorder %s8751_s27, %s8746_s15 }
  0x9a   : > { %p8749_p1 = pnand %p8748_p8, %p8747_p12  ;;  %p8755_p5 = scmp.lt.u32.totalorder %s8746_s15, %s9157_s10 }
  0x9b   : > { %p8754_p2 = por %p8753_p0, %p8752_p13 }
  0x9c   : > { %p8750_p3 = pneg %p8749_p1 }
  0x9d   : > { %p8756_p9 = por %p8755_p5, %p8754_p2 }
  0x9f   : > { %p8757_p4 = pnand %p8756_p9, %p8750_p3 }
  0xa1   : > { %8760 = shalt.err (!%p8757_p4)
}
  0xa2   : > { %s8761_s17 = scalar_lea.vmem %s9163_s1, 2048  ;;  %s8863_s29 = smov [#allocation2]  }
  0xa3   : > { %p8762_p12 = scmp.ne.s32.totalorder %s9163_s1, %s8761_s17  ;;  %s8766_s14 = sshll.u32 %s8863_s29, 4  ;;  %s8767_s14 = int_to_ptr.vmem [resolvable:$false] %s8766_s14 }
  0xa4   : > { %s8768_s23 = scalar_lea.vmem %s8767_s14, 4096  ;;  %p8769_p6 = scmp.lt.s32.totalorder %s9163_s1, %s8767_s14 }
  0xa5   : > { %p8764_p1 = pnand %p8762_p12, %p8748_p8  ;;  %p8770_p13 = scmp.lt.s32.totalorder %s8768_s23, %s8761_s17 }
  0xa7   : > { %p8765_p10 = pneg %p8764_p1  ;;  %p8771_p0 = por %p8770_p13, %p8769_p6 }
  0xa9   : > { %p8772_p2 = pnand %p8771_p0, %p8765_p10 }
  0xab   : > { %8775 = shalt.err (!%p8772_p2)
}
  0xac   : > { %s15639_s15 = smov 128   ;;  %p15640_p8 = scmp.ne.s32.totalorder %s15630_s25, 0 }
  0xad   : > { %7793 = dma.hbm_to_vmem [thread:$0]  (!%p9159_p11), %s9157_s10, 2048, %s9163_s1, %s9165_s7, %s15639_s15, %s15639_s15, %s8860_s13  }
  0xae   : > { %513 = sbr.rel (%p15640_p8) target bundleno = 4413 (0x113d), region = 80 }
  0xb5   : > { %s9199_s27 = sand.u32 1, %s8846_s19  }
  0xb6   : > { %s7111_s30 = sshll.u32 %s9199_s27, 7  ;;  %s516_s17 = scalar_lea.sflag [#allocation3], %s9199_s27 }
  0xb7   : > { %s9205_s28 = scalar_lea.vmem [#allocation2], %s7111_s30 }
  0xb8   : > { %8821 = dma.done.wait (%p9139_p7), %s516_s17, 2048  }
  0xb9   : > { %8823 = vsyncadd (%p9139_p7), %s516_s17, 4294965248  ;;  %p15641_p6 = scmp.eq.s32.totalorder %s8971_s24, 0 }
  0xbb   : > { %8825 = dma.done.wait (%p15641_p6), [#allocation6], 4096   ;;  %p15642_p10 = pmov %p15641_p6 }
  0xbc   : > { %p15643_p11 = pmov %p15641_p6 }
  0xbd   : > { %8827 = vsyncadd (%p15642_p10), [#allocation6], 4294963200 }
  0xbe   : > { %8829 = dma.done.wait (%p15643_p11), [#allocation9], 4096   ;;  %p15644_p3 = pmov %p15641_p6 }
  0xc0   : > { %8831 = vsyncadd (%p15644_p3), [#allocation9], 4294963200  ;;  %p15645_p5 = pmov %p15644_p3 }
  0xc1   : > { %p15646_p9 = pmov %p15644_p3 }
  0xc2   : > { %8833 = dma.done.wait (%p15645_p5), [#allocation12], 2048  }
  0xc3   : > { %8835 = vsyncadd (%p15646_p9), [#allocation12], 4294965248  ;;  %v604_v0 = vld [vmem:[#allocation5] sm:$0xff]  ;;  %v605_v1 = vld [vmem:[#allocation5 + $0x8] sm:$0xff]  ;;  %s8864_s12 = smov 96   ;;  %s8865_s10 = smov 64  }
  0xc4   : > { %v772_v2 = vld [vmem:[#allocation7] sm:$0xff]  ;;  %v7574_v3 = vpack.c.bf16 %v605_v1, %v604_v0  ;;  %v773_v4 = vld [vmem:[#allocation7 + $0x8] sm:$0xff]  ;;  %v606_v5 = vld [vmem:[#allocation5 + $0x10] sm:$0xff]  ;;  %s8866_s1 = smov 32   ;;  %vm1124_vm0 = vcmask 261120   ;;  %vm5957_vm1 = vcmask 523264  }
  0xc5   : > { %v607_v6 = vld [vmem:[#allocation5 + $0x18] sm:$0xff]  ;;  %v7606_v7 = vpack.c.bf16 %v773_v4, %v772_v2  ;;  %v774_v9 = vld [vmem:[#allocation7 + $0x10] sm:$0xff]  ;;  %v608_v11 = vld [vmem:[#allocation5 + $0x20] sm:$0xff]  ;;  %vm5974_vm2 = vcmask 785408   ;;  %s16431_s7 = sld [smem:[#allocation206_spill]]  ;;  %s16432_s23 = sld [smem:[#allocation207_spill]] }
  0xc6   : > { %v7578_v8 = vpack.c.bf16 %v607_v6, %v606_v5  ;;  %v775_v10 = vld [vmem:[#allocation7 + $0x18] sm:$0xff]  ;;  %7575 = vmatprep.subr.bf16.mxu0 %v7574_v3  ;;  %v609_v13 = vld [vmem:[#allocation5 + $0x28] sm:$0xff]  ;;  %v776_v14 = vld [vmem:[#allocation7 + $0x20] sm:$0xff]  ;;  %s16435_s14 = sld [smem:[#allocation210_spill]]  ;;  %p16436_p4 = scmp.ne.s32.totalorder %s15636_s16, 0 }
  0xc7   : > { %v7610_v12 = vpack.c.bf16 %v775_v10, %v774_v9  ;;  %v777_v15 = vld [vmem:[#allocation7 + $0x28] sm:$0xff]  ;;  %7607 = vmatprep.subr.bf16.mxu1 %v7606_v7  ;;  %7577 = vmatpush3.bf16.msra.mxu0 %v7574_v3  ;;  %v7582_v16 = vpack.c.bf16 %v609_v13, %v608_v11  ;;  %v610_v18 = vld [vmem:[#allocation5 + $0x30] sm:$0xff]  ;;  %v611_v19 = vld [vmem:[#allocation5 + $0x38] sm:$0xff]  ;;  %s8867_s17 = smov [#allocation13]  }
  0xc8   : > { %7609 = vmatpush3.bf16.msra.mxu1 %v7606_v7  ;;  %7579 = vmatprep.subr.bf16.mxu0 %v7578_v8  ;;  %v7614_v17 = vpack.c.bf16 %v777_v15, %v776_v14  ;;  %v778_v20 = vld [vmem:[#allocation7 + $0x30] sm:$0xff]  ;;  %v779_v21 = vld [vmem:[#allocation7 + $0x38] sm:$0xff]  ;;  %v7586_v22 = vpack.c.bf16 %v611_v19, %v610_v18  ;;  %v612_v24 = vld [vmem:[#allocation5 + $0x40] sm:$0xff] }
  0xc9   : > { %7611 = vmatprep.subr.bf16.mxu1 %v7610_v12  ;;  %v7618_v23 = vpack.c.bf16 %v779_v21, %v778_v20  ;;  %v613_v25 = vld [vmem:[#allocation5 + $0x48] sm:$0xff]  ;;  %v9224_v26 = vld [vmem:[%s9205_s28] sm:$0xff]  ;;  %v614_v31 = vld [vmem:[#allocation5 + $0x50] sm:$0xff] }
  0xca   : > { %v780_v27 = vld [vmem:[#allocation7 + $0x40] sm:$0xff]  ;;  %v781_v28 = vld [vmem:[#allocation7 + $0x48] sm:$0xff]  ;;  %7326 = vmatprep.mubr.f32.mxu0 %v9224_v26  ;;  %7382 = vmatprep.mubr.f32.mxu1 %v9224_v26  ;;  %v7590_v29 = vpack.c.bf16 %v613_v25, %v612_v24  ;;  %v615_v32 = vld [vmem:[#allocation5 + $0x58] sm:$0xff] }
  0xcb   : > { %7581 = vmatpush3.bf16.msra.mxu0 %v7578_v8  ;;  %v7622_v30 = vpack.c.bf16 %v781_v28, %v780_v27  ;;  %v782_v33 = vld [vmem:[#allocation7 + $0x50] sm:$0xff]  ;;  %v783_v34 = vld [vmem:[#allocation7 + $0x58] sm:$0xff]  ;;  %v7594_v35 = vpack.c.bf16 %v615_v32, %v614_v31  ;;  %v616_v37 = vld [vmem:[#allocation5 + $0x60] sm:$0xff] }
  0xcc   : > { %7613 = vmatpush3.bf16.msra.mxu1 %v7610_v12  ;;  %7583 = vmatprep.subr.bf16.mxu0 %v7582_v16  ;;  %v7626_v36 = vpack.c.bf16 %v783_v34, %v782_v33  ;;  %v617_v38 = vld [vmem:[#allocation5 + $0x68] sm:$0xff]  ;;  %v784_v39 = vld [vmem:[#allocation7 + $0x60] sm:$0xff]  ;;  %v618_v43 = vld [vmem:[#allocation5 + $0x70] sm:$0xff] }
  0xcd   : > { %7615 = vmatprep.subr.bf16.mxu1 %v7614_v17  ;;  %v785_v40 = vld [vmem:[#allocation7 + $0x68] sm:$0xff]  ;;  %v7598_v41 = vpack.c.bf16 %v617_v38, %v616_v37  ;;  %v619_v44 = vld [vmem:[#allocation5 + $0x78] sm:$0xff]  ;;  %v786_v45 = vld [vmem:[#allocation7 + $0x70] sm:$0xff] }
  0xce   : > { %v7630_v42 = vpack.c.bf16 %v785_v40, %v784_v39  ;;  %v787_v46 = vld [vmem:[#allocation7 + $0x78] sm:$0xff]  ;;  %v7602_v47 = vpack.c.bf16 %v619_v44, %v618_v43  ;;  %v9229_v49 = vld [vmem:[%s9205_s28 + $0x8] sm:$0xff]  ;;  %v9232_v50 = vld [vmem:[%s9205_s28 + $0x10] sm:$0xff] }
  0xcf   : > { %7585 = vmatpush3.bf16.msra.mxu0 %v7582_v16  ;;  %v7634_v48 = vpack.c.bf16 %v787_v46, %v786_v45  ;;  %v9239_v51 = vld [vmem:[%s9205_s28 + $0x18] sm:$0xff]  ;;  %v9242_v52 = vld [vmem:[%s9205_s28 + $0x20] sm:$0xff]  ;;  %v9248_v53 = vld [vmem:[%s9205_s28 + $0x28] sm:$0xff] }
  0xd0   : > { %7617 = vmatpush3.bf16.msra.mxu1 %v7614_v17  ;;  %7587 = vmatprep.subr.bf16.mxu0 %v7586_v22  ;;  %v9252_v54 = vld [vmem:[%s9205_s28 + $0x30] sm:$0xff]  ;;  %v9258_v55 = vld [vmem:[%s9205_s28 + $0x38] sm:$0xff]  ;;  %v9262_v56 = vld [vmem:[%s9205_s28 + $0x40] sm:$0xff] }
  0xd1   : > { %7619 = vmatprep.subr.bf16.mxu1 %v7618_v23  ;;  %v9268_v57 = vld [vmem:[%s9205_s28 + $0x48] sm:$0xff]  ;;  %v9274_v58 = vld [vmem:[%s9205_s28 + $0x50] sm:$0xff]  ;;  %v9279_v59 = vld [vmem:[%s9205_s28 + $0x58] sm:$0xff] }
  0xd2   : > { %v9284_v60 = vld [vmem:[%s9205_s28 + $0x60] sm:$0xff]  ;;  %v9289_v61 = vld [vmem:[%s9205_s28 + $0x68] sm:$0xff]  ;;  %v9320_v19 = vld [vmem:[%s9205_s28 + $0x70] sm:$0xff] }
  0xd3   : > { %7589 = vmatpush3.bf16.msra.mxu0 %v7586_v22  ;;  %v9296_v62 = vld [vmem:[%s15366_s4] ss:$0 sm:$0xff]  ;;  %v9326_v20 = vld [vmem:[%s9205_s28 + $0x78] sm:$0xff] }
  0xd4   : > { %7621 = vmatpush3.bf16.msra.mxu1 %v7618_v23  ;;  %7591 = vmatprep.subr.bf16.mxu0 %v7590_v29  ;;  %v9333_v21 = vld [vmem:[%s15364_s2] ss:$0 sm:$0xff] }
  0xd5   : > { %7623 = vmatprep.subr.bf16.mxu1 %v7622_v30 }
  0xd7   : > { %7593 = vmatpush3.bf16.msra.mxu0 %v7590_v29 }
  0xd8   : > { %7625 = vmatpush3.bf16.msra.mxu1 %v7622_v30  ;;  %7595 = vmatprep.subr.bf16.mxu0 %v7594_v35 }
  0xd9   : > { %7627 = vmatprep.subr.bf16.mxu1 %v7626_v36 }
  0xdb   : > { %7597 = vmatpush3.bf16.msra.mxu0 %v7594_v35 }
  0xdc   : > { %7629 = vmatpush3.bf16.msra.mxu1 %v7626_v36  ;;  %7599 = vmatprep.subr.bf16.mxu0 %v7598_v41 }
  0xdd   : > { %7631 = vmatprep.subr.bf16.mxu1 %v7630_v42 }
  0xdf   : > { %7601 = vmatpush3.bf16.msra.mxu0 %v7598_v41 }
  0xe0   : > { %7633 = vmatpush3.bf16.msra.mxu1 %v7630_v42  ;;  %7603 = vmatprep.subr.bf16.mxu0 %v7602_v47 }
  0xe1   : > { %7635 = vmatprep.subr.bf16.mxu1 %v7634_v48 }
  0xe3   : > { %7605 = vmatpush3.bf16.msra.mxu0 %v7602_v47 }
  0xe4   : > { %7637 = vmatpush3.bf16.msra.mxu1 %v7634_v48 }
  0xe6   : > { %7327 = vmatmul.mubr.f32.vlgmr.msra.gmra.mrb[0].mxu0 %v9229_v49 }
  0xe7   : > { %7383 = vmatmul.mubr.f32.vlgmr.msra.gmra.mrb[0].mxu1 %v9229_v49  ;;  %7329 = vmatprep.mubr.f32.mxu0 %v9232_v50 }
  0xe8   : > { %7385 = vmatprep.mubr.f32.mxu1 %v9232_v50 }
  0xea   : > { %7330 = vmatmul.mubr.f32.gmra.mrb[2].mxu0 %v9239_v51 }
  0xeb   : > { %7386 = vmatmul.mubr.f32.gmra.mrb[2].mxu1 %v9239_v51  ;;  %7332 = vmatprep.mubr.f32.mxu0 %v9242_v52 }
  0xec   : > { %7388 = vmatprep.mubr.f32.mxu1 %v9242_v52 }
  0xee   : > { %7333 = vmatmul.mubr.f32.gmra.mrb[4].mxu0 %v9248_v53 }
  0xef   : > { %7389 = vmatmul.mubr.f32.gmra.mrb[4].mxu1 %v9248_v53  ;;  %7335 = vmatprep.mubr.f32.mxu0 %v9252_v54 }
  0xf0   : > { %7391 = vmatprep.mubr.f32.mxu1 %v9252_v54 }
  0xf2   : > { %7336 = vmatmul.mubr.f32.gmra.mrb[6].mxu0 %v9258_v55 }
  0xf3   : > { %7392 = vmatmul.mubr.f32.gmra.mrb[6].mxu1 %v9258_v55  ;;  %7338 = vmatprep.mubr.f32.mxu0 %v9262_v56 }
  0xf4   : > { %7394 = vmatprep.mubr.f32.mxu1 %v9262_v56 }
  0xf6   : > { %7339 = vmatmul.mubr.f32.gmra.mrb[8].mxu0 %v9268_v57 }
  0xf7   : > { %7395 = vmatmul.mubr.f32.gmra.mrb[8].mxu1 %v9268_v57  ;;  %7341 = vmatprep.mubr.f32.mxu0 %v9274_v58 }
  0xf8   : > { %7397 = vmatprep.mubr.f32.mxu1 %v9274_v58 }
  0xfa   : > { %7342 = vmatmul.mubr.f32.gmra.mrb[10].mxu0 %v9279_v59 }
  0xfb   : > { %7398 = vmatmul.mubr.f32.gmra.mrb[10].mxu1 %v9279_v59  ;;  %7344 = vmatprep.mubr.f32.mxu0 %v9284_v60 }
  0xfc   : > { %7400 = vmatprep.mubr.f32.mxu1 %v9284_v60 }
  0xfe   : > { %7345 = vmatmul.mubr.f32.gmra.mrb[12].mxu0 %v9289_v61 }
  0xff   : > { %7401 = vmatmul.mubr.f32.gmra.mrb[12].mxu1 %v9289_v61  ;;  %7347 = vmatprep.mubr.f32.mxu0 %v9320_v19 }
 0x100   : > { %7403 = vmatprep.mubr.f32.mxu1 %v9320_v19 }
 0x102   : > { %7348 = vmatmul.mubr.f32.gmra.mrb[14].mxu0 %v9326_v20 }
 0x103   : > { %7404 = vmatmul.mubr.f32.gmra.mrb[14].mxu1 %v9326_v20  ;;  %7438 = vmatprep.mubr.f32.mxu0 %v9224_v26 }
 0x1b9   : > { %v7328_v63 = vpop.f32.mrb[0].mxu0 }
 0x1ba   : > { %v7384_v0 = vpop.f32.mrb[0].mxu1  ;;  %v693_v1 = vpop.f32.mrb[1].mxu0  ;;  %v9338_v22 = vadd.f32 %v7328_v63, %v9333_v21 }
 0x1bb   : > { %v867_v2 = vadd.f32 %v7384_v0, %v9296_v62  ;;  %v861_v3 = vpop.f32.mrb[1].mxu1  ;;  %v9342_v23 = vadd.f32 %v9333_v21, %v693_v1 }
 0x1bc   : > { %v862_v4 = vadd.f32 %v9296_v62, %v861_v3 }
 0x1bd   : > { %1207 = vrot.lane.b32.xlu1 %v867_v2, %s8864_s12  ;;  %v7331_v5 = vpop.f32.mrb[2].mxu0  ;;  %v9345_v24 = vmul.f32 %v867_v2, %v9338_v22 }
 0x1be   : > { %1205 = vrot.lane.b32.xlu0 %v862_v4, %s8864_s12  ;;  %v7387_v6 = vpop.f32.mrb[2].mxu1  ;;  %v703_v7 = vpop.f32.mrb[3].mxu0  ;;  %v9350_v27 = vmul.f32 %v862_v4, %v9342_v23  ;;  %v9357_v32 = vadd.f32 %v7331_v5, %v9333_v21 }
 0x1bf   : > { %v871_v8 = vpop.f32.mrb[3].mxu1  ;;  %v877_v13 = vadd.f32 %v7387_v6, %v9296_v62  ;;  %15647 = vst [vmem:[#allocation19_spill] sm:$0xff] %v9345_v24  ;;  %v1128_v25 = vsel %vm1124_vm0, %v9345_v24, 0.0  ;;  %v9361_v34 = vadd.f32 %v9333_v21, %v703_v7 }
 0x1c0   : > { %v872_v18 = vadd.f32 %v9296_v62, %v871_v8  ;;  %15648 = vst [vmem:[#allocation20_spill] sm:$0xff] %v9350_v27  ;;  %v1125_v26 = vsel %vm1124_vm0, %v9350_v27, 0.0 }
 0x1c1   : > { %1335 = vrot.lane.b32.xlu1 %v867_v2, %s8865_s10  ;;  %v9303_v9 = vpop.f32.mrb[4].mxu0  ;;  %v9364_v35 = vmul.f32 %v877_v13, %v9357_v32 }
 0x1c2   : > { %1333 = vrot.lane.b32.xlu0 %v862_v4, %s8865_s10  ;;  %v7390_v10 = vpop.f32.mrb[4].mxu1  ;;  %v713_v11 = vpop.f32.mrb[5].mxu0  ;;  %v9370_v37 = vmul.f32 %v872_v18, %v9361_v34  ;;  %v9393_v48 = vadd.f32 %v9303_v9, %v9333_v21 }
 0x1c3   : > { %v881_v12 = vpop.f32.mrb[5].mxu1  ;;  %15649 = vst [vmem:[#allocation21_spill] sm:$0xff] %v9364_v35  ;;  %v1134_v36 = vsel %vm1124_vm0, %v9364_v35, 0.0  ;;  %v887_v39 = vadd.f32 %v7390_v10, %v9296_v62  ;;  %v9380_v40 = vadd.f32 %v9333_v21, %v713_v11 }
 0x1c4   : > { %v882_v33 = vadd.f32 %v9296_v62, %v881_v12  ;;  %15650 = vst [vmem:[#allocation22_spill] sm:$0xff] %v9370_v37  ;;  %v1131_v38 = vsel %vm1124_vm0, %v9370_v37, 0.0 }
 0x1c5   : > { %1463 = vrot.lane.b32.xlu1 %v867_v2, %s8866_s1  ;;  %v9308_v14 = vpop.f32.mrb[6].mxu0  ;;  %v9397_v63 = vmul.f32 %v887_v39, %v9393_v48 }
 0x1c6   : > { %1461 = vrot.lane.b32.xlu0 %v862_v4, %s8866_s1  ;;  %v9311_v15 = vpop.f32.mrb[6].mxu1  ;;  %v9313_v16 = vpop.f32.mrb[7].mxu0  ;;  %v9384_v41 = vmul.f32 %v882_v33, %v9380_v40  ;;  %v9428_v10 = vadd.f32 %v9308_v14, %v9333_v21 }
 0x1c7   : > { %v891_v17 = vpop.f32.mrb[7].mxu1  ;;  %15652 = vst [vmem:[#allocation24_spill] sm:$0xff] %v9397_v63  ;;  %v1140_v0 = vsel %vm1124_vm0, %v9397_v63, 0.0  ;;  %v897_v1 = vadd.f32 %v9311_v15, %v9296_v62  ;;  %v9409_v2 = vadd.f32 %v9333_v21, %v9313_v16 }
 0x1c8   : > { %15651 = vst [vmem:[#allocation23_spill] sm:$0xff] %v9384_v41  ;;  %v1137_v42 = vsel %vm1124_vm0, %v9384_v41, 0.0  ;;  %v892_v47 = vadd.f32 %v9296_v62, %v891_v17 }
 0x1c9   : > { %1211 = vrot.lane.b32.xlu1 %v877_v13, %s8864_s12  ;;  %v9354_v28 = vpop.f32.mrb[8].mxu0  ;;  %v9432_v11 = vmul.f32 %v897_v1, %v9428_v10 }
 0x1ca   : > { %v7396_v29 = vpop.f32.mrb[8].mxu1  ;;  %v733_v30 = vpop.f32.mrb[9].mxu0  ;;  %v9413_v3 = vmul.f32 %v892_v47, %v9409_v2 }
 0x1cb   : > { %v901_v31 = vpop.f32.mrb[9].mxu1  ;;  %15654 = vst [vmem:[#allocation26_spill] sm:$0xff] %v9432_v11  ;;  %v1146_v12 = vsel %vm1124_vm0, %v9432_v11, 0.0  ;;  %v9442_v14 = vadd.f32 %v9333_v21, %v733_v30  ;;  %v9461_v30 = vadd.f32 %v9354_v28, %v9333_v21  ;;  %v941_v28 = vld [vmem:[#allocation8 + $0x8] sm:$0xff] }
 0x1cc   : > { %15653 = vst [vmem:[#allocation25_spill] sm:$0xff] %v9413_v3  ;;  %v1143_v4 = vsel %vm1124_vm0, %v9413_v3, 0.0  ;;  %v902_v9 = vadd.f32 %v9296_v62, %v901_v31 }
 0x1cd   : > { %1339 = vrot.lane.b32.xlu1 %v877_v13, %s8865_s10  ;;  %v9388_v43 = vpop.f32.mrb[10].mxu0 }
 0x1ce   : > { %v7399_v44 = vpop.f32.mrb[10].mxu1  ;;  %v743_v45 = vpop.f32.mrb[11].mxu0  ;;  %v9446_v15 = vmul.f32 %v902_v9, %v9442_v14 }
 0x1cf   : > { %v911_v46 = vpop.f32.mrb[11].mxu1 }
 0x1d0   : > { %15655 = vst [vmem:[#allocation27_spill] sm:$0xff] %v9446_v15  ;;  %v1149_v16 = vsel %vm1124_vm0, %v9446_v15, 0.0 }
 0x1d1   : > { %1467 = vrot.lane.b32.xlu1 %v877_v13, %s8866_s1  ;;  %v9417_v5 = vpop.f32.mrb[12].mxu0  ;;  %v907_v13 = vadd.f32 %v7396_v29, %v9296_v62  ;;  %v912_v29 = vadd.f32 %v9296_v62, %v911_v46  ;;  %v943_v46 = vld [vmem:[#allocation8 + $0x18] sm:$0xff] }
 0x1d2   : > { %v9419_v6 = vpop.f32.mrb[12].mxu1  ;;  %v9421_v7 = vpop.f32.mrb[13].mxu0 }
 0x1d3   : > { %v9423_v8 = vpop.f32.mrb[13].mxu1  ;;  %v9465_v31 = vmul.f32 %v907_v13, %v9461_v30 }
 0x1d5   : > { %1209 = vrot.lane.b32.xlu1 %v872_v18, %s8864_s12  ;;  %v9450_v17 = vpop.f32.mrb[14].mxu0  ;;  %15656 = vst [vmem:[#allocation28_spill] sm:$0xff] %v9465_v31 }
 0x1d9   : > { %1337 = vrot.lane.b32.xlu1 %v872_v18, %s8865_s10 }
 0x1dd   : > { %1465 = vrot.lane.b32.xlu1 %v872_v18, %s8866_s1  ;;  %v9452_v18 = vpop.f32.mrb[14].mxu1 }
 0x1e5   : > { %1129 = vadd.xlane.f32.xlu0 %v1128_v25  ;;  %v9454_v25 = vpop.f32.mrb[15].mxu0 }
 0x1e9   : > { %1126 = vadd.xlane.f32.xlu0 %v1125_v26  ;;  %v9456_v26 = vpop.f32.mrb[15].mxu1 }
 0x1ff   : > { %1213 = vrot.lane.b32.xlu0 %v882_v33, %s8864_s12 }
 0x201   : > { %1135 = vadd.xlane.f32.xlu1 %v1134_v36  ;;  %v917_v36 = vadd.f32 %v7399_v44, %v9296_v62  ;;  %v944_v44 = vld [vmem:[#allocation8 + $0x20] sm:$0xff] }
 0x203   : > { %1341 = vrot.lane.b32.xlu0 %v882_v33, %s8865_s10 }
 0x205   : > { %1132 = vadd.xlane.f32.xlu1 %v1131_v38  ;;  %v940_v38 = vld [vmem:[#allocation8] sm:$0xff] }
 0x207   : > { %1469 = vrot.lane.b32.xlu0 %v882_v33, %s8866_s1  ;;  %v1152_v33 = vsel %vm1124_vm0, %v9465_v31, 0.0 }
 0x216   : > { %1215 = vrot.lane.b32.xlu1 %v887_v39, %s8864_s12 }
 0x21a   : > { %1343 = vrot.lane.b32.xlu1 %v887_v39, %s8865_s10 }
 0x21e   : > { %1471 = vrot.lane.b32.xlu1 %v887_v39, %s8866_s1  ;;  %v7638_v39 = vpack.c.bf16 %v941_v28, %v940_v38  ;;  %v949_v38 = vld [vmem:[#allocation8 + $0x48] sm:$0xff] }
 0x220   : > { %7639 = vmatprep.subr.bf16.mxu0 %v7638_v39 }
 0x221   : > { %7641 = vmatpush3.bf16.msra.mxu0 %v7638_v39  ;;  %v950_v39 = vld [vmem:[#allocation8 + $0x50] sm:$0xff] }
 0x226   : > { %1138 = vadd.xlane.f32.xlu0 %v1137_v42  ;;  %v942_v42 = vld [vmem:[#allocation8 + $0x10] sm:$0xff] }
 0x23c   : > { %1217 = vrot.lane.b32.xlu0 %v892_v47, %s8864_s12 }
 0x240   : > { %1345 = vrot.lane.b32.xlu0 %v892_v47, %s8865_s10 }
 0x242   : > { %1141 = vadd.xlane.f32.xlu1 %v1140_v0  ;;  %v9475_v0 = vadd.f32 %v9333_v21, %v743_v45 }
 0x244   : > { %1473 = vrot.lane.b32.xlu0 %v892_v47, %s8866_s1  ;;  %v7642_v47 = vpack.c.bf16 %v943_v46, %v942_v42  ;;  %v951_v42 = vld [vmem:[#allocation8 + $0x58] sm:$0xff] }
 0x245   : > { %v7658_v46 = vpack.c.bf16 %v951_v42, %v950_v39 }
 0x246   : > { %7643 = vmatprep.subr.bf16.mxu0 %v7642_v47 }
 0x247   : > { %7645 = vmatpush3.bf16.msra.mxu0 %v7642_v47  ;;  %v952_v47 = vld [vmem:[#allocation8 + $0x60] sm:$0xff] }
 0x253   : > { %1219 = vrot.lane.b32.xlu1 %v897_v1, %s8864_s12 }
 0x257   : > { %1347 = vrot.lane.b32.xlu1 %v897_v1, %s8865_s10 }
 0x25b   : > { %1475 = vrot.lane.b32.xlu1 %v897_v1, %s8866_s1  ;;  %v945_v1 = vld [vmem:[#allocation8 + $0x28] sm:$0xff] }
 0x263   : > { %1144 = vadd.xlane.f32.xlu0 %v1143_v4  ;;  %v7646_v4 = vpack.c.bf16 %v945_v1, %v944_v44  ;;  %v953_v44 = vld [vmem:[#allocation8 + $0x68] sm:$0xff]  ;;  %v954_v1 = vld [vmem:[#allocation8 + $0x70] sm:$0xff] }
 0x265   : > { %7647 = vmatprep.subr.bf16.mxu0 %v7646_v4 }
 0x266   : > { %7649 = vmatpush3.bf16.msra.mxu0 %v7646_v4  ;;  %v955_v4 = vld [vmem:[#allocation8 + $0x78] sm:$0xff] }
 0x279   : > { %1221 = vrot.lane.b32.xlu0 %v902_v9, %s8864_s12 }
 0x27d   : > { %1349 = vrot.lane.b32.xlu0 %v902_v9, %s8865_s10 }
 0x27f   : > { %1147 = vadd.xlane.f32.xlu1 %v1146_v12  ;;  %v947_v12 = vld [vmem:[#allocation8 + $0x38] sm:$0xff] }
 0x281   : > { %1477 = vrot.lane.b32.xlu0 %v902_v9, %s8866_s1  ;;  %v946_v9 = vld [vmem:[#allocation8 + $0x30] sm:$0xff] }
 0x290   : > { %1223 = vrot.lane.b32.xlu1 %v907_v13, %s8864_s12 }
 0x294   : > { %1351 = vrot.lane.b32.xlu1 %v907_v13, %s8865_s10 }
 0x298   : > { %1479 = vrot.lane.b32.xlu1 %v907_v13, %s8866_s1  ;;  %v9479_v13 = vmul.f32 %v912_v29, %v9475_v0 }
 0x29a   : > { %15657 = vst [vmem:[#allocation29_spill] sm:$0xff] %v9479_v13  ;;  %v1155_v28 = vsel %vm1124_vm0, %v9479_v13, 0.0 }
 0x2a0   : > { %1150 = vadd.xlane.f32.xlu0 %v1149_v16  ;;  %v7650_v16 = vpack.c.bf16 %v947_v12, %v946_v9  ;;  %v7666_v9 = vpack.c.bf16 %v955_v4, %v954_v1  ;;  %v922_v12 = vadd.f32 %v9296_v62, %v9423_v8 }
 0x2a2   : > { %7651 = vmatprep.subr.bf16.mxu0 %v7650_v16 }
 0x2a3   : > { %7653 = vmatpush3.bf16.msra.mxu0 %v7650_v16  ;;  %v9487_v16 = vadd.f32 %v9388_v43, %v9333_v21 }
 0x2b6   : > { %1225 = vrot.lane.b32.xlu0 %v912_v29, %s8864_s12 }
 0x2ba   : > { %1353 = vrot.lane.b32.xlu0 %v912_v29, %s8865_s10 }
 0x2bc   : > { %1153 = vadd.xlane.f32.xlu1 %v1152_v33  ;;  %v948_v33 = vld [vmem:[#allocation8 + $0x40] sm:$0xff] }
 0x2bd   : > { %v7654_v45 = vpack.c.bf16 %v949_v38, %v948_v33  ;;  %v9493_v33 = vmul.f32 %v917_v36, %v9487_v16 }
 0x2be   : > { %1481 = vrot.lane.b32.xlu0 %v912_v29, %s8866_s1  ;;  %v7662_v29 = vpack.c.bf16 %v953_v44, %v952_v47 }
 0x2bf   : > { %7655 = vmatprep.subr.bf16.mxu0 %v7654_v45  ;;  %15658 = vst [vmem:[#allocation30_spill] sm:$0xff] %v9493_v33  ;;  %v1158_v8 = vsel %vm1124_vm0, %v9493_v33, 0.0 }
 0x2c0   : > { %7657 = vmatpush3.bf16.msra.mxu0 %v7654_v45 }
 0x2c1   : > { %7659 = vmatprep.subr.bf16.mxu0 %v7658_v46 }
 0x2c4   : > { %7661 = vmatpush3.bf16.msra.mxu0 %v7658_v46 }
 0x2c5   : > { %7663 = vmatprep.subr.bf16.mxu0 %v7662_v29 }
 0x2c8   : > { %7665 = vmatpush3.bf16.msra.mxu0 %v7662_v29 }
 0x2c9   : > { %7667 = vmatprep.subr.bf16.mxu0 %v7666_v9 }
 0x2cc   : > { %7669 = vmatpush3.bf16.msra.mxu0 %v7666_v9 }
 0x2cd   : > { %1227 = vrot.lane.b32.xlu1 %v917_v36, %s8864_s12 }
 0x2cf   : > { %7439 = vmatmul.mubr.f32.vlgmr.msra.gmra.mrb[16].mxu0 %v9229_v49  ;;  %v927_v49 = vadd.f32 %v9419_v6, %v9296_v62 }
 0x2d0   : > { %7441 = vmatprep.mubr.f32.mxu0 %v9232_v50  ;;  %v9518_v50 = vadd.f32 %v9333_v21, %v9421_v7 }
 0x2d1   : > { %1355 = vrot.lane.b32.xlu1 %v917_v36, %s8865_s10 }
 0x2d3   : > { %7442 = vmatmul.mubr.f32.gmra.mrb[18].mxu0 %v9239_v51  ;;  %v9522_v51 = vmul.f32 %v922_v12, %v9518_v50 }
 0x2d4   : > { %7444 = vmatprep.mubr.f32.mxu0 %v9242_v52 }
 0x2d5   : > { %1483 = vrot.lane.b32.xlu1 %v917_v36, %s8866_s1  ;;  %15659 = vst [vmem:[#allocation31_spill] sm:$0xff] %v9522_v51  ;;  %v1161_v52 = vsel %vm1124_vm0, %v9522_v51, 0.0 }
 0x2d7   : > { %7445 = vmatmul.mubr.f32.gmra.mrb[20].mxu0 %v9248_v53  ;;  %v932_v53 = vadd.f32 %v9296_v62, %v9456_v26 }
 0x2d8   : > { %7447 = vmatprep.mubr.f32.mxu0 %v9252_v54  ;;  %v9530_v54 = vadd.f32 %v9417_v5, %v9333_v21  ;;  %v1208_v5 = vpop.permute.xlu1 %1207 }
 0x2db   : > { %7448 = vmatmul.mubr.f32.gmra.mrb[22].mxu0 %v9258_v55  ;;  %v9534_v55 = vmul.f32 %v927_v49, %v9530_v54 }
 0x2dc   : > { %7450 = vmatprep.mubr.f32.mxu0 %v9262_v56  ;;  %v1336_v7 = vpop.permute.xlu1 %1335 }
 0x2dd   : > { %1156 = vadd.xlane.f32.xlu0 %v1155_v28  ;;  %15660 = vst [vmem:[#allocation32_spill] sm:$0xff] %v9534_v55  ;;  %v1164_v56 = vsel %vm1124_vm0, %v9534_v55, 0.0 }
 0x2df   : > { %7451 = vmatmul.mubr.f32.gmra.mrb[24].mxu0 %v9268_v57  ;;  %v937_v57 = vadd.f32 %v9452_v18, %v9296_v62 }
 0x2e0   : > { %7453 = vmatprep.mubr.f32.mxu0 %v9274_v58  ;;  %v9546_v58 = vadd.f32 %v9333_v21, %v9454_v25  ;;  %v1464_v25 = vpop.permute.xlu1 %1463 }
 0x2e3   : > { %7454 = vmatmul.mubr.f32.gmra.mrb[26].mxu0 %v9279_v59  ;;  %v9550_v59 = vmul.f32 %v932_v53, %v9546_v58 }
 0x2e4   : > { %7456 = vmatprep.mubr.f32.mxu0 %v9284_v60  ;;  %v1212_v26 = vpop.permute.xlu1 %1211 }
 0x2e5   : > { %15661 = vst [vmem:[#allocation33_spill] sm:$0xff] %v9550_v59  ;;  %v1167_v60 = vsel %vm1124_vm0, %v9550_v59, 0.0  ;;  %v9590_v29 = vmul.f32 %v1212_v26, %v9357_v32 }
 0x2e7   : > { %7457 = vmatmul.mubr.f32.gmra.mrb[28].mxu0 %v9289_v61  ;;  %v1206_v61 = vpop.permute.xlu0 %1205  ;;  %15667 = vst [vmem:[#allocation39_spill] sm:$0xff] %v9590_v29 }
 0x2e8   : > { %7459 = vmatprep.mubr.f32.mxu0 %v9320_v19  ;;  %v9576_v38 = vmul.f32 %v1206_v61, %v9342_v23  ;;  %v9615_v61 = vmul.f32 %v1208_v5, %v9338_v22 }
 0x2ea   : > { %15665 = vst [vmem:[#allocation37_spill] sm:$0xff] %v9576_v38  ;;  %v1269_v42 = vsel %vm1124_vm0, %v9576_v38, 0.0  ;;  %15670 = vst [vmem:[#allocation42_spill] sm:$0xff] %v9615_v61 }
 0x2eb   : > { %7460 = vmatmul.mubr.f32.gmra.mrb[30].mxu0 %v9326_v20  ;;  %v1334_v19 = vpop.permute.xlu0 %1333  ;;  %v9556_v20 = vadd.f32 %v9450_v17, %v9333_v21  ;;  %v9569_v21 = vmul.f32 %v1464_v25, %v9338_v22  ;;  %v1340_v17 = vpop.permute.xlu1 %1339 }
 0x2ec   : > { %v9579_v28 = vmul.f32 %v1334_v19, %v9342_v23  ;;  %v9595_v4 = vmul.f32 %v1340_v17, %v9357_v32  ;;  %v9620_v19 = vmul.f32 %v1336_v7, %v9338_v22 }
 0x2ed   : > { %v9564_v6 = vmul.f32 %v937_v57, %v9556_v20  ;;  %15664 = vst [vmem:[#allocation36_spill] sm:$0xff] %v9569_v21  ;;  %v1528_v5 = vsel %vm1124_vm0, %v9569_v21, 0.0 }
 0x2ee   : > { %15666 = vst [vmem:[#allocation38_spill] sm:$0xff] %v9579_v28  ;;  %v1397_v46 = vsel %vm1124_vm0, %v9579_v28, 0.0  ;;  %15668 = vst [vmem:[#allocation40_spill] sm:$0xff] %v9595_v4  ;;  %v1400_v25 = vsel %vm1124_vm0, %v9620_v19, 0.0 }
 0x2ef   : > { %v1462_v62 = vpop.permute.xlu0 %1461  ;;  %15663 = vst [vmem:[#allocation35_spill] sm:$0xff] %v9564_v6  ;;  %v1170_v18 = vsel %vm1124_vm0, %v9564_v6, 0.0  ;;  %v1468_v45 = vpop.permute.xlu1 %1467  ;;  %15671 = vst [vmem:[#allocation43_spill] sm:$0xff] %v9620_v19 }
 0x2f0   : > { %v9559_v43 = vmul.f32 %v1462_v62, %v9342_v23 }
 0x2f2   : > { %15662 = vst [vmem:[#allocation34_spill] sm:$0xff] %v9559_v43  ;;  %v1525_v23 = vsel %vm1124_vm0, %v9559_v43, 0.0 }
 0x2f3   : > { %1229 = vrot.lane.b32.xlu0 %v922_v12, %s8864_s12  ;;  %v9573_v36 = vpop.xlane.xlu0 %1129  ;;  %v1210_v47 = vpop.permute.xlu1 %1209 }
 0x2f4   : > { %v9667_v28 = vmul.f32 %v1210_v47, %v9361_v34 }
 0x2f6   : > { %15676 = vst [vmem:[#allocation48_spill] sm:$0xff] %v9667_v28  ;;  %v1275_v38 = vsel %vm1124_vm0, %v9667_v28, 0.0 }
 0x2f7   : > { %1357 = vrot.lane.b32.xlu0 %v922_v12, %s8865_s10  ;;  %v9581_v39 = vpop.xlane.xlu0 %1126  ;;  %v1338_v1 = vpop.permute.xlu1 %1337 }
 0x2f8   : > { %v9674_v19 = vmul.f32 %v1338_v1, %v9361_v34 }
 0x2f9   : > { %1159 = vadd.xlane.f32.xlu1 %v1158_v8  ;;  %v9602_v8 = vmul.f32 %v1468_v45, %v9357_v32 }
 0x2fa   : > { %15677 = vst [vmem:[#allocation49_spill] sm:$0xff] %v9674_v19 }
 0x2fb   : > { %1485 = vrot.lane.b32.xlu0 %v922_v12, %s8866_s1  ;;  %v9587_v44 = vpop.permute.xlu0 %1213  ;;  %v1278_v12 = vsel %vm1124_vm0, %v9590_v29, 0.0  ;;  %15669 = vst [vmem:[#allocation41_spill] sm:$0xff] %v9602_v8 }
 0x2fc   : > { %v9749_v11 = vmul.f32 %v9587_v44, %v9380_v40 }
 0x2fe   : > { %15689 = vst [vmem:[#allocation61_spill] sm:$0xff] %v9749_v11 }
 0x2ff   : > { %v9597_v9 = vpop.permute.xlu0 %1341 }
 0x30a   : > { %1231 = vrot.lane.b32.xlu1 %v927_v49, %s8864_s12 }
 0x30e   : > { %1359 = vrot.lane.b32.xlu1 %v927_v49, %s8865_s10 }
 0x312   : > { %1487 = vrot.lane.b32.xlu1 %v927_v49, %s8866_s1  ;;  %v1406_v49 = vsel %vm1124_vm0, %v9595_v4, 0.0 }
 0x31a   : > { %1162 = vadd.xlane.f32.xlu0 %v1161_v52  ;;  %v1466_v52 = vpop.permute.xlu1 %1465 }
 0x31b   : > { %v9635_v7 = vmul.f32 %v1466_v52, %v9361_v34 }
 0x31d   : > { %15672 = vst [vmem:[#allocation44_spill] sm:$0xff] %v9635_v7  ;;  %v1531_v51 = vsel %vm1124_vm0, %v9635_v7, 0.0 }
 0x330   : > { %1233 = vrot.lane.b32.xlu0 %v932_v53, %s8864_s12 }
 0x334   : > { %1361 = vrot.lane.b32.xlu0 %v932_v53, %s8865_s10 }
 0x336   : > { %1165 = vadd.xlane.f32.xlu1 %v1164_v56  ;;  %v1534_v56 = vsel %vm1124_vm0, %v9602_v8, 0.0 }
 0x338   : > { %1489 = vrot.lane.b32.xlu0 %v932_v53, %s8866_s1  ;;  %v9606_v53 = vpop.permute.xlu0 %1469 }
 0x347   : > { %1235 = vrot.lane.b32.xlu1 %v937_v57, %s8864_s12 }
 0x34b   : > { %1363 = vrot.lane.b32.xlu1 %v937_v57, %s8865_s10 }
 0x34f   : > { %1491 = vrot.lane.b32.xlu1 %v937_v57, %s8866_s1  ;;  %v9610_v57 = vpop.xlane.xlu1 %1135 }
 0x353   : > { %v9617_v32 = vpop.xlane.xlu1 %1132 }
 0x357   : > { %1168 = vadd.xlane.f32.xlu0 %v1167_v60  ;;  %v9612_v60 = vpop.xlane.xlu0 %1138  ;;  %v1216_v26 = vpop.permute.xlu1 %1215 }
 0x35b   : > { %v9622_v62 = vpop.permute.xlu0 %1217  ;;  %v1344_v45 = vpop.permute.xlu1 %1343 }
 0x35f   : > { %v9628_v17 = vpop.permute.xlu0 %1345 }
 0x363   : > { %v9632_v22 = vpop.permute.xlu0 %1473 }
 0x36d   : > { %2293 = vrot.lane.b32.xlu0 %v9559_v43, %s8864_s12 }
 0x373   : > { %1171 = vadd.xlane.f32.xlu1 %v1170_v18  ;;  %v1272_v18 = vsel %vm1124_vm0, %v9615_v61, 0.0  ;;  %v1403_v61 = vsel %vm1124_vm0, %v9674_v19, 0.0  ;;  %v9700_v19 = vmul.f32 %v1344_v45, %v9393_v48  ;;  %v9718_v45 = vmul.f32 %v9606_v53, %v9380_v40 }
 0x375   : > { %15681 = vst [vmem:[#allocation53_spill] sm:$0xff] %v9700_v19  ;;  %15682 = vst [vmem:[#allocation54_spill] sm:$0xff] %v9718_v45 }
 0x384   : > { %2295 = vrot.lane.b32.xlu1 %v9569_v21, %s8864_s12 }
 0x38c   : > { %1270 = vadd.xlane.f32.xlu0 %v1269_v42  ;;  %v9639_v42 = vpop.xlane.xlu0 %1144 }
 0x390   : > { %1398 = vadd.xlane.f32.xlu0 %v1397_v46  ;;  %v1472_v46 = vpop.permute.xlu1 %1471 }
 0x394   : > { %1526 = vadd.xlane.f32.xlu0 %v1525_v23  ;;  %v9641_v23 = vpop.xlane.xlu1 %1141 }
 0x398   : > { %1279 = vadd.xlane.f32.xlu0 %v1278_v12  ;;  %v9643_v12 = vpop.permute.xlu0 %1221 }
 0x39c   : > { %1407 = vadd.xlane.f32.xlu0 %v1406_v49  ;;  %v9647_v49 = vpop.permute.xlu1 %1219  ;;  %v9652_v52 = vpop.permute.xlu0 %1349 }
 0x3a0   : > { %1535 = vadd.xlane.f32.xlu0 %v1534_v56  ;;  %v9650_v56 = vmul.f32 %v1472_v46, %v9393_v48 }
 0x3a2   : > { %15673 = vst [vmem:[#allocation45_spill] sm:$0xff] %v9650_v56 }
 0x3a8   : > { %1273 = vadd.xlane.f32.xlu1 %v1272_v18  ;;  %v9656_v18 = vpop.permute.xlu1 %1347 }
 0x3ac   : > { %1401 = vadd.xlane.f32.xlu1 %v1400_v25  ;;  %v9658_v25 = vpop.f32.mrb[16].mxu0 }
 0x3ad   : > { %15674 = vst [vmem:[#allocation46_spill] sm:$0xff] %v9658_v25  ;;  %v9662_v21 = vpop.f32.mrb[17].mxu0 }
 0x3ae   : > { %15675 = vst [vmem:[#allocation47_spill] sm:$0xff] %v9662_v21  ;;  %v9678_v29 = vpop.f32.mrb[18].mxu0 }
 0x3af   : > { %15678 = vst [vmem:[#allocation50_spill] sm:$0xff] %v9678_v29  ;;  %v9761_v29 = vpop.f32.mrb[19].mxu0 }
 0x3b0   : > { %1529 = vadd.xlane.f32.xlu1 %v1528_v5  ;;  %v9660_v5 = vpop.permute.xlu0 %1477  ;;  %15692 = vst [vmem:[#allocation64_spill] sm:$0xff] %v9761_v29 }
 0x3b4   : > { %v9664_v43 = vpop.xlane.xlu0 %1150 }
 0x3b6   : > { %2297 = vrot.lane.b32.xlu0 %v9635_v7, %s8864_s12  ;;  %v1412_v7 = vsel %vm1124_vm0, %v9700_v19, 0.0 }
 0x3b8   : > { %v9671_v4 = vpop.permute.xlu0 %1225 }
 0x3bc   : > { %v9684_v47 = vpop.permute.xlu0 %1353 }
 0x3c0   : > { %v9690_v1 = vpop.permute.xlu0 %1481 }
 0x3c1   : > { %2299 = vrot.lane.b32.xlu1 %v9602_v8, %s8864_s12  ;;  %v1476_v8 = vpop.permute.xlu1 %1475 }
 0x3c4   : > { %v9692_v28 = vpop.xlane.xlu0 %1156 }
 0x3c5   : > { %2303 = vrot.lane.b32.xlu1 %v9650_v56, %s8864_s12  ;;  %v9669_v46 = vpop.xlane.xlu1 %1147  ;;  %15679 = vst [vmem:[#allocation51_spill] sm:$0xff] %v9692_v28 }
 0x3c9   : > { %v9682_v59 = vpop.permute.xlu1 %1223 }
 0x3cd   : > { %v9688_v34 = vpop.permute.xlu1 %1351 }
 0x3d1   : > { %v9697_v13 = vpop.permute.xlu1 %1479 }
 0x3d5   : > { %1276 = vadd.xlane.f32.xlu0 %v1275_v38  ;;  %v9695_v38 = vmul.f32 %v1216_v26, %v9393_v48  ;;  %v9704_v15 = vpop.xlane.xlu1 %1153  ;;  %v1540_v48 = vsel %vm1124_vm0, %v9650_v56, 0.0  ;;  %v9735_v56 = vmul.f32 %v1476_v8, %v9428_v10  ;;  %v9755_v8 = vmul.f32 %v9597_v9, %v9380_v40 }
 0x3d6   : > { %v1537_v40 = vsel %vm1124_vm0, %v9718_v45, 0.0 }
 0x3d7   : > { %15680 = vst [vmem:[#allocation52_spill] sm:$0xff] %v9695_v38  ;;  %15686 = vst [vmem:[#allocation58_spill] sm:$0xff] %v9735_v56  ;;  %v1409_v44 = vsel %vm1124_vm0, %v9755_v8, 0.0 }
 0x3d8   : > { %15691 = vst [vmem:[#allocation63_spill] sm:$0xff] %v9755_v8 }
 0x3d9   : > { %1404 = vadd.xlane.f32.xlu0 %v1403_v61  ;;  %v1284_v61 = vsel %vm1124_vm0, %v9695_v38, 0.0  ;;  %v9710_v3 = vpop.permute.xlu1 %1227 }
 0x3dd   : > { %1532 = vadd.xlane.f32.xlu0 %v1531_v51  ;;  %v9706_v51 = vpop.permute.xlu0 %1229 }
 0x3e1   : > { %v9712_v26 = vpop.permute.xlu0 %1357 }
 0x3e5   : > { %v9724_v38 = vpop.permute.xlu0 %1485 }
 0x3e9   : > { %1285 = vadd.xlane.f32.xlu1 %v1284_v61  ;;  %v9722_v61 = vpop.permute.xlu1 %1355 }
 0x3ed   : > { %1413 = vadd.xlane.f32.xlu1 %v1412_v7  ;;  %v9726_v7 = vpop.xlane.xlu0 %1162  ;;  %v9728_v19 = vpop.permute.xlu1 %1483 }
 0x3ee   : > { %15683 = vst [vmem:[#allocation55_spill] sm:$0xff] %v9726_v7  ;;  %v1281_v7 = vsel %vm1124_vm0, %v9749_v11, 0.0 }
 0x3f1   : > { %1541 = vadd.xlane.f32.xlu1 %v1540_v48  ;;  %v9730_v6 = vpop.xlane.xlu1 %1159  ;;  %v9732_v55 = vpop.permute.xlu0 %1233 }
 0x3f2   : > { %15684 = vst [vmem:[#allocation56_spill] sm:$0xff] %v9730_v6  ;;  %15685 = vst [vmem:[#allocation57_spill] sm:$0xff] %v9732_v55  ;;  %v9780_v55 = vpop.f32.mrb[20].mxu0 }
 0x3f3   : > { %2301 = vrot.lane.b32.xlu0 %v9718_v45, %s8864_s12  ;;  %15696 = vst [vmem:[#allocation68_spill] sm:$0xff] %v9780_v55 }
 0x3f5   : > { %v9739_v53 = vpop.permute.xlu1 %1231  ;;  %v9741_v48 = vpop.permute.xlu0 %1361 }
 0x3f6   : > { %15687 = vst [vmem:[#allocation59_spill] sm:$0xff] %v9741_v48 }
 0x3f9   : > { %v9743_v33 = vpop.permute.xlu1 %1359  ;;  %v9745_v31 = vpop.permute.xlu0 %1489 }
 0x3fa   : > { %15688 = vst [vmem:[#allocation60_spill] sm:$0xff] %v9745_v31 }
 0x3fd   : > { %v9751_v63 = vpop.xlane.xlu0 %1168  ;;  %v9757_v21 = vpop.permute.xlu1 %1487 }
 0x3fe   : > { %15690 = vst [vmem:[#allocation62_spill] sm:$0xff] %v9751_v63 }
 0x401   : > { %v9763_v25 = vpop.xlane.xlu1 %1165  ;;  %v9765_v41 = vpop.permute.xlu0 %2293 }
 0x402   : > { %2307 = vrot.lane.b32.xlu1 %v9735_v56, %s8864_s12  ;;  %15693 = vst [vmem:[#allocation65_spill] sm:$0xff] %v9763_v25  ;;  %15694 = vst [vmem:[#allocation66_spill] sm:$0xff] %v9765_v41  ;;  %v9776_v41 = vmul.f32 %v9647_v49, %v9428_v10 }
 0x404   : > { %15695 = vst [vmem:[#allocation67_spill] sm:$0xff] %v9776_v41 }
 0x405   : > { %v9771_v9 = vpop.permute.xlu1 %1235 }
 0x409   : > { %v9778_v25 = vpop.permute.xlu1 %1363 }
 0x40d   : > { %v9788_v37 = vpop.permute.xlu1 %1491 }
 0x412   : > { %1282 = vadd.xlane.f32.xlu0 %v1281_v7  ;;  %v1173_v7 = vmul.f32 0.17677669, %v9581_v39 }
 0x416   : > { %1410 = vadd.xlane.f32.xlu0 %v1409_v44 }
 0x419   : > { %v1271_v63 = vpop.xlane.xlu0 %1270 }
 0x41a   : > { %1538 = vadd.xlane.f32.xlu0 %v1537_v40  ;;  %v1317_v27 = vmul.f32 0.17677669, %v1271_v63  ;;  %v9784_v63 = vmul.f32 %v9656_v18, %v9428_v10  ;;  %v1176_v18 = vmul.f32 0.17677669, %v9610_v57 }
 0x41c   : > { %v1589_v28 = vmax.f32 %v1173_v7, %v1317_v27  ;;  %15697 = vst [vmem:[#allocation69_spill] sm:$0xff] %v9784_v63  ;;  %v1418_v10 = vsel %vm1124_vm0, %v9784_v63, 0.0 }
 0x41d   : > { %v1399_v11 = vpop.xlane.xlu0 %1398 }
 0x41e   : > { %v1445_v29 = vmul.f32 0.17677669, %v1399_v11  ;;  %v1290_v11 = vsel %vm1124_vm0, %v9776_v41, 0.0 }
 0x420   : > { %v1605_v8 = vmax.f32 %v1589_v28, %v1445_v29 }
 0x421   : > { %v1527_v44 = vpop.xlane.xlu0 %1526 }
 0x422   : > { %v1573_v48 = vmul.f32 0.17677669, %v1527_v44 }
 0x424   : > { %v1621_v40 = vmax.f32 %v1605_v8, %v1573_v48 }
 0x425   : > { %v1280_v45 = vpop.xlane.xlu0 %1279 }
 0x426   : > { %v1637_v39 = vsub.f32 %v1173_v7, %v1621_v40  ;;  %v1685_v35 = vsub.f32 %v1317_v27, %v1621_v40  ;;  %v1733_v49 = vsub.f32 %v1445_v29, %v1621_v40  ;;  %1291 = vadd.xlane.f32.xlu1 %v1290_v11  ;;  %v1781_v24 = vsub.f32 %v1573_v48, %v1621_v40  ;;  %v9793_v7 = vpop.xlane.xlu1 %1171 }
 0x427   : > { %v1320_v6 = vmul.f32 0.17677669, %v1280_v45  ;;  %15698 = vst [vmem:[#allocation70_spill] sm:$0xff] %v9793_v7  ;;  %v9799_v45 = vmul.f32 %v9632_v22, %v9409_v2 }
 0x428   : > { %v1653_v28 = vmul.f32 1.442695, %v1637_v39  ;;  %v1701_v44 = vmul.f32 1.442695, %v1685_v35  ;;  %v1749_v55 = vmul.f32 1.442695, %v1733_v49 }
 0x429   : > { %v1408_v8 = vpop.xlane.xlu0 %1407  ;;  %v1797_v27 = vmul.f32 1.442695, %v1781_v24  ;;  %v1592_v29 = vmax.f32 %v1176_v18, %v1320_v6  ;;  %v1546_v35 = vsel %vm1124_vm0, %v9735_v56, 0.0  ;;  %15699 = vst [vmem:[#allocation71_spill] sm:$0xff] %v9799_v45 }
 0x42a   : > { %7854 = vpow2.f32 %v1653_v28  ;;  %v1448_v31 = vmul.f32 0.17677669, %v1408_v8  ;;  %1419 = vadd.xlane.f32.xlu1 %v1418_v10  ;;  %v9803_v39 = vpop.permute.xlu1 %2295 }
 0x42b   : > { %7856 = vpow2.f32 %v1701_v44 }
 0x42c   : > { %7858 = vpow2.f32 %v1749_v55  ;;  %v1608_v40 = vmax.f32 %v1592_v29, %v1448_v31 }
 0x42d   : > { %v1536_v48 = vpop.xlane.xlu0 %1535  ;;  %7860 = vpow2.f32 %v1797_v27 }
 0x42e   : > { %v1576_v11 = vmul.f32 0.17677669, %v1536_v48  ;;  %1547 = vadd.xlane.f32.xlu1 %v1546_v35 }
 0x430   : > { %v1624_v57 = vmax.f32 %v1608_v40, %v1576_v11  ;;  %2305 = vrot.lane.b32.xlu0 %v9799_v45, %s8864_s12 }
 0x432   : > { %v1640_v24 = vsub.f32 %v1176_v18, %v1624_v57  ;;  %v1688_v55 = vsub.f32 %v1320_v6, %v1624_v57  ;;  %v1736_v49 = vsub.f32 %v1448_v31, %v1624_v57  ;;  %v1784_v28 = vsub.f32 %v1576_v11, %v1624_v57 }
 0x433   : > { %v1174_v11 = vmul.f32 0.17677669, %v9573_v36 }
 0x434   : > { %v7855_v44 = vpop.eup %7854  ;;  %v1659_v8 = vmul.f32 1.442695, %v1640_v24  ;;  %v1707_v10 = vmul.f32 1.442695, %v1688_v55  ;;  %v1755_v22 = vmul.f32 1.442695, %v1736_v49  ;;  %v9817_v49 = vmul.f32 %v9697_v13, %v9461_v30 }
 0x435   : > { %v9805_v56 = vpop.eup %7856  ;;  %v1274_v29 = vpop.xlane.xlu1 %1273  ;;  %v1803_v35 = vmul.f32 1.442695, %v1784_v28 }
 0x436   : > { %15700 = vst [vmem:[#allocation72_spill] sm:$0xff] %v9805_v56  ;;  %v1829_v48 = vadd.f32 %v9805_v56, %v7855_v44  ;;  %7862 = vpow2.f32 %v1659_v8  ;;  %v9808_v27 = vpop.eup %7858  ;;  %v1318_v18 = vmul.f32 0.17677669, %v1274_v29  ;;  %15703 = vst [vmem:[#allocation75_spill] sm:$0xff] %v9817_v49 }
 0x437   : > { %15701 = vst [vmem:[#allocation73_spill] sm:$0xff] %v9808_v27  ;;  %7864 = vpow2.f32 %v1707_v10  ;;  %v9811_v6 = vpop.eup %7860 }
 0x438   : > { %v1845_v40 = vadd.f32 %v9808_v27, %v1829_v48  ;;  %15702 = vst [vmem:[#allocation74_spill] sm:$0xff] %v9811_v6  ;;  %7866 = vpow2.f32 %v1755_v22  ;;  %v1590_v55 = vmax.f32 %v1174_v11, %v1318_v18 }
 0x439   : > { %v1402_v31 = vpop.xlane.xlu1 %1401  ;;  %7868 = vpow2.f32 %v1803_v35 }
 0x43a   : > { %v1861_v57 = vadd.f32 %v9811_v6, %v1845_v40  ;;  %v1446_v24 = vmul.f32 0.17677669, %v1402_v31 }
 0x43c   : > { %7870 = vrcp.f32 %v1861_v57  ;;  %v1606_v8 = vmax.f32 %v1590_v55, %v1446_v24 }
 0x43d   : > { %v1530_v28 = vpop.xlane.xlu1 %1529 }
 0x43e   : > { %v1574_v10 = vmul.f32 0.17677669, %v1530_v28 }
 0x43f   : > { %2311 = vrot.lane.b32.xlu1 %v9817_v49, %s8864_s12 }
 0x440   : > { %v7863_v22 = vpop.eup %7862  ;;  %v1622_v29 = vmax.f32 %v1606_v8, %v1574_v10 }
 0x441   : > { %v9821_v48 = vpop.eup %7864 }
 0x442   : > { %v1832_v36 = vadd.f32 %v9821_v48, %v7863_v22  ;;  %v1638_v40 = vsub.f32 %v1174_v11, %v1622_v29  ;;  %v1686_v35 = vsub.f32 %v1318_v18, %v1622_v29  ;;  %v1734_v31 = vsub.f32 %v1446_v24, %v1622_v29  ;;  %v9824_v57 = vpop.eup %7866 }
 0x443   : > { %v1782_v63 = vsub.f32 %v1574_v10, %v1622_v29  ;;  %v9827_v28 = vpop.eup %7868  ;;  %v9837_v11 = vmul.f32 %v9622_v62, %v9409_v2  ;;  %v9841_v24 = vmul.f32 %v9628_v17, %v9409_v2 }
 0x444   : > { %v1848_v13 = vadd.f32 %v9824_v57, %v1832_v36  ;;  %v1655_v41 = vmul.f32 1.442695, %v1638_v40  ;;  %v1703_v55 = vmul.f32 1.442695, %v1686_v35  ;;  %v1751_v6 = vmul.f32 1.442695, %v1734_v31 }
 0x445   : > { %v1799_v56 = vmul.f32 1.442695, %v1782_v63  ;;  %15706 = vst [vmem:[#allocation78_spill] sm:$0xff] %v9837_v11  ;;  %15707 = vst [vmem:[#allocation79_spill] sm:$0xff] %v9841_v24  ;;  %v1287_v10 = vsel %vm1124_vm0, %v9837_v11, 0.0  ;;  %v1415_v62 = vsel %vm1124_vm0, %v9841_v24, 0.0  ;;  %v9867_v31 = vmul.f32 %v9682_v59, %v9461_v30 }
 0x446   : > { %v9829_v27 = vpop.eup %7870  ;;  %v1864_v8 = vadd.f32 %v9827_v28, %v1848_v13  ;;  %7872 = vpow2.f32 %v1655_v41  ;;  %v9845_v41 = vpop.f32.mrb[21].mxu0  ;;  %v1543_v35 = vsel %vm1124_vm0, %v9799_v45, 0.0 }
 0x447   : > { %15704 = vst [vmem:[#allocation76_spill] sm:$0xff] %v9829_v27  ;;  %7874 = vpow2.f32 %v1703_v55  ;;  %v9833_v18 = vmul.f32 %v9829_v27, %v7855_v44  ;;  %15708 = vst [vmem:[#allocation80_spill] sm:$0xff] %v9845_v41  ;;  %v9869_v13 = vpop.permute.xlu0 %2297  ;;  %v9871_v55 = vpop.f32.mrb[22].mxu0 }
 0x448   : > { %7876 = vrcp.f32 %v1864_v8  ;;  %15710 = vst [vmem:[#allocation82_spill] sm:$0xff] %v9867_v31  ;;  %15711 = vst [vmem:[#allocation83_spill] sm:$0xff] %v9871_v55  ;;  %v9877_v8 = vmul.f32 %v9688_v34, %v9461_v30  ;;  %v1552_v34 = vsel %vm1124_vm0, %v9817_v49, 0.0 }
 0x449   : > { %15705 = vst [vmem:[#allocation77_spill] sm:$0xff] %v9833_v18  ;;  %7878 = vpow2.f32 %v1751_v6 }
 0x44a   : > { %7880 = vpow2.f32 %v1799_v56  ;;  %15712 = vst [vmem:[#allocation84_spill] sm:$0xff] %v9877_v8 }
 0x44f   : > { %1288 = vadd.xlane.f32.xlu0 %v1287_v10 }
 0x450   : > { %v7873_v63 = vpop.eup %7872 }
 0x451   : > { %v9847_v29 = vpop.eup %7874 }
 0x452   : > { %v9849_v44 = vpop.eup %7876  ;;  %v1830_v6 = vadd.f32 %v9847_v29, %v7873_v63 }
 0x453   : > { %v9854_v56 = vpop.eup %7878  ;;  %1416 = vadd.xlane.f32.xlu0 %v1415_v62  ;;  %v9857_v2 = vmul.f32 %v9849_v44, %v7863_v22 }
 0x454   : > { %v1846_v17 = vadd.f32 %v9854_v56, %v1830_v6  ;;  %v9860_v36 = vpop.eup %7880  ;;  %v1296_v6 = vsel %vm1124_vm0, %v9867_v31, 0.0 }
 0x455   : > { %15709 = vst [vmem:[#allocation81_spill] sm:$0xff] %v9857_v2 }
 0x456   : > { %v1862_v40 = vadd.f32 %v9860_v36, %v1846_v17 }
 0x457   : > { %1544 = vadd.xlane.f32.xlu0 %v1543_v35  ;;  %v1175_v35 = vmul.f32 0.17677669, %v9617_v32 }
 0x458   : > { %7882 = vrcp.f32 %v1862_v40  ;;  %v1424_v40 = vsel %vm1124_vm0, %v9877_v8, 0.0 }
 0x462   : > { %v9873_v22 = vpop.eup %7882  ;;  %v1277_v10 = vpop.xlane.xlu0 %1276 }
 0x463   : > { %1297 = vadd.xlane.f32.xlu1 %v1296_v6  ;;  %v9882_v62 = vmul.f32 %v9873_v22, %v7873_v63  ;;  %v1319_v59 = vmul.f32 0.17677669, %v1277_v10  ;;  %v9891_v6 = vmul.f32 %v9660_v5, %v9442_v14  ;;  %v9893_v10 = vpop.permute.xlu1 %2299 }
 0x465   : > { %15713 = vst [vmem:[#allocation85_spill] sm:$0xff] %v9882_v62  ;;  %v1591_v18 = vmax.f32 %v1175_v35, %v1319_v59  ;;  %15714 = vst [vmem:[#allocation86_spill] sm:$0xff] %v9891_v6 }
 0x466   : > { %v1405_v17 = vpop.xlane.xlu0 %1404 }
 0x467   : > { %v1447_v2 = vmul.f32 0.17677669, %v1405_v17  ;;  %1425 = vadd.xlane.f32.xlu1 %v1424_v40  ;;  %v9897_v49 = vpop.permute.xlu1 %2303 }
 0x469   : > { %v1607_v63 = vmax.f32 %v1591_v18, %v1447_v2 }
 0x46a   : > { %v1533_v30 = vpop.xlane.xlu0 %1532 }
 0x46b   : > { %v1575_v62 = vmul.f32 0.17677669, %v1533_v30  ;;  %1553 = vadd.xlane.f32.xlu1 %v1552_v34  ;;  %v9901_v34 = vmul.f32 %v9728_v19, %v9487_v16 }
 0x46d   : > { %v1623_v45 = vmax.f32 %v1607_v63, %v1575_v62  ;;  %2309 = vrot.lane.b32.xlu0 %v9891_v6, %s8864_s12  ;;  %15715 = vst [vmem:[#allocation87_spill] sm:$0xff] %v9901_v34 }
 0x46f   : > { %v1639_v32 = vsub.f32 %v1175_v35, %v1623_v45  ;;  %v1687_v17 = vsub.f32 %v1319_v59, %v1623_v45  ;;  %v1735_v40 = vsub.f32 %v1447_v2, %v1623_v45  ;;  %v1783_v24 = vsub.f32 %v1575_v62, %v1623_v45 }
 0x470   : > { %v1178_v2 = vmul.f32 0.17677669, %v9641_v23 }
 0x471   : > { %v1657_v8 = vmul.f32 1.442695, %v1639_v32  ;;  %v1705_v11 = vmul.f32 1.442695, %v1687_v17  ;;  %v1753_v31 = vmul.f32 1.442695, %v1735_v40 }
 0x472   : > { %v1801_v5 = vmul.f32 1.442695, %v1783_v24 }
 0x473   : > { %7884 = vpow2.f32 %v1657_v8 }
 0x474   : > { %7886 = vpow2.f32 %v1705_v11 }
 0x475   : > { %7888 = vpow2.f32 %v1753_v31 }
 0x476   : > { %v1286_v18 = vpop.xlane.xlu1 %1285  ;;  %7890 = vpow2.f32 %v1801_v5 }
 0x477   : > { %v1322_v30 = vmul.f32 0.17677669, %v1286_v18 }
 0x479   : > { %v1594_v59 = vmax.f32 %v1178_v2, %v1322_v30 }
 0x47a   : > { %v1414_v35 = vpop.xlane.xlu1 %1413 }
 0x47b   : > { %v1450_v45 = vmul.f32 0.17677669, %v1414_v35 }
 0x47c   : > { %2315 = vrot.lane.b32.xlu1 %v9901_v34, %s8864_s12 }
 0x47d   : > { %v7885_v62 = vpop.eup %7884  ;;  %v1610_v31 = vmax.f32 %v1594_v59, %v1450_v45  ;;  %v9917_v59 = vmul.f32 %v9643_v12, %v9442_v14 }
 0x47e   : > { %v9906_v8 = vpop.eup %7886  ;;  %v1542_v11 = vpop.xlane.xlu1 %1541 }
 0x47f   : > { %v1831_v24 = vadd.f32 %v9906_v8, %v7885_v62  ;;  %v1578_v63 = vmul.f32 0.17677669, %v1542_v11  ;;  %v9909_v32 = vpop.eup %7888  ;;  %15717 = vst [vmem:[#allocation89_spill] sm:$0xff] %v9917_v59 }
 0x480   : > { %v9912_v40 = vpop.eup %7890 }
 0x481   : > { %v1847_v19 = vadd.f32 %v9909_v32, %v1831_v24  ;;  %v1626_v17 = vmax.f32 %v1610_v31, %v1578_v63  ;;  %15716 = vst [vmem:[#allocation88_spill] sm:$0xff] %v9912_v40  ;;  %v9921_v24 = vmul.f32 %v9652_v52, %v9442_v14  ;;  %v1549_v52 = vsel %vm1124_vm0, %v9891_v6, 0.0 }
 0x483   : > { %v1863_v23 = vadd.f32 %v9912_v40, %v1847_v19  ;;  %v1642_v5 = vsub.f32 %v1178_v2, %v1626_v17  ;;  %v1690_v18 = vsub.f32 %v1322_v30, %v1626_v17  ;;  %v1738_v35 = vsub.f32 %v1450_v45, %v1626_v17  ;;  %15718 = vst [vmem:[#allocation90_spill] sm:$0xff] %v9921_v24  ;;  %v9925_v2 = vpop.f32.mrb[23].mxu0 }
 0x484   : > { %v1786_v41 = vsub.f32 %v1578_v63, %v1626_v17  ;;  %v1293_v30 = vsel %vm1124_vm0, %v9917_v59, 0.0  ;;  %15719 = vst [vmem:[#allocation91_spill] sm:$0xff] %v9925_v2  ;;  %v1421_v12 = vsel %vm1124_vm0, %v9921_v24, 0.0  ;;  %v9949_v17 = vpop.permute.xlu0 %2301 }
 0x485   : > { %7892 = vrcp.f32 %v1863_v23  ;;  %v1663_v27 = vmul.f32 1.442695, %v1642_v5  ;;  %v1711_v55 = vmul.f32 1.442695, %v1690_v18  ;;  %v1759_v7 = vmul.f32 1.442695, %v1738_v35 }
 0x486   : > { %v1807_v11 = vmul.f32 1.442695, %v1786_v41  ;;  %v9951_v23 = vpop.f32.mrb[24].mxu0  ;;  %v9955_v5 = vmul.f32 %v9722_v61, %v9487_v16 }
 0x487   : > { %7894 = vpow2.f32 %v1663_v27 }
 0x488   : > { %7896 = vpow2.f32 %v1711_v55  ;;  %15722 = vst [vmem:[#allocation94_spill] sm:$0xff] %v9955_v5 }
 0x489   : > { %7898 = vpow2.f32 %v1759_v7 }
 0x48a   : > { %7900 = vpow2.f32 %v1807_v11 }
 0x48c   : > { %1294 = vadd.xlane.f32.xlu0 %v1293_v30 }
 0x48f   : > { %v9927_v45 = vpop.eup %7892 }
 0x490   : > { %1422 = vadd.xlane.f32.xlu0 %v1421_v12  ;;  %v9932_v27 = vmul.f32 %v9927_v45, %v7885_v62  ;;  %v9947_v62 = vmul.f32 %v9710_v3, %v9487_v16  ;;  %v1430_v3 = vsel %vm1124_vm0, %v9955_v5, 0.0  ;;  %v9975_v5 = vpop.permute.xlu1 %2307 }
 0x491   : > { %v7895_v7 = vpop.eup %7894 }
 0x492   : > { %15720 = vst [vmem:[#allocation92_spill] sm:$0xff] %v9932_v27  ;;  %v9934_v41 = vpop.eup %7896  ;;  %15721 = vst [vmem:[#allocation93_spill] sm:$0xff] %v9947_v62  ;;  %v1302_v35 = vsel %vm1124_vm0, %v9947_v62, 0.0 }
 0x493   : > { %v1834_v14 = vadd.f32 %v9934_v41, %v7895_v7  ;;  %v9939_v55 = vpop.eup %7898 }
 0x494   : > { %1550 = vadd.xlane.f32.xlu0 %v1549_v52  ;;  %v9942_v63 = vpop.eup %7900 }
 0x495   : > { %v1850_v31 = vadd.f32 %v9939_v55, %v1834_v14  ;;  %v1177_v14 = vmul.f32 0.17677669, %v9612_v60 }
 0x497   : > { %v1866_v19 = vadd.f32 %v9942_v63, %v1850_v31 }
 0x499   : > { %7902 = vrcp.f32 %v1866_v19  ;;  %v1558_v19 = vsel %vm1124_vm0, %v9901_v34, 0.0 }
 0x49f   : > { %v1283_v18 = vpop.xlane.xlu0 %1282 }
 0x4a0   : > { %1303 = vadd.xlane.f32.xlu1 %v1302_v35  ;;  %v1321_v11 = vmul.f32 0.17677669, %v1283_v18  ;;  %v9971_v18 = vmul.f32 %v9690_v1, %v9475_v0 }
 0x4a2   : > { %v1593_v16 = vmax.f32 %v1177_v14, %v1321_v11  ;;  %15724 = vst [vmem:[#allocation96_spill] sm:$0xff] %v9971_v18 }
 0x4a3   : > { %v9959_v30 = vpop.eup %7902  ;;  %v1411_v12 = vpop.xlane.xlu0 %1410 }
 0x4a4   : > { %v1449_v52 = vmul.f32 0.17677669, %v1411_v12  ;;  %1431 = vadd.xlane.f32.xlu1 %v1430_v3  ;;  %v9965_v31 = vmul.f32 %v9959_v30, %v7895_v7 }
 0x4a6   : > { %15723 = vst [vmem:[#allocation95_spill] sm:$0xff] %v9965_v31  ;;  %v1609_v35 = vmax.f32 %v1593_v16, %v1449_v52 }
 0x4a7   : > { %v1539_v61 = vpop.xlane.xlu0 %1538 }
 0x4a8   : > { %v1577_v27 = vmul.f32 0.17677669, %v1539_v61  ;;  %1559 = vadd.xlane.f32.xlu1 %v1558_v19  ;;  %v9979_v19 = vmul.f32 %v9757_v21, %v9530_v54 }
 0x4aa   : > { %v1625_v6 = vmax.f32 %v1609_v35, %v1577_v27  ;;  %2313 = vrot.lane.b32.xlu0 %v9971_v18, %s8864_s12  ;;  %15725 = vst [vmem:[#allocation97_spill] sm:$0xff] %v9979_v19 }
 0x4ac   : > { %v1641_v60 = vsub.f32 %v1177_v14, %v1625_v6  ;;  %v1689_v12 = vsub.f32 %v1321_v11, %v1625_v6  ;;  %v1737_v7 = vsub.f32 %v1449_v52, %v1625_v6  ;;  %v1785_v3 = vsub.f32 %v1577_v27, %v1625_v6 }
 0x4ad   : > { %v1180_v11 = vmul.f32 0.17677669, %v9669_v46 }
 0x4ae   : > { %v1661_v31 = vmul.f32 1.442695, %v1641_v60  ;;  %v1709_v24 = vmul.f32 1.442695, %v1689_v12  ;;  %v1757_v34 = vmul.f32 1.442695, %v1737_v7 }
 0x4af   : > { %v1805_v1 = vmul.f32 1.442695, %v1785_v3 }
 0x4b0   : > { %7904 = vpow2.f32 %v1661_v31 }
 0x4b1   : > { %7906 = vpow2.f32 %v1709_v24 }
 0x4b2   : > { %7908 = vpow2.f32 %v1757_v34 }
 0x4b3   : > { %v1292_v16 = vpop.xlane.xlu1 %1291  ;;  %7910 = vpow2.f32 %v1805_v1 }
 0x4b4   : > { %v1324_v61 = vmul.f32 0.17677669, %v1292_v16 }
 0x4b6   : > { %v1596_v52 = vmax.f32 %v1180_v11, %v1324_v61 }
 0x4b7   : > { %v1420_v14 = vpop.xlane.xlu1 %1419 }
 0x4b8   : > { %v1452_v6 = vmul.f32 0.17677669, %v1420_v14 }
 0x4b9   : > { %2319 = vrot.lane.b32.xlu1 %v9979_v19, %s8864_s12 }
 0x4ba   : > { %v7905_v27 = vpop.eup %7904  ;;  %v1612_v35 = vmax.f32 %v1596_v52, %v1452_v6  ;;  %v9995_v52 = vmul.f32 %v9671_v4, %v9475_v0 }
 0x4bb   : > { %v9984_v31 = vpop.eup %7906  ;;  %v1548_v24 = vpop.xlane.xlu1 %1547 }
 0x4bc   : > { %v1833_v34 = vadd.f32 %v9984_v31, %v7905_v27  ;;  %v1580_v60 = vmul.f32 0.17677669, %v1548_v24  ;;  %v9987_v12 = vpop.eup %7908  ;;  %15727 = vst [vmem:[#allocation99_spill] sm:$0xff] %v9995_v52 }
 0x4bd   : > { %v9990_v3 = vpop.eup %7910 }
 0x4be   : > { %v1849_v21 = vadd.f32 %v9987_v12, %v1833_v34  ;;  %v1628_v7 = vmax.f32 %v1612_v35, %v1580_v60  ;;  %15726 = vst [vmem:[#allocation98_spill] sm:$0xff] %v9990_v3  ;;  %v9999_v34 = vmul.f32 %v9684_v47, %v9475_v0  ;;  %v1555_v47 = vsel %vm1124_vm0, %v9971_v18, 0.0 }
 0x4c0   : > { %v1865_v46 = vadd.f32 %v9990_v3, %v1849_v21  ;;  %v1644_v1 = vsub.f32 %v1180_v11, %v1628_v7  ;;  %v1692_v16 = vsub.f32 %v1324_v61, %v1628_v7  ;;  %v1740_v14 = vsub.f32 %v1452_v6, %v1628_v7  ;;  %15728 = vst [vmem:[#allocation100_spill] sm:$0xff] %v9999_v34  ;;  %v10003_v11 = vpop.f32.mrb[25].mxu0 }
 0x4c1   : > { %v1788_v59 = vsub.f32 %v1580_v60, %v1628_v7  ;;  %v1299_v61 = vsel %vm1124_vm0, %v9995_v52, 0.0  ;;  %15729 = vst [vmem:[#allocation101_spill] sm:$0xff] %v10003_v11  ;;  %v1427_v4 = vsel %vm1124_vm0, %v9999_v34, 0.0  ;;  %v10027_v7 = vpop.permute.xlu0 %2305 }
 0x4c2   : > { %7912 = vrcp.f32 %v1865_v46  ;;  %v1667_v62 = vmul.f32 1.442695, %v1644_v1  ;;  %v1715_v2 = vmul.f32 1.442695, %v1692_v16  ;;  %v1763_v40 = vmul.f32 1.442695, %v1740_v14 }
 0x4c3   : > { %v1811_v24 = vmul.f32 1.442695, %v1788_v59  ;;  %v10029_v46 = vpop.f32.mrb[26].mxu0  ;;  %v10033_v1 = vmul.f32 %v9743_v33, %v9530_v54 }
 0x4c4   : > { %7914 = vpow2.f32 %v1667_v62 }
 0x4c5   : > { %7916 = vpow2.f32 %v1715_v2  ;;  %15732 = vst [vmem:[#allocation104_spill] sm:$0xff] %v10033_v1 }
 0x4c6   : > { %7918 = vpow2.f32 %v1763_v40 }
 0x4c7   : > { %7920 = vpow2.f32 %v1811_v24 }
 0x4c9   : > { %1300 = vadd.xlane.f32.xlu0 %v1299_v61 }
 0x4cc   : > { %v10005_v6 = vpop.eup %7912 }
 0x4cd   : > { %1428 = vadd.xlane.f32.xlu0 %v1427_v4  ;;  %v10010_v59 = vmul.f32 %v10005_v6, %v7905_v27  ;;  %v10025_v27 = vmul.f32 %v9739_v53, %v9530_v54  ;;  %v1436_v53 = vsel %vm1124_vm0, %v10033_v1, 0.0  ;;  %v10053_v1 = vpop.permute.xlu1 %2311 }
 0x4ce   : > { %v7915_v40 = vpop.eup %7914 }
 0x4cf   : > { %15730 = vst [vmem:[#allocation102_spill] sm:$0xff] %v10010_v59  ;;  %v10012_v2 = vpop.eup %7916  ;;  %15731 = vst [vmem:[#allocation103_spill] sm:$0xff] %v10025_v27  ;;  %v1308_v14 = vsel %vm1124_vm0, %v10025_v27, 0.0 }
 0x4d0   : > { %v1836_v0 = vadd.f32 %v10012_v2, %v7915_v40  ;;  %v10017_v62 = vpop.eup %7918 }
 0x4d1   : > { %1556 = vadd.xlane.f32.xlu0 %v1555_v47  ;;  %v10020_v60 = vpop.eup %7920 }
 0x4d2   : > { %v1852_v35 = vadd.f32 %v10017_v62, %v1836_v0  ;;  %v1179_v0 = vmul.f32 0.17677669, %v9639_v42 }
 0x4d4   : > { %v1868_v21 = vadd.f32 %v10020_v60, %v1852_v35 }
 0x4d6   : > { %7922 = vrcp.f32 %v1868_v21  ;;  %v1564_v21 = vsel %vm1124_vm0, %v9979_v19, 0.0 }
 0x4dc   : > { %v1289_v16 = vpop.xlane.xlu0 %1288 }
 0x4dd   : > { %1309 = vadd.xlane.f32.xlu1 %v1308_v14  ;;  %v1323_v24 = vmul.f32 0.17677669, %v1289_v16  ;;  %v10049_v16 = vmul.f32 %v9724_v38, %v9518_v50 }
 0x4df   : > { %v1595_v33 = vmax.f32 %v1179_v0, %v1323_v24  ;;  %15734 = vst [vmem:[#allocation106_spill] sm:$0xff] %v10049_v16 }
 0x4e0   : > { %v10037_v61 = vpop.eup %7922  ;;  %v1417_v4 = vpop.xlane.xlu0 %1416 }
 0x4e1   : > { %v1451_v47 = vmul.f32 0.17677669, %v1417_v4  ;;  %1437 = vadd.xlane.f32.xlu1 %v1436_v53  ;;  %v10043_v35 = vmul.f32 %v10037_v61, %v7915_v40 }
 0x4e3   : > { %15733 = vst [vmem:[#allocation105_spill] sm:$0xff] %v10043_v35  ;;  %v1611_v14 = vmax.f32 %v1595_v33, %v1451_v47 }
 0x4e4   : > { %v1545_v54 = vpop.xlane.xlu0 %1544 }
 0x4e5   : > { %v1579_v59 = vmul.f32 0.17677669, %v1545_v54  ;;  %1565 = vadd.xlane.f32.xlu1 %v1564_v21  ;;  %v10057_v21 = vmul.f32 %v9788_v37, %v9556_v20 }
 0x4e7   : > { %v1627_v18 = vmax.f32 %v1611_v14, %v1579_v59  ;;  %2317 = vrot.lane.b32.xlu0 %v10049_v16, %s8864_s12  ;;  %15735 = vst [vmem:[#allocation107_spill] sm:$0xff] %v10057_v21 }
 0x4e9   : > { %v1643_v42 = vsub.f32 %v1179_v0, %v1627_v18  ;;  %v1691_v4 = vsub.f32 %v1323_v24, %v1627_v18  ;;  %v1739_v40 = vsub.f32 %v1451_v47, %v1627_v18  ;;  %v1787_v53 = vsub.f32 %v1579_v59, %v1627_v18 }
 0x4ea   : > { %v1182_v24 = vmul.f32 0.17677669, %v9704_v15 }
 0x4eb   : > { %v1665_v35 = vmul.f32 1.442695, %v1643_v42  ;;  %v1713_v34 = vmul.f32 1.442695, %v1691_v4  ;;  %v1761_v19 = vmul.f32 1.442695, %v1739_v40 }
 0x4ec   : > { %v1809_v38 = vmul.f32 1.442695, %v1787_v53 }
 0x4ed   : > { %7924 = vpow2.f32 %v1665_v35 }
 0x4ee   : > { %7926 = vpow2.f32 %v1713_v34 }
 0x4ef   : > { %7928 = vpow2.f32 %v1761_v19 }
 0x4f0   : > { %v1298_v33 = vpop.xlane.xlu1 %1297  ;;  %7930 = vpow2.f32 %v1809_v38 }
 0x4f1   : > { %v1326_v54 = vmul.f32 0.17677669, %v1298_v33 }
 0x4f3   : > { %v1598_v47 = vmax.f32 %v1182_v24, %v1326_v54 }
 0x4f4   : > { %v1426_v0 = vpop.xlane.xlu1 %1425 }
 0x4f5   : > { %v1454_v18 = vmul.f32 0.17677669, %v1426_v0 }
 0x4f6   : > { %2323 = vrot.lane.b32.xlu1 %v10057_v21, %s8864_s12 }
 0x4f7   : > { %v7925_v59 = vpop.eup %7924  ;;  %v1614_v14 = vmax.f32 %v1598_v47, %v1454_v18  ;;  %v10073_v47 = vmul.f32 %v9706_v51, %v9518_v50 }
 0x4f8   : > { %v10062_v35 = vpop.eup %7926  ;;  %v1554_v34 = vpop.xlane.xlu1 %1553 }
 0x4f9   : > { %v1835_v19 = vadd.f32 %v10062_v35, %v7925_v59  ;;  %v1582_v42 = vmul.f32 0.17677669, %v1554_v34  ;;  %v10065_v4 = vpop.eup %7928  ;;  %15738 = vst [vmem:[#allocation110_spill] sm:$0xff] %v10073_v47 }
 0x4fa   : > { %15736 = vst [vmem:[#allocation108_spill] sm:$0xff] %v10065_v4  ;;  %v10068_v53 = vpop.eup %7930 }
 0x4fb   : > { %v1851_v37 = vadd.f32 %v10065_v4, %v1835_v19  ;;  %v1630_v40 = vmax.f32 %v1614_v14, %v1582_v42  ;;  %15737 = vst [vmem:[#allocation109_spill] sm:$0xff] %v10068_v53  ;;  %v10077_v19 = vmul.f32 %v9712_v26, %v9518_v50  ;;  %v1561_v26 = vsel %vm1124_vm0, %v10049_v16, 0.0 }
 0x4fd   : > { %v1867_v15 = vadd.f32 %v10068_v53, %v1851_v37  ;;  %v1646_v38 = vsub.f32 %v1182_v24, %v1630_v40  ;;  %v1694_v33 = vsub.f32 %v1326_v54, %v1630_v40  ;;  %v1742_v0 = vsub.f32 %v1454_v18, %v1630_v40  ;;  %15739 = vst [vmem:[#allocation111_spill] sm:$0xff] %v10077_v19  ;;  %v10081_v24 = vpop.f32.mrb[27].mxu0 }
 0x4fe   : > { %v1790_v52 = vsub.f32 %v1582_v42, %v1630_v40  ;;  %v1305_v54 = vsel %vm1124_vm0, %v10073_v47, 0.0  ;;  %15740 = vst [vmem:[#allocation112_spill] sm:$0xff] %v10081_v24  ;;  %v1433_v51 = vsel %vm1124_vm0, %v10077_v19, 0.0  ;;  %v10105_v40 = vpop.permute.xlu0 %2309  ;;  %v10131_v47 = vpop.permute.xlu1 %2315 }
 0x4ff   : > { %7932 = vrcp.f32 %v1867_v15  ;;  %v1671_v27 = vmul.f32 1.442695, %v1646_v38  ;;  %v1719_v11 = vmul.f32 1.442695, %v1694_v33  ;;  %v1767_v3 = vmul.f32 1.442695, %v1742_v0 }
 0x500   : > { %v1815_v34 = vmul.f32 1.442695, %v1790_v52  ;;  %v10107_v15 = vpop.f32.mrb[28].mxu0  ;;  %v10111_v38 = vmul.f32 %v9778_v25, %v9556_v20 }
 0x501   : > { %7934 = vpow2.f32 %v1671_v27 }
 0x502   : > { %7936 = vpow2.f32 %v1719_v11  ;;  %15744 = vst [vmem:[#allocation116_spill] sm:$0xff] %v10111_v38 }
 0x503   : > { %7938 = vpow2.f32 %v1767_v3 }
 0x504   : > { %7940 = vpow2.f32 %v1815_v34 }
 0x506   : > { %1306 = vadd.xlane.f32.xlu0 %v1305_v54 }
 0x509   : > { %v10083_v18 = vpop.eup %7932 }
 0x50a   : > { %15741 = vst [vmem:[#allocation113_spill] sm:$0xff] %v10083_v18  ;;  %1434 = vadd.xlane.f32.xlu0 %v1433_v51  ;;  %v10088_v52 = vmul.f32 %v10083_v18, %v7925_v59  ;;  %v10103_v59 = vmul.f32 %v9771_v9, %v9556_v20  ;;  %v1442_v9 = vsel %vm1124_vm0, %v10111_v38, 0.0 }
 0x50b   : > { %v7935_v3 = vpop.eup %7934 }
 0x50c   : > { %15742 = vst [vmem:[#allocation114_spill] sm:$0xff] %v10088_v52  ;;  %v10090_v11 = vpop.eup %7936  ;;  %15743 = vst [vmem:[#allocation115_spill] sm:$0xff] %v10103_v59  ;;  %v1314_v0 = vsel %vm1124_vm0, %v10103_v59, 0.0 }
 0x50d   : > { %v1838_v50 = vadd.f32 %v10090_v11, %v7935_v3  ;;  %v10095_v27 = vpop.eup %7938 }
 0x50e   : > { %1562 = vadd.xlane.f32.xlu0 %v1561_v26  ;;  %v10098_v42 = vpop.eup %7940 }
 0x50f   : > { %v1854_v14 = vadd.f32 %v10095_v27, %v1838_v50  ;;  %v1181_v50 = vmul.f32 0.17677669, %v9664_v43 }
 0x511   : > { %v1870_v37 = vadd.f32 %v10098_v42, %v1854_v14 }
 0x513   : > { %7942 = vrcp.f32 %v1870_v37  ;;  %v1570_v37 = vsel %vm1124_vm0, %v10057_v21, 0.0 }
 0x519   : > { %v1295_v33 = vpop.xlane.xlu0 %1294 }
 0x51a   : > { %1315 = vadd.xlane.f32.xlu1 %v1314_v0  ;;  %v1325_v34 = vmul.f32 0.17677669, %v1295_v33  ;;  %v15746_v33 = vld [vmem:[#allocation60_spill] sm:$0xff] }
 0x51b   : > { %v10127_v0 = vmul.f32 %v15746_v33, %v9546_v58 }
 0x51c   : > { %v1597_v20 = vmax.f32 %v1181_v50, %v1325_v34 }
 0x51d   : > { %v10115_v54 = vpop.eup %7942  ;;  %v1423_v51 = vpop.xlane.xlu0 %1422  ;;  %15747 = vst [vmem:[#allocation60_spill] sm:$0xff] %v10127_v0 }
 0x51e   : > { %v1453_v26 = vmul.f32 0.17677669, %v1423_v51  ;;  %1443 = vadd.xlane.f32.xlu1 %v1442_v9  ;;  %v10121_v14 = vmul.f32 %v10115_v54, %v7935_v3 }
 0x520   : > { %15745 = vst [vmem:[#allocation117_spill] sm:$0xff] %v10121_v14  ;;  %v1613_v52 = vmax.f32 %v1597_v20, %v1453_v26 }
 0x521   : > { %v1551_v25 = vpop.xlane.xlu0 %1550 }
 0x522   : > { %v1581_v16 = vmul.f32 0.17677669, %v1551_v25  ;;  %1571 = vadd.xlane.f32.xlu1 %v1570_v37  ;;  %v15748_v37 = vld [vmem:[#allocation56_spill] sm:$0xff] }
 0x523   : > { %v1184_v59 = vmul.f32 0.17677669, %v15748_v37 }
 0x524   : > { %v1629_v19 = vmax.f32 %v1613_v52, %v1581_v16  ;;  %2321 = vrot.lane.b32.xlu0 %v10127_v0, %s8864_s12 }
 0x526   : > { %v1645_v43 = vsub.f32 %v1181_v50, %v1629_v19  ;;  %v1693_v51 = vsub.f32 %v1325_v34, %v1629_v19  ;;  %v1741_v3 = vsub.f32 %v1453_v26, %v1629_v19  ;;  %v1789_v9 = vsub.f32 %v1581_v16, %v1629_v19  ;;  %v15749_v34 = vld [vmem:[#allocation19_spill] sm:$0xff] }
 0x528   : > { %v1669_v14 = vmul.f32 1.442695, %v1645_v43  ;;  %v1717_v38 = vmul.f32 1.442695, %v1693_v51  ;;  %v1765_v21 = vmul.f32 1.442695, %v1741_v3 }
 0x529   : > { %v1813_v33 = vmul.f32 1.442695, %v1789_v9  ;;  %v15752_v51 = vld [vmem:[#allocation22_spill] sm:$0xff] }
 0x52a   : > { %7944 = vpow2.f32 %v1669_v14 }
 0x52b   : > { %7946 = vpow2.f32 %v1717_v38 }
 0x52c   : > { %7948 = vpow2.f32 %v1765_v21 }
 0x52d   : > { %v1304_v20 = vpop.xlane.xlu1 %1303  ;;  %7950 = vpow2.f32 %v1813_v33 }
 0x52e   : > { %v1328_v25 = vmul.f32 0.17677669, %v1304_v20 }
 0x530   : > { %v1600_v19 = vmax.f32 %v1184_v59, %v1328_v25 }
 0x531   : > { %v1432_v52 = vpop.xlane.xlu1 %1431 }
 0x532   : > { %v1456_v24 = vmul.f32 0.17677669, %v1432_v52 }
 0x533   : > { %2423 = vrot.lane.b32.xlu1 %v15749_v34, %s8864_s12 }
 0x534   : > { %v7945_v16 = vpop.eup %7944  ;;  %v1616_v38 = vmax.f32 %v1600_v19, %v1456_v24 }
 0x535   : > { %v10136_v50 = vpop.eup %7946  ;;  %v1560_v26 = vpop.xlane.xlu1 %1559 }
 0x536   : > { %15750 = vst [vmem:[#allocation56_spill] sm:$0xff] %v10136_v50  ;;  %v1837_v14 = vadd.f32 %v10136_v50, %v7945_v16  ;;  %v1584_v43 = vmul.f32 0.17677669, %v1560_v26  ;;  %v10139_v21 = vpop.eup %7948  ;;  %v15754_v50 = vld [vmem:[#allocation21_spill] sm:$0xff] }
 0x537   : > { %15751 = vst [vmem:[#allocation118_spill] sm:$0xff] %v10139_v21  ;;  %2425 = vrot.lane.b32.xlu1 %v15752_v51, %s8864_s12  ;;  %v10144_v33 = vpop.eup %7950  ;;  %v15755_v51 = vld [vmem:[#allocation57_spill] sm:$0xff] }
 0x538   : > { %v1853_v3 = vadd.f32 %v10139_v21, %v1837_v14  ;;  %v1632_v9 = vmax.f32 %v1616_v38, %v1584_v43  ;;  %15753 = vst [vmem:[#allocation119_spill] sm:$0xff] %v10144_v33  ;;  %v10151_v18 = vmul.f32 %v15755_v51, %v9546_v58  ;;  %v10159_v38 = vpop.f32.mrb[29].mxu0 }
 0x539   : > { %15759 = vst [vmem:[#allocation120_spill] sm:$0xff] %v10159_v38  ;;  %v2356_v38 = vsel %vm1124_vm0, %v9897_v49, 0.0 }
 0x53a   : > { %v1869_v20 = vadd.f32 %v10144_v33, %v1853_v3  ;;  %v1648_v52 = vsub.f32 %v1184_v59, %v1632_v9  ;;  %v1696_v37 = vsub.f32 %v1328_v25, %v1632_v9  ;;  %v1744_v34 = vsub.f32 %v1456_v24, %v1632_v9  ;;  %15756 = vst [vmem:[#allocation57_spill] sm:$0xff] %v10151_v18  ;;  %v15757_v59 = vld [vmem:[#allocation59_spill] sm:$0xff] }
 0x53b   : > { %v1792_v53 = vsub.f32 %v1584_v43, %v1632_v9  ;;  %2427 = vrot.lane.b32.xlu1 %v15754_v50, %s8864_s12  ;;  %v10155_v25 = vmul.f32 %v15757_v59, %v9546_v58  ;;  %v1311_v24 = vsel %vm1124_vm0, %v10151_v18, 0.0  ;;  %v1567_v3 = vsel %vm1124_vm0, %v10127_v0, 0.0 }
 0x53c   : > { %7952 = vrcp.f32 %v1869_v20  ;;  %v1675_v19 = vmul.f32 1.442695, %v1648_v52  ;;  %v1723_v26 = vmul.f32 1.442695, %v1696_v37  ;;  %v1771_v4 = vmul.f32 1.442695, %v1744_v34 }
 0x53d   : > { %v1819_v14 = vmul.f32 1.442695, %v1792_v53  ;;  %15758 = vst [vmem:[#allocation59_spill] sm:$0xff] %v10155_v25  ;;  %v1439_v43 = vsel %vm1124_vm0, %v10155_v25, 0.0 }
 0x53e   : > { %7954 = vpow2.f32 %v1675_v19  ;;  %v10181_v19 = vpop.f32.mrb[30].mxu0 }
 0x53f   : > { %7956 = vpow2.f32 %v1723_v26 }
 0x540   : > { %7958 = vpow2.f32 %v1771_v4 }
 0x541   : > { %7960 = vpow2.f32 %v1819_v14 }
 0x543   : > { %1312 = vadd.xlane.f32.xlu0 %v1311_v24 }
 0x546   : > { %v10161_v34 = vpop.eup %7952 }
 0x547   : > { %15760 = vst [vmem:[#allocation121_spill] sm:$0xff] %v10161_v34  ;;  %1440 = vadd.xlane.f32.xlu0 %v1439_v43  ;;  %v10166_v53 = vmul.f32 %v10161_v34, %v7945_v16  ;;  %v10179_v16 = vpop.permute.xlu0 %2313  ;;  %v15762_v43 = vld [vmem:[#allocation51_spill] sm:$0xff] }
 0x548   : > { %v7955_v4 = vpop.eup %7954  ;;  %v15765_v34 = vld [vmem:[#allocation23_spill] sm:$0xff] }
 0x549   : > { %15761 = vst [vmem:[#allocation122_spill] sm:$0xff] %v10166_v53  ;;  %v10168_v51 = vpop.eup %7956  ;;  %v1183_v53 = vmul.f32 0.17677669, %v15762_v43 }
 0x54a   : > { %v1840_v58 = vadd.f32 %v10168_v51, %v7955_v4  ;;  %v10173_v9 = vpop.eup %7958 }
 0x54b   : > { %1568 = vadd.xlane.f32.xlu0 %v1567_v3  ;;  %v10176_v52 = vpop.eup %7960 }
 0x54c   : > { %v1856_v20 = vadd.f32 %v10173_v9, %v1840_v58 }
 0x54e   : > { %v1872_v37 = vadd.f32 %v10176_v52, %v1856_v20  ;;  %v2344_v20 = vsel %vm1124_vm0, %v9803_v39, 0.0  ;;  %v2320_v39 = vpop.permute.xlu1 %2319 }
 0x550   : > { %7962 = vrcp.f32 %v1872_v37 }
 0x556   : > { %v1301_v26 = vpop.xlane.xlu0 %1300 }
 0x557   : > { %v1327_v14 = vmul.f32 0.17677669, %v1301_v26  ;;  %v15764_v26 = vld [vmem:[#allocation20_spill] sm:$0xff] }
 0x559   : > { %v1599_v58 = vmax.f32 %v1183_v53, %v1327_v14 }
 0x55a   : > { %v10183_v59 = vpop.eup %7962  ;;  %v1429_v24 = vpop.xlane.xlu0 %1428 }
 0x55b   : > { %v1455_v0 = vmul.f32 0.17677669, %v1429_v24  ;;  %v10187_v3 = vmul.f32 %v10183_v59, %v7955_v4 }
 0x55d   : > { %15763 = vst [vmem:[#allocation51_spill] sm:$0xff] %v10187_v3  ;;  %v1615_v37 = vmax.f32 %v1599_v58, %v1455_v0  ;;  %v2362_v58 = vsel %vm1124_vm0, %v9975_v5, 0.0 }
 0x55e   : > { %v1557_v50 = vpop.xlane.xlu0 %1556 }
 0x55f   : > { %v1583_v25 = vmul.f32 0.17677669, %v1557_v50  ;;  %2345 = vadd.xlane.f32.xlu1 %v2344_v20 }
 0x561   : > { %v1631_v18 = vmax.f32 %v1615_v37, %v1583_v25  ;;  %2421 = vrot.lane.b32.xlu0 %v15764_v26, %s8864_s12  ;;  %v10215_v26 = vpop.f32.mrb[31].mxu0 }
 0x563   : > { %v1647_v43 = vsub.f32 %v1183_v53, %v1631_v18  ;;  %v1695_v24 = vsub.f32 %v1327_v14, %v1631_v18  ;;  %v1743_v33 = vsub.f32 %v1455_v0, %v1631_v18  ;;  %2357 = vadd.xlane.f32.xlu1 %v2356_v38  ;;  %v1791_v4 = vsub.f32 %v1583_v25, %v1631_v18 }
 0x564   : > { %v2368_v0 = vsel %vm1124_vm0, %v10053_v1, 0.0  ;;  %v2374_v38 = vsel %vm1124_vm0, %v10131_v47, 0.0 }
 0x565   : > { %v1673_v3 = vmul.f32 1.442695, %v1647_v43  ;;  %v1721_v21 = vmul.f32 1.442695, %v1695_v24  ;;  %2429 = vrot.lane.b32.xlu0 %v15765_v34, %s8864_s12  ;;  %v1769_v50 = vmul.f32 1.442695, %v1743_v33 }
 0x566   : > { %v1817_v20 = vmul.f32 1.442695, %v1791_v4  ;;  %v15766_v33 = vld [vmem:[#allocation65_spill] sm:$0xff]  ;;  %v2380_v43 = vsel %vm1124_vm0, %v2320_v39, 0.0 }
 0x567   : > { %7964 = vpow2.f32 %v1673_v3  ;;  %2363 = vadd.xlane.f32.xlu1 %v2362_v58  ;;  %v1186_v53 = vmul.f32 0.17677669, %v15766_v33 }
 0x568   : > { %7966 = vpow2.f32 %v1721_v21 }
 0x569   : > { %7968 = vpow2.f32 %v1769_v50 }
 0x56a   : > { %v1310_v49 = vpop.xlane.xlu1 %1309  ;;  %7970 = vpow2.f32 %v1817_v20 }
 0x56b   : > { %2369 = vadd.xlane.f32.xlu1 %v2368_v0  ;;  %v1330_v18 = vmul.f32 0.17677669, %v1310_v49 }
 0x56d   : > { %v1602_v3 = vmax.f32 %v1186_v53, %v1330_v18 }
 0x56e   : > { %v1438_v25 = vpop.xlane.xlu1 %1437 }
 0x56f   : > { %v1458_v14 = vmul.f32 0.17677669, %v1438_v25  ;;  %2375 = vadd.xlane.f32.xlu1 %v2374_v38 }
 0x571   : > { %v7965_v5 = vpop.eup %7964  ;;  %v1618_v24 = vmax.f32 %v1602_v3, %v1458_v14 }
 0x572   : > { %v10204_v21 = vpop.eup %7966  ;;  %v1566_v37 = vpop.xlane.xlu1 %1565 }
 0x573   : > { %v1839_v1 = vadd.f32 %v10204_v21, %v7965_v5  ;;  %v1586_v4 = vmul.f32 0.17677669, %v1566_v37  ;;  %2381 = vadd.xlane.f32.xlu1 %v2380_v43  ;;  %v10208_v50 = vpop.eup %7968 }
 0x574   : > { %v10211_v20 = vpop.eup %7970 }
 0x575   : > { %v1855_v47 = vadd.f32 %v10208_v50, %v1839_v1  ;;  %v1634_v58 = vmax.f32 %v1618_v24, %v1586_v4 }
 0x576   : > { %v2324_v49 = vpop.permute.xlu1 %2323 }
 0x577   : > { %v1871_v0 = vadd.f32 %v10211_v20, %v1855_v47  ;;  %v1650_v25 = vsub.f32 %v1186_v53, %v1634_v58  ;;  %v1698_v38 = vsub.f32 %v1330_v18, %v1634_v58  ;;  %v1746_v33 = vsub.f32 %v1458_v14, %v1634_v58  ;;  %v10222_v18 = vld [vmem:[%s15368_s6] ss:$0 sm:$0xff]  ;;  %v15767_v53 = vld [vmem:[#allocation66_spill] sm:$0xff] }
 0x578   : > { %v1794_v34 = vsub.f32 %v1586_v4, %v1634_v58  ;;  %v2386_v39 = vsel %vm1124_vm0, %v2324_v49, 0.0  ;;  %v2341_v14 = vsel %vm1124_vm0, %v15767_v53, 0.0  ;;  %v15768_v4 = vld [vmem:[#allocation46_spill] sm:$0xff]  ;;  %v2353_v53 = vsel %vm1124_vm0, %v9949_v17, 0.0 }
 0x579   : > { %7972 = vrcp.f32 %v1871_v0  ;;  %v1679_v3 = vmul.f32 1.442695, %v1650_v25  ;;  %v1727_v37 = vmul.f32 1.442695, %v1698_v38  ;;  %2387 = vadd.xlane.f32.xlu1 %v2386_v39  ;;  %v1775_v43 = vmul.f32 1.442695, %v1746_v33 }
 0x57a   : > { %v1823_v1 = vmul.f32 1.442695, %v1794_v34  ;;  %v10228_v47 = vadd.f32 %v15768_v4, %v10222_v18  ;;  %v1942_v34 = vmul.f32 %v9873_v22, %v9847_v29  ;;  %v2350_v38 = vsel %vm1124_vm0, %v9893_v10, 0.0 }
 0x57b   : > { %7974 = vpow2.f32 %v1679_v3  ;;  %v2054_v3 = vmul.f32 %v9873_v22, %v9854_v56  ;;  %v2318_v56 = vpop.permute.xlu0 %2317  ;;  %v2056_v17 = vmul.f32 %v9849_v44, %v9824_v57 }
 0x57c   : > { %7976 = vpow2.f32 %v1727_v37  ;;  %15769 = vst [vmem:[#allocation65_spill] sm:$0xff] %v10228_v47  ;;  %v1958_v39 = vmul.f32 %v1942_v34, %v10228_v47  ;;  %v1944_v34 = vmul.f32 %v9849_v44, %v9821_v48  ;;  %v2365_v48 = vsel %vm1124_vm0, %v10105_v40, 0.0 }
 0x57d   : > { %7978 = vpow2.f32 %v1775_v43  ;;  %v2347_v43 = vsel %vm1124_vm0, %v9869_v13, 0.0  ;;  %v2070_v10 = vmul.f32 %v2054_v3, %v10228_v47 }
 0x57e   : > { %7980 = vpow2.f32 %v1823_v1  ;;  %v2166_v1 = vmul.f32 %v9873_v22, %v9860_v36  ;;  %v2359_v22 = vsel %vm1124_vm0, %v10027_v7, 0.0 }
 0x580   : > { %v2182_v13 = vmul.f32 %v2166_v1, %v10228_v47 }
 0x583   : > { %v10217_v24 = vpop.eup %7972 }
 0x584   : > { %2342 = vadd.xlane.f32.xlu0 %v2341_v14  ;;  %v10233_v58 = vmul.f32 %v10217_v24, %v7965_v5  ;;  %v15771_v14 = vld [vmem:[#allocation50_spill] sm:$0xff] }
 0x585   : > { %v7975_v49 = vpop.eup %7974  ;;  %v10260_v4 = vadd.f32 %v15771_v14, %v10222_v18 }
 0x586   : > { %15770 = vst [vmem:[#allocation66_spill] sm:$0xff] %v10233_v58  ;;  %v10235_v0 = vpop.eup %7976 }
 0x587   : > { %v1842_v25 = vadd.f32 %v10235_v0, %v7975_v49  ;;  %v10240_v33 = vpop.eup %7978  ;;  %15772 = vst [vmem:[#allocation46_spill] sm:$0xff] %v10260_v4  ;;  %v2072_v7 = vmul.f32 %v2056_v17, %v10260_v4  ;;  %v2377_v17 = vsel %vm1124_vm0, %v2318_v56, 0.0 }
 0x588   : > { %2351 = vadd.xlane.f32.xlu0 %v2350_v38  ;;  %v10246_v5 = vpop.eup %7980 }
 0x589   : > { %v1858_v29 = vadd.f32 %v10240_v33, %v1842_v25  ;;  %v1960_v25 = vmul.f32 %v1944_v34, %v10260_v4  ;;  %v1943_v34 = vmul.f32 %v9927_v45, %v9906_v8 }
 0x58a   : > { %1991 = vrot.lane.b32.xlu1 %v1958_v39, %s8864_s12 }
 0x58b   : > { %v1874_v37 = vadd.f32 %v10246_v5, %v1858_v29  ;;  %v15773_v29 = vld [vmem:[#allocation55_spill] sm:$0xff] }
 0x58c   : > { %2348 = vadd.xlane.f32.xlu0 %v2347_v43 }
 0x58d   : > { %7982 = vrcp.f32 %v1874_v37  ;;  %v1185_v37 = vmul.f32 0.17677669, %v15773_v29 }
 0x58e   : > { %2103 = vrot.lane.b32.xlu1 %v2070_v10, %s8865_s10  ;;  %v2168_v10 = vmul.f32 %v9849_v44, %v9827_v28 }
 0x590   : > { %2354 = vadd.xlane.f32.xlu0 %v2353_v53  ;;  %v15775_v53 = vld [vmem:[#allocation64_spill] sm:$0xff]  ;;  %v2184_v28 = vmul.f32 %v2168_v10, %v10260_v4 }
 0x591   : > { %v10286_v14 = vadd.f32 %v10222_v18, %v15775_v53 }
 0x592   : > { %2215 = vrot.lane.b32.xlu1 %v2182_v13, %s8866_s1  ;;  %v2371_v13 = vsel %vm1124_vm0, %v10179_v16, 0.0 }
 0x593   : > { %v1307_v36 = vpop.xlane.xlu0 %1306  ;;  %15776 = vst [vmem:[#allocation55_spill] sm:$0xff] %v10286_v14 }
 0x594   : > { %2360 = vadd.xlane.f32.xlu0 %v2359_v22  ;;  %v1329_v38 = vmul.f32 0.17677669, %v1307_v36 }
 0x596   : > { %1995 = vrot.lane.b32.xlu1 %v1960_v25, %s8864_s12  ;;  %v1601_v1 = vmax.f32 %v1185_v37, %v1329_v38 }
 0x597   : > { %v10272_v39 = vpop.eup %7982  ;;  %v1435_v3 = vpop.xlane.xlu0 %1434 }
 0x598   : > { %v1457_v43 = vmul.f32 0.17677669, %v1435_v3  ;;  %2366 = vadd.xlane.f32.xlu0 %v2365_v48  ;;  %v10281_v57 = vmul.f32 %v10272_v39, %v7975_v49  ;;  %v15777_v49 = vld [vmem:[#allocation68_spill] sm:$0xff]  ;;  %v1959_v3 = vmul.f32 %v1943_v34, %v10286_v14  ;;  %v2170_v34 = vmul.f32 %v9959_v30, %v9942_v63 }
 0x599   : > { %v10296_v25 = vadd.f32 %v15777_v49, %v10222_v18 }
 0x59a   : > { %15774 = vst [vmem:[#allocation50_spill] sm:$0xff] %v10281_v57  ;;  %2107 = vrot.lane.b32.xlu1 %v2072_v7, %s8865_s10  ;;  %v1617_v36 = vmax.f32 %v1601_v1, %v1457_v43  ;;  %v1946_v7 = vmul.f32 %v9959_v30, %v9934_v41 }
 0x59b   : > { %v1563_v40 = vpop.xlane.xlu0 %1562  ;;  %15778 = vst [vmem:[#allocation64_spill] sm:$0xff] %v10296_v25 }
 0x59c   : > { %v1585_v22 = vmul.f32 0.17677669, %v1563_v40  ;;  %2372 = vadd.xlane.f32.xlu0 %v2371_v13  ;;  %v1962_v56 = vmul.f32 %v1946_v7, %v10296_v25 }
 0x59e   : > { %v1633_v44 = vmax.f32 %v1617_v36, %v1585_v22  ;;  %2219 = vrot.lane.b32.xlu1 %v2184_v28, %s8866_s1 }
 0x59f   : > { %v2322_v8 = vpop.permute.xlu0 %2321 }
 0x5a0   : > { %v1649_v16 = vsub.f32 %v1185_v37, %v1633_v44  ;;  %v1697_v48 = vsub.f32 %v1329_v38, %v1633_v44  ;;  %v1745_v29 = vsub.f32 %v1457_v43, %v1633_v44  ;;  %2378 = vadd.xlane.f32.xlu0 %v2377_v17  ;;  %v1793_v10 = vsub.f32 %v1585_v22, %v1633_v44  ;;  %v15779_v22 = vld [vmem:[#allocation70_spill] sm:$0xff] }
 0x5a1   : > { %v2383_v13 = vsel %vm1124_vm0, %v2322_v8, 0.0  ;;  %v2058_v38 = vmul.f32 %v9959_v30, %v9939_v55  ;;  %v1188_v28 = vmul.f32 0.17677669, %v15779_v22  ;;  %v15780_v55 = vld [vmem:[#allocation83_spill] sm:$0xff]  ;;  %v2060_v8 = vmul.f32 %v10037_v61, %v10017_v62 }
 0x5a2   : > { %v1677_v1 = vmul.f32 1.442695, %v1649_v16  ;;  %v1725_v53 = vmul.f32 1.442695, %v1697_v48  ;;  %1993 = vrot.lane.b32.xlu1 %v1959_v3, %s8864_s12  ;;  %v1773_v40 = vmul.f32 1.442695, %v1745_v29  ;;  %v10315_v49 = vadd.f32 %v15780_v55, %v10222_v18 }
 0x5a3   : > { %v1821_v37 = vmul.f32 1.442695, %v1793_v10  ;;  %v2074_v43 = vmul.f32 %v2058_v38, %v10296_v25  ;;  %v2186_v3 = vmul.f32 %v2170_v34, %v10296_v25  ;;  %v1948_v16 = vmul.f32 %v10037_v61, %v10012_v2  ;;  %v15782_v38 = vld [vmem:[#allocation47_spill] sm:$0xff]  ;;  %v15785_v34 = vld [vmem:[#allocation76_spill] sm:$0xff] }
 0x5a4   : > { %7984 = vpow2.f32 %v1677_v1  ;;  %2384 = vadd.xlane.f32.xlu0 %v2383_v13  ;;  %15781 = vst [vmem:[#allocation68_spill] sm:$0xff] %v10315_v49  ;;  %v2076_v62 = vmul.f32 %v2060_v8, %v10315_v49 }
 0x5a5   : > { %7986 = vpow2.f32 %v1725_v53  ;;  %v1964_v53 = vmul.f32 %v1948_v16, %v10315_v49 }
 0x5a6   : > { %1999 = vrot.lane.b32.xlu1 %v1962_v56, %s8864_s12  ;;  %7988 = vpow2.f32 %v1773_v40 }
 0x5a7   : > { %v1316_v41 = vpop.xlane.xlu1 %1315  ;;  %7990 = vpow2.f32 %v1821_v37  ;;  %v10335_v37 = vadd.f32 %v10222_v18, %v15782_v38 }
 0x5a8   : > { %v1332_v36 = vmul.f32 0.17677669, %v1316_v41  ;;  %v2172_v41 = vmul.f32 %v10037_v61, %v10020_v60  ;;  %v10349_v61 = vadd.f32 %v9951_v23, %v10222_v18  ;;  %v2062_v23 = vmul.f32 %v10115_v54, %v10095_v27 }
 0x5a9   : > { %15783 = vst [vmem:[#allocation70_spill] sm:$0xff] %v10335_v37  ;;  %v2174_v27 = vmul.f32 %v10115_v54, %v10098_v42 }
 0x5aa   : > { %2111 = vrot.lane.b32.xlu1 %v2074_v43, %s8865_s10  ;;  %v1604_v29 = vmax.f32 %v1188_v28, %v1332_v36  ;;  %v15784_v43 = vld [vmem:[#allocation72_spill] sm:$0xff]  ;;  %15787 = vst [vmem:[#allocation83_spill] sm:$0xff] %v10349_v61 }
 0x5ab   : > { %v1444_v44 = vpop.xlane.xlu1 %1443  ;;  %v1941_v22 = vmul.f32 %v15785_v34, %v15784_v43 }
 0x5ac   : > { %v1460_v17 = vmul.f32 0.17677669, %v1444_v44 }
 0x5ad   : > { %v1957_v8 = vmul.f32 %v1941_v22, %v10335_v37 }
 0x5ae   : > { %v7985_v48 = vpop.eup %7984  ;;  %2223 = vrot.lane.b32.xlu1 %v2186_v3, %s8866_s1  ;;  %v1620_v10 = vmax.f32 %v1604_v29, %v1460_v17 }
 0x5af   : > { %v10321_v63 = vpop.eup %7986  ;;  %v1572_v30 = vpop.xlane.xlu1 %1571 }
 0x5b0   : > { %v1841_v7 = vadd.f32 %v10321_v63, %v7985_v48  ;;  %v1588_v1 = vmul.f32 0.17677669, %v1572_v30  ;;  %v10327_v40 = vpop.eup %7988 }
 0x5b1   : > { %v10331_v56 = vpop.eup %7990 }
 0x5b2   : > { %v1857_v2 = vadd.f32 %v10327_v40, %v1841_v7  ;;  %v1636_v13 = vmax.f32 %v1620_v10, %v1588_v1  ;;  %2003 = vrot.lane.b32.xlu1 %v1964_v53, %s8864_s12  ;;  %v15786_v53 = vld [vmem:[#allocation73_spill] sm:$0xff] }
 0x5b3   : > { %v2053_v60 = vmul.f32 %v15785_v34, %v15786_v53  ;;  %v2064_v53 = vmul.f32 %v10183_v59, %v10173_v9 }
 0x5b4   : > { %v1873_v44 = vadd.f32 %v10331_v56, %v1857_v2  ;;  %v1652_v55 = vsub.f32 %v1188_v28, %v1636_v13  ;;  %v1700_v3 = vsub.f32 %v1332_v36, %v1636_v13  ;;  %v1748_v16 = vsub.f32 %v1460_v17, %v1636_v13 }
 0x5b5   : > { %v1796_v29 = vsub.f32 %v1588_v1, %v1636_v13  ;;  %v2188_v36 = vmul.f32 %v2172_v41, %v10315_v49  ;;  %v1950_v28 = vmul.f32 %v10115_v54, %v10090_v11  ;;  %v2069_v2 = vmul.f32 %v2053_v60, %v10335_v37  ;;  %v15788_v13 = vld [vmem:[#allocation74_spill] sm:$0xff] }
 0x5b6   : > { %7992 = vrcp.f32 %v1873_v44  ;;  %v1683_v30 = vmul.f32 1.442695, %v1652_v55  ;;  %v1731_v7 = vmul.f32 1.442695, %v1700_v3  ;;  %2115 = vrot.lane.b32.xlu1 %v2076_v62, %s8865_s10  ;;  %v1779_v10 = vmul.f32 1.442695, %v1748_v16 }
 0x5b7   : > { %v1827_v17 = vmul.f32 1.442695, %v1796_v29  ;;  %v1966_v1 = vmul.f32 %v1950_v28, %v10349_v61  ;;  %v2165_v38 = vmul.f32 %v15785_v34, %v15788_v13  ;;  %v2055_v11 = vmul.f32 %v9927_v45, %v9909_v32  ;;  %v15790_v55 = vld [vmem:[#allocation88_spill] sm:$0xff] }
 0x5b8   : > { %7994 = vpow2.f32 %v1683_v30  ;;  %v2078_v41 = vmul.f32 %v2062_v23, %v10349_v61  ;;  %v2167_v3 = vmul.f32 %v9927_v45, %v15790_v55  ;;  %v10384_v16 = vadd.f32 %v10029_v46, %v10222_v18  ;;  %v15799_v55 = vld [vmem:[#allocation62_spill] sm:$0xff] }
 0x5b9   : > { %7996 = vpow2.f32 %v1731_v7  ;;  %v2181_v43 = vmul.f32 %v2165_v38, %v10335_v37  ;;  %v2071_v32 = vmul.f32 %v2055_v11, %v10286_v14  ;;  %v2190_v54 = vmul.f32 %v2174_v27, %v10349_v61  ;;  %v15792_v7 = vld [vmem:[#allocation80_spill] sm:$0xff] }
 0x5ba   : > { %2227 = vrot.lane.b32.xlu1 %v2188_v36, %s8866_s1  ;;  %1989 = vrot.lane.b32.xlu0 %v1957_v8, %s8864_s12  ;;  %7998 = vpow2.f32 %v1779_v10  ;;  %15791 = vst [vmem:[#allocation72_spill] sm:$0xff] %v10384_v16  ;;  %v10399_v46 = vadd.f32 %v10222_v18, %v15792_v7  ;;  %v2183_v10 = vmul.f32 %v2167_v3, %v10286_v14  ;;  %v1187_v3 = vmul.f32 0.17677669, %v15799_v55 }
 0x5bb   : > { %8000 = vpow2.f32 %v1827_v17  ;;  %v1945_v60 = vmul.f32 %v10005_v6, %v9984_v31  ;;  %v2080_v36 = vmul.f32 %v2064_v53, %v10384_v16  ;;  %v2176_v17 = vmul.f32 %v10183_v59, %v10176_v52  ;;  %v15794_v31 = vld [vmem:[#allocation98_spill] sm:$0xff] }
 0x5bc   : > { %15793 = vst [vmem:[#allocation76_spill] sm:$0xff] %v10399_v46  ;;  %v2169_v9 = vmul.f32 %v10005_v6, %v15794_v31  ;;  %v1954_v52 = vmul.f32 %v10272_v39, %v10235_v0  ;;  %v2066_v27 = vmul.f32 %v10272_v39, %v10240_v33  ;;  %v15798_v0 = vld [vmem:[#allocation113_spill] sm:$0xff]  ;;  %v2178_v33 = vmul.f32 %v10272_v39, %v10246_v5 }
 0x5bd   : > { %v1961_v28 = vmul.f32 %v1945_v60, %v10399_v46  ;;  %v2192_v13 = vmul.f32 %v2176_v17, %v10384_v16  ;;  %v15802_v60 = vld [vmem:[#allocation109_spill] sm:$0xff]  ;;  %v10459_v17 = vadd.f32 %v10181_v19, %v10222_v18 }
 0x5be   : > { %2007 = vrot.lane.b32.xlu1 %v1966_v1, %s8864_s12  ;;  %2101 = vrot.lane.b32.xlu0 %v2069_v2, %s8865_s10  ;;  %v2057_v1 = vmul.f32 %v10005_v6, %v9987_v12  ;;  %v10422_v2 = vadd.f32 %v10107_v15, %v10222_v18  ;;  %v15796_v12 = vld [vmem:[#allocation91_spill] sm:$0xff] }
 0x5bf   : > { %15803 = vst [vmem:[#allocation80_spill] sm:$0xff] %v10459_v17 }
 0x5c0   : > { %v10366_v62 = vpop.eup %7992  ;;  %15795 = vst [vmem:[#allocation73_spill] sm:$0xff] %v10422_v2  ;;  %v2073_v38 = vmul.f32 %v2057_v1, %v10399_v46  ;;  %v2082_v7 = vmul.f32 %v2066_v27, %v10422_v2  ;;  %v2194_v5 = vmul.f32 %v2178_v33, %v10422_v2  ;;  %v15807_v27 = vld [vmem:[#allocation121_spill] sm:$0xff] }
 0x5c1   : > { %v10373_v22 = vmul.f32 %v10366_v62, %v7985_v48  ;;  %v1952_v48 = vmul.f32 %v10183_v59, %v10168_v51  ;;  %v10432_v59 = vadd.f32 %v10222_v18, %v15796_v12 }
 0x5c2   : > { %v7995_v34 = vpop.eup %7994  ;;  %2119 = vrot.lane.b32.xlu1 %v2078_v41, %s8865_s10  ;;  %2213 = vrot.lane.b32.xlu0 %v2181_v43, %s8866_s1  ;;  %v1970_v41 = vmul.f32 %v1954_v52, %v10422_v2  ;;  %v2185_v43 = vmul.f32 %v2169_v9, %v10399_v46 }
 0x5c3   : > { %15789 = vst [vmem:[#allocation47_spill] sm:$0xff] %v10373_v22  ;;  %v10377_v44 = vpop.eup %7996  ;;  %v1968_v51 = vmul.f32 %v1952_v48, %v10384_v16  ;;  %15797 = vst [vmem:[#allocation74_spill] sm:$0xff] %v10432_v59 }
 0x5c4   : > { %v1844_v42 = vadd.f32 %v10377_v44, %v7995_v34  ;;  %v10390_v29 = vpop.eup %7998 }
 0x5c5   : > { %v10395_v45 = vpop.eup %8000 }
 0x5c6   : > { %v1860_v30 = vadd.f32 %v10390_v29, %v1844_v42  ;;  %2231 = vrot.lane.b32.xlu1 %v2190_v54, %s8866_s1  ;;  %2105 = vrot.lane.b32.xlu0 %v2071_v32, %s8865_s10  ;;  %v1947_v32 = vmul.f32 %v15798_v0, %v10062_v35 }
 0x5c8   : > { %v1876_v8 = vadd.f32 %v10395_v45, %v1860_v30 }
 0x5ca   : > { %8002 = vrcp.f32 %v1876_v8  ;;  %2011 = vrot.lane.b32.xlu1 %v1968_v51, %s8864_s12  ;;  %2217 = vrot.lane.b32.xlu0 %v2183_v10, %s8866_s1  ;;  %v1963_v10 = vmul.f32 %v1947_v32, %v10432_v59  ;;  %v15801_v8 = vld [vmem:[#allocation108_spill] sm:$0xff] }
 0x5cb   : > { %v2059_v35 = vmul.f32 %v15798_v0, %v15801_v8  ;;  %v15809_v8 = vld [vmem:[#allocation119_spill] sm:$0xff] }
 0x5cd   : > { %v2075_v39 = vmul.f32 %v2059_v35, %v10432_v59  ;;  %v2173_v35 = vmul.f32 %v15807_v27, %v15809_v8 }
 0x5ce   : > { %2123 = vrot.lane.b32.xlu1 %v2080_v36, %s8865_s10  ;;  %1997 = vrot.lane.b32.xlu0 %v1961_v28, %s8864_s12  ;;  %v2171_v36 = vmul.f32 %v15798_v0, %v15802_v60  ;;  %v10455_v28 = vpop.permute.xlu1 %2423 }
 0x5d0   : > { %v1313_v23 = vpop.xlane.xlu0 %1312 }
 0x5d1   : > { %v1331_v6 = vmul.f32 0.17677669, %v1313_v23 }
 0x5d2   : > { %2235 = vrot.lane.b32.xlu1 %v2192_v13, %s8866_s1  ;;  %2109 = vrot.lane.b32.xlu0 %v2073_v38, %s8865_s10  ;;  %v15804_v38 = vld [vmem:[#allocation101_spill] sm:$0xff]  ;;  %v10475_v32 = vpop.permute.xlu1 %2425 }
 0x5d3   : > { %v1603_v48 = vmax.f32 %v1187_v3, %v1331_v6  ;;  %v10468_v52 = vadd.f32 %v10222_v18, %v15804_v38  ;;  %v2063_v38 = vmul.f32 %v10217_v24, %v10208_v50  ;;  %v15815_v50 = vld [vmem:[#allocation120_spill] sm:$0xff] }
 0x5d4   : > { %v8003_v11 = vpop.eup %8002  ;;  %v1441_v15 = vpop.xlane.xlu0 %1440 }
 0x5d5   : > { %v1459_v42 = vmul.f32 0.17677669, %v1441_v15  ;;  %v10443_v54 = vmul.f32 %v8003_v11, %v7995_v34  ;;  %v1956_v1 = vmul.f32 %v8003_v11, %v10377_v44  ;;  %15805 = vst [vmem:[#allocation98_spill] sm:$0xff] %v10468_v52  ;;  %v2187_v15 = vmul.f32 %v2171_v36, %v10432_v59 }
 0x5d6   : > { %2015 = vrot.lane.b32.xlu1 %v1970_v41, %s8864_s12  ;;  %2221 = vrot.lane.b32.xlu0 %v2185_v43, %s8866_s1  ;;  %v2068_v44 = vmul.f32 %v8003_v11, %v10390_v29  ;;  %v2189_v60 = vmul.f32 %v2173_v35, %v10468_v52  ;;  %v1951_v36 = vmul.f32 %v10217_v24, %v10204_v21 }
 0x5d7   : > { %15800 = vst [vmem:[#allocation88_spill] sm:$0xff] %v10443_v54  ;;  %v1619_v51 = vmax.f32 %v1603_v48, %v1459_v42  ;;  %v1972_v43 = vmul.f32 %v1956_v1, %v10459_v17  ;;  %v15812_v1 = vld [vmem:[#allocation24_spill] sm:$0xff] }
 0x5d8   : > { %v1569_v30 = vpop.xlane.xlu0 %1568  ;;  %v2084_v48 = vmul.f32 %v2068_v44, %v10459_v17  ;;  %v10524_v44 = vadd.f32 %v10222_v18, %v15815_v50 }
 0x5d9   : > { %v1587_v53 = vmul.f32 0.17677669, %v1569_v30  ;;  %v2180_v30 = vmul.f32 %v8003_v11, %v10395_v45  ;;  %v15810_v11 = vld [vmem:[#allocation112_spill] sm:$0xff] }
 0x5da   : > { %2127 = vrot.lane.b32.xlu1 %v2082_v7, %s8865_s10  ;;  %2001 = vrot.lane.b32.xlu0 %v1963_v10, %s8864_s12  ;;  %v10486_v7 = vpop.permute.xlu1 %2427  ;;  %15816 = vst [vmem:[#allocation113_spill] sm:$0xff] %v10524_v44 }
 0x5db   : > { %v1635_v34 = vmax.f32 %v1619_v51, %v1587_v53  ;;  %v2196_v10 = vmul.f32 %v2180_v30, %v10459_v17 }
 0x5dd   : > { %v1651_v31 = vsub.f32 %v1187_v3, %v1635_v34  ;;  %v1699_v9 = vsub.f32 %v1331_v6, %v1635_v34  ;;  %v1747_v23 = vsub.f32 %v1459_v42, %v1635_v34  ;;  %v1795_v13 = vsub.f32 %v1587_v53, %v1635_v34  ;;  %v15806_v6 = vld [vmem:[#allocation56_spill] sm:$0xff]  ;;  %v15808_v3 = vld [vmem:[#allocation118_spill] sm:$0xff] }
 0x5de   : > { %2239 = vrot.lane.b32.xlu1 %v2194_v5, %s8866_s1  ;;  %2113 = vrot.lane.b32.xlu0 %v2075_v39, %s8865_s10  ;;  %v1949_v0 = vmul.f32 %v15807_v27, %v15806_v6  ;;  %v2061_v42 = vmul.f32 %v15807_v27, %v15808_v3  ;;  %v10496_v53 = vadd.f32 %v10222_v18, %v15810_v11  ;;  %v2422_v11 = vpop.permute.xlu0 %2421 }
 0x5df   : > { %v1681_v19 = vmul.f32 1.442695, %v1651_v31  ;;  %v1729_v12 = vmul.f32 1.442695, %v1699_v9  ;;  %v1777_v41 = vmul.f32 1.442695, %v1747_v23  ;;  %v2065_v3 = vmul.f32 %v10366_v62, %v10327_v40 }
 0x5e0   : > { %v1825_v55 = vmul.f32 1.442695, %v1795_v13  ;;  %v1965_v29 = vmul.f32 %v1949_v0, %v10468_v52  ;;  %v2077_v33 = vmul.f32 %v2061_v42, %v10468_v52  ;;  %15811 = vst [vmem:[#allocation91_spill] sm:$0xff] %v10496_v53  ;;  %v1967_v13 = vmul.f32 %v1951_v36, %v10496_v53 }
 0x5e1   : > { %8004 = vpow2.f32 %v1681_v19  ;;  %v1953_v0 = vmul.f32 %v10366_v62, %v10321_v63  ;;  %v2081_v30 = vmul.f32 %v2065_v3, %v10524_v44  ;;  %v10554_v40 = vadd.f32 %v10222_v18, %v10215_v26 }
 0x5e2   : > { %8006 = vpow2.f32 %v1729_v12  ;;  %2019 = vrot.lane.b32.xlu1 %v1972_v43, %s8864_s12  ;;  %2225 = vrot.lane.b32.xlu0 %v2187_v15, %s8866_s1  ;;  %v15813_v12 = vld [vmem:[#allocation26_spill] sm:$0xff]  ;;  %v2079_v15 = vmul.f32 %v2063_v38, %v10496_v53  ;;  %v15814_v43 = vld [vmem:[#allocation28_spill] sm:$0xff]  ;;  %v2430_v26 = vpop.permute.xlu0 %2429 }
 0x5e3   : > { %8008 = vpow2.f32 %v1777_v41  ;;  %v2175_v41 = vmul.f32 %v10217_v24, %v10211_v20  ;;  %v1969_v24 = vmul.f32 %v1953_v0, %v10524_v44  ;;  %15821 = vst [vmem:[#allocation108_spill] sm:$0xff] %v10554_v40  ;;  %v15830_v0 = vld [vmem:[#allocation29_spill] sm:$0xff] }
 0x5e4   : > { %8010 = vpow2.f32 %v1825_v55  ;;  %v15817_v55 = vld [vmem:[#allocation30_spill] sm:$0xff] }
 0x5e5   : > { %v2191_v27 = vmul.f32 %v2175_v41, %v10496_v53  ;;  %v15828_v41 = vld [vmem:[#allocation27_spill] sm:$0xff] }
 0x5e6   : > { %2131 = vrot.lane.b32.xlu1 %v2084_v48, %s8865_s10  ;;  %2005 = vrot.lane.b32.xlu0 %v1965_v29, %s8864_s12  ;;  %v15818_v48 = vld [vmem:[#allocation32_spill] sm:$0xff] }
 0x5ea   : > { %2243 = vrot.lane.b32.xlu1 %v2196_v10, %s8866_s1  ;;  %2117 = vrot.lane.b32.xlu0 %v2077_v33, %s8865_s10  ;;  %v2177_v10 = vmul.f32 %v10366_v62, %v10331_v56  ;;  %v15820_v33 = vld [vmem:[#allocation35_spill] sm:$0xff] }
 0x5eb   : > { %v8005_v51 = vpop.eup %8004 }
 0x5ec   : > { %v8007_v45 = vpop.eup %8006  ;;  %v10498_v34 = vpop.xlane.xlu1 %2345  ;;  %v2193_v8 = vmul.f32 %v2177_v10, %v10524_v44 }
 0x5ed   : > { %v1843_v5 = vadd.f32 %v8007_v45, %v8005_v51  ;;  %v8009_v39 = vpop.eup %8008 }
 0x5ee   : > { %2431 = vrot.lane.b32.xlu1 %v15812_v1, %s8864_s12  ;;  %2229 = vrot.lane.b32.xlu0 %v2189_v60, %s8866_s1  ;;  %v8011_v9 = vpop.eup %8010 }
 0x5ef   : > { %v1859_v31 = vadd.f32 %v8009_v39, %v1843_v5 }
 0x5f0   : > { %v10506_v23 = vpop.xlane.xlu1 %2357 }
 0x5f1   : > { %v1875_v19 = vadd.f32 %v8011_v9, %v1859_v31 }
 0x5f2   : > { %2435 = vrot.lane.b32.xlu1 %v15813_v12, %s8864_s12  ;;  %2009 = vrot.lane.b32.xlu0 %v1967_v13, %s8864_s12 }
 0x5f3   : > { %8012 = vrcp.f32 %v1875_v19  ;;  %v15826_v19 = vld [vmem:[#allocation25_spill] sm:$0xff] }
 0x5f4   : > { %v10514_v21 = vpop.xlane.xlu1 %2363 }
 0x5f6   : > { %2439 = vrot.lane.b32.xlu1 %v15814_v43, %s8864_s12  ;;  %2121 = vrot.lane.b32.xlu0 %v2079_v15, %s8865_s10 }
 0x5f8   : > { %v10526_v6 = vpop.xlane.xlu1 %2369 }
 0x5fa   : > { %2443 = vrot.lane.b32.xlu1 %v15817_v55, %s8864_s12  ;;  %2233 = vrot.lane.b32.xlu0 %v2191_v27, %s8866_s1 }
 0x5fc   : > { %v10534_v20 = vpop.xlane.xlu1 %2375 }
 0x5fd   : > { %v8013_v42 = vpop.eup %8012 }
 0x5fe   : > { %2447 = vrot.lane.b32.xlu1 %v15818_v48, %s8864_s12  ;;  %2013 = vrot.lane.b32.xlu0 %v1969_v24, %s8864_s12  ;;  %v10542_v29 = vmul.f32 %v8013_v42, %v8005_v51  ;;  %v1955_v35 = vmul.f32 %v8013_v42, %v8007_v45  ;;  %v2067_v56 = vmul.f32 %v8013_v42, %v8009_v39 }
 0x5ff   : > { %v2179_v5 = vmul.f32 %v8013_v42, %v8011_v9  ;;  %v15832_v42 = vld [vmem:[#allocation31_spill] sm:$0xff] }
 0x600   : > { %15819 = vst [vmem:[#allocation62_spill] sm:$0xff] %v10542_v29  ;;  %v10544_v63 = vpop.xlane.xlu1 %2381  ;;  %v1971_v60 = vmul.f32 %v1955_v35, %v10554_v40  ;;  %v2083_v36 = vmul.f32 %v2067_v56, %v10554_v40  ;;  %v15834_v35 = vld [vmem:[#allocation33_spill] sm:$0xff] }
 0x601   : > { %v2195_v45 = vmul.f32 %v2179_v5, %v10554_v40 }
 0x602   : > { %2451 = vrot.lane.b32.xlu1 %v15820_v33, %s8864_s12  ;;  %2125 = vrot.lane.b32.xlu0 %v2081_v30, %s8865_s10  ;;  %v2472_v30 = vsel %vm1124_vm0, %v10455_v28, 0.0 }
 0x606   : > { %v10557_v51 = vpop.xlane.xlu1 %2387  ;;  %2237 = vrot.lane.b32.xlu0 %v2193_v8, %s8866_s1 }
 0x60a   : > { %v10561_v62 = vpop.permute.xlu1 %1991  ;;  %2017 = vrot.lane.b32.xlu0 %v1971_v60, %s8864_s12 }
 0x60b   : > { %15822 = vst [vmem:[#allocation109_spill] sm:$0xff] %v10561_v62 }
 0x60e   : > { %v10565_v18 = vpop.permute.xlu1 %2103  ;;  %2129 = vrot.lane.b32.xlu0 %v2083_v36, %s8865_s10 }
 0x60f   : > { %15823 = vst [vmem:[#allocation101_spill] sm:$0xff] %v10565_v18  ;;  %v15889_v18 = vld [vmem:[#allocation110_spill] sm:$0xff] }
 0x611   : > { %v10569_v31 = vpop.xlane.xlu0 %2342 }
 0x612   : > { %v10571_v13 = vpop.permute.xlu1 %2215  ;;  %2241 = vrot.lane.b32.xlu0 %v2195_v45, %s8866_s1 }
 0x613   : > { %15824 = vst [vmem:[#allocation56_spill] sm:$0xff] %v10571_v13 }
 0x615   : > { %v10574_v39 = vpop.xlane.xlu0 %2351 }
 0x616   : > { %v10576_v38 = vpop.permute.xlu1 %1995  ;;  %2433 = vrot.lane.b32.xlu0 %v15826_v19, %s8864_s12 }
 0x617   : > { %15825 = vst [vmem:[#allocation121_spill] sm:$0xff] %v10576_v38  ;;  %v15888_v38 = vld [vmem:[#allocation99_spill] sm:$0xff] }
 0x619   : > { %v10580_v9 = vpop.xlane.xlu0 %2348 }
 0x61a   : > { %v10582_v15 = vpop.permute.xlu1 %2107  ;;  %2437 = vrot.lane.b32.xlu0 %v15828_v41, %s8864_s12 }
 0x61b   : > { %15827 = vst [vmem:[#allocation118_spill] sm:$0xff] %v10582_v15 }
 0x61d   : > { %v10586_v50 = vpop.xlane.xlu0 %2354 }
 0x61e   : > { %v10588_v27 = vpop.permute.xlu1 %2219  ;;  %2441 = vrot.lane.b32.xlu0 %v15830_v0, %s8864_s12 }
 0x61f   : > { %15829 = vst [vmem:[#allocation119_spill] sm:$0xff] %v10588_v27 }
 0x621   : > { %v10592_v24 = vpop.xlane.xlu0 %2360 }
 0x622   : > { %v10594_v3 = vpop.permute.xlu1 %1993  ;;  %2445 = vrot.lane.b32.xlu0 %v15832_v42, %s8864_s12 }
 0x623   : > { %15831 = vst [vmem:[#allocation112_spill] sm:$0xff] %v10594_v3 }
 0x625   : > { %v10600_v10 = vpop.xlane.xlu0 %2366 }
 0x626   : > { %2473 = vadd.xlane.f32.xlu1 %v2472_v30  ;;  %v10602_v8 = vpop.permute.xlu1 %1999  ;;  %2449 = vrot.lane.b32.xlu0 %v15834_v35, %s8864_s12 }
 0x627   : > { %15833 = vst [vmem:[#allocation120_spill] sm:$0xff] %v10602_v8 }
 0x629   : > { %v10606_v60 = vpop.xlane.xlu0 %2372 }
 0x62a   : > { %v10608_v56 = vpop.permute.xlu1 %2111 }
 0x62b   : > { %15835 = vst [vmem:[#allocation123_spill] sm:$0xff] %v10608_v56 }
 0x62d   : > { %v10610_v36 = vpop.xlane.xlu0 %2378 }
 0x62e   : > { %v10612_v5 = vpop.permute.xlu1 %2223 }
 0x62f   : > { %15836 = vst [vmem:[#allocation124_spill] sm:$0xff] %v10612_v5  ;;  %v2469_v5 = vsel %vm1124_vm0, %v2422_v11, 0.0 }
 0x631   : > { %v10614_v45 = vpop.xlane.xlu0 %2384 }
 0x632   : > { %v10616_v29 = vpop.permute.xlu1 %2003 }
 0x633   : > { %15837 = vst [vmem:[#allocation125_spill] sm:$0xff] %v10616_v29 }
 0x635   : > { %v10618_v28 = vpop.permute.xlu0 %1989 }
 0x636   : > { %15838 = vst [vmem:[#allocation126_spill] sm:$0xff] %v10618_v28  ;;  %v10620_v30 = vpop.permute.xlu1 %2115 }
 0x637   : > { %15839 = vst [vmem:[#allocation127_spill] sm:$0xff] %v10620_v30  ;;  %v2475_v30 = vsel %vm1124_vm0, %v10475_v32, 0.0 }
 0x639   : > { %v10622_v54 = vpop.permute.xlu0 %2101 }
 0x63a   : > { %15840 = vst [vmem:[#allocation128_spill] sm:$0xff] %v10622_v54  ;;  %v10624_v57 = vpop.permute.xlu1 %2227 }
 0x63b   : > { %15841 = vst [vmem:[#allocation129_spill] sm:$0xff] %v10624_v57 }
 0x63d   : > { %v10626_v22 = vpop.permute.xlu0 %2213 }
 0x63e   : > { %15842 = vst [vmem:[#allocation130_spill] sm:$0xff] %v10626_v22  ;;  %v10628_v58 = vpop.permute.xlu1 %2007 }
 0x63f   : > { %15843 = vst [vmem:[#allocation131_spill] sm:$0xff] %v10628_v58  ;;  %v2478_v58 = vsel %vm1124_vm0, %v10486_v7, 0.0 }
 0x641   : > { %v10630_v27 = vpop.permute.xlu0 %2105 }
 0x642   : > { %15844 = vst [vmem:[#allocation132_spill] sm:$0xff] %v10630_v27  ;;  %v10632_v56 = vpop.permute.xlu1 %2119  ;;  %v15890_v27 = vld [vmem:[#allocation57_spill] sm:$0xff] }
 0x643   : > { %15845 = vst [vmem:[#allocation133_spill] sm:$0xff] %v10632_v56 }
 0x645   : > { %2470 = vadd.xlane.f32.xlu0 %v2469_v5  ;;  %v10635_v29 = vpop.permute.xlu0 %2217  ;;  %v2481_v5 = vsel %vm1124_vm0, %v2430_v26, 0.0 }
 0x646   : > { %15846 = vst [vmem:[#allocation134_spill] sm:$0xff] %v10635_v29  ;;  %v10637_v15 = vpop.permute.xlu1 %2231  ;;  %v15887_v29 = vld [vmem:[#allocation89_spill] sm:$0xff] }
 0x647   : > { %15847 = vst [vmem:[#allocation135_spill] sm:$0xff] %v10637_v15 }
 0x649   : > { %2476 = vadd.xlane.f32.xlu0 %v2475_v30  ;;  %v10641_v57 = vpop.permute.xlu0 %1997 }
 0x64a   : > { %15848 = vst [vmem:[#allocation136_spill] sm:$0xff] %v10641_v57  ;;  %v10643_v8 = vpop.permute.xlu1 %2011 }
 0x64b   : > { %15849 = vst [vmem:[#allocation137_spill] sm:$0xff] %v10643_v8 }
 0x64d   : > { %2479 = vadd.xlane.f32.xlu0 %v2478_v58  ;;  %v10647_v56 = vpop.permute.xlu0 %2109 }
 0x64e   : > { %15850 = vst [vmem:[#allocation138_spill] sm:$0xff] %v10647_v56  ;;  %v10649_v11 = vpop.permute.xlu1 %2123  ;;  %v15882_v56 = vld [vmem:[#allocation103_spill] sm:$0xff] }
 0x64f   : > { %15851 = vst [vmem:[#allocation139_spill] sm:$0xff] %v10649_v11 }
 0x651   : > { %2482 = vadd.xlane.f32.xlu0 %v2481_v5  ;;  %v10652_v15 = vpop.permute.xlu0 %2221 }
 0x652   : > { %15852 = vst [vmem:[#allocation140_spill] sm:$0xff] %v10652_v15  ;;  %v10654_v13 = vpop.permute.xlu1 %2235 }
 0x653   : > { %15853 = vst [vmem:[#allocation141_spill] sm:$0xff] %v10654_v13 }
 0x655   : > { %v10656_v32 = vpop.permute.xlu0 %2001 }
 0x656   : > { %15854 = vst [vmem:[#allocation142_spill] sm:$0xff] %v10656_v32  ;;  %v10658_v30 = vpop.permute.xlu1 %2015 }
 0x657   : > { %15855 = vst [vmem:[#allocation143_spill] sm:$0xff] %v10658_v30 }
 0x659   : > { %v10660_v8 = vpop.permute.xlu0 %2113 }
 0x65a   : > { %15856 = vst [vmem:[#allocation144_spill] sm:$0xff] %v10660_v8  ;;  %v10662_v57 = vpop.permute.xlu1 %2127 }
 0x65b   : > { %15857 = vst [vmem:[#allocation145_spill] sm:$0xff] %v10662_v57 }
 0x65d   : > { %v10664_v58 = vpop.permute.xlu0 %2225 }
 0x65e   : > { %15858 = vst [vmem:[#allocation146_spill] sm:$0xff] %v10664_v58  ;;  %v10666_v7 = vpop.permute.xlu1 %2239 }
 0x65f   : > { %15859 = vst [vmem:[#allocation147_spill] sm:$0xff] %v10666_v7 }
 0x661   : > { %v10668_v11 = vpop.permute.xlu0 %2005 }
 0x662   : > { %15860 = vst [vmem:[#allocation148_spill] sm:$0xff] %v10668_v11  ;;  %v10670_v26 = vpop.permute.xlu1 %2019 }
 0x663   : > { %15861 = vst [vmem:[#allocation149_spill] sm:$0xff] %v10670_v26 }
 0x665   : > { %v10672_v5 = vpop.permute.xlu0 %2117 }
 0x666   : > { %15862 = vst [vmem:[#allocation150_spill] sm:$0xff] %v10672_v5  ;;  %v10674_v15 = vpop.permute.xlu1 %2131 }
 0x667   : > { %15863 = vst [vmem:[#allocation151_spill] sm:$0xff] %v10674_v15 }
 0x669   : > { %v10676_v13 = vpop.permute.xlu0 %2229 }
 0x66a   : > { %15864 = vst [vmem:[#allocation152_spill] sm:$0xff] %v10676_v13  ;;  %v10678_v32 = vpop.permute.xlu1 %2243 }
 0x66b   : > { %15865 = vst [vmem:[#allocation153_spill] sm:$0xff] %v10678_v32 }
 0x66d   : > { %v10680_v30 = vpop.permute.xlu0 %2009 }
 0x66e   : > { %15866 = vst [vmem:[#allocation154_spill] sm:$0xff] %v10680_v30  ;;  %v2432_v8 = vpop.permute.xlu1 %2431 }
 0x66f   : > { %v2484_v57 = vsel %vm1124_vm0, %v2432_v8, 0.0 }
 0x670   : > { %2485 = vadd.xlane.f32.xlu1 %v2484_v57 }
 0x671   : > { %v10683_v58 = vpop.permute.xlu0 %2121 }
 0x672   : > { %15867 = vst [vmem:[#allocation155_spill] sm:$0xff] %v10683_v58  ;;  %v2436_v7 = vpop.permute.xlu1 %2435 }
 0x673   : > { %v2490_v11 = vsel %vm1124_vm0, %v2436_v7, 0.0 }
 0x674   : > { %2491 = vadd.xlane.f32.xlu1 %v2490_v11 }
 0x675   : > { %v10686_v26 = vpop.permute.xlu0 %2233 }
 0x676   : > { %15868 = vst [vmem:[#allocation156_spill] sm:$0xff] %v10686_v26  ;;  %v2440_v5 = vpop.permute.xlu1 %2439 }
 0x677   : > { %v2496_v15 = vsel %vm1124_vm0, %v2440_v5, 0.0 }
 0x678   : > { %2497 = vadd.xlane.f32.xlu1 %v2496_v15 }
 0x679   : > { %v10689_v13 = vpop.permute.xlu0 %2013 }
 0x67a   : > { %15869 = vst [vmem:[#allocation157_spill] sm:$0xff] %v10689_v13  ;;  %v2444_v32 = vpop.permute.xlu1 %2443 }
 0x67b   : > { %v2502_v30 = vsel %vm1124_vm0, %v2444_v32, 0.0 }
 0x67c   : > { %2503 = vadd.xlane.f32.xlu1 %v2502_v30 }
 0x67d   : > { %v10692_v8 = vpop.permute.xlu0 %2125 }
 0x67e   : > { %15870 = vst [vmem:[#allocation158_spill] sm:$0xff] %v10692_v8  ;;  %v2448_v57 = vpop.permute.xlu1 %2447  ;;  %v15875_v8 = vld [vmem:[#allocation42_spill] sm:$0xff] }
 0x67f   : > { %v2508_v58 = vsel %vm1124_vm0, %v2448_v57, 0.0 }
 0x680   : > { %2509 = vadd.xlane.f32.xlu1 %v2508_v58 }
 0x681   : > { %v10695_v7 = vpop.permute.xlu0 %2237 }
 0x682   : > { %15871 = vst [vmem:[#allocation159_spill] sm:$0xff] %v10695_v7  ;;  %v2452_v11 = vpop.permute.xlu1 %2451 }
 0x683   : > { %v2514_v26 = vsel %vm1124_vm0, %v2452_v11, 0.0  ;;  %v15876_v11 = vld [vmem:[#allocation48_spill] sm:$0xff] }
 0x684   : > { %2515 = vadd.xlane.f32.xlu1 %v2514_v26 }
 0x685   : > { %v10698_v5 = vpop.permute.xlu0 %2017 }
 0x686   : > { %15872 = vst [vmem:[#allocation160_spill] sm:$0xff] %v10698_v5 }
 0x689   : > { %v10700_v15 = vpop.permute.xlu0 %2129 }
 0x68a   : > { %15873 = vst [vmem:[#allocation161_spill] sm:$0xff] %v10700_v15 }
 0x68d   : > { %v10702_v13 = vpop.permute.xlu0 %2241 }
 0x68e   : > { %15874 = vst [vmem:[#allocation162_spill] sm:$0xff] %v10702_v13  ;;  %v15877_v13 = vld [vmem:[#allocation39_spill] sm:$0xff] }
 0x691   : > { %v2434_v32 = vpop.permute.xlu0 %2433 }
 0x692   : > { %v2487_v30 = vsel %vm1124_vm0, %v2434_v32, 0.0 }
 0x693   : > { %2488 = vadd.xlane.f32.xlu0 %v2487_v30  ;;  %v15878_v30 = vld [vmem:[#allocation52_spill] sm:$0xff] }
 0x695   : > { %2551 = vrot.lane.b32.xlu1 %v15875_v8, %s8864_s12  ;;  %v2438_v58 = vpop.permute.xlu0 %2437 }
 0x696   : > { %v2493_v57 = vsel %vm1124_vm0, %v2438_v58, 0.0 }
 0x697   : > { %2494 = vadd.xlane.f32.xlu0 %v2493_v57  ;;  %v15879_v57 = vld [vmem:[#allocation67_spill] sm:$0xff] }
 0x699   : > { %2553 = vrot.lane.b32.xlu1 %v15876_v11, %s8864_s12  ;;  %v2442_v26 = vpop.permute.xlu0 %2441 }
 0x69a   : > { %v2499_v5 = vsel %vm1124_vm0, %v2442_v26, 0.0  ;;  %v15880_v26 = vld [vmem:[#allocation82_spill] sm:$0xff] }
 0x69b   : > { %2500 = vadd.xlane.f32.xlu0 %v2499_v5  ;;  %v15881_v5 = vld [vmem:[#allocation93_spill] sm:$0xff] }
 0x69d   : > { %2555 = vrot.lane.b32.xlu1 %v15877_v13, %s8864_s12  ;;  %v2446_v15 = vpop.permute.xlu0 %2445 }
 0x69e   : > { %v2505_v32 = vsel %vm1124_vm0, %v2446_v15, 0.0  ;;  %v15883_v15 = vld [vmem:[#allocation115_spill] sm:$0xff] }
 0x69f   : > { %2506 = vadd.xlane.f32.xlu0 %v2505_v32  ;;  %v15884_v32 = vld [vmem:[#allocation37_spill] sm:$0xff] }
 0x6a1   : > { %2559 = vrot.lane.b32.xlu1 %v15878_v30, %s8864_s12  ;;  %v2450_v7 = vpop.permute.xlu0 %2449 }
 0x6a2   : > { %v2511_v58 = vsel %vm1124_vm0, %v2450_v7, 0.0  ;;  %v15885_v7 = vld [vmem:[#allocation61_spill] sm:$0xff] }
 0x6a3   : > { %2512 = vadd.xlane.f32.xlu0 %v2511_v58  ;;  %v15886_v58 = vld [vmem:[#allocation78_spill] sm:$0xff] }
 0x6a5   : > { %2563 = vrot.lane.b32.xlu1 %v15879_v57, %s8864_s12 }
 0x6a9   : > { %2567 = vrot.lane.b32.xlu1 %v15880_v26, %s8864_s12 }
 0x6ad   : > { %2571 = vrot.lane.b32.xlu1 %v15881_v5, %s8864_s12 }
 0x6b1   : > { %2575 = vrot.lane.b32.xlu1 %v15882_v56, %s8864_s12 }
 0x6b3   : > { %v10741_v62 = vpop.xlane.xlu1 %2473 }
 0x6b5   : > { %2579 = vrot.lane.b32.xlu1 %v15883_v15, %s8864_s12 }
 0x6b9   : > { %2549 = vrot.lane.b32.xlu0 %v15884_v32, %s8864_s12 }
 0x6bd   : > { %2557 = vrot.lane.b32.xlu0 %v15885_v7, %s8864_s12 }
 0x6c1   : > { %2561 = vrot.lane.b32.xlu0 %v15886_v58, %s8864_s12 }
 0x6c5   : > { %2565 = vrot.lane.b32.xlu0 %v15887_v29, %s8864_s12 }
 0x6c9   : > { %2569 = vrot.lane.b32.xlu0 %v15888_v38, %s8864_s12 }
 0x6cd   : > { %2573 = vrot.lane.b32.xlu0 %v15889_v18, %s8864_s12 }
 0x6d1   : > { %2577 = vrot.lane.b32.xlu0 %v15890_v27, %s8864_s12 }
 0x6d2   : > { %v10751_v15 = vpop.xlane.xlu0 %2470 }
 0x6d6   : > { %v10755_v35 = vpop.xlane.xlu0 %2476 }
 0x6da   : > { %v10759_v27 = vpop.xlane.xlu0 %2479 }
 0x6de   : > { %v10762_v5 = vpop.xlane.xlu0 %2482 }
 0x6fd   : > { %v10743_v22 = vpop.xlane.xlu1 %2485 }
 0x701   : > { %v10745_v3 = vpop.xlane.xlu1 %2491 }
 0x705   : > { %v10747_v54 = vpop.xlane.xlu1 %2497 }
 0x709   : > { %v10749_v28 = vpop.xlane.xlu1 %2503 }
 0x70d   : > { %v10753_v33 = vpop.xlane.xlu1 %2509 }
 0x711   : > { %v10757_v56 = vpop.xlane.xlu1 %2515 }
 0x715   : > { %v2552_v48 = vpop.permute.xlu1 %2551 }
 0x716   : > { %v2600_v18 = vsel %vm1124_vm0, %v2552_v48, 0.0 }
 0x717   : > { %2601 = vadd.xlane.f32.xlu1 %v2600_v18 }
 0x719   : > { %v2554_v42 = vpop.permute.xlu1 %2553 }
 0x71d   : > { %v2556_v55 = vpop.permute.xlu1 %2555 }
 0x720   : > { %v10764_v38 = vpop.xlane.xlu0 %2488 }
 0x721   : > { %v2560_v0 = vpop.permute.xlu1 %2559 }
 0x722   : > { %v2612_v26 = vsel %vm1124_vm0, %v2560_v0, 0.0 }
 0x723   : > { %2613 = vadd.xlane.f32.xlu1 %v2612_v26 }
 0x724   : > { %v10767_v43 = vpop.xlane.xlu0 %2494 }
 0x725   : > { %v2564_v29 = vpop.permute.xlu1 %2563 }
 0x726   : > { %v2618_v41 = vsel %vm1124_vm0, %v2564_v29, 0.0 }
 0x727   : > { %2619 = vadd.xlane.f32.xlu1 %v2618_v41 }
 0x728   : > { %v10770_v57 = vpop.xlane.xlu0 %2500 }
 0x729   : > { %v2568_v48 = vpop.permute.xlu1 %2567 }
 0x72a   : > { %v2624_v18 = vsel %vm1124_vm0, %v2568_v48, 0.0 }
 0x72b   : > { %2625 = vadd.xlane.f32.xlu1 %v2624_v18  ;;  %v2603_v18 = vsel %vm1124_vm0, %v2554_v42, 0.0 }
 0x72c   : > { %v10773_v12 = vpop.xlane.xlu0 %2506 }
 0x72d   : > { %v2572_v58 = vpop.permute.xlu1 %2571 }
 0x72e   : > { %v2630_v19 = vsel %vm1124_vm0, %v2572_v58, 0.0 }
 0x72f   : > { %2631 = vadd.xlane.f32.xlu1 %v2630_v19  ;;  %v2606_v19 = vsel %vm1124_vm0, %v2556_v55, 0.0 }
 0x730   : > { %v10776_v0 = vpop.xlane.xlu0 %2512 }
 0x731   : > { %v2576_v26 = vpop.permute.xlu1 %2575 }
 0x732   : > { %v2636_v30 = vsel %vm1124_vm0, %v2576_v26, 0.0 }
 0x733   : > { %2637 = vadd.xlane.f32.xlu1 %v2636_v30 }
 0x734   : > { %v2550_v29 = vpop.permute.xlu0 %2549 }
 0x735   : > { %v2580_v41 = vpop.permute.xlu1 %2579  ;;  %v2597_v1 = vsel %vm1124_vm0, %v2550_v29, 0.0  ;;  %v15891_v29 = vld [vmem:[#allocation43_spill] sm:$0xff] }
 0x736   : > { %v2642_v7 = vsel %vm1124_vm0, %v2580_v41, 0.0  ;;  %2598 = vadd.xlane.f32.xlu0 %v2597_v1  ;;  %v15893_v41 = vld [vmem:[#allocation40_spill] sm:$0xff] }
 0x737   : > { %2643 = vadd.xlane.f32.xlu1 %v2642_v7  ;;  %v15892_v7 = vld [vmem:[#allocation49_spill] sm:$0xff] }
 0x738   : > { %v2558_v48 = vpop.permute.xlu0 %2557 }
 0x739   : > { %v2609_v26 = vsel %vm1124_vm0, %v2558_v48, 0.0 }
 0x73a   : > { %2604 = vadd.xlane.f32.xlu0 %v2603_v18 }
 0x73c   : > { %v2562_v58 = vpop.permute.xlu0 %2561 }
 0x73d   : > { %v2615_v30 = vsel %vm1124_vm0, %v2562_v58, 0.0  ;;  %v15894_v58 = vld [vmem:[#allocation53_spill] sm:$0xff] }
 0x73e   : > { %2607 = vadd.xlane.f32.xlu0 %v2606_v19  ;;  %v15895_v19 = vld [vmem:[#allocation69_spill] sm:$0xff] }
 0x740   : > { %v2566_v13 = vpop.permute.xlu0 %2565 }
 0x741   : > { %v2621_v1 = vsel %vm1124_vm0, %v2566_v13, 0.0 }
 0x742   : > { %2610 = vadd.xlane.f32.xlu0 %v2609_v26  ;;  %v15896_v26 = vld [vmem:[#allocation84_spill] sm:$0xff] }
 0x744   : > { %v2570_v11 = vpop.permute.xlu0 %2569 }
 0x745   : > { %v2627_v55 = vsel %vm1124_vm0, %v2570_v11, 0.0  ;;  %v15897_v11 = vld [vmem:[#allocation94_spill] sm:$0xff] }
 0x746   : > { %2616 = vadd.xlane.f32.xlu0 %v2615_v30  ;;  %v15898_v30 = vld [vmem:[#allocation104_spill] sm:$0xff] }
 0x748   : > { %2679 = vrot.lane.b32.xlu1 %v15891_v29, %s8864_s12  ;;  %v2574_v42 = vpop.permute.xlu0 %2573 }
 0x749   : > { %v2633_v48 = vsel %vm1124_vm0, %v2574_v42, 0.0  ;;  %v15900_v42 = vld [vmem:[#allocation38_spill] sm:$0xff] }
 0x74a   : > { %2622 = vadd.xlane.f32.xlu0 %v2621_v1  ;;  %v15899_v1 = vld [vmem:[#allocation116_spill] sm:$0xff] }
 0x74c   : > { %2681 = vrot.lane.b32.xlu1 %v15892_v7, %s8864_s12  ;;  %v2578_v18 = vpop.permute.xlu0 %2577 }
 0x74d   : > { %v2639_v13 = vsel %vm1124_vm0, %v2578_v18, 0.0  ;;  %v15903_v18 = vld [vmem:[#allocation90_spill] sm:$0xff] }
 0x74e   : > { %2628 = vadd.xlane.f32.xlu0 %v2627_v55  ;;  %v15901_v55 = vld [vmem:[#allocation63_spill] sm:$0xff] }
 0x750   : > { %2683 = vrot.lane.b32.xlu1 %v15893_v41, %s8864_s12 }
 0x752   : > { %2634 = vadd.xlane.f32.xlu0 %v2633_v48  ;;  %v15902_v48 = vld [vmem:[#allocation79_spill] sm:$0xff] }
 0x754   : > { %2687 = vrot.lane.b32.xlu1 %v15894_v58, %s8864_s12 }
 0x756   : > { %2640 = vadd.xlane.f32.xlu0 %v2639_v13  ;;  %v15904_v13 = vld [vmem:[#allocation100_spill] sm:$0xff] }
 0x758   : > { %2691 = vrot.lane.b32.xlu1 %v15895_v19, %s8864_s12 }
 0x75c   : > { %2695 = vrot.lane.b32.xlu1 %v15896_v26, %s8864_s12 }
 0x760   : > { %2699 = vrot.lane.b32.xlu1 %v15897_v11, %s8864_s12 }
 0x764   : > { %2703 = vrot.lane.b32.xlu1 %v15898_v30, %s8864_s12  ;;  %v15905_v30 = vld [vmem:[#allocation111_spill] sm:$0xff] }
 0x768   : > { %2707 = vrot.lane.b32.xlu1 %v15899_v1, %s8864_s12  ;;  %v15906_v1 = vld [vmem:[#allocation59_spill] sm:$0xff] }
 0x76c   : > { %2677 = vrot.lane.b32.xlu0 %v15900_v42, %s8864_s12 }
 0x770   : > { %2685 = vrot.lane.b32.xlu0 %v15901_v55, %s8864_s12 }
 0x774   : > { %2689 = vrot.lane.b32.xlu0 %v15902_v48, %s8864_s12 }
 0x778   : > { %2693 = vrot.lane.b32.xlu0 %v15903_v18, %s8864_s12 }
 0x77c   : > { %2697 = vrot.lane.b32.xlu0 %v15904_v13, %s8864_s12 }
 0x780   : > { %2701 = vrot.lane.b32.xlu0 %v15905_v30, %s8864_s12 }
 0x784   : > { %2705 = vrot.lane.b32.xlu0 %v15906_v1, %s8864_s12 }
 0x7a4   : > { %v10821_v11 = vpop.xlane.xlu1 %2601 }
 0x7b0   : > { %v10823_v26 = vpop.xlane.xlu1 %2613 }
 0x7b4   : > { %v10825_v19 = vpop.xlane.xlu1 %2619 }
 0x7b8   : > { %v10827_v58 = vpop.xlane.xlu1 %2625 }
 0x7bc   : > { %v10829_v48 = vpop.xlane.xlu1 %2631 }
 0x7c0   : > { %v10831_v18 = vpop.xlane.xlu1 %2637 }
 0x7c3   : > { %v10833_v55 = vpop.xlane.xlu0 %2598 }
 0x7c4   : > { %v10835_v13 = vpop.xlane.xlu1 %2643 }
 0x7c7   : > { %v10837_v30 = vpop.xlane.xlu0 %2604 }
 0x7c8   : > { %v2680_v41 = vpop.permute.xlu1 %2679 }
 0x7c9   : > { %v2728_v1 = vsel %vm1124_vm0, %v2680_v41, 0.0 }
 0x7ca   : > { %2729 = vadd.xlane.f32.xlu1 %v2728_v1 }
 0x7cb   : > { %v10840_v7 = vpop.xlane.xlu0 %2607 }
 0x7cc   : > { %v2682_v32 = vpop.permute.xlu1 %2681 }
 0x7cf   : > { %v10842_v8 = vpop.xlane.xlu0 %2610 }
 0x7d0   : > { %v2684_v29 = vpop.permute.xlu1 %2683 }
 0x7d3   : > { %v10844_v42 = vpop.xlane.xlu0 %2616 }
 0x7d4   : > { %v2688_v40 = vpop.permute.xlu1 %2687 }
 0x7d5   : > { %v2740_v44 = vsel %vm1124_vm0, %v2688_v40, 0.0 }
 0x7d6   : > { %2741 = vadd.xlane.f32.xlu1 %v2740_v44 }
 0x7d7   : > { %v10847_v17 = vpop.xlane.xlu0 %2622 }
 0x7d8   : > { %v2692_v2 = vpop.permute.xlu1 %2691 }
 0x7d9   : > { %v2746_v53 = vsel %vm1124_vm0, %v2692_v2, 0.0 }
 0x7da   : > { %2747 = vadd.xlane.f32.xlu1 %v2746_v53 }
 0x7db   : > { %v10850_v41 = vpop.xlane.xlu0 %2628 }
 0x7dc   : > { %v2696_v1 = vpop.permute.xlu1 %2695 }
 0x7dd   : > { %v2752_v16 = vsel %vm1124_vm0, %v2696_v1, 0.0  ;;  %v2731_v1 = vsel %vm1124_vm0, %v2682_v32, 0.0 }
 0x7de   : > { %2753 = vadd.xlane.f32.xlu1 %v2752_v16 }
 0x7df   : > { %v10853_v52 = vpop.xlane.xlu0 %2634 }
 0x7e0   : > { %15907 = vst [vmem:[#allocation163_spill] sm:$0xff] %v10853_v52  ;;  %v2700_v61 = vpop.permute.xlu1 %2699 }
 0x7e1   : > { %v2758_v59 = vsel %vm1124_vm0, %v2700_v61, 0.0 }
 0x7e2   : > { %2759 = vadd.xlane.f32.xlu1 %v2758_v59  ;;  %v2734_v59 = vsel %vm1124_vm0, %v2684_v29, 0.0 }
 0x7e3   : > { %v10856_v40 = vpop.xlane.xlu0 %2640 }
 0x7e4   : > { %15908 = vst [vmem:[#allocation164_spill] sm:$0xff] %v10856_v40  ;;  %v2704_v44 = vpop.permute.xlu1 %2703 }
 0x7e5   : > { %v2764_v49 = vsel %vm1124_vm0, %v2704_v44, 0.0 }
 0x7e6   : > { %2765 = vadd.xlane.f32.xlu1 %v2764_v49 }
 0x7e7   : > { %v2678_v2 = vpop.permute.xlu0 %2677 }
 0x7e8   : > { %v2708_v53 = vpop.permute.xlu1 %2707  ;;  %v2725_v46 = vsel %vm1124_vm0, %v2678_v2, 0.0 }
 0x7e9   : > { %v2770_v25 = vsel %vm1124_vm0, %v2708_v53, 0.0  ;;  %2726 = vadd.xlane.f32.xlu0 %v2725_v46 }
 0x7ea   : > { %2771 = vadd.xlane.f32.xlu1 %v2770_v25 }
 0x7eb   : > { %v2686_v16 = vpop.permute.xlu0 %2685 }
 0x7ec   : > { %v2737_v44 = vsel %vm1124_vm0, %v2686_v16, 0.0  ;;  %v2518_v16 = vmul.f32 0.17677669, %v10741_v62  ;;  %v10885_v62 = vmul.f32 0.17677669, %v10544_v63 }
 0x7ed   : > { %2732 = vadd.xlane.f32.xlu0 %v2731_v1  ;;  %v2390_v1 = vmul.f32 0.17677669, %v10498_v34  ;;  %v10888_v34 = vmul.f32 0.17677669, %v10557_v51  ;;  %v10903_v63 = vmul.f32 0.17677669, %v10592_v24 }
 0x7ee   : > { %v10906_v51 = vmul.f32 0.17677669, %v10600_v10  ;;  %v10924_v10 = vmul.f32 0.17677669, %v10614_v45  ;;  %v10937_v45 = vmul.f32 0.17677669, %v10745_v3 }
 0x7ef   : > { %v2690_v61 = vpop.permute.xlu0 %2689  ;;  %v10953_v3 = vmul.f32 0.17677669, %v10757_v56 }
 0x7f0   : > { %v2743_v49 = vsel %vm1124_vm0, %v2690_v61, 0.0  ;;  %v2646_v61 = vmul.f32 0.17677669, %v10821_v11  ;;  %15909 = vst [vmem:[#allocation165_spill] sm:$0xff] %v10924_v10 }
 0x7f1   : > { %2735 = vadd.xlane.f32.xlu0 %v2734_v59  ;;  %v2790_v59 = vmax.f32 %v2390_v1, %v2518_v16 }
 0x7f3   : > { %v2694_v4 = vpop.permute.xlu0 %2693  ;;  %v2806_v11 = vmax.f32 %v2790_v59, %v2646_v61  ;;  %v2522_v59 = vmul.f32 0.17677669, %v10743_v22  ;;  %v2650_v22 = vmul.f32 0.17677669, %v10823_v26  ;;  %v10959_v26 = vmul.f32 0.17677669, %v10767_v43 }
 0x7f4   : > { %v2749_v2 = vsel %vm1124_vm0, %v2694_v4, 0.0  ;;  %v10873_v4 = vmul.f32 0.17677669, %v10506_v23 }
 0x7f5   : > { %2738 = vadd.xlane.f32.xlu0 %v2737_v44  ;;  %v10879_v44 = vmul.f32 0.17677669, %v10526_v6  ;;  %v10897_v6 = vmul.f32 0.17677669, %v10580_v9  ;;  %v10918_v9 = vmul.f32 0.17677669, %v10606_v60 }
 0x7f7   : > { %v2698_v14 = vpop.permute.xlu0 %2697 }
 0x7f8   : > { %v2755_v46 = vsel %vm1124_vm0, %v2698_v14, 0.0  ;;  %v10876_v14 = vmul.f32 0.17677669, %v10514_v21  ;;  %v10894_v21 = vmul.f32 0.17677669, %v10574_v39 }
 0x7f9   : > { %2744 = vadd.xlane.f32.xlu0 %v2743_v49  ;;  %v10882_v49 = vmul.f32 0.17677669, %v10534_v20  ;;  %v10900_v20 = vmul.f32 0.17677669, %v10586_v50  ;;  %v10915_v39 = vmul.f32 0.17677669, %v10759_v27 }
 0x7fb   : > { %v2702_v25 = vpop.permute.xlu0 %2701 }
 0x7fc   : > { %v2761_v32 = vsel %vm1124_vm0, %v2702_v25, 0.0  ;;  %v10891_v25 = vmul.f32 0.17677669, %v10569_v31  ;;  %v10912_v31 = vmul.f32 0.17677669, %v10755_v35 }
 0x7fd   : > { %2750 = vadd.xlane.f32.xlu0 %v2749_v2 }
 0x7ff   : > { %v2706_v53 = vpop.permute.xlu0 %2705 }
 0x800   : > { %v2767_v29 = vsel %vm1124_vm0, %v2706_v53, 0.0 }
 0x801   : > { %2756 = vadd.xlane.f32.xlu0 %v2755_v46 }
 0x805   : > { %2762 = vadd.xlane.f32.xlu0 %v2761_v32  ;;  %v10909_v32 = vmul.f32 0.17677669, %v10751_v15  ;;  %v10927_v15 = vmul.f32 0.17677669, %v10762_v5  ;;  %v10940_v5 = vmul.f32 0.17677669, %v10747_v54 }
 0x806   : > { %v10956_v54 = vmul.f32 0.17677669, %v10764_v38 }
 0x807   : > { %v2798_v56 = vmax.f32 %v10879_v44, %v10940_v5 }
 0x809   : > { %2768 = vadd.xlane.f32.xlu0 %v2767_v29  ;;  %v10921_v29 = vmul.f32 0.17677669, %v10610_v36 }
 0x857   : > { %v2730_v2 = vpop.xlane.xlu1 %2729 }
 0x858   : > { %v2774_v23 = vmul.f32 0.17677669, %v2730_v2 }
 0x85a   : > { %v2822_v46 = vmax.f32 %v2806_v11, %v2774_v23  ;;  %v10946_v11 = vmul.f32 0.17677669, %v10749_v28  ;;  %v10965_v28 = vmul.f32 0.17677669, %v10773_v12 }
 0x85c   : > { %v2838_v50 = vsub.f32 %v2390_v1, %v2822_v46  ;;  %v2886_v53 = vsub.f32 %v2518_v16, %v2822_v46  ;;  %v2934_v24 = vsub.f32 %v2646_v61, %v2822_v46  ;;  %v2982_v35 = vsub.f32 %v2774_v23, %v2822_v46  ;;  %15910 = vst [vmem:[#allocation166_spill] sm:$0xff] %v10965_v28 }
 0x85d   : > { %v2794_v46 = vmax.f32 %v10873_v4, %v2522_v59  ;;  %v2800_v43 = vmax.f32 %v10882_v49, %v10946_v11 }
 0x85e   : > { %v2855_v27 = vmul.f32 1.442695, %v2838_v50  ;;  %v2903_v2 = vmul.f32 1.442695, %v2886_v53  ;;  %v2951_v1 = vmul.f32 1.442695, %v2934_v24 }
 0x85f   : > { %v2999_v23 = vmul.f32 1.442695, %v2982_v35  ;;  %v10950_v50 = vmul.f32 0.17677669, %v10753_v33  ;;  %v10962_v53 = vmul.f32 0.17677669, %v10770_v57  ;;  %v2796_v33 = vmax.f32 %v10876_v14, %v10937_v45 }
 0x860   : > { %8014 = vpow2.f32 %v2855_v27  ;;  %v2810_v35 = vmax.f32 %v2794_v46, %v2650_v22  ;;  %v2652_v27 = vmul.f32 0.17677669, %v10825_v19  ;;  %v10975_v57 = vmul.f32 0.17677669, %v10827_v58 }
 0x861   : > { %8016 = vpow2.f32 %v2903_v2  ;;  %v2802_v12 = vmax.f32 %v10885_v62, %v10950_v50  ;;  %v2804_v2 = vmax.f32 %v10888_v34, %v10953_v3 }
 0x862   : > { %8018 = vpow2.f32 %v2951_v1  ;;  %v10982_v1 = vmul.f32 0.17677669, %v10829_v48  ;;  %v2812_v37 = vmax.f32 %v2796_v33, %v2652_v27 }
 0x863   : > { %v2742_v24 = vpop.xlane.xlu1 %2741  ;;  %8020 = vpow2.f32 %v2999_v23 }
 0x864   : > { %v2778_v38 = vmul.f32 0.17677669, %v2742_v24  ;;  %v2814_v24 = vmax.f32 %v2798_v56, %v10975_v57  ;;  %v2816_v58 = vmax.f32 %v2800_v43, %v10982_v1 }
 0x866   : > { %v2826_v46 = vmax.f32 %v2810_v35, %v2778_v38  ;;  %v10994_v35 = vmul.f32 0.17677669, %v10776_v0 }
 0x867   : > { %v2748_v61 = vpop.xlane.xlu1 %2747 }
 0x868   : > { %v2842_v36 = vsub.f32 %v10873_v4, %v2826_v46  ;;  %v2890_v16 = vsub.f32 %v2522_v59, %v2826_v46  ;;  %v2938_v60 = vsub.f32 %v2650_v22, %v2826_v46  ;;  %v2986_v48 = vsub.f32 %v2778_v38, %v2826_v46 }
 0x869   : > { %v2780_v40 = vmul.f32 0.17677669, %v2748_v61  ;;  %v11003_v4 = vmul.f32 0.17677669, %v10831_v18  ;;  %v11006_v59 = vmul.f32 0.17677669, %v10833_v55 }
 0x86a   : > { %v10997_v19 = vpop.eup %8014  ;;  %v2863_v10 = vmul.f32 1.442695, %v2842_v36  ;;  %v2911_v52 = vmul.f32 1.442695, %v2890_v16  ;;  %v2959_v23 = vmul.f32 1.442695, %v2938_v60 }
 0x86b   : > { %15911 = vst [vmem:[#allocation167_spill] sm:$0xff] %v10997_v19  ;;  %v11000_v28 = vpop.eup %8016  ;;  %v3007_v0 = vmul.f32 1.442695, %v2986_v48  ;;  %v2828_v22 = vmax.f32 %v2812_v37, %v2780_v40  ;;  %v2754_v33 = vpop.xlane.xlu1 %2753  ;;  %v11009_v61 = vmul.f32 0.17677669, %v10835_v13 }
 0x86c   : > { %v3030_v56 = vadd.f32 %v11000_v28, %v10997_v19  ;;  %8022 = vpow2.f32 %v2863_v10  ;;  %v2782_v16 = vmul.f32 0.17677669, %v2754_v33  ;;  %v11013_v60 = vpop.eup %8018 }
 0x86d   : > { %8024 = vpow2.f32 %v2911_v52  ;;  %v2844_v18 = vsub.f32 %v10876_v14, %v2828_v22  ;;  %v2892_v36 = vsub.f32 %v10937_v45, %v2828_v22  ;;  %v2940_v55 = vsub.f32 %v2652_v27, %v2828_v22  ;;  %v11018_v13 = vpop.eup %8020 }
 0x86e   : > { %v3046_v38 = vadd.f32 %v11013_v60, %v3030_v56  ;;  %8026 = vpow2.f32 %v2959_v23  ;;  %v2988_v37 = vsub.f32 %v2780_v40, %v2828_v22  ;;  %v2830_v43 = vmax.f32 %v2814_v24, %v2782_v16  ;;  %15912 = vst [vmem:[#allocation168_spill] sm:$0xff] %v11018_v13 }
 0x86f   : > { %8028 = vpow2.f32 %v3007_v0  ;;  %v2867_v46 = vmul.f32 1.442695, %v2844_v18  ;;  %v2915_v48 = vmul.f32 1.442695, %v2892_v36  ;;  %v2963_v10 = vmul.f32 1.442695, %v2940_v55  ;;  %v2760_v33 = vpop.xlane.xlu1 %2759 }
 0x870   : > { %v3062_v19 = vadd.f32 %v11018_v13, %v3046_v38  ;;  %v3011_v52 = vmul.f32 1.442695, %v2988_v37  ;;  %v2846_v14 = vsub.f32 %v10879_v44, %v2830_v43  ;;  %v2894_v45 = vsub.f32 %v10940_v5, %v2830_v43 }
 0x871   : > { %8030 = vpow2.f32 %v2867_v46  ;;  %v2942_v27 = vsub.f32 %v10975_v57, %v2830_v43  ;;  %v2990_v23 = vsub.f32 %v2782_v16, %v2830_v43  ;;  %v2784_v40 = vmul.f32 0.17677669, %v2760_v33 }
 0x872   : > { %v2818_v24 = vmax.f32 %v2802_v12, %v11003_v4  ;;  %v15913_v0 = vmax.f32 %v10891_v25, %v10909_v32  ;;  %8032 = vrcp.f32 %v3062_v19  ;;  %v2871_v56 = vmul.f32 1.442695, %v2846_v14 }
 0x873   : > { %v2820_v18 = vmax.f32 %v2804_v2, %v11009_v61  ;;  %8034 = vpow2.f32 %v2915_v48  ;;  %v2919_v44 = vmul.f32 1.442695, %v2894_v45  ;;  %v2832_v5 = vmax.f32 %v2816_v58, %v2784_v40  ;;  %v2766_v36 = vpop.xlane.xlu1 %2765 }
 0x874   : > { %v11029_v22 = vmax.f32 %v15913_v0, %v11006_v59  ;;  %8036 = vpow2.f32 %v2963_v10  ;;  %v2967_v57 = vmul.f32 1.442695, %v2942_v27  ;;  %v3015_v16 = vmul.f32 1.442695, %v2990_v23 }
 0x875   : > { %v2786_v55 = vmul.f32 0.17677669, %v2766_v36  ;;  %8038 = vpow2.f32 %v3011_v52  ;;  %v2848_v12 = vsub.f32 %v10882_v49, %v2832_v5  ;;  %v2896_v38 = vsub.f32 %v10946_v11, %v2832_v5 }
 0x876   : > { %v2944_v37 = vsub.f32 %v10982_v1, %v2832_v5  ;;  %v11035_v43 = vpop.eup %8022  ;;  %v11038_v19 = vmul.f32 0.17677669, %v10837_v30  ;;  %8040 = vpow2.f32 %v2871_v56  ;;  %v2992_v2 = vsub.f32 %v2784_v40, %v2832_v5  ;;  %v2727_v46 = vpop.xlane.xlu0 %2726 }
 0x877   : > { %15914 = vst [vmem:[#allocation169_spill] sm:$0xff] %v11035_v43  ;;  %v2834_v58 = vmax.f32 %v2818_v24, %v2786_v55  ;;  %v11040_v48 = vpop.eup %8024  ;;  %v11043_v10 = vmul.f32 0.17677669, %v10840_v7  ;;  %8042 = vpow2.f32 %v2919_v44  ;;  %v2875_v49 = vmul.f32 1.442695, %v2848_v12  ;;  %v2772_v11 = vpop.xlane.xlu1 %2771 }
 0x878   : > { %v2923_v33 = vmul.f32 1.442695, %v2896_v38  ;;  %v11045_v52 = vpop.eup %8026  ;;  %v3034_v1 = vadd.f32 %v11040_v48, %v11035_v43  ;;  %8044 = vpow2.f32 %v2967_v57  ;;  %v2971_v30 = vmul.f32 1.442695, %v2944_v37 }
 0x879   : > { %15915 = vst [vmem:[#allocation170_spill] sm:$0xff] %v11045_v52  ;;  %v2850_v14 = vsub.f32 %v10885_v62, %v2834_v58  ;;  %v11050_v45 = vpop.eup %8028  ;;  %8046 = vpow2.f32 %v3015_v16  ;;  %v2898_v27 = vsub.f32 %v10950_v50, %v2834_v58  ;;  %v2946_v7 = vsub.f32 %v11003_v4, %v2834_v58 }
 0x87a   : > { %v2994_v23 = vsub.f32 %v2786_v55, %v2834_v58  ;;  %v3050_v40 = vadd.f32 %v11045_v52, %v3034_v1  ;;  %8048 = vpow2.f32 %v2875_v49  ;;  %v3019_v24 = vmul.f32 1.442695, %v2992_v2  ;;  %v2733_v56 = vpop.xlane.xlu0 %2732 }
 0x87b   : > { %v2788_v0 = vmul.f32 0.17677669, %v2772_v11  ;;  %v11055_v44 = vpop.eup %8030  ;;  %v15917_v62 = vmax.f32 %v10897_v6, %v10912_v31  ;;  %v15918_v50 = vmax.f32 %v10894_v21, %v10915_v39  ;;  %8050 = vpow2.f32 %v2923_v33 }
 0x87c   : > { %15916 = vst [vmem:[#allocation171_spill] sm:$0xff] %v11055_v44  ;;  %v2879_v4 = vmul.f32 1.442695, %v2850_v14  ;;  %v11067_v57 = vpop.eup %8032  ;;  %v2927_v16 = vmul.f32 1.442695, %v2898_v27  ;;  %v3066_v2 = vadd.f32 %v11050_v45, %v3050_v40  ;;  %8052 = vpow2.f32 %v2971_v30 }
 0x87d   : > { %v2807_v5 = vmax.f32 %v15917_v62, %v11038_v19  ;;  %v11065_v36 = vmax.f32 %v15918_v50, %v11043_v10  ;;  %15919 = vst [vmem:[#allocation172_spill] sm:$0xff] %v11067_v57  ;;  %v2975_v55 = vmul.f32 1.442695, %v2946_v7  ;;  %v2836_v12 = vmax.f32 %v2820_v18, %v2788_v0  ;;  %v11071_v37 = vpop.eup %8034 }
 0x87e   : > { %v11069_v38 = vmul.f32 0.17677669, %v2727_v46  ;;  %v3023_v58 = vmul.f32 1.442695, %v2994_v23  ;;  %v11076_v49 = vmul.f32 %v11067_v57, %v11013_v60  ;;  %v11078_v11 = vpop.eup %8036  ;;  %v3036_v33 = vadd.f32 %v11071_v37, %v11055_v44  ;;  %v2736_v1 = vpop.xlane.xlu0 %2735 }
 0x87f   : > { %15920 = vst [vmem:[#allocation173_spill] sm:$0xff] %v11078_v11  ;;  %8054 = vpow2.f32 %v3019_v24  ;;  %v2852_v18 = vsub.f32 %v10888_v34, %v2836_v12  ;;  %v2900_v46 = vsub.f32 %v10953_v3, %v2836_v12  ;;  %v11084_v14 = vpop.eup %8038  ;;  %v2948_v30 = vsub.f32 %v11009_v61, %v2836_v12 }
 0x880   : > { %8056 = vpow2.f32 %v2879_v4  ;;  %v2996_v27 = vsub.f32 %v2788_v0, %v2836_v12  ;;  %v2821_v60 = vmax.f32 %v11029_v22, %v11069_v38  ;;  %v11089_v7 = vpop.eup %8040  ;;  %v3052_v23 = vadd.f32 %v11078_v11, %v3036_v33 }
 0x881   : > { %15921 = vst [vmem:[#allocation174_spill] sm:$0xff] %v11089_v7  ;;  %8058 = vpow2.f32 %v2927_v16  ;;  %v2883_v40 = vmul.f32 1.442695, %v2852_v18  ;;  %v11092_v24 = vmul.f32 0.17677669, %v2733_v56  ;;  %v11094_v34 = vpop.eup %8042 }
 0x882   : > { %v11097_v3 = vmul.f32 0.17677669, %v10842_v8  ;;  %8060 = vrcp.f32 %v3066_v2  ;;  %v2931_v62 = vmul.f32 1.442695, %v2900_v46  ;;  %v2837_v61 = vsub.f32 %v10891_v25, %v2821_v60  ;;  %v11100_v0 = vpop.eup %8044  ;;  %v2739_v4 = vpop.xlane.xlu0 %2738 }
 0x883   : > { %15922 = vst [vmem:[#allocation175_spill] sm:$0xff] %v11100_v0  ;;  %v3068_v22 = vadd.f32 %v11084_v14, %v3052_v23  ;;  %v3038_v50 = vadd.f32 %v11094_v34, %v11089_v7  ;;  %8062 = vpow2.f32 %v2975_v55  ;;  %v2885_v56 = vsub.f32 %v10909_v32, %v2821_v60  ;;  %v11106_v16 = vpop.eup %8046 }
 0x884   : > { %v11109_v8 = vmul.f32 0.17677669, %v10844_v42  ;;  %8064 = vpow2.f32 %v3023_v58  ;;  %v2979_v12 = vmul.f32 1.442695, %v2948_v30  ;;  %v3027_v2 = vmul.f32 1.442695, %v2996_v27  ;;  %v11111_v25 = vpop.eup %8048 }
 0x885   : > { %15923 = vst [vmem:[#allocation176_spill] sm:$0xff] %v11111_v25  ;;  %v3054_v33 = vadd.f32 %v11100_v0, %v3038_v50  ;;  %8066 = vpow2.f32 %v2883_v40  ;;  %v2933_v18 = vsub.f32 %v11006_v59, %v2821_v60  ;;  %v2823_v55 = vmax.f32 %v2807_v5, %v11092_v24  ;;  %v11116_v46 = vpop.eup %8050 }
 0x886   : > { %8068 = vrcp.f32 %v3068_v22  ;;  %v2853_v32 = vmul.f32 1.442695, %v2837_v61  ;;  %v2981_v23 = vsub.f32 %v11069_v38, %v2821_v60  ;;  %v11119_v42 = vmul.f32 0.17677669, %v2736_v1  ;;  %v2745_v40 = vpop.xlane.xlu0 %2744  ;;  %v11124_v50 = vpop.eup %8052 }
 0x887   : > { %v3040_v58 = vadd.f32 %v11116_v46, %v11111_v25  ;;  %8070 = vpow2.f32 %v2931_v62  ;;  %v2901_v30 = vmul.f32 1.442695, %v2885_v56  ;;  %v2839_v27 = vsub.f32 %v10897_v6, %v2823_v55  ;;  %15924 = vst [vmem:[#allocation177_spill] sm:$0xff] %v11124_v50 }
 0x888   : > { %v3070_v59 = vadd.f32 %v11106_v16, %v3054_v33  ;;  %8072 = vpow2.f32 %v2979_v12  ;;  %v2887_v5 = vsub.f32 %v10912_v31, %v2823_v55  ;;  %v3142_v38 = vmul.f32 %v11067_v57, %v11000_v28 }
 0x889   : > { %v11130_v1 = vpop.eup %8054  ;;  %v3056_v60 = vadd.f32 %v11124_v50, %v3040_v58  ;;  %8074 = vpow2.f32 %v3027_v2  ;;  %v2949_v62 = vmul.f32 1.442695, %v2933_v18  ;;  %v2824_v6 = vmax.f32 %v11065_v36, %v11119_v42  ;;  %v15941_v50 = vld [vmem:[#allocation164_spill] sm:$0xff] }
 0x88a   : > { %v11135_v61 = vpop.eup %8056  ;;  %8076 = vpow2.f32 %v2853_v32  ;;  %v2997_v22 = vmul.f32 1.442695, %v2981_v23  ;;  %v2935_v56 = vsub.f32 %v11038_v19, %v2823_v55  ;;  %v2983_v31 = vsub.f32 %v11092_v24, %v2823_v55 }
 0x88b   : > { %v11139_v12 = vpop.eup %8058  ;;  %v15925_v28 = vmax.f32 %v10900_v20, %v10927_v15  ;;  %v15926_v2 = vmax.f32 %v10903_v63, %v10956_v54  ;;  %8078 = vpow2.f32 %v2901_v30  ;;  %v2857_v18 = vmul.f32 1.442695, %v2839_v27  ;;  %v2751_v30 = vpop.xlane.xlu0 %2750 }
 0x88c   : > { %v11149_v32 = vpop.eup %8060  ;;  %8080 = vrcp.f32 %v3070_v59  ;;  %v3042_v19 = vadd.f32 %v11139_v12, %v11135_v61  ;;  %v2905_v24 = vmul.f32 1.442695, %v2887_v5  ;;  %v2840_v55 = vsub.f32 %v10894_v21, %v2824_v6 }
 0x88d   : > { %v2809_v33 = vmax.f32 %v15925_v28, %v11097_v3  ;;  %v2811_v36 = vmax.f32 %v15926_v2, %v11109_v8  ;;  %15927 = vst [vmem:[#allocation178_spill] sm:$0xff] %v11149_v32  ;;  %v11154_v23 = vpop.eup %8062  ;;  %v3072_v58 = vadd.f32 %v11130_v1, %v3056_v60  ;;  %8082 = vpow2.f32 %v2949_v62 }
 0x88e   : > { %15928 = vst [vmem:[#allocation179_spill] sm:$0xff] %v11154_v23  ;;  %v2888_v28 = vsub.f32 %v10915_v39, %v2824_v6  ;;  %v3158_v2 = vmul.f32 %v3142_v38, %v10228_v47  ;;  %v11159_v27 = vpop.eup %8064  ;;  %v3058_v59 = vadd.f32 %v11154_v23, %v3042_v19  ;;  %8084 = vpow2.f32 %v2997_v22 }
 0x88f   : > { %v2953_v25 = vmul.f32 1.442695, %v2935_v56  ;;  %v3001_v7 = vmul.f32 1.442695, %v2983_v31  ;;  %v11162_v5 = vpop.eup %8066  ;;  %8086 = vpow2.f32 %v2857_v18  ;;  %v2936_v21 = vsub.f32 %v11043_v10, %v2824_v6 }
 0x890   : > { %3191 = vrot.lane.b32.xlu1 %v3158_v2, %s8864_s12  ;;  %v2777_v60 = vmul.f32 0.17677669, %v2739_v4  ;;  %v11166_v62 = vmul.f32 0.17677669, %v2745_v40  ;;  %v11168_v39 = vpop.eup %8068  ;;  %v11171_v38 = vmul.f32 0.17677669, %v10847_v17  ;;  %8088 = vpow2.f32 %v2905_v24 }
 0x891   : > { %15929 = vst [vmem:[#allocation180_spill] sm:$0xff] %v11168_v39  ;;  %v2859_v19 = vmul.f32 1.442695, %v2840_v55  ;;  %v2984_v22 = vsub.f32 %v11119_v42, %v2824_v6  ;;  %v11174_v56 = vpop.eup %8070  ;;  %8090 = vrcp.f32 %v3072_v58  ;;  %v2907_v31 = vmul.f32 1.442695, %v2888_v28 }
 0x892   : > { %v2825_v18 = vmax.f32 %v2809_v33, %v2777_v60  ;;  %v11177_v10 = vmax.f32 %v2811_v36, %v11166_v62  ;;  %v11179_v4 = vpop.eup %8072  ;;  %v11182_v40 = vmul.f32 0.17677669, %v10850_v41  ;;  %v3074_v17 = vadd.f32 %v11159_v27, %v3058_v59  ;;  %v2757_v36 = vpop.xlane.xlu0 %2756 }
 0x893   : > { %15930 = vst [vmem:[#allocation181_spill] sm:$0xff] %v11179_v4  ;;  %8092 = vpow2.f32 %v2953_v25  ;;  %v11185_v24 = vmul.f32 0.17677669, %v2751_v30  ;;  %v11187_v55 = vpop.eup %8074  ;;  %v2955_v42 = vmul.f32 1.442695, %v2936_v21  ;;  %v15931_v41 = vmax.f32 %v10906_v51, %v10959_v26 }
 0x894   : > { %8094 = vpow2.f32 %v3001_v7  ;;  %v2841_v6 = vsub.f32 %v10900_v20, %v2825_v18  ;;  %v2889_v33 = vsub.f32 %v10927_v15, %v2825_v18  ;;  %v11191_v58 = vpop.eup %8076  ;;  %v3003_v25 = vmul.f32 1.442695, %v2984_v22 }
 0x895   : > { %v2813_v28 = vmax.f32 %v15931_v41, %v11171_v38  ;;  %8096 = vpow2.f32 %v2859_v19  ;;  %v2937_v2 = vsub.f32 %v11097_v3, %v2825_v18  ;;  %v11198_v30 = vpop.eup %8078  ;;  %v2985_v59 = vsub.f32 %v2777_v60, %v2825_v18 }
 0x896   : > { %8098 = vpow2.f32 %v2907_v31  ;;  %v2861_v7 = vmul.f32 1.442695, %v2841_v6  ;;  %v2843_v20 = vsub.f32 %v10903_v63, %v11177_v10  ;;  %v11202_v15 = vpop.eup %8080  ;;  %v3029_v21 = vadd.f32 %v11198_v30, %v11191_v58 }
 0x897   : > { %15932 = vst [vmem:[#allocation182_spill] sm:$0xff] %v11202_v15  ;;  %8100 = vrcp.f32 %v3074_v17  ;;  %v2909_v44 = vmul.f32 1.442695, %v2889_v33  ;;  %v11207_v19 = vmax.f32 %v2813_v28, %v11185_v24  ;;  %v11209_v22 = vpop.eup %8082  ;;  %v15934_v3 = vmax.f32 %v10918_v9, %v10962_v53  ;;  %v15935_v28 = vld [vmem:[#allocation163_spill] sm:$0xff] }
 0x898   : > { %15933 = vst [vmem:[#allocation183_spill] sm:$0xff] %v11209_v22  ;;  %8102 = vpow2.f32 %v2955_v42  ;;  %v2957_v31 = vmul.f32 1.442695, %v2937_v2  ;;  %v2891_v63 = vsub.f32 %v10956_v54, %v11177_v10  ;;  %v11217_v18 = vpop.eup %8084  ;;  %v3045_v17 = vadd.f32 %v11209_v22, %v3029_v21 }
 0x899   : > { %v2815_v60 = vmax.f32 %v15934_v3, %v11182_v40  ;;  %8104 = vpow2.f32 %v3003_v25  ;;  %v2939_v6 = vsub.f32 %v11109_v8, %v11177_v10  ;;  %v11222_v33 = vmul.f32 0.17677669, %v2757_v36  ;;  %v11224_v41 = vpop.eup %8086  ;;  %v2763_v3 = vpop.xlane.xlu0 %2762 }
 0x89a   : > { %v11227_v43 = vmul.f32 0.17677669, %v15935_v28  ;;  %8106 = vpow2.f32 %v2861_v7  ;;  %v3005_v42 = vmul.f32 1.442695, %v2985_v59  ;;  %v2865_v2 = vmul.f32 1.442695, %v2843_v20  ;;  %v11229_v54 = vpop.eup %8088 }
 0x89b   : > { %v3061_v57 = vadd.f32 %v11217_v18, %v3045_v17  ;;  %8108 = vpow2.f32 %v2909_v44  ;;  %v2987_v25 = vsub.f32 %v11166_v62, %v11177_v10  ;;  %v2845_v8 = vsub.f32 %v10906_v51, %v11207_v19  ;;  %v11236_v36 = vpop.eup %8090  ;;  %v15938_v44 = vld [vmem:[#allocation165_spill] sm:$0xff]  ;;  %v15939_v28 = vld [vmem:[#allocation166_spill] sm:$0xff] }
 0x89c   : > { %15936 = vst [vmem:[#allocation163_spill] sm:$0xff] %v11236_v36  ;;  %v3031_v21 = vadd.f32 %v11229_v54, %v11224_v41  ;;  %8110 = vpow2.f32 %v2957_v31  ;;  %v2913_v7 = vmul.f32 1.442695, %v2891_v63  ;;  %v2893_v59 = vsub.f32 %v10959_v26, %v11207_v19 }
 0x89d   : > { %v11242_v20 = vpop.eup %8092  ;;  %v2803_v17 = vmax.f32 %v15938_v44, %v10994_v35  ;;  %8112 = vrcp.f32 %v3061_v57  ;;  %v2961_v62 = vmul.f32 1.442695, %v2939_v6  ;;  %v2831_v10 = vmax.f32 %v2815_v60, %v11222_v33 }
 0x89e   : > { %15937 = vst [vmem:[#allocation184_spill] sm:$0xff] %v11242_v20  ;;  %v11247_v51 = vpop.eup %8094  ;;  %v15940_v13 = vmax.f32 %v10921_v29, %v15939_v28  ;;  %v3047_v63 = vadd.f32 %v11242_v20, %v3031_v21  ;;  %8114 = vpow2.f32 %v3005_v42  ;;  %v2941_v26 = vsub.f32 %v11171_v38, %v11207_v19  ;;  %v2769_v21 = vpop.xlane.xlu0 %2768 }
 0x89f   : > { %v11256_v23 = vpop.eup %8096  ;;  %v11259_v57 = vmul.f32 0.17677669, %v15941_v50  ;;  %8116 = vpow2.f32 %v2865_v2  ;;  %v3009_v60 = vmul.f32 1.442695, %v2987_v25  ;;  %v2869_v6 = vmul.f32 1.442695, %v2845_v8 }
 0x8a0   : > { %v2817_v31 = vmax.f32 %v15940_v13, %v11227_v43  ;;  %v11261_v0 = vpop.eup %8098  ;;  %v3063_v11 = vadd.f32 %v11247_v51, %v3047_v63  ;;  %8118 = vpow2.f32 %v2913_v7  ;;  %v2917_v13 = vmul.f32 1.442695, %v2893_v59 }
 0x8a1   : > { %v2989_v42 = vsub.f32 %v11185_v24, %v11207_v19  ;;  %v11266_v20 = vpop.eup %8100  ;;  %v3032_v38 = vadd.f32 %v11261_v0, %v11256_v23  ;;  %8120 = vpow2.f32 %v2961_v62  ;;  %v2847_v50 = vsub.f32 %v10918_v9, %v2831_v10 }
 0x8a2   : > { %v2785_v2 = vmul.f32 0.17677669, %v2763_v3  ;;  %v11271_v25 = vpop.eup %8102  ;;  %8122 = vrcp.f32 %v3063_v11  ;;  %v2965_v8 = vmul.f32 1.442695, %v2941_v26  ;;  %v2895_v7 = vsub.f32 %v10962_v53, %v2831_v10 }
 0x8a3   : > { %v2943_v59 = vsub.f32 %v11182_v40, %v2831_v10  ;;  %v11275_v63 = vpop.eup %8104  ;;  %v3048_v24 = vadd.f32 %v11271_v25, %v3032_v38  ;;  %8124 = vpow2.f32 %v3009_v60  ;;  %v11278_v52 = vmul.f32 0.17677669, %v2769_v21 }
 0x8a4   : > { %v2833_v19 = vmax.f32 %v2817_v31, %v2785_v2  ;;  %v11280_v62 = vpop.eup %8106  ;;  %v2819_v9 = vmax.f32 %v2803_v17, %v11259_v57  ;;  %8126 = vpow2.f32 %v2869_v6  ;;  %v3013_v3 = vmul.f32 1.442695, %v2989_v42 }
 0x8a5   : > { %v11283_v11 = vpop.eup %8108  ;;  %v3064_v53 = vadd.f32 %v11275_v63, %v3048_v24  ;;  %8128 = vpow2.f32 %v2917_v13  ;;  %v2873_v40 = vmul.f32 1.442695, %v2847_v50  ;;  %v2991_v26 = vsub.f32 %v11222_v33, %v2831_v10 }
 0x8a6   : > { %v11287_v22 = vpop.eup %8110  ;;  %v3033_v31 = vadd.f32 %v11283_v11, %v11280_v62  ;;  %8130 = vpow2.f32 %v2965_v8  ;;  %v2921_v60 = vmul.f32 1.442695, %v2895_v7  ;;  %v2849_v21 = vsub.f32 %v10921_v29, %v2833_v19 }
 0x8a7   : > { %v11292_v17 = vpop.eup %8112  ;;  %8132 = vrcp.f32 %v3064_v53  ;;  %v2969_v6 = vmul.f32 1.442695, %v2943_v59  ;;  %v2897_v42 = vsub.f32 %v15939_v28, %v2833_v19  ;;  %v2835_v13 = vmax.f32 %v2819_v9, %v11278_v52 }
 0x8a8   : > { %v11296_v38 = vpop.eup %8114  ;;  %v3049_v33 = vadd.f32 %v11287_v22, %v3033_v31  ;;  %8134 = vpow2.f32 %v3013_v3  ;;  %v2945_v10 = vsub.f32 %v11227_v43, %v2833_v19  ;;  %v3044_v29 = vadd.f32 %v11174_v56, %v11162_v5  ;;  %v15943_v31 = vld [vmem:[#allocation70_spill] sm:$0xff] }
 0x8a9   : > { %v11300_v50 = vpop.eup %8116  ;;  %8136 = vpow2.f32 %v2873_v40  ;;  %v3017_v8 = vmul.f32 1.442695, %v2991_v26  ;;  %v2993_v7 = vsub.f32 %v2785_v2, %v2833_v19  ;;  %v2877_v24 = vmul.f32 1.442695, %v2849_v21 }
 0x8aa   : > { %v11304_v59 = vpop.eup %8118  ;;  %v3065_v28 = vadd.f32 %v11296_v38, %v3049_v33  ;;  %8138 = vpow2.f32 %v2921_v60  ;;  %v3141_v9 = vmul.f32 %v11292_v17, %v11198_v30  ;;  %v2925_v53 = vmul.f32 1.442695, %v2897_v42 }
 0x8ab   : > { %v11309_v3 = vpop.eup %8120  ;;  %v3035_v43 = vadd.f32 %v11304_v59, %v11300_v50  ;;  %8140 = vpow2.f32 %v2969_v6  ;;  %v2851_v40 = vsub.f32 %v15938_v44, %v2835_v13  ;;  %v2973_v2 = vmul.f32 1.442695, %v2945_v10 }
 0x8ac   : > { %15942 = vst [vmem:[#allocation165_spill] sm:$0xff] %v11309_v3  ;;  %v11314_v26 = vpop.eup %8122  ;;  %8142 = vrcp.f32 %v3065_v28  ;;  %v2899_v19 = vsub.f32 %v10994_v35, %v2835_v13  ;;  %v3157_v60 = vmul.f32 %v3141_v9, %v15943_v31  ;;  %v2947_v33 = vsub.f32 %v11259_v57, %v2835_v13  ;;  %v15944_v9 = vld [vmem:[#allocation55_spill] sm:$0xff] }
 0x8ad   : > { %v11318_v21 = vpop.eup %8124  ;;  %v3051_v30 = vadd.f32 %v11309_v3, %v3035_v43  ;;  %8144 = vpow2.f32 %v3017_v8  ;;  %v3143_v6 = vmul.f32 %v11314_v26, %v11229_v54  ;;  %v3021_v44 = vmul.f32 1.442695, %v2993_v7 }
 0x8ae   : > { %v11324_v42 = vpop.eup %8126  ;;  %8146 = vpow2.f32 %v2877_v24  ;;  %3189 = vrot.lane.b32.xlu0 %v3157_v60, %s8864_s12  ;;  %v2881_v28 = vmul.f32 1.442695, %v2851_v40  ;;  %v2929_v54 = vmul.f32 1.442695, %v2899_v19  ;;  %v2995_v24 = vsub.f32 %v11278_v52, %v2835_v13 }
 0x8af   : > { %v11327_v10 = vpop.eup %8128  ;;  %v3067_v35 = vadd.f32 %v11318_v21, %v3051_v30  ;;  %8148 = vpow2.f32 %v2925_v53  ;;  %v3159_v43 = vmul.f32 %v3143_v6, %v15944_v9  ;;  %v3060_v60 = vadd.f32 %v11179_v4, %v3044_v29 }
 0x8b0   : > { %v11331_v8 = vpop.eup %8130  ;;  %v3037_v57 = vadd.f32 %v11327_v10, %v11324_v42  ;;  %8150 = vpow2.f32 %v2973_v2  ;;  %v2977_v3 = vmul.f32 1.442695, %v2947_v33  ;;  %v3146_v52 = vmul.f32 %v11149_v32, %v11040_v48  ;;  %v15945_v33 = vld [vmem:[#allocation46_spill] sm:$0xff] }
 0x8b1   : > { %v11336_v7 = vpop.eup %8132  ;;  %8152 = vrcp.f32 %v3067_v35  ;;  %3193 = vrot.lane.b32.xlu1 %v3159_v43, %s8864_s12  ;;  %v3025_v19 = vmul.f32 1.442695, %v2995_v24  ;;  %v15946_v24 = vld [vmem:[#allocation64_spill] sm:$0xff] }
 0x8b2   : > { %v11340_v53 = vpop.eup %8134  ;;  %v3053_v40 = vadd.f32 %v11331_v8, %v3037_v57  ;;  %8154 = vpow2.f32 %v3021_v44  ;;  %v3144_v30 = vmul.f32 %v11336_v7, %v11261_v0  ;;  %v3076_v44 = vadd.f32 %v11187_v55, %v3060_v60 }
 0x8b3   : > { %v11345_v2 = vpop.eup %8136  ;;  %8156 = vpow2.f32 %v2881_v28  ;;  %v3162_v60 = vmul.f32 %v3146_v52, %v15946_v24  ;;  %v11388_v52 = vmul.f32 %v11336_v7, %v11275_v63  ;;  %v11407_v63 = vmul.f32 %v11168_v39, %v11084_v14 }
 0x8b4   : > { %v11349_v13 = vpop.eup %8138  ;;  %v3069_v29 = vadd.f32 %v11340_v53, %v3053_v40  ;;  %8158 = vpow2.f32 %v2929_v54  ;;  %v3160_v6 = vmul.f32 %v3144_v30, %v15945_v33 }
 0x8b5   : > { %v11353_v35 = vpop.eup %8140  ;;  %v3039_v0 = vadd.f32 %v11349_v13, %v11345_v2  ;;  %8160 = vpow2.f32 %v2977_v3  ;;  %v3148_v3 = vmul.f32 %v11168_v39, %v11071_v37  ;;  %v11384_v37 = vmul.f32 %v11292_v17, %v11217_v18  ;;  %15949 = vst [vmem:[#allocation164_spill] sm:$0xff] %v11388_v52 }
 0x8b6   : > { %v11358_v28 = vpop.eup %8142  ;;  %8162 = vrcp.f32 %v3069_v29  ;;  %3195 = vrot.lane.b32.xlu1 %v3160_v6, %s8864_s12  ;;  %v15947_v29 = vld [vmem:[#allocation76_spill] sm:$0xff] }
 0x8b7   : > { %v11361_v48 = vpop.eup %8144  ;;  %v3055_v43 = vadd.f32 %v11353_v35, %v3039_v0  ;;  %v3145_v57 = vmul.f32 %v11358_v28, %v11283_v11  ;;  %8164 = vpow2.f32 %v3025_v19  ;;  %v3150_v0 = vmul.f32 %v11202_v15, %v11094_v34  ;;  %15948 = vst [vmem:[#allocation166_spill] sm:$0xff] %v11384_v37 }
 0x8b8   : > { %v11366_v54 = vpop.eup %8146  ;;  %8166 = vrcp.f32 %v3076_v44  ;;  %v11392_v19 = vmul.f32 %v11314_v26, %v11247_v51  ;;  %v11399_v44 = vmul.f32 %v11149_v32, %v11050_v45  ;;  %v11403_v18 = vmul.f32 %v11358_v28, %v11296_v38 }
 0x8b9   : > { %v11371_v40 = vpop.eup %8148  ;;  %v3071_v30 = vadd.f32 %v11361_v48, %v3055_v43  ;;  %v3161_v6 = vmul.f32 %v3145_v57, %v15947_v29  ;;  %v15953_v57 = vld [vmem:[#allocation68_spill] sm:$0xff] }
 0x8ba   : > { %v11377_v4 = vpop.eup %8150  ;;  %v3041_v11 = vadd.f32 %v11371_v40, %v11366_v54  ;;  %3199 = vrot.lane.b32.xlu1 %v3162_v60, %s8864_s12  ;;  %15950 = vst [vmem:[#allocation185_spill] sm:$0xff] %v11392_v19  ;;  %15951 = vst [vmem:[#allocation186_spill] sm:$0xff] %v11399_v44  ;;  %v3164_v60 = vmul.f32 %v3148_v3, %v15953_v57  ;;  %v15954_v44 = vld [vmem:[#allocation74_spill] sm:$0xff] }
 0x8bb   : > { %v11394_v34 = vpop.eup %8152  ;;  %8168 = vrcp.f32 %v3071_v30  ;;  %3197 = vrot.lane.b32.xlu0 %v3161_v6, %s8864_s12  ;;  %15952 = vst [vmem:[#allocation187_spill] sm:$0xff] %v11403_v18  ;;  %v15955_v18 = vld [vmem:[#allocation83_spill] sm:$0xff] }
 0x8bc   : > { %v8155_v43 = vpop.eup %8154  ;;  %v3057_v51 = vadd.f32 %v11377_v4, %v3041_v11  ;;  %v3147_v30 = vmul.f32 %v11394_v34, %v11304_v59  ;;  %v3166_v37 = vmul.f32 %v3150_v0, %v15955_v18  ;;  %v3152_v11 = vmul.f32 %v11236_v36, %v11116_v46 }
 0x8bd   : > { %v8157_v6 = vpop.eup %8156  ;;  %v11422_v3 = vmul.f32 %v11394_v34, %v11318_v21  ;;  %v11426_v59 = vmul.f32 %v11202_v15, %v11106_v16  ;;  %v11433_v0 = vmul.f32 %v11236_v36, %v11130_v1  ;;  %v11437_v46 = vmul.f32 %v11266_v20, %v11159_v27 }
 0x8be   : > { %v8159_v19 = vpop.eup %8158  ;;  %v3073_v45 = vadd.f32 %v8155_v43, %v3057_v51  ;;  %3203 = vrot.lane.b32.xlu1 %v3164_v60, %s8864_s12  ;;  %v3163_v38 = vmul.f32 %v3147_v30, %v15954_v44  ;;  %v11441_v21 = vmul.f32 %v11292_v17, %v11191_v58 }
 0x8bf   : > { %v11416_v52 = vpop.eup %8160  ;;  %v3043_v14 = vadd.f32 %v8159_v19, %v8157_v6  ;;  %15956 = vst [vmem:[#allocation188_spill] sm:$0xff] %v11433_v0  ;;  %15957 = vst [vmem:[#allocation189_spill] sm:$0xff] %v11437_v46  ;;  %v15960_v0 = vld [vmem:[#allocation72_spill] sm:$0xff] }
 0x8c0   : > { %v11428_v51 = vpop.eup %8162  ;;  %8170 = vrcp.f32 %v3073_v45  ;;  %3201 = vrot.lane.b32.xlu0 %v3163_v38, %s8864_s12  ;;  %15958 = vst [vmem:[#allocation190_spill] sm:$0xff] %v11441_v21  ;;  %v15959_v38 = vld [vmem:[#allocation98_spill] sm:$0xff]  ;;  %v3168_v58 = vmul.f32 %v3152_v11, %v15960_v0 }
 0x8c1   : > { %v3059_v16 = vadd.f32 %v11416_v52, %v3043_v14  ;;  %v3149_v60 = vmul.f32 %v11428_v51, %v11327_v10  ;;  %v8165_v30 = vpop.eup %8164  ;;  %v11449_v1 = vmul.f32 %v11428_v51, %v11340_v53  ;;  %v3154_v14 = vmul.f32 %v11266_v20, %v11139_v12 }
 0x8c2   : > { %3207 = vrot.lane.b32.xlu1 %v3166_v37, %s8864_s12  ;;  %v11451_v45 = vpop.eup %8166  ;;  %v11459_v10 = vmul.f32 %v11314_v26, %v11224_v41  ;;  %v11463_v37 = vmul.f32 %v11336_v7, %v11256_v23  ;;  %v15964_v23 = vld [vmem:[#allocation91_spill] sm:$0xff] }
 0x8c3   : > { %v3075_v27 = vadd.f32 %v8165_v30, %v3059_v16  ;;  %v3165_v46 = vmul.f32 %v3149_v60, %v15959_v38  ;;  %v11470_v16 = vmul.f32 %v11358_v28, %v11280_v62  ;;  %v15965_v60 = vld [vmem:[#allocation73_spill] sm:$0xff]  ;;  %v11485_v62 = vmul.f32 %v11394_v34, %v11300_v50 }
 0x8c4   : > { %15961 = vst [vmem:[#allocation191_spill] sm:$0xff] %v11459_v10  ;;  %15962 = vst [vmem:[#allocation192_spill] sm:$0xff] %v11463_v37  ;;  %v3170_v37 = vmul.f32 %v3154_v14, %v15965_v60  ;;  %v11503_v50 = vmul.f32 %v11451_v45, %v11162_v5  ;;  %v15971_v14 = vld [vmem:[#allocation80_spill] sm:$0xff]  ;;  %v3270_v5 = vmul.f32 %v11076_v49, %v10228_v47  ;;  %v15979_v49 = vld [vmem:[#allocation170_spill] sm:$0xff] }
 0x8c5   : > { %v11465_v53 = vpop.eup %8168  ;;  %8172 = vrcp.f32 %v3075_v27  ;;  %3205 = vrot.lane.b32.xlu0 %v3165_v46, %s8864_s12  ;;  %15963 = vst [vmem:[#allocation193_spill] sm:$0xff] %v11470_v16  ;;  %v3156_v46 = vmul.f32 %v11451_v45, %v11174_v56  ;;  %15966 = vst [vmem:[#allocation194_spill] sm:$0xff] %v11485_v62  ;;  %v11489_v27 = vmul.f32 %v11428_v51, %v11324_v42  ;;  %v16083_v16 = vld [vmem:[#allocation94_spill] sm:$0xff] }
 0x8c6   : > { %3211 = vrot.lane.b32.xlu1 %v3168_v58, %s8864_s12  ;;  %v3151_v12 = vmul.f32 %v11465_v53, %v11349_v13  ;;  %v11477_v41 = vmul.f32 %v11465_v53, %v11361_v48  ;;  %v11493_v13 = vmul.f32 %v11465_v53, %v11345_v2  ;;  %v11499_v56 = vmul.f32 %v11266_v20, %v11135_v61 }
 0x8c7   : > { %15967 = vst [vmem:[#allocation195_spill] sm:$0xff] %v11489_v27  ;;  %15970 = vst [vmem:[#allocation198_spill] sm:$0xff] %v11503_v50  ;;  %v3172_v2 = vmul.f32 %v3156_v46, %v15971_v14  ;;  %v11516_v61 = vmul.f32 %v11451_v45, %v11187_v55  ;;  %v15978_v55 = vld [vmem:[#allocation183_spill] sm:$0xff] }
 0x8c8   : > { %v3167_v11 = vmul.f32 %v3151_v12, %v15964_v23  ;;  %15968 = vst [vmem:[#allocation196_spill] sm:$0xff] %v11493_v13  ;;  %15969 = vst [vmem:[#allocation197_spill] sm:$0xff] %v11499_v56  ;;  %v15972_v12 = vld [vmem:[#allocation113_spill] sm:$0xff]  ;;  %v3253_v50 = vmul.f32 %v11292_v17, %v15978_v55  ;;  %v16048_v56 = vld [vmem:[#allocation52_spill] sm:$0xff] }
 0x8c9   : > { %15974 = vst [vmem:[#allocation200_spill] sm:$0xff] %v11516_v61  ;;  %v16092_v61 = vld [vmem:[#allocation106_spill] sm:$0xff] }
 0x8ca   : > { %v8171_v48 = vpop.eup %8170  ;;  %3209 = vrot.lane.b32.xlu0 %v3167_v11, %s8864_s12  ;;  %3215 = vrot.lane.b32.xlu1 %v3170_v37, %s8864_s12 }
 0x8cb   : > { %v3153_v42 = vmul.f32 %v8171_v48, %v11371_v40  ;;  %v11506_v58 = vmul.f32 %v8171_v48, %v8155_v43  ;;  %v11511_v11 = vmul.f32 %v8171_v48, %v11366_v54  ;;  %v3256_v43 = vmul.f32 %v11336_v7, %v11271_v25  ;;  %v15980_v7 = vld [vmem:[#allocation184_spill] sm:$0xff] }
 0x8cc   : > { %v3269_v25 = vmul.f32 %v3253_v50, %v15943_v31 }
 0x8cd   : > { %v3169_v13 = vmul.f32 %v3153_v42, %v15972_v12  ;;  %15973 = vst [vmem:[#allocation199_spill] sm:$0xff] %v11511_v11  ;;  %v15977_v42 = vld [vmem:[#allocation108_spill] sm:$0xff] }
 0x8ce   : > { %3219 = vrot.lane.b32.xlu1 %v3172_v2, %s8864_s12 }
 0x8cf   : > { %v8173_v37 = vpop.eup %8172  ;;  %3213 = vrot.lane.b32.xlu0 %v3169_v13, %s8864_s12  ;;  %v3272_v13 = vmul.f32 %v3256_v43, %v15945_v33  ;;  %v3257_v43 = vmul.f32 %v11358_v28, %v11287_v22 }
 0x8d0   : > { %v3155_v40 = vmul.f32 %v8173_v37, %v8159_v19  ;;  %v11523_v46 = vmul.f32 %v8173_v37, %v8157_v6  ;;  %v11525_v54 = vmul.f32 %v8173_v37, %v8165_v30  ;;  %v3258_v19 = vmul.f32 %v11149_v32, %v15979_v49  ;;  %v16084_v32 = vld [vmem:[#allocation96_spill] sm:$0xff] }
 0x8d1   : > { %v3255_v6 = vmul.f32 %v11314_v26, %v15980_v7  ;;  %v3273_v55 = vmul.f32 %v3257_v43, %v15947_v29  ;;  %v3261_v7 = vmul.f32 %v11428_v51, %v11331_v8  ;;  %v15986_v43 = vld [vmem:[#allocation181_spill] sm:$0xff] }
 0x8d2   : > { %15975 = vst [vmem:[#allocation201_spill] sm:$0xff] %v11523_v46  ;;  %15976 = vst [vmem:[#allocation202_spill] sm:$0xff] %v11525_v54  ;;  %v3171_v2 = vmul.f32 %v3155_v40, %v15977_v42  ;;  %3303 = vrot.lane.b32.xlu1 %v3270_v5, %s8865_s10  ;;  %v3274_v30 = vmul.f32 %v3258_v19, %v15946_v24  ;;  %v15981_v5 = vld [vmem:[#allocation173_spill] sm:$0xff]  ;;  %v3268_v8 = vmul.f32 %v11451_v45, %v15986_v43 }
 0x8d3   : > { %v3260_v17 = vmul.f32 %v11168_v39, %v15981_v5  ;;  %v3271_v40 = vmul.f32 %v3255_v6, %v15944_v9  ;;  %v3277_v5 = vmul.f32 %v3261_v7, %v15959_v38  ;;  %v15993_v7 = vld [vmem:[#allocation187_spill] sm:$0xff]  ;;  %v3393_v43 = vmul.f32 %v11506_v58, %v15972_v12  ;;  %v16001_v58 = vld [vmem:[#allocation37_spill] sm:$0xff]  ;;  %v16080_v39 = vld [vmem:[#allocation28_spill] sm:$0xff] }
 0x8d4   : > { %3217 = vrot.lane.b32.xlu0 %v3171_v2, %s8864_s12  ;;  %v15982_v2 = vld [vmem:[#allocation175_spill] sm:$0xff] }
 0x8d5   : > { %v3276_v50 = vmul.f32 %v3260_v17, %v15953_v57  ;;  %v3262_v26 = vmul.f32 %v11202_v15, %v15982_v2  ;;  %v3263_v17 = vmul.f32 %v11465_v53, %v11353_v35  ;;  %v15987_v2 = vld [vmem:[#allocation168_spill] sm:$0xff]  ;;  %v16076_v15 = vld [vmem:[#allocation86_spill] sm:$0xff] }
 0x8d6   : > { %3307 = vrot.lane.b32.xlu1 %v3272_v13, %s8865_s10  ;;  %v15983_v13 = vld [vmem:[#allocation165_spill] sm:$0xff] }
 0x8d7   : > { %v3259_v49 = vmul.f32 %v11394_v34, %v15983_v13  ;;  %v3278_v19 = vmul.f32 %v3262_v26, %v15955_v18  ;;  %v3279_v51 = vmul.f32 %v3263_v17, %v15964_v23  ;;  %v15988_v26 = vld [vmem:[#allocation172_spill] sm:$0xff]  ;;  %v3389_v17 = vmul.f32 %v11449_v1, %v15959_v38  ;;  %v16097_v38 = vld [vmem:[#allocation103_spill] sm:$0xff] }
 0x8d8   : > { %3301 = vrot.lane.b32.xlu0 %v3269_v25, %s8865_s10  ;;  %v15984_v25 = vld [vmem:[#allocation177_spill] sm:$0xff]  ;;  %v3366_v35 = vmul.f32 %v15988_v26, %v15987_v2  ;;  %v15997_v1 = vld [vmem:[#allocation36_spill] sm:$0xff] }
 0x8d9   : > { %v3264_v22 = vmul.f32 %v11236_v36, %v15984_v25  ;;  %v3275_v28 = vmul.f32 %v3259_v49, %v15954_v44  ;;  %v15990_v49 = vld [vmem:[#allocation166_spill] sm:$0xff]  ;;  %v15992_v25 = vld [vmem:[#allocation185_spill] sm:$0xff]  ;;  %v16091_v26 = vld [vmem:[#allocation104_spill] sm:$0xff] }
 0x8da   : > { %3311 = vrot.lane.b32.xlu1 %v3274_v30, %s8865_s10  ;;  %v15985_v30 = vld [vmem:[#allocation179_spill] sm:$0xff]  ;;  %v3382_v45 = vmul.f32 %v3366_v35, %v10228_v47  ;;  %v16004_v35 = vld [vmem:[#allocation20_spill] sm:$0xff] }
 0x8db   : > { %v3280_v6 = vmul.f32 %v3264_v22, %v15960_v0  ;;  %v3266_v34 = vmul.f32 %v11266_v20, %v15985_v30  ;;  %v3265_v20 = vmul.f32 %v8171_v48, %v11377_v4  ;;  %v15989_v4 = vld [vmem:[#allocation164_spill] sm:$0xff]  ;;  %v3383_v22 = vmul.f32 %v15992_v25, %v15944_v9  ;;  %v16015_v25 = vld [vmem:[#allocation41_spill] sm:$0xff] }
 0x8dc   : > { %3305 = vrot.lane.b32.xlu0 %v3271_v40, %s8865_s10  ;;  %v3384_v48 = vmul.f32 %v15989_v4, %v15945_v33  ;;  %v3390_v30 = vmul.f32 %v11426_v59, %v15955_v18  ;;  %v16009_v4 = vld [vmem:[#allocation40_spill] sm:$0xff] }
 0x8dd   : > { %v3282_v40 = vmul.f32 %v3266_v34, %v15965_v60  ;;  %v3281_v53 = vmul.f32 %v3265_v20, %v15972_v12  ;;  %v3387_v34 = vmul.f32 %v11422_v3, %v15954_v44  ;;  %v3391_v3 = vmul.f32 %v11477_v41, %v15964_v23  ;;  %v15999_v41 = vld [vmem:[#allocation43_spill] sm:$0xff]  ;;  %v16000_v20 = vld [vmem:[#allocation42_spill] sm:$0xff]  ;;  %v16096_v18 = vld [vmem:[#allocation32_spill] sm:$0xff] }
 0x8de   : > { %3315 = vrot.lane.b32.xlu1 %v3276_v50, %s8865_s10  ;;  %v3284_v50 = vmul.f32 %v3268_v8, %v15971_v14  ;;  %v15996_v8 = vld [vmem:[#allocation34_spill] sm:$0xff]  ;;  %v16093_v14 = vld [vmem:[#allocation97_spill] sm:$0xff]  ;;  %v16094_v12 = vld [vmem:[#allocation31_spill] sm:$0xff] }
 0x8df   : > { %v16102_v9 = vld [vmem:[#allocation116_spill] sm:$0xff] }
 0x8e0   : > { %3309 = vrot.lane.b32.xlu0 %v3273_v55, %s8865_s10  ;;  %v3267_v55 = vmul.f32 %v8173_v37, %v11416_v52  ;;  %v15991_v52 = vld [vmem:[#allocation186_spill] sm:$0xff] }
 0x8e1   : > { %v3386_v37 = vmul.f32 %v15991_v52, %v15946_v24  ;;  %v16098_v24 = vld [vmem:[#allocation59_spill] sm:$0xff] }
 0x8e2   : > { %3319 = vrot.lane.b32.xlu1 %v3278_v19, %s8865_s10  ;;  %v3283_v13 = vmul.f32 %v3267_v55, %v15977_v42  ;;  %v3381_v19 = vmul.f32 %v15990_v49, %v15943_v31  ;;  %v16103_v31 = vld [vmem:[#allocation60_spill] sm:$0xff] }
 0x8e4   : > { %3313 = vrot.lane.b32.xlu0 %v3275_v28, %s8865_s10  ;;  %v3388_v28 = vmul.f32 %v11407_v63, %v15953_v57 }
 0x8e6   : > { %3323 = vrot.lane.b32.xlu1 %v3280_v6, %s8865_s10  ;;  %v3385_v6 = vmul.f32 %v15993_v7, %v15947_v29 }
 0x8e8   : > { %3317 = vrot.lane.b32.xlu0 %v3277_v5, %s8865_s10  ;;  %v15994_v5 = vld [vmem:[#allocation188_spill] sm:$0xff] }
 0x8e9   : > { %v3392_v63 = vmul.f32 %v15994_v5, %v15960_v0 }
 0x8ea   : > { %3327 = vrot.lane.b32.xlu1 %v3282_v40, %s8865_s10  ;;  %v15995_v40 = vld [vmem:[#allocation189_spill] sm:$0xff] }
 0x8eb   : > { %v3394_v59 = vmul.f32 %v15995_v40, %v15965_v60 }
 0x8ec   : > { %3321 = vrot.lane.b32.xlu0 %v3279_v51, %s8865_s10  ;;  %v15998_v51 = vld [vmem:[#allocation38_spill] sm:$0xff] }
 0x8ee   : > { %3331 = vrot.lane.b32.xlu1 %v3284_v50, %s8865_s10  ;;  %v16002_v50 = vld [vmem:[#allocation19_spill] sm:$0xff] }
 0x8f0   : > { %3325 = vrot.lane.b32.xlu0 %v3281_v53, %s8865_s10  ;;  %v16005_v53 = vld [vmem:[#allocation49_spill] sm:$0xff] }
 0x8f2   : > { %3415 = vrot.lane.b32.xlu1 %v3382_v45, %s8866_s1 }
 0x8f4   : > { %3329 = vrot.lane.b32.xlu0 %v3283_v13, %s8865_s10 }
 0x8f6   : > { %3419 = vrot.lane.b32.xlu1 %v3384_v48, %s8866_s1  ;;  %v16010_v48 = vld [vmem:[#allocation44_spill] sm:$0xff] }
 0x8f8   : > { %3413 = vrot.lane.b32.xlu0 %v3381_v19, %s8866_s1 }
 0x8fa   : > { %3423 = vrot.lane.b32.xlu1 %v3386_v37, %s8866_s1 }
 0x8fc   : > { %3417 = vrot.lane.b32.xlu0 %v3383_v22, %s8866_s1 }
 0x8fe   : > { %3427 = vrot.lane.b32.xlu1 %v3388_v28, %s8866_s1  ;;  %v16017_v28 = vld [vmem:[#allocation22_spill] sm:$0xff] }
 0x900   : > { %3421 = vrot.lane.b32.xlu0 %v3385_v6, %s8866_s1  ;;  %v16019_v6 = vld [vmem:[#allocation48_spill] sm:$0xff] }
 0x902   : > { %3431 = vrot.lane.b32.xlu1 %v3390_v30, %s8866_s1  ;;  %v11645_v2 = vpop.permute.xlu1 %3191 }
 0x903   : > { %16003 = vst [vmem:[#allocation183_spill] sm:$0xff] %v11645_v2  ;;  %v16090_v2 = vld [vmem:[#allocation111_spill] sm:$0xff] }
 0x904   : > { %3425 = vrot.lane.b32.xlu0 %v3387_v34, %s8866_s1 }
 0x906   : > { %3435 = vrot.lane.b32.xlu1 %v3392_v63, %s8866_s1  ;;  %v16023_v63 = vld [vmem:[#allocation21_spill] sm:$0xff] }
 0x908   : > { %3429 = vrot.lane.b32.xlu0 %v3389_v17, %s8866_s1  ;;  %v16024_v17 = vld [vmem:[#allocation39_spill] sm:$0xff] }
 0x90a   : > { %3439 = vrot.lane.b32.xlu1 %v3394_v59, %s8866_s1 }
 0x90c   : > { %3433 = vrot.lane.b32.xlu0 %v3391_v3, %s8866_s1  ;;  %v16027_v3 = vld [vmem:[#allocation63_spill] sm:$0xff] }
 0x90e   : > { %3589 = vrot.lane.b32.xlu1 %v15996_v8, %s8865_s10 }
 0x910   : > { %3437 = vrot.lane.b32.xlu0 %v3393_v43, %s8866_s1 }
 0x912   : > { %3591 = vrot.lane.b32.xlu1 %v15997_v1, %s8865_s10 }
 0x914   : > { %3477 = vrot.lane.b32.xlu0 %v15998_v51, %s8865_s10 }
 0x916   : > { %4725 = vrot.lane.b32.xlu1 %v15998_v51, %s8866_s1 }
 0x918   : > { %3479 = vrot.lane.b32.xlu0 %v15999_v41, %s8865_s10 }
 0x91a   : > { %4615 = vrot.lane.b32.xlu1 %v16000_v20, %s8866_s1 }
 0x91c   : > { %4613 = vrot.lane.b32.xlu0 %v16001_v58, %s8866_s1 }
 0x91e   : > { %3703 = vrot.lane.b32.xlu1 %v16002_v50, %s8865_s10 }
 0x920   : > { %3701 = vrot.lane.b32.xlu0 %v16004_v35, %s8865_s10  ;;  %v11661_v13 = vpop.permute.xlu0 %3189 }
 0x921   : > { %16008 = vst [vmem:[#allocation173_spill] sm:$0xff] %v11661_v13 }
 0x922   : > { %3481 = vrot.lane.b32.xlu1 %v16005_v53, %s8865_s10 }
 0x923   : > { %v11651_v55 = vpop.permute.xlu1 %3193 }
 0x924   : > { %16006 = vst [vmem:[#allocation170_spill] sm:$0xff] %v11651_v55  ;;  %4727 = vrot.lane.b32.xlu0 %v15999_v41, %s8866_s1  ;;  %v16032_v41 = vld [vmem:[#allocation53_spill] sm:$0xff] }
 0x926   : > { %3813 = vrot.lane.b32.xlu1 %v16001_v58, %s8865_s10 }
 0x928   : > { %4837 = vrot.lane.b32.xlu0 %v15996_v8, %s8866_s1  ;;  %v11659_v45 = vpop.permute.xlu1 %3195 }
 0x929   : > { %16007 = vst [vmem:[#allocation184_spill] sm:$0xff] %v11659_v45  ;;  %v16086_v45 = vld [vmem:[#allocation29_spill] sm:$0xff] }
 0x92a   : > { %3483 = vrot.lane.b32.xlu1 %v16009_v4, %s8865_s10 }
 0x92c   : > { %3593 = vrot.lane.b32.xlu0 %v16010_v48, %s8865_s10  ;;  %v11667_v49 = vpop.permute.xlu1 %3199 }
 0x92d   : > { %16011 = vst [vmem:[#allocation175_spill] sm:$0xff] %v11667_v49  ;;  %v11669_v19 = vpop.permute.xlu0 %3197 }
 0x92e   : > { %16012 = vst [vmem:[#allocation165_spill] sm:$0xff] %v11669_v19  ;;  %3815 = vrot.lane.b32.xlu1 %v16000_v20, %s8865_s10  ;;  %v16033_v20 = vld [vmem:[#allocation54_spill] sm:$0xff] }
 0x930   : > { %4839 = vrot.lane.b32.xlu0 %v15997_v1, %s8866_s1  ;;  %v11675_v52 = vpop.permute.xlu1 %3203 }
 0x931   : > { %16013 = vst [vmem:[#allocation177_spill] sm:$0xff] %v11675_v52  ;;  %v16078_v52 = vld [vmem:[#allocation27_spill] sm:$0xff] }
 0x932   : > { %v11677_v37 = vpop.permute.xlu0 %3201  ;;  %4729 = vrot.lane.b32.xlu1 %v16005_v53, %s8866_s1 }
 0x933   : > { %16014 = vst [vmem:[#allocation179_spill] sm:$0xff] %v11677_v37 }
 0x934   : > { %3595 = vrot.lane.b32.xlu0 %v16015_v25, %s8865_s10  ;;  %v11683_v22 = vpop.permute.xlu1 %3207 }
 0x935   : > { %16016 = vst [vmem:[#allocation181_spill] sm:$0xff] %v11683_v22  ;;  %v16071_v22 = vld [vmem:[#allocation26_spill] sm:$0xff] }
 0x936   : > { %3705 = vrot.lane.b32.xlu1 %v16017_v28, %s8865_s10 }
 0x937   : > { %v11687_v7 = vpop.permute.xlu0 %3205 }
 0x938   : > { %16018 = vst [vmem:[#allocation168_spill] sm:$0xff] %v11687_v7  ;;  %4617 = vrot.lane.b32.xlu0 %v16019_v6, %s8866_s1  ;;  %v11691_v30 = vpop.permute.xlu1 %3211  ;;  %v16072_v7 = vld [vmem:[#allocation67_spill] sm:$0xff] }
 0x939   : > { %16020 = vst [vmem:[#allocation164_spill] sm:$0xff] %v11691_v30 }
 0x93a   : > { %4731 = vrot.lane.b32.xlu1 %v16009_v4, %s8866_s1  ;;  %v16038_v4 = vld [vmem:[#allocation45_spill] sm:$0xff] }
 0x93c   : > { %4949 = vrot.lane.b32.xlu0 %v16004_v35, %s8866_s1  ;;  %v11697_v34 = vpop.permute.xlu0 %3209  ;;  %v11699_v5 = vpop.permute.xlu1 %3215 }
 0x93d   : > { %16021 = vst [vmem:[#allocation166_spill] sm:$0xff] %v11697_v34  ;;  %16022 = vst [vmem:[#allocation186_spill] sm:$0xff] %v11699_v5  ;;  %v16047_v5 = vld [vmem:[#allocation24_spill] sm:$0xff] }
 0x93e   : > { %3707 = vrot.lane.b32.xlu1 %v16023_v63, %s8865_s10 }
 0x940   : > { %4619 = vrot.lane.b32.xlu0 %v16024_v17, %s8866_s1  ;;  %v11705_v40 = vpop.permute.xlu1 %3219 }
 0x941   : > { %16025 = vst [vmem:[#allocation185_spill] sm:$0xff] %v11705_v40  ;;  %v11707_v59 = vpop.permute.xlu0 %3213  ;;  %v16041_v40 = vld [vmem:[#allocation23_spill] sm:$0xff] }
 0x942   : > { %16026 = vst [vmem:[#allocation187_spill] sm:$0xff] %v11707_v59  ;;  %3485 = vrot.lane.b32.xlu1 %v16027_v3, %s8865_s10 }
 0x944   : > { %4951 = vrot.lane.b32.xlu0 %v16002_v50, %s8866_s1  ;;  %v11713_v43 = vpop.permute.xlu1 %3303 }
 0x945   : > { %16028 = vst [vmem:[#allocation188_spill] sm:$0xff] %v11713_v43 }
 0x946   : > { %v11715_v8 = vpop.permute.xlu0 %3217  ;;  %3817 = vrot.lane.b32.xlu1 %v16019_v6, %s8865_s10 }
 0x947   : > { %16029 = vst [vmem:[#allocation189_spill] sm:$0xff] %v11715_v8 }
 0x948   : > { %4841 = vrot.lane.b32.xlu0 %v16010_v48, %s8866_s1  ;;  %v11721_v1 = vpop.permute.xlu1 %3307 }
 0x949   : > { %16030 = vst [vmem:[#allocation34_spill] sm:$0xff] %v11721_v1 }
 0x94a   : > { %v11723_v51 = vpop.permute.xlu0 %3301  ;;  %3487 = vrot.lane.b32.xlu1 %v16032_v41, %s8865_s10 }
 0x94b   : > { %16031 = vst [vmem:[#allocation36_spill] sm:$0xff] %v11723_v51 }
 0x94c   : > { %3597 = vrot.lane.b32.xlu0 %v16033_v20, %s8865_s10  ;;  %v11729_v58 = vpop.permute.xlu1 %3311 }
 0x94d   : > { %16034 = vst [vmem:[#allocation38_spill] sm:$0xff] %v11729_v58 }
 0x94e   : > { %v11731_v50 = vpop.permute.xlu0 %3305  ;;  %3819 = vrot.lane.b32.xlu1 %v16024_v17, %s8865_s10  ;;  %v16042_v17 = vld [vmem:[#allocation61_spill] sm:$0xff] }
 0x94f   : > { %16035 = vst [vmem:[#allocation43_spill] sm:$0xff] %v11731_v50 }
 0x950   : > { %4843 = vrot.lane.b32.xlu0 %v16015_v25, %s8866_s1  ;;  %v11737_v35 = vpop.permute.xlu1 %3315 }
 0x951   : > { %16036 = vst [vmem:[#allocation42_spill] sm:$0xff] %v11737_v35 }
 0x952   : > { %v11739_v53 = vpop.permute.xlu0 %3309  ;;  %4733 = vrot.lane.b32.xlu1 %v16027_v3, %s8866_s1 }
 0x953   : > { %16037 = vst [vmem:[#allocation37_spill] sm:$0xff] %v11739_v53  ;;  %v16082_v53 = vld [vmem:[#allocation100_spill] sm:$0xff] }
 0x954   : > { %3599 = vrot.lane.b32.xlu0 %v16038_v4, %s8865_s10  ;;  %v11745_v48 = vpop.permute.xlu1 %3319 }
 0x955   : > { %16039 = vst [vmem:[#allocation19_spill] sm:$0xff] %v11745_v48  ;;  %v16065_v48 = vld [vmem:[#allocation25_spill] sm:$0xff] }
 0x956   : > { %v11747_v6 = vpop.permute.xlu0 %3313  ;;  %3709 = vrot.lane.b32.xlu1 %v16041_v40, %s8865_s10 }
 0x957   : > { %16040 = vst [vmem:[#allocation20_spill] sm:$0xff] %v11747_v6 }
 0x958   : > { %4621 = vrot.lane.b32.xlu0 %v16042_v17, %s8866_s1  ;;  %v11753_v25 = vpop.permute.xlu1 %3323 }
 0x959   : > { %16043 = vst [vmem:[#allocation49_spill] sm:$0xff] %v11753_v25  ;;  %v16051_v25 = vld [vmem:[#allocation79_spill] sm:$0xff] }
 0x95a   : > { %v11755_v8 = vpop.permute.xlu0 %3317  ;;  %4735 = vrot.lane.b32.xlu1 %v16032_v41, %s8866_s1 }
 0x95b   : > { %16044 = vst [vmem:[#allocation40_spill] sm:$0xff] %v11755_v8 }
 0x95c   : > { %4953 = vrot.lane.b32.xlu0 %v16017_v28, %s8866_s1  ;;  %v11761_v3 = vpop.permute.xlu1 %3327 }
 0x95d   : > { %16045 = vst [vmem:[#allocation44_spill] sm:$0xff] %v11761_v3 }
 0x95e   : > { %v11763_v46 = vpop.permute.xlu0 %3321  ;;  %3711 = vrot.lane.b32.xlu1 %v16047_v5, %s8865_s10 }
 0x95f   : > { %16046 = vst [vmem:[#allocation41_spill] sm:$0xff] %v11763_v46  ;;  %v16057_v46 = vld [vmem:[#allocation71_spill] sm:$0xff] }
 0x960   : > { %4623 = vrot.lane.b32.xlu0 %v16048_v56, %s8866_s1  ;;  %v11769_v59 = vpop.permute.xlu1 %3331 }
 0x961   : > { %16049 = vst [vmem:[#allocation22_spill] sm:$0xff] %v11769_v59 }
 0x962   : > { %v11771_v11 = vpop.permute.xlu0 %3325  ;;  %3489 = vrot.lane.b32.xlu1 %v16051_v25, %s8865_s10 }
 0x963   : > { %16050 = vst [vmem:[#allocation48_spill] sm:$0xff] %v11771_v11  ;;  %v16056_v11 = vld [vmem:[#allocation69_spill] sm:$0xff] }
 0x964   : > { %4955 = vrot.lane.b32.xlu0 %v16023_v63, %s8866_s1  ;;  %v11777_v28 = vpop.permute.xlu1 %3415 }
 0x965   : > { %16052 = vst [vmem:[#allocation21_spill] sm:$0xff] %v11777_v28  ;;  %v16088_v28 = vld [vmem:[#allocation30_spill] sm:$0xff] }
 0x966   : > { %v11779_v41 = vpop.permute.xlu0 %3329  ;;  %3821 = vrot.lane.b32.xlu1 %v16042_v17, %s8865_s10 }
 0x967   : > { %16053 = vst [vmem:[#allocation39_spill] sm:$0xff] %v11779_v41  ;;  %v16062_v41 = vld [vmem:[#allocation58_spill] sm:$0xff] }
 0x968   : > { %4845 = vrot.lane.b32.xlu0 %v16033_v20, %s8866_s1  ;;  %v11785_v3 = vpop.permute.xlu1 %3419 }
 0x969   : > { %16054 = vst [vmem:[#allocation63_spill] sm:$0xff] %v11785_v3 }
 0x96a   : > { %v11787_v59 = vpop.permute.xlu0 %3413  ;;  %3491 = vrot.lane.b32.xlu1 %v16056_v11, %s8865_s10 }
 0x96b   : > { %16055 = vst [vmem:[#allocation53_spill] sm:$0xff] %v11787_v59  ;;  %v16089_v59 = vld [vmem:[#allocation93_spill] sm:$0xff] }
 0x96c   : > { %3601 = vrot.lane.b32.xlu0 %v16057_v46, %s8865_s10  ;;  %v11793_v63 = vpop.permute.xlu1 %3423 }
 0x96d   : > { %16058 = vst [vmem:[#allocation54_spill] sm:$0xff] %v11793_v63  ;;  %v16081_v63 = vld [vmem:[#allocation82_spill] sm:$0xff] }
 0x96e   : > { %v11795_v30 = vpop.permute.xlu0 %3417  ;;  %3823 = vrot.lane.b32.xlu1 %v16048_v56, %s8865_s10  ;;  %v16066_v56 = vld [vmem:[#allocation78_spill] sm:$0xff] }
 0x96f   : > { %16059 = vst [vmem:[#allocation45_spill] sm:$0xff] %v11795_v30  ;;  %v16085_v30 = vld [vmem:[#allocation87_spill] sm:$0xff] }
 0x970   : > { %4847 = vrot.lane.b32.xlu0 %v16038_v4, %s8866_s1  ;;  %v11801_v20 = vpop.permute.xlu1 %3427 }
 0x971   : > { %16060 = vst [vmem:[#allocation23_spill] sm:$0xff] %v11801_v20 }
 0x972   : > { %v11803_v17 = vpop.permute.xlu0 %3421  ;;  %4737 = vrot.lane.b32.xlu1 %v16051_v25, %s8866_s1 }
 0x973   : > { %16061 = vst [vmem:[#allocation61_spill] sm:$0xff] %v11803_v17 }
 0x974   : > { %3603 = vrot.lane.b32.xlu0 %v16062_v41, %s8865_s10  ;;  %v11809_v34 = vpop.permute.xlu1 %3431 }
 0x975   : > { %16063 = vst [vmem:[#allocation24_spill] sm:$0xff] %v11809_v34 }
 0x976   : > { %v11811_v36 = vpop.permute.xlu0 %3425  ;;  %3713 = vrot.lane.b32.xlu1 %v16065_v48, %s8865_s10 }
 0x977   : > { %16064 = vst [vmem:[#allocation52_spill] sm:$0xff] %v11811_v36  ;;  %v16077_v36 = vld [vmem:[#allocation75_spill] sm:$0xff] }
 0x978   : > { %4625 = vrot.lane.b32.xlu0 %v16066_v56, %s8866_s1  ;;  %v11817_v4 = vpop.permute.xlu1 %3435 }
 0x979   : > { %16067 = vst [vmem:[#allocation79_spill] sm:$0xff] %v11817_v4 }
 0x97a   : > { %v11819_v8 = vpop.permute.xlu0 %3429  ;;  %4739 = vrot.lane.b32.xlu1 %v16056_v11, %s8866_s1 }
 0x97b   : > { %16068 = vst [vmem:[#allocation69_spill] sm:$0xff] %v11819_v8  ;;  %v16074_v8 = vld [vmem:[#allocation90_spill] sm:$0xff] }
 0x97c   : > { %4957 = vrot.lane.b32.xlu0 %v16041_v40, %s8866_s1  ;;  %v11825_v25 = vpop.permute.xlu1 %3439 }
 0x97d   : > { %16069 = vst [vmem:[#allocation71_spill] sm:$0xff] %v11825_v25 }
 0x97e   : > { %v11827_v34 = vpop.permute.xlu0 %3433  ;;  %3715 = vrot.lane.b32.xlu1 %v16071_v22, %s8865_s10 }
 0x97f   : > { %16070 = vst [vmem:[#allocation58_spill] sm:$0xff] %v11827_v34 }
 0x980   : > { %4627 = vrot.lane.b32.xlu0 %v16072_v7, %s8866_s1  ;;  %v11833_v27 = vpop.permute.xlu1 %3589 }
 0x982   : > { %v11835_v4 = vpop.permute.xlu0 %3437  ;;  %3493 = vrot.lane.b32.xlu1 %v16074_v8, %s8865_s10 }
 0x983   : > { %16073 = vst [vmem:[#allocation25_spill] sm:$0xff] %v11835_v4  ;;  %v16075_v4 = vld [vmem:[#allocation84_spill] sm:$0xff] }
 0x984   : > { %4959 = vrot.lane.b32.xlu0 %v16047_v5, %s8866_s1  ;;  %v11841_v11 = vpop.permute.xlu1 %3591 }
 0x986   : > { %v11843_v40 = vpop.permute.xlu0 %3477  ;;  %3825 = vrot.lane.b32.xlu1 %v16066_v56, %s8865_s10 }
 0x988   : > { %4849 = vrot.lane.b32.xlu0 %v16057_v46, %s8866_s1  ;;  %v11849_v25 = vpop.permute.xlu1 %4725 }
 0x98a   : > { %v11851_v34 = vpop.permute.xlu0 %3479  ;;  %3495 = vrot.lane.b32.xlu1 %v16075_v4, %s8865_s10 }
 0x98c   : > { %3605 = vrot.lane.b32.xlu0 %v16076_v15, %s8865_s10  ;;  %v11857_v5 = vpop.permute.xlu1 %4615 }
 0x98e   : > { %v11859_v20 = vpop.permute.xlu0 %4613  ;;  %3827 = vrot.lane.b32.xlu1 %v16072_v7, %s8865_s10  ;;  %v16079_v7 = vld [vmem:[#allocation89_spill] sm:$0xff] }
 0x990   : > { %4851 = vrot.lane.b32.xlu0 %v16062_v41, %s8866_s1  ;;  %v11865_v46 = vpop.permute.xlu1 %3703 }
 0x992   : > { %v11867_v56 = vpop.permute.xlu0 %3701  ;;  %4741 = vrot.lane.b32.xlu1 %v16074_v8, %s8866_s1 }
 0x994   : > { %3607 = vrot.lane.b32.xlu0 %v16077_v36, %s8865_s10  ;;  %v11873_v35 = vpop.permute.xlu1 %3481 }
 0x996   : > { %v11875_v6 = vpop.permute.xlu0 %4727  ;;  %3717 = vrot.lane.b32.xlu1 %v16078_v52, %s8865_s10 }
 0x998   : > { %4629 = vrot.lane.b32.xlu0 %v16079_v7, %s8866_s1  ;;  %v11881_v41 = vpop.permute.xlu1 %3813 }
 0x99a   : > { %v11883_v37 = vpop.permute.xlu0 %4837  ;;  %4743 = vrot.lane.b32.xlu1 %v16075_v4, %s8866_s1 }
 0x99c   : > { %4961 = vrot.lane.b32.xlu0 %v16065_v48, %s8866_s1  ;;  %v11889_v8 = vpop.permute.xlu1 %3483 }
 0x99e   : > { %v11891_v62 = vpop.permute.xlu0 %3593  ;;  %3719 = vrot.lane.b32.xlu1 %v16080_v39, %s8865_s10 }
 0x9a0   : > { %4631 = vrot.lane.b32.xlu0 %v16081_v63, %s8866_s1  ;;  %v11897_v17 = vpop.permute.xlu1 %3815 }
 0x9a2   : > { %v11899_v58 = vpop.permute.xlu0 %4839  ;;  %3497 = vrot.lane.b32.xlu1 %v16082_v53, %s8865_s10 }
 0x9a4   : > { %4963 = vrot.lane.b32.xlu0 %v16071_v22, %s8866_s1  ;;  %v11905_v48 = vpop.permute.xlu1 %4729 }
 0x9a6   : > { %v11907_v4 = vpop.permute.xlu0 %3595  ;;  %3829 = vrot.lane.b32.xlu1 %v16079_v7, %s8865_s10 }
 0x9a8   : > { %4853 = vrot.lane.b32.xlu0 %v16076_v15, %s8866_s1  ;;  %v11913_v49 = vpop.permute.xlu1 %3705 }
 0x9aa   : > { %v11915_v19 = vpop.permute.xlu0 %4617  ;;  %3499 = vrot.lane.b32.xlu1 %v16083_v16, %s8865_s10 }
 0x9ac   : > { %3609 = vrot.lane.b32.xlu0 %v16084_v32, %s8865_s10  ;;  %v11921_v22 = vpop.permute.xlu1 %4731 }
 0x9ae   : > { %v11923_v3 = vpop.permute.xlu0 %4949  ;;  %3831 = vrot.lane.b32.xlu1 %v16081_v63, %s8865_s10  ;;  %v16087_v63 = vld [vmem:[#allocation99_spill] sm:$0xff] }
 0x9b0   : > { %4855 = vrot.lane.b32.xlu0 %v16077_v36, %s8866_s1  ;;  %v11929_v15 = vpop.permute.xlu1 %3707 }
 0x9b2   : > { %v11931_v7 = vpop.permute.xlu0 %4619  ;;  %4745 = vrot.lane.b32.xlu1 %v16082_v53, %s8866_s1 }
 0x9b4   : > { %3611 = vrot.lane.b32.xlu0 %v16085_v30, %s8865_s10  ;;  %v11937_v1 = vpop.permute.xlu1 %3485 }
 0x9b6   : > { %v11939_v50 = vpop.permute.xlu0 %4951  ;;  %3721 = vrot.lane.b32.xlu1 %v16086_v45, %s8865_s10 }
 0x9b8   : > { %4633 = vrot.lane.b32.xlu0 %v16087_v63, %s8866_s1  ;;  %v11945_v36 = vpop.permute.xlu1 %3817 }
 0x9ba   : > { %v11947_v55 = vpop.permute.xlu0 %4841  ;;  %4747 = vrot.lane.b32.xlu1 %v16083_v16, %s8866_s1 }
 0x9bc   : > { %4965 = vrot.lane.b32.xlu0 %v16078_v52, %s8866_s1  ;;  %v11953_v53 = vpop.permute.xlu1 %3487 }
 0x9be   : > { %v11955_v10 = vpop.permute.xlu0 %3597  ;;  %3723 = vrot.lane.b32.xlu1 %v16088_v28, %s8865_s10 }
 0x9c0   : > { %4635 = vrot.lane.b32.xlu0 %v16089_v59, %s8866_s1  ;;  %v11961_v43 = vpop.permute.xlu1 %3819 }
 0x9c2   : > { %v11963_v51 = vpop.permute.xlu0 %4843  ;;  %3501 = vrot.lane.b32.xlu1 %v16090_v2, %s8865_s10 }
 0x9c4   : > { %4967 = vrot.lane.b32.xlu0 %v16080_v39, %s8866_s1  ;;  %v11969_v16 = vpop.permute.xlu1 %4733 }
 0x9c6   : > { %v11971_v52 = vpop.permute.xlu0 %3599  ;;  %3833 = vrot.lane.b32.xlu1 %v16087_v63, %s8865_s10 }
 0x9c8   : > { %4857 = vrot.lane.b32.xlu0 %v16084_v32, %s8866_s1  ;;  %v11977_v13 = vpop.permute.xlu1 %3709 }
 0x9ca   : > { %v11979_v21 = vpop.permute.xlu0 %4621  ;;  %3503 = vrot.lane.b32.xlu1 %v16091_v26, %s8865_s10 }
 0x9cc   : > { %3613 = vrot.lane.b32.xlu0 %v16092_v61, %s8865_s10  ;;  %v11985_v39 = vpop.permute.xlu1 %4735 }
 0x9ce   : > { %v11987_v54 = vpop.permute.xlu0 %4953  ;;  %3835 = vrot.lane.b32.xlu1 %v16089_v59, %s8865_s10  ;;  %v16095_v59 = vld [vmem:[#allocation110_spill] sm:$0xff] }
 0x9d0   : > { %4859 = vrot.lane.b32.xlu0 %v16085_v30, %s8866_s1  ;;  %v11993_v32 = vpop.permute.xlu1 %3711 }
 0x9d2   : > { %v11995_v63 = vpop.permute.xlu0 %4623  ;;  %4749 = vrot.lane.b32.xlu1 %v16090_v2, %s8866_s1 }
 0x9d4   : > { %3615 = vrot.lane.b32.xlu0 %v16093_v14, %s8865_s10  ;;  %v12001_v42 = vpop.permute.xlu1 %3489 }
 0x9d6   : > { %v12003_v60 = vpop.permute.xlu0 %4955  ;;  %3725 = vrot.lane.b32.xlu1 %v16094_v12, %s8865_s10 }
 0x9d8   : > { %4637 = vrot.lane.b32.xlu0 %v16095_v59, %s8866_s1  ;;  %v12009_v30 = vpop.permute.xlu1 %3821 }
 0x9da   : > { %v12011_v0 = vpop.permute.xlu0 %4845  ;;  %4751 = vrot.lane.b32.xlu1 %v16091_v26, %s8866_s1 }
 0x9dc   : > { %4969 = vrot.lane.b32.xlu0 %v16086_v45, %s8866_s1  ;;  %v12017_v2 = vpop.permute.xlu1 %3491 }
 0x9de   : > { %v12019_v23 = vpop.permute.xlu0 %3601  ;;  %3727 = vrot.lane.b32.xlu1 %v16096_v18, %s8865_s10 }
 0x9e0   : > { %4639 = vrot.lane.b32.xlu0 %v16097_v38, %s8866_s1  ;;  %v12025_v57 = vpop.permute.xlu1 %3823 }
 0x9e2   : > { %v12027_v44 = vpop.permute.xlu0 %4847  ;;  %3505 = vrot.lane.b32.xlu1 %v16098_v24, %s8865_s10 }
 0x9e4   : > { %4971 = vrot.lane.b32.xlu0 %v16088_v28, %s8866_s1  ;;  %v12033_v26 = vpop.permute.xlu1 %4737 }
 0x9e6   : > { %v12035_v45 = vpop.permute.xlu0 %3603  ;;  %3837 = vrot.lane.b32.xlu1 %v16095_v59, %s8865_s10 }
 0x9e7   : > { %16099 = vst [vmem:[#allocation78_spill] sm:$0xff] %v12035_v45 }
 0x9e8   : > { %4861 = vrot.lane.b32.xlu0 %v16092_v61, %s8866_s1  ;;  %v12041_v29 = vpop.permute.xlu1 %3713 }
 0x9e9   : > { %16100 = vst [vmem:[#allocation26_spill] sm:$0xff] %v12041_v29 }
 0x9ea   : > { %v12043_v33 = vpop.permute.xlu0 %4625  ;;  %3507 = vrot.lane.b32.xlu1 %v16102_v9, %s8865_s10 }
 0x9eb   : > { %16101 = vst [vmem:[#allocation67_spill] sm:$0xff] %v12043_v33  ;;  %v16108_v33 = vld [vmem:[#allocation107_spill] sm:$0xff] }
 0x9ec   : > { %3617 = vrot.lane.b32.xlu0 %v16103_v31, %s8865_s10  ;;  %v12049_v28 = vpop.permute.xlu1 %4739 }
 0x9ed   : > { %16104 = vst [vmem:[#allocation90_spill] sm:$0xff] %v12049_v28 }
 0x9ee   : > { %v12051_v47 = vpop.permute.xlu0 %4957  ;;  %3839 = vrot.lane.b32.xlu1 %v16097_v38, %s8865_s10  ;;  %v16112_v38 = vld [vmem:[#allocation57_spill] sm:$0xff] }
 0x9ef   : > { %16105 = vst [vmem:[#allocation84_spill] sm:$0xff] %v12051_v47  ;;  %v16111_v47 = vld [vmem:[#allocation33_spill] sm:$0xff] }
 0x9f0   : > { %4863 = vrot.lane.b32.xlu0 %v16093_v14, %s8866_s1  ;;  %v12057_v61 = vpop.permute.xlu1 %3715 }
 0x9f1   : > { %16106 = vst [vmem:[#allocation86_spill] sm:$0xff] %v12057_v61 }
 0x9f2   : > { %v12059_v59 = vpop.permute.xlu0 %4627  ;;  %4753 = vrot.lane.b32.xlu1 %v16098_v24, %s8866_s1 }
 0x9f3   : > { %16107 = vst [vmem:[#allocation75_spill] sm:$0xff] %v12059_v59 }
 0x9f4   : > { %3619 = vrot.lane.b32.xlu0 %v16108_v33, %s8865_s10  ;;  %v12065_v45 = vpop.permute.xlu1 %3493 }
 0x9f5   : > { %16109 = vst [vmem:[#allocation27_spill] sm:$0xff] %v12065_v45  ;;  %v16116_v45 = vld [vmem:[#allocation115_spill] sm:$0xff] }
 0x9f6   : > { %v12067_v28 = vpop.permute.xlu0 %4959  ;;  %3729 = vrot.lane.b32.xlu1 %v16111_v47, %s8865_s10 }
 0x9f7   : > { %16110 = vst [vmem:[#allocation89_spill] sm:$0xff] %v12067_v28  ;;  %v16115_v28 = vld [vmem:[#allocation35_spill] sm:$0xff] }
 0x9f8   : > { %4641 = vrot.lane.b32.xlu0 %v16112_v38, %s8866_s1  ;;  %v12073_v14 = vpop.permute.xlu1 %3825 }
 0x9f9   : > { %16113 = vst [vmem:[#allocation28_spill] sm:$0xff] %v12073_v14 }
 0x9fa   : > { %v12075_v61 = vpop.permute.xlu0 %4849  ;;  %4755 = vrot.lane.b32.xlu1 %v16102_v9, %s8866_s1 }
 0x9fc   : > { %4973 = vrot.lane.b32.xlu0 %v16094_v12, %s8866_s1  ;;  %v12081_v24 = vpop.permute.xlu1 %3495 }
 0x9fe   : > { %v12083_v59 = vpop.permute.xlu0 %3605  ;;  %3731 = vrot.lane.b32.xlu1 %v16115_v28, %s8865_s10 }
 0x9ff   : > { %16114 = vst [vmem:[#allocation82_spill] sm:$0xff] %v12083_v59 }
 0xa00   : > { %4643 = vrot.lane.b32.xlu0 %v16116_v45, %s8866_s1  ;;  %v12089_v29 = vpop.permute.xlu1 %3827 }
 0xa01   : > { %16117 = vst [vmem:[#allocation100_spill] sm:$0xff] %v12089_v29 }
 0xa02   : > { %v12091_v14 = vpop.permute.xlu0 %4851  ;;  %3841 = vrot.lane.b32.xlu1 %v16112_v38, %s8865_s10 }
 0xa03   : > { %16118 = vst [vmem:[#allocation94_spill] sm:$0xff] %v12091_v14 }
 0xa04   : > { %4975 = vrot.lane.b32.xlu0 %v16096_v18, %s8866_s1  ;;  %v12097_v9 = vpop.permute.xlu1 %4741 }
 0xa06   : > { %v12099_v12 = vpop.permute.xlu0 %3607  ;;  %3843 = vrot.lane.b32.xlu1 %v16116_v45, %s8865_s10 }
 0xa07   : > { %16119 = vst [vmem:[#allocation96_spill] sm:$0xff] %v12099_v12 }
 0xa08   : > { %4865 = vrot.lane.b32.xlu0 %v16103_v31, %s8866_s1  ;;  %v12105_v59 = vpop.permute.xlu1 %3717 }
 0xa09   : > { %16120 = vst [vmem:[#allocation87_spill] sm:$0xff] %v12105_v59 }
 0xa0a   : > { %v12107_v29 = vpop.permute.xlu0 %4629  ;;  %4979 = vrot.lane.b32.xlu1 %v16115_v28, %s8866_s1 }
 0xa0b   : > { %16121 = vst [vmem:[#allocation29_spill] sm:$0xff] %v12107_v29 }
 0xa0c   : > { %4867 = vrot.lane.b32.xlu0 %v16108_v33, %s8866_s1  ;;  %v12115_v38 = vpop.permute.xlu1 %4743 }
 0xa0d   : > { %16123 = vst [vmem:[#allocation30_spill] sm:$0xff] %v12115_v38 }
 0xa0e   : > { %v12113_v18 = vpop.permute.xlu0 %4961 }
 0xa0f   : > { %16122 = vst [vmem:[#allocation99_spill] sm:$0xff] %v12113_v18 }
 0xa10   : > { %4977 = vrot.lane.b32.xlu0 %v16111_v47, %s8866_s1  ;;  %v12121_v31 = vpop.permute.xlu1 %3719  ;;  %v3637_v47 = vsel %vm1124_vm0, %v11833_v27, 0.0  ;;  %v4664_v27 = vsel %vm1124_vm0, %v11857_v5, 0.0  ;;  %v3531_v5 = vsel %vm1124_vm0, %v11873_v35, 0.0  ;;  %v3534_v35 = vsel %vm1124_vm0, %v11889_v8, 0.0 }
 0xa11   : > { %v4779_v8 = vsel %vm1124_vm0, %v11905_v48, 0.0  ;;  %v4782_v48 = vsel %vm1124_vm0, %v11921_v22, 0.0  ;;  %v3537_v22 = vsel %vm1124_vm0, %v11937_v1, 0.0  ;;  %v3540_v1 = vsel %vm1124_vm0, %v11953_v53, 0.0 }
 0xa12   : > { %v12119_v45 = vpop.permute.xlu0 %4631  ;;  %v4785_v53 = vsel %vm1124_vm0, %v11969_v16, 0.0  ;;  %v4788_v16 = vsel %vm1124_vm0, %v11985_v39, 0.0  ;;  %v3543_v39 = vsel %vm1124_vm0, %v12001_v42, 0.0  ;;  %v3546_v42 = vsel %vm1124_vm0, %v12017_v2, 0.0 }
 0xa13   : > { %16124 = vst [vmem:[#allocation93_spill] sm:$0xff] %v12119_v45  ;;  %v4791_v2 = vsel %vm1124_vm0, %v12033_v26, 0.0  ;;  %v16132_v26 = vld [vmem:[#allocation90_spill] sm:$0xff] }
 0xa14   : > { %v12125_v29 = vpop.permute.xlu1 %3497 }
 0xa16   : > { %v12123_v12 = vpop.permute.xlu0 %4963 }
 0xa17   : > { %16125 = vst [vmem:[#allocation111_spill] sm:$0xff] %v12123_v12  ;;  %v3525_v12 = vsel %vm1124_vm0, %v11843_v40, 0.0  ;;  %v3640_v40 = vsel %vm1124_vm0, %v11841_v11, 0.0  ;;  %v3749_v11 = vsel %vm1124_vm0, %v11867_v56, 0.0 }
 0xa18   : > { %v12129_v28 = vpop.permute.xlu1 %3829 }
 0xa1a   : > { %v12127_v59 = vpop.permute.xlu0 %4853 }
 0xa1b   : > { %16126 = vst [vmem:[#allocation104_spill] sm:$0xff] %v12127_v59  ;;  %v4773_v59 = vsel %vm1124_vm0, %v11849_v25, 0.0  ;;  %v3752_v25 = vsel %vm1124_vm0, %v11865_v46, 0.0  ;;  %v3861_v46 = vsel %vm1124_vm0, %v11881_v41, 0.0  ;;  %v3864_v41 = vsel %vm1124_vm0, %v11897_v17, 0.0 }
 0xa1c   : > { %v12133_v18 = vpop.permute.xlu1 %3499  ;;  %v3755_v17 = vsel %vm1124_vm0, %v11913_v49, 0.0  ;;  %v3758_v49 = vsel %vm1124_vm0, %v11929_v15, 0.0  ;;  %v3867_v15 = vsel %vm1124_vm0, %v11945_v36, 0.0  ;;  %v3870_v36 = vsel %vm1124_vm0, %v11961_v43, 0.0 }
 0xa1d   : > { %v3761_v43 = vsel %vm1124_vm0, %v11977_v13, 0.0  ;;  %v3764_v13 = vsel %vm1124_vm0, %v11993_v32, 0.0  ;;  %v3873_v32 = vsel %vm1124_vm0, %v12009_v30, 0.0  ;;  %v3876_v30 = vsel %vm1124_vm0, %v12025_v57, 0.0 }
 0xa1e   : > { %v12131_v33 = vpop.permute.xlu0 %3609 }
 0xa1f   : > { %16127 = vst [vmem:[#allocation106_spill] sm:$0xff] %v12131_v33  ;;  %v3528_v33 = vsel %vm1124_vm0, %v11851_v34, 0.0 }
 0xa20   : > { %v12137_v14 = vpop.permute.xlu1 %3831 }
 0xa21   : > { %16129 = vst [vmem:[#allocation31_spill] sm:$0xff] %v12137_v14 }
 0xa22   : > { %v12135_v38 = vpop.permute.xlu0 %4855 }
 0xa23   : > { %16128 = vst [vmem:[#allocation97_spill] sm:$0xff] %v12135_v38 }
 0xa24   : > { %v12149_v38 = vpop.permute.xlu1 %4745 }
 0xa26   : > { %v12141_v45 = vpop.permute.xlu0 %3611 }
 0xa2a   : > { %v12151_v14 = vpop.permute.xlu0 %4633 }
 0xa2e   : > { %3638 = vadd.xlane.f32.xlu1 %v3637_v47  ;;  %v12161_v34 = vpop.permute.xlu0 %4965 }
 0xa2f   : > { %3526 = vadd.xlane.f32.xlu0 %v3525_v12  ;;  %v12157_v12 = vpop.permute.xlu1 %3721 }
 0xa32   : > { %4774 = vadd.xlane.f32.xlu1 %v4773_v59  ;;  %v4661_v59 = vsel %vm1124_vm0, %v11859_v20, 0.0  ;;  %v12171_v47 = vpop.permute.xlu0 %4635  ;;  %v4776_v20 = vsel %vm1124_vm0, %v11875_v6, 0.0  ;;  %v3643_v6 = vsel %vm1124_vm0, %v11891_v62, 0.0 }
 0xa33   : > { %3529 = vadd.xlane.f32.xlu0 %v3528_v33  ;;  %v12169_v33 = vpop.permute.xlu1 %4747 }
 0xa36   : > { %4665 = vadd.xlane.f32.xlu1 %v4664_v27  ;;  %v12181_v56 = vpop.permute.xlu0 %4967 }
 0xa37   : > { %3641 = vadd.xlane.f32.xlu0 %v3640_v40  ;;  %v12177_v27 = vpop.permute.xlu1 %3723  ;;  %v4885_v40 = vsel %vm1124_vm0, %v11883_v37, 0.0  ;;  %v4888_v37 = vsel %vm1124_vm0, %v11899_v58, 0.0  ;;  %v4667_v58 = vsel %vm1124_vm0, %v11915_v19, 0.0 }
 0xa3a   : > { %3753 = vadd.xlane.f32.xlu1 %v3752_v25 }
 0xa3b   : > { %4662 = vadd.xlane.f32.xlu0 %v4661_v59  ;;  %v12189_v25 = vpop.permute.xlu1 %3501  ;;  %v12191_v59 = vpop.permute.xlu0 %4857 }
 0xa3e   : > { %3532 = vadd.xlane.f32.xlu1 %v3531_v5 }
 0xa3f   : > { %3750 = vadd.xlane.f32.xlu0 %v3749_v11  ;;  %v12197_v5 = vpop.permute.xlu1 %3833  ;;  %v12201_v62 = vpop.permute.xlu0 %3613  ;;  %v3646_v11 = vsel %vm1124_vm0, %v11907_v4, 0.0  ;;  %v4997_v4 = vsel %vm1124_vm0, %v11923_v3, 0.0  ;;  %v5000_v3 = vsel %vm1124_vm0, %v11939_v50, 0.0 }
 0xa42   : > { %3862 = vadd.xlane.f32.xlu1 %v3861_v46 }
 0xa43   : > { %4777 = vadd.xlane.f32.xlu0 %v4776_v20  ;;  %v12209_v46 = vpop.permute.xlu1 %3503  ;;  %v12211_v20 = vpop.permute.xlu0 %4859 }
 0xa46   : > { %3535 = vadd.xlane.f32.xlu1 %v3534_v35 }
 0xa47   : > { %4886 = vadd.xlane.f32.xlu0 %v4885_v40  ;;  %v12217_v35 = vpop.permute.xlu1 %3835  ;;  %v12221_v19 = vpop.permute.xlu0 %3615  ;;  %v4670_v40 = vsel %vm1124_vm0, %v11931_v7, 0.0  ;;  %v4891_v7 = vsel %vm1124_vm0, %v11947_v55, 0.0  ;;  %v4894_v55 = vsel %vm1124_vm0, %v11963_v51, 0.0 }
 0xa4a   : > { %3865 = vadd.xlane.f32.xlu1 %v3864_v41 }
 0xa4b   : > { %3644 = vadd.xlane.f32.xlu0 %v3643_v6  ;;  %v12229_v41 = vpop.permute.xlu1 %4749  ;;  %v12231_v6 = vpop.permute.xlu0 %4637 }
 0xa4e   : > { %4780 = vadd.xlane.f32.xlu1 %v4779_v8 }
 0xa4f   : > { %4889 = vadd.xlane.f32.xlu0 %v4888_v37  ;;  %v12237_v8 = vpop.permute.xlu1 %3725  ;;  %v12241_v50 = vpop.permute.xlu0 %4969  ;;  %v3649_v37 = vsel %vm1124_vm0, %v11955_v10, 0.0  ;;  %v3652_v10 = vsel %vm1124_vm0, %v11971_v52, 0.0  ;;  %v5003_v52 = vsel %vm1124_vm0, %v11987_v54, 0.0 }
 0xa52   : > { %3756 = vadd.xlane.f32.xlu1 %v3755_v17 }
 0xa53   : > { %3647 = vadd.xlane.f32.xlu0 %v3646_v11  ;;  %v12249_v17 = vpop.permute.xlu1 %4751  ;;  %v12251_v11 = vpop.permute.xlu0 %4639 }
 0xa56   : > { %4783 = vadd.xlane.f32.xlu1 %v4782_v48 }
 0xa57   : > { %4668 = vadd.xlane.f32.xlu0 %v4667_v58  ;;  %v12257_v48 = vpop.permute.xlu1 %3727  ;;  %v12261_v51 = vpop.permute.xlu0 %4971  ;;  %v4673_v58 = vsel %vm1124_vm0, %v11979_v21, 0.0  ;;  %v4676_v21 = vsel %vm1124_vm0, %v11995_v63, 0.0  ;;  %v4897_v63 = vsel %vm1124_vm0, %v12011_v0, 0.0 }
 0xa5a   : > { %3759 = vadd.xlane.f32.xlu1 %v3758_v49 }
 0xa5b   : > { %4998 = vadd.xlane.f32.xlu0 %v4997_v4  ;;  %v12269_v49 = vpop.permute.xlu1 %3505  ;;  %v12271_v4 = vpop.permute.xlu0 %4861 }
 0xa5e   : > { %3538 = vadd.xlane.f32.xlu1 %v3537_v22 }
 0xa5f   : > { %4671 = vadd.xlane.f32.xlu0 %v4670_v40  ;;  %v12277_v22 = vpop.permute.xlu1 %3837  ;;  %v12281_v54 = vpop.permute.xlu0 %3617  ;;  %v5006_v40 = vsel %vm1124_vm0, %v12003_v60, 0.0  ;;  %v3655_v60 = vsel %vm1124_vm0, %v12019_v23, 0.0 }
 0xa62   : > { %3868 = vadd.xlane.f32.xlu1 %v3867_v15 }
 0xa63   : > { %5001 = vadd.xlane.f32.xlu0 %v5000_v3  ;;  %v12289_v15 = vpop.permute.xlu1 %3507  ;;  %v12291_v3 = vpop.permute.xlu0 %4863 }
 0xa66   : > { %3541 = vadd.xlane.f32.xlu1 %v3540_v1 }
 0xa67   : > { %4892 = vadd.xlane.f32.xlu0 %v4891_v7  ;;  %v12297_v1 = vpop.permute.xlu1 %3839  ;;  %v12301_v0 = vpop.permute.xlu0 %3619  ;;  %v4900_v7 = vsel %vm1124_vm0, %v12027_v44, 0.0 }
 0xa6a   : > { %3871 = vadd.xlane.f32.xlu1 %v3870_v36  ;;  %v16130_v36 = vld [vmem:[#allocation26_spill] sm:$0xff] }
 0xa6b   : > { %3650 = vadd.xlane.f32.xlu0 %v3649_v37  ;;  %v3767_v57 = vsel %vm1124_vm0, %v16130_v36, 0.0  ;;  %v16131_v37 = vld [vmem:[#allocation78_spill] sm:$0xff]  ;;  %v16140_v36 = vld [vmem:[#allocation89_spill] sm:$0xff] }
 0xa6c   : > { %v3658_v23 = vsel %vm1124_vm0, %v16131_v37, 0.0 }
 0xa6e   : > { %4786 = vadd.xlane.f32.xlu1 %v4785_v53  ;;  %v12309_v53 = vpop.permute.xlu1 %4753 }
 0xa6f   : > { %4895 = vadd.xlane.f32.xlu0 %v4894_v55  ;;  %v12311_v55 = vpop.permute.xlu0 %4641 }
 0xa72   : > { %3762 = vadd.xlane.f32.xlu1 %v3761_v43  ;;  %v4794_v43 = vsel %vm1124_vm0, %v16132_v26, 0.0 }
 0xa73   : > { %3653 = vadd.xlane.f32.xlu0 %v3652_v10  ;;  %v16133_v10 = vld [vmem:[#allocation67_spill] sm:$0xff] }
 0xa74   : > { %v4679_v44 = vsel %vm1124_vm0, %v16133_v10, 0.0  ;;  %v16143_v10 = vld [vmem:[#allocation100_spill] sm:$0xff] }
 0xa76   : > { %4789 = vadd.xlane.f32.xlu1 %v4788_v16  ;;  %v12317_v16 = vpop.permute.xlu1 %3729 }
 0xa77   : > { %4674 = vadd.xlane.f32.xlu0 %v4673_v58  ;;  %v16134_v58 = vld [vmem:[#allocation86_spill] sm:$0xff] }
 0xa7a   : > { %3765 = vadd.xlane.f32.xlu1 %v3764_v13  ;;  %v3770_v13 = vsel %vm1124_vm0, %v16134_v58, 0.0  ;;  %v16144_v58 = vld [vmem:[#allocation82_spill] sm:$0xff] }
 0xa7b   : > { %5004 = vadd.xlane.f32.xlu0 %v5003_v52  ;;  %v12321_v52 = vpop.permute.xlu0 %4973 }
 0xa7e   : > { %3544 = vadd.xlane.f32.xlu1 %v3543_v39  ;;  %v16135_v39 = vld [vmem:[#allocation84_spill] sm:$0xff] }
 0xa7f   : > { %4677 = vadd.xlane.f32.xlu0 %v4676_v21  ;;  %v5009_v21 = vsel %vm1124_vm0, %v16135_v39, 0.0 }
 0xa82   : > { %3874 = vadd.xlane.f32.xlu1 %v3873_v32  ;;  %v16136_v32 = vld [vmem:[#allocation27_spill] sm:$0xff] }
 0xa83   : > { %5007 = vadd.xlane.f32.xlu0 %v5006_v40  ;;  %v3549_v40 = vsel %vm1124_vm0, %v16136_v32, 0.0  ;;  %v16147_v32 = vld [vmem:[#allocation94_spill] sm:$0xff] }
 0xa86   : > { %3547 = vadd.xlane.f32.xlu1 %v3546_v42  ;;  %v16137_v42 = vld [vmem:[#allocation75_spill] sm:$0xff] }
 0xa87   : > { %4898 = vadd.xlane.f32.xlu0 %v4897_v63  ;;  %v4682_v63 = vsel %vm1124_vm0, %v16137_v42, 0.0  ;;  %v16149_v42 = vld [vmem:[#allocation87_spill] sm:$0xff] }
 0xa8a   : > { %3877 = vadd.xlane.f32.xlu1 %v3876_v30  ;;  %v12329_v30 = vpop.permute.xlu1 %4755 }
 0xa8b   : > { %3656 = vadd.xlane.f32.xlu0 %v3655_v60  ;;  %v12331_v60 = vpop.permute.xlu0 %4643 }
 0xa8c   : > { %16138 = vst [vmem:[#allocation110_spill] sm:$0xff] %v12331_v60 }
 0xa8e   : > { %4792 = vadd.xlane.f32.xlu1 %v4791_v2  ;;  %v16139_v2 = vld [vmem:[#allocation28_spill] sm:$0xff]  ;;  %v12337_v37 = vpop.permute.xlu1 %3731 }
 0xa8f   : > { %4901 = vadd.xlane.f32.xlu0 %v4900_v7  ;;  %v3879_v7 = vsel %vm1124_vm0, %v16139_v2, 0.0  ;;  %16141 = vst [vmem:[#allocation32_spill] sm:$0xff] %v12337_v37  ;;  %v12341_v26 = vpop.permute.xlu0 %4975 }
 0xa90   : > { %16142 = vst [vmem:[#allocation103_spill] sm:$0xff] %v12341_v26 }
 0xa92   : > { %3768 = vadd.xlane.f32.xlu1 %v3767_v57  ;;  %v5012_v57 = vsel %vm1124_vm0, %v16140_v36, 0.0  ;;  %v12349_v39 = vpop.permute.xlu1 %3841 }
 0xa93   : > { %3659 = vadd.xlane.f32.xlu0 %v3658_v23  ;;  %v3552_v23 = vsel %vm1124_vm0, %v12081_v24, 0.0  ;;  %16145 = vst [vmem:[#allocation59_spill] sm:$0xff] %v12349_v39  ;;  %v4797_v24 = vsel %vm1124_vm0, %v12097_v9, 0.0 }
 0xa96   : > { %4795 = vadd.xlane.f32.xlu1 %v4794_v43  ;;  %v4903_v43 = vsel %vm1124_vm0, %v12075_v61, 0.0  ;;  %v4906_v61 = vsel %vm1124_vm0, %v16147_v32, 0.0 }
 0xa97   : > { %4680 = vadd.xlane.f32.xlu0 %v4679_v44  ;;  %v3882_v44 = vsel %vm1124_vm0, %v16143_v10, 0.0 }
 0xa9a   : > { %3771 = vadd.xlane.f32.xlu1 %v3770_v13  ;;  %v3661_v13 = vsel %vm1124_vm0, %v16144_v58, 0.0  ;;  %v3776_v58 = vsel %vm1124_vm0, %v12121_v31, 0.0 }
 0xa9b   : > { %5010 = vadd.xlane.f32.xlu0 %v5009_v21  ;;  %v12351_v21 = vpop.permute.xlu0 %4865 }
 0xa9c   : > { %16146 = vst [vmem:[#allocation116_spill] sm:$0xff] %v12351_v21 }
 0xa9e   : > { %3550 = vadd.xlane.f32.xlu1 %v3549_v40  ;;  %v12357_v40 = vpop.permute.xlu1 %3843 }
 0xa9f   : > { %4683 = vadd.xlane.f32.xlu0 %v4682_v63  ;;  %16148 = vst [vmem:[#allocation60_spill] sm:$0xff] %v12357_v40  ;;  %v3773_v63 = vsel %vm1124_vm0, %v16149_v42, 0.0  ;;  %v12361_v2 = vpop.permute.xlu0 %4867 }
 0xaa0   : > { %16150 = vst [vmem:[#allocation107_spill] sm:$0xff] %v12361_v2 }
 0xaa2   : > { %3880 = vadd.xlane.f32.xlu1 %v3879_v7  ;;  %v16151_v7 = vld [vmem:[#allocation96_spill] sm:$0xff]  ;;  %v12369_v10 = vpop.permute.xlu1 %4979 }
 0xaa3   : > { %5013 = vadd.xlane.f32.xlu0 %v5012_v57  ;;  %v3664_v36 = vsel %vm1124_vm0, %v16151_v7, 0.0  ;;  %v16152_v57 = vld [vmem:[#allocation30_spill] sm:$0xff]  ;;  %16154 = vst [vmem:[#allocation33_spill] sm:$0xff] %v12369_v10  ;;  %v3555_v7 = vsel %vm1124_vm0, %v12125_v29, 0.0 }
 0xaa4   : > { %v4800_v9 = vsel %vm1124_vm0, %v16152_v57, 0.0 }
 0xaa6   : > { %3553 = vadd.xlane.f32.xlu1 %v3552_v23  ;;  %v16153_v23 = vld [vmem:[#allocation29_spill] sm:$0xff] }
 0xaa7   : > { %4904 = vadd.xlane.f32.xlu0 %v4903_v43  ;;  %v4685_v43 = vsel %vm1124_vm0, %v16153_v23, 0.0 }
 0xaaa   : > { %3883 = vadd.xlane.f32.xlu1 %v3882_v44  ;;  %v12371_v44 = vpop.permute.xlu0 %4977 }
 0xaab   : > { %3662 = vadd.xlane.f32.xlu0 %v3661_v13  ;;  %16155 = vst [vmem:[#allocation57_spill] sm:$0xff] %v12371_v44  ;;  %v16156_v13 = vld [vmem:[#allocation99_spill] sm:$0xff] }
 0xaae   : > { %4798 = vadd.xlane.f32.xlu1 %v4797_v24  ;;  %v5015_v24 = vsel %vm1124_vm0, %v16156_v13, 0.0 }
 0xaaf   : > { %4907 = vadd.xlane.f32.xlu0 %v4906_v61 }
 0xab2   : > { %3774 = vadd.xlane.f32.xlu1 %v3773_v63 }
 0xab3   : > { %3665 = vadd.xlane.f32.xlu0 %v3664_v36  ;;  %v16157_v36 = vld [vmem:[#allocation93_spill] sm:$0xff] }
 0xab4   : > { %v4688_v57 = vsel %vm1124_vm0, %v16157_v36, 0.0  ;;  %v16159_v36 = vld [vmem:[#allocation104_spill] sm:$0xff] }
 0xab6   : > { %4801 = vadd.xlane.f32.xlu1 %v4800_v9 }
 0xab7   : > { %4686 = vadd.xlane.f32.xlu0 %v4685_v43  ;;  %v3885_v43 = vsel %vm1124_vm0, %v12129_v28, 0.0 }
 0xaba   : > { %3777 = vadd.xlane.f32.xlu1 %v3776_v58  ;;  %v16158_v58 = vld [vmem:[#allocation111_spill] sm:$0xff] }
 0xabb   : > { %5016 = vadd.xlane.f32.xlu0 %v5015_v24  ;;  %v3639_v32 = vpop.xlane.xlu1 %3638  ;;  %v5018_v13 = vsel %vm1124_vm0, %v16158_v58, 0.0 }
 0xabc   : > { %v3527_v61 = vpop.xlane.xlu0 %3526  ;;  %v3685_v42 = vmul.f32 0.17677669, %v3639_v32 }
 0xabd   : > { %v3573_v63 = vmul.f32 0.17677669, %v3527_v61 }
 0xabe   : > { %3556 = vadd.xlane.f32.xlu1 %v3555_v7  ;;  %v3558_v7 = vsel %vm1124_vm0, %v12133_v18, 0.0  ;;  %v16161_v18 = vld [vmem:[#allocation106_spill] sm:$0xff] }
 0xabf   : > { %4689 = vadd.xlane.f32.xlu0 %v4688_v57  ;;  %v3925_v9 = vmax.f32 %v3573_v63, %v3685_v42  ;;  %v4775_v23 = vpop.xlane.xlu1 %4774  ;;  %v4909_v57 = vsel %vm1124_vm0, %v16159_v36, 0.0  ;;  %v3667_v10 = vsel %vm1124_vm0, %v16161_v18, 0.0 }
 0xac0   : > { %v3530_v31 = vpop.xlane.xlu0 %3529  ;;  %v12397_v44 = vmul.f32 0.17677669, %v4775_v23  ;;  %v4803_v23 = vsel %vm1124_vm0, %v12149_v38, 0.0 }
 0xac1   : > { %v12385_v61 = vmul.f32 0.17677669, %v3530_v31 }
 0xac2   : > { %3886 = vadd.xlane.f32.xlu1 %v3885_v43 }
 0xac3   : > { %5019 = vadd.xlane.f32.xlu0 %v5018_v13  ;;  %v4666_v24 = vpop.xlane.xlu1 %4665 }
 0xac4   : > { %v3642_v32 = vpop.xlane.xlu0 %3641 }
 0xac5   : > { %v12387_v29 = vmul.f32 0.17677669, %v3642_v32  ;;  %v16160_v32 = vld [vmem:[#allocation31_spill] sm:$0xff] }
 0xac6   : > { %3559 = vadd.xlane.f32.xlu1 %v3558_v7  ;;  %v3888_v2 = vsel %vm1124_vm0, %v16160_v32, 0.0 }
 0xac7   : > { %v3926_v28 = vmax.f32 %v12385_v61, %v12387_v29  ;;  %4910 = vadd.xlane.f32.xlu0 %v4909_v57  ;;  %v3754_v58 = vpop.xlane.xlu1 %3753 }
 0xac8   : > { %v4663_v43 = vpop.xlane.xlu0 %4662  ;;  %v12395_v13 = vmul.f32 0.17677669, %v3754_v58 }
 0xac9   : > { %v12399_v31 = vmul.f32 0.17677669, %v4663_v43  ;;  %v16162_v43 = vld [vmem:[#allocation97_spill] sm:$0xff] }
 0xaca   : > { %v3942_v7 = vmax.f32 %v3926_v28, %v12395_v13  ;;  %3889 = vadd.xlane.f32.xlu1 %v3888_v2  ;;  %v4912_v40 = vsel %vm1124_vm0, %v16162_v43, 0.0  ;;  %v12412_v2 = vmul.f32 0.17677669, %v4666_v24 }
 0xacb   : > { %3668 = vadd.xlane.f32.xlu0 %v3667_v10  ;;  %v3533_v57 = vpop.xlane.xlu1 %3532  ;;  %v3779_v10 = vsel %vm1124_vm0, %v12157_v12, 0.0 }
 0xacc   : > { %v3751_v58 = vpop.xlane.xlu0 %3750 }
 0xacd   : > { %v3797_v21 = vmul.f32 0.17677669, %v3751_v58  ;;  %v3670_v58 = vsel %vm1124_vm0, %v12141_v45, 0.0  ;;  %v4691_v45 = vsel %vm1124_vm0, %v12151_v14, 0.0 }
 0xace   : > { %4804 = vadd.xlane.f32.xlu1 %v4803_v23 }
 0xacf   : > { %v3941_v32 = vmax.f32 %v3925_v9, %v3797_v21  ;;  %4913 = vadd.xlane.f32.xlu0 %v4912_v40  ;;  %v3863_v18 = vpop.xlane.xlu1 %3862 }
 0xad0   : > { %v4778_v26 = vpop.xlane.xlu0 %4777  ;;  %v3909_v28 = vmul.f32 0.17677669, %v3863_v18 }
 0xad1   : > { %v12414_v60 = vmul.f32 0.17677669, %v4778_v26  ;;  %v4806_v26 = vsel %vm1124_vm0, %v12169_v33, 0.0 }
 0xad2   : > { %v3957_v38 = vmax.f32 %v3941_v32, %v3909_v28  ;;  %3780 = vadd.xlane.f32.xlu1 %v3779_v10 }
 0xad3   : > { %v5062_v23 = vmax.f32 %v12412_v2, %v12414_v60  ;;  %3671 = vadd.xlane.f32.xlu0 %v3670_v58  ;;  %v3536_v40 = vpop.xlane.xlu1 %3535 }
 0xad4   : > { %v4887_v9 = vpop.xlane.xlu0 %4886  ;;  %v3973_v43 = vsub.f32 %v3573_v63, %v3957_v38  ;;  %v4021_v18 = vsub.f32 %v3685_v42, %v3957_v38  ;;  %v4069_v24 = vsub.f32 %v3797_v21, %v3957_v38  ;;  %v4117_v36 = vsub.f32 %v3909_v28, %v3957_v38 }
 0xad5   : > { %v3782_v42 = vsel %vm1124_vm0, %v12177_v27, 0.0  ;;  %v12428_v21 = vmul.f32 0.17677669, %v3533_v57  ;;  %v5021_v28 = vsel %vm1124_vm0, %v12161_v34, 0.0  ;;  %v3561_v34 = vsel %vm1124_vm0, %v12189_v25, 0.0 }
 0xad6   : > { %v3989_v39 = vmul.f32 1.442695, %v3973_v43  ;;  %v4037_v12 = vmul.f32 1.442695, %v4021_v18  ;;  %4807 = vadd.xlane.f32.xlu1 %v4806_v26  ;;  %v4085_v32 = vmul.f32 1.442695, %v4069_v24 }
 0xad7   : > { %4692 = vadd.xlane.f32.xlu0 %v4691_v45  ;;  %v3866_v10 = vpop.xlane.xlu1 %3865  ;;  %v4133_v63 = vmul.f32 1.442695, %v4117_v36 }
 0xad8   : > { %8174 = vpow2.f32 %v3989_v39  ;;  %v3645_v58 = vpop.xlane.xlu0 %3644  ;;  %v3910_v37 = vmul.f32 0.17677669, %v3866_v10 }
 0xad9   : > { %8176 = vpow2.f32 %v4037_v12  ;;  %v12430_v33 = vmul.f32 0.17677669, %v3645_v58  ;;  %v4694_v12 = vsel %vm1124_vm0, %v12171_v47, 0.0  ;;  %v5024_v47 = vsel %vm1124_vm0, %v12181_v56, 0.0 }
 0xada   : > { %v3958_v14 = vmax.f32 %v3942_v7, %v3910_v37  ;;  %3783 = vadd.xlane.f32.xlu1 %v3782_v42  ;;  %8178 = vpow2.f32 %v4085_v32  ;;  %v12450_v32 = vmul.f32 0.17677669, %v3536_v40  ;;  %v4933_v56 = vmul.f32 0.17677669, %v4887_v9 }
 0xadb   : > { %v3927_v39 = vmax.f32 %v12428_v21, %v12430_v33  ;;  %5022 = vadd.xlane.f32.xlu0 %v5021_v28  ;;  %v4781_v38 = vpop.xlane.xlu1 %4780  ;;  %8180 = vpow2.f32 %v4133_v63  ;;  %v3564_v28 = vsel %vm1124_vm0, %v12209_v46, 0.0 }
 0xadc   : > { %v4890_v43 = vpop.xlane.xlu0 %4889  ;;  %v3974_v27 = vsub.f32 %v12385_v61, %v3958_v14  ;;  %v4022_v57 = vsub.f32 %v12387_v29, %v3958_v14  ;;  %v4070_v36 = vsub.f32 %v12395_v13, %v3958_v14  ;;  %v4118_v24 = vsub.f32 %v3910_v37, %v3958_v14 }
 0xadd   : > { %v12439_v18 = vmul.f32 0.17677669, %v4890_v43  ;;  %v3891_v37 = vsel %vm1124_vm0, %v12197_v5, 0.0  ;;  %v12470_v43 = vmul.f32 0.17677669, %v4781_v38 }
 0xade   : > { %v3991_v7 = vmul.f32 1.442695, %v3974_v27  ;;  %v4039_v26 = vmul.f32 1.442695, %v4022_v57  ;;  %3562 = vadd.xlane.f32.xlu1 %v3561_v34  ;;  %v4087_v61 = vmul.f32 1.442695, %v4070_v36 }
 0xadf   : > { %v12446_v45 = vmax.f32 %v5062_v23, %v12439_v18  ;;  %4695 = vadd.xlane.f32.xlu0 %v4694_v12  ;;  %v3757_v29 = vpop.xlane.xlu1 %3756  ;;  %v4135_v25 = vmul.f32 1.442695, %v4118_v24  ;;  %v4915_v36 = vsel %vm1124_vm0, %v12191_v59, 0.0  ;;  %v3894_v59 = vsel %vm1124_vm0, %v12217_v35, 0.0 }
 0xae0   : > { %8182 = vpow2.f32 %v3991_v7  ;;  %v3648_v13 = vpop.xlane.xlu0 %3647 }
 0xae1   : > { %8184 = vpow2.f32 %v4039_v26  ;;  %v12452_v10 = vmul.f32 0.17677669, %v3648_v13  ;;  %v16163_v26 = vmax.f32 %v12399_v31, %v12397_v44 }
 0xae2   : > { %v12454_v58 = vpop.eup %8174  ;;  %3892 = vadd.xlane.f32.xlu1 %v3891_v37  ;;  %8186 = vpow2.f32 %v4087_v61  ;;  %v3673_v37 = vsel %vm1124_vm0, %v12201_v62, 0.0  ;;  %v4809_v62 = vsel %vm1124_vm0, %v12229_v41, 0.0 }
 0xae3   : > { %v12458_v23 = vpop.eup %8176  ;;  %v3928_v42 = vmax.f32 %v12450_v32, %v12452_v10  ;;  %5025 = vadd.xlane.f32.xlu0 %v5024_v47  ;;  %v12462_v5 = vpop.xlane.xlu1 %4783  ;;  %8188 = vpow2.f32 %v4135_v25  ;;  %v5077_v12 = vmax.f32 %v16163_v26, %v4933_v56 }
 0xae4   : > { %v4165_v40 = vadd.f32 %v12458_v23, %v12454_v58  ;;  %v4669_v63 = vpop.xlane.xlu0 %4668  ;;  %v12468_v14 = vpop.eup %8178 }
 0xae5   : > { %v12472_v27 = vmul.f32 0.17677669, %v4669_v63  ;;  %v12477_v24 = vpop.eup %8180 }
 0xae6   : > { %v4181_v57 = vadd.f32 %v12468_v14, %v4165_v40  ;;  %3565 = vadd.xlane.f32.xlu1 %v3564_v28 }
 0xae7   : > { %4916 = vadd.xlane.f32.xlu0 %v4915_v36  ;;  %v3760_v46 = vpop.xlane.xlu1 %3759 }
 0xae8   : > { %v4197_v9 = vadd.f32 %v12477_v24, %v4181_v57  ;;  %v4999_v7 = vpop.xlane.xlu0 %4998  ;;  %v12482_v38 = vmul.f32 0.17677669, %v3760_v46  ;;  %v12502_v57 = vmul.f32 0.17677669, %v3757_v29 }
 0xae9   : > { %v5045_v61 = vmul.f32 0.17677669, %v4999_v7 }
 0xaea   : > { %v12489_v13 = vpop.eup %8182  ;;  %v12494_v25 = vmax.f32 %v3928_v42, %v12482_v38  ;;  %3895 = vadd.xlane.f32.xlu1 %v3894_v59  ;;  %8190 = vrcp.f32 %v4197_v9 }
 0xaeb   : > { %v12496_v47 = vpop.eup %8184  ;;  %v5093_v40 = vmax.f32 %v5077_v12, %v5045_v61  ;;  %3674 = vadd.xlane.f32.xlu0 %v3673_v37  ;;  %v12498_v63 = vpop.xlane.xlu1 %3538  ;;  %v4918_v12 = vsel %vm1124_vm0, %v12211_v20, 0.0 }
 0xaec   : > { %v4166_v28 = vadd.f32 %v12496_v47, %v12489_v13  ;;  %v12504_v35 = vpop.xlane.xlu0 %4671  ;;  %v12508_v36 = vpop.eup %8186 }
 0xaed   : > { %v5109_v42 = vsub.f32 %v12399_v31, %v5093_v40  ;;  %v5157_v46 = vsub.f32 %v12397_v44, %v5093_v40  ;;  %v5205_v7 = vsub.f32 %v4933_v56, %v5093_v40  ;;  %v12515_v29 = vpop.eup %8188  ;;  %v5253_v34 = vsub.f32 %v5045_v61, %v5093_v40 }
 0xaee   : > { %v4182_v26 = vadd.f32 %v12508_v36, %v4166_v28  ;;  %4810 = vadd.xlane.f32.xlu1 %v4809_v62  ;;  %v3943_v44 = vmax.f32 %v3927_v39, %v12502_v57  ;;  %v3785_v62 = vsel %vm1124_vm0, %v12237_v8, 0.0  ;;  %v3676_v61 = vsel %vm1124_vm0, %v12221_v19, 0.0 }
 0xaef   : > { %v5125_v59 = vmul.f32 1.442695, %v5109_v42  ;;  %v5173_v37 = vmul.f32 1.442695, %v5157_v46  ;;  %4919 = vadd.xlane.f32.xlu0 %v4918_v12  ;;  %v3869_v41 = vpop.xlane.xlu1 %3868  ;;  %v5221_v28 = vmul.f32 1.442695, %v5205_v7 }
 0xaf0   : > { %v4198_v9 = vadd.f32 %v12515_v29, %v4182_v26  ;;  %v5002_v31 = vpop.xlane.xlu0 %5001  ;;  %v3911_v56 = vmul.f32 0.17677669, %v3869_v41  ;;  %v5269_v42 = vmul.f32 1.442695, %v5253_v34  ;;  %v4812_v8 = vsel %vm1124_vm0, %v12249_v17, 0.0 }
 0xaf1   : > { %8192 = vpow2.f32 %v5125_v59  ;;  %v5046_v20 = vmul.f32 0.17677669, %v5002_v31  ;;  %v4697_v41 = vsel %vm1124_vm0, %v12231_v6, 0.0 }
 0xaf2   : > { %8194 = vrcp.f32 %v4198_v9  ;;  %v3959_v40 = vmax.f32 %v3943_v44, %v3911_v56  ;;  %3786 = vadd.xlane.f32.xlu1 %v3785_v62 }
 0xaf3   : > { %8196 = vpow2.f32 %v5173_v37  ;;  %v5094_v46 = vmax.f32 %v12446_v45, %v5046_v20  ;;  %3677 = vadd.xlane.f32.xlu0 %v3676_v61  ;;  %v12527_v39 = vpop.xlane.xlu1 %3541 }
 0xaf4   : > { %v12529_v26 = vpop.xlane.xlu0 %4892  ;;  %v3975_v7 = vsub.f32 %v12428_v21, %v3959_v40  ;;  %v4023_v12 = vsub.f32 %v12430_v33, %v3959_v40  ;;  %8198 = vpow2.f32 %v5221_v28  ;;  %v4071_v37 = vsub.f32 %v12502_v57, %v3959_v40  ;;  %v8191_v21 = vpop.eup %8190 }
 0xaf5   : > { %v5110_v19 = vsub.f32 %v12412_v2, %v5094_v46  ;;  %v5158_v59 = vsub.f32 %v12414_v60, %v5094_v46  ;;  %v5206_v34 = vsub.f32 %v12439_v18, %v5094_v46  ;;  %v5254_v45 = vsub.f32 %v5046_v20, %v5094_v46 }
 0xaf6   : > { %4813 = vadd.xlane.f32.xlu1 %v4812_v8  ;;  %8200 = vpow2.f32 %v5269_v42  ;;  %v3993_v44 = vmul.f32 1.442695, %v3975_v7  ;;  %v5027_v60 = vsel %vm1124_vm0, %v12241_v50, 0.0  ;;  %v3788_v18 = vsel %vm1124_vm0, %v12257_v48, 0.0 }
 0xaf7   : > { %v5127_v33 = vmul.f32 1.442695, %v5110_v19  ;;  %v5175_v9 = vmul.f32 1.442695, %v5158_v59  ;;  %4698 = vadd.xlane.f32.xlu0 %v4697_v41  ;;  %v3872_v17 = vpop.xlane.xlu1 %3871  ;;  %v5223_v31 = vmul.f32 1.442695, %v5206_v34  ;;  %v4119_v28 = vsub.f32 %v3911_v56, %v3959_v40 }
 0xaf8   : > { %v12541_v2 = vpop.xlane.xlu0 %3650  ;;  %v5271_v57 = vmul.f32 1.442695, %v5254_v45  ;;  %v4041_v6 = vmul.f32 1.442695, %v4023_v12  ;;  %v3912_v20 = vmul.f32 0.17677669, %v3872_v17  ;;  %v12548_v62 = vmul.f32 %v8191_v21, %v12468_v14 }
 0xaf9   : > { %8202 = vpow2.f32 %v5127_v33  ;;  %v12551_v61 = vmul.f32 %v8191_v21, %v12458_v23  ;;  %v4089_v50 = vmul.f32 1.442695, %v4071_v37  ;;  %v12558_v48 = vmul.f32 %v8191_v21, %v12477_v24 }
 0xafa   : > { %8204 = vpow2.f32 %v5175_v9  ;;  %3789 = vadd.xlane.f32.xlu1 %v3788_v18  ;;  %v12561_v56 = vmul.f32 %v8191_v21, %v12454_v58  ;;  %v3960_v23 = vmax.f32 %v12494_v25, %v3912_v20  ;;  %v4700_v7 = vsel %vm1124_vm0, %v12251_v11, 0.0 }
 0xafb   : > { %v12553_v42 = vpop.eup %8192  ;;  %8206 = vpow2.f32 %v3993_v44  ;;  %5028 = vadd.xlane.f32.xlu0 %v5027_v60  ;;  %v12555_v46 = vpop.xlane.xlu1 %4786  ;;  %v4137_v8 = vmul.f32 1.442695, %v4119_v28  ;;  %v3567_v24 = vsel %vm1124_vm0, %v12269_v49, 0.0  ;;  %v4935_v28 = vmul.f32 0.17677669, %v12529_v26 }
 0xafc   : > { %16164 = vst [vmem:[#allocation35_spill] sm:$0xff] %v12561_v56  ;;  %v8195_v40 = vpop.eup %8194  ;;  %8208 = vpow2.f32 %v5223_v31  ;;  %v12563_v14 = vpop.xlane.xlu0 %4895  ;;  %v3976_v59 = vsub.f32 %v12450_v32, %v3960_v23  ;;  %v4024_v25 = vsub.f32 %v12452_v10, %v3960_v23  ;;  %v4072_v34 = vsub.f32 %v12482_v38, %v3960_v23 }
 0xafd   : > { %v12568_v12 = vpop.eup %8196  ;;  %8210 = vpow2.f32 %v4041_v6  ;;  %v12573_v19 = vmul.f32 %v8195_v40, %v12496_v47  ;;  %v4120_v45 = vsub.f32 %v3912_v20, %v3960_v23  ;;  %v3897_v10 = vsel %vm1124_vm0, %v12277_v22, 0.0 }
 0xafe   : > { %v5301_v58 = vadd.f32 %v12568_v12, %v12553_v42  ;;  %8212 = vpow2.f32 %v5271_v57  ;;  %3568 = vadd.xlane.f32.xlu1 %v3567_v24  ;;  %v12579_v11 = vpop.eup %8198  ;;  %v3995_v37 = vmul.f32 1.442695, %v3976_v59  ;;  %v4043_v41 = vmul.f32 1.442695, %v4024_v25 }
 0xaff   : > { %8214 = vpow2.f32 %v4089_v50  ;;  %4701 = vadd.xlane.f32.xlu0 %v4700_v7  ;;  %v12582_v49 = vpop.xlane.xlu1 %3762  ;;  %v4091_v32 = vmul.f32 1.442695, %v4072_v34  ;;  %v5030_v38 = vsel %vm1124_vm0, %v12261_v51, 0.0  ;;  %v12595_v44 = vmul.f32 %v8195_v40, %v12508_v36 }
 0xb00   : > { %v5317_v47 = vadd.f32 %v12579_v11, %v5301_v58  ;;  %v12585_v21 = vpop.xlane.xlu0 %3653  ;;  %v12587_v33 = vpop.eup %8200  ;;  %8216 = vpow2.f32 %v4137_v8  ;;  %v4139_v31 = vmul.f32 1.442695, %v4120_v45  ;;  %v12602_v18 = vmul.f32 %v8195_v40, %v12515_v29 }
 0xb01   : > { %8218 = vpow2.f32 %v3995_v37  ;;  %v12609_v51 = vmul.f32 %v8195_v40, %v12489_v13  ;;  %v3570_v29 = vsel %vm1124_vm0, %v12289_v15, 0.0  ;;  %v4921_v50 = vsel %vm1124_vm0, %v12271_v4, 0.0 }
 0xb02   : > { %v5333_v9 = vadd.f32 %v12587_v33, %v5317_v47  ;;  %3898 = vadd.xlane.f32.xlu1 %v3897_v10  ;;  %8220 = vpow2.f32 %v4043_v41  ;;  %v12630_v26 = vmul.f32 0.17677669, %v12504_v35  ;;  %v3679_v4 = vsel %vm1124_vm0, %v12281_v54, 0.0 }
 0xb03   : > { %v12597_v17 = vpop.eup %8202  ;;  %5031 = vadd.xlane.f32.xlu0 %v5030_v38  ;;  %v12599_v60 = vpop.xlane.xlu1 %4789  ;;  %16165 = vst [vmem:[#allocation115_spill] sm:$0xff] %v12609_v51  ;;  %v3900_v24 = vsel %vm1124_vm0, %v12297_v1, 0.0  ;;  %v16166_v25 = vmax.f32 %v12472_v27, %v12470_v43  ;;  %v4924_v45 = vsel %vm1124_vm0, %v12291_v3, 0.0  ;;  %v12647_v47 = vmul.f32 0.17677669, %v12462_v5 }
 0xb04   : > { %v12604_v22 = vpop.eup %8204  ;;  %8222 = vrcp.f32 %v5333_v9  ;;  %v12606_v57 = vpop.xlane.xlu0 %4674  ;;  %v12651_v37 = vmul.f32 0.17677669, %v12541_v2  ;;  %v4815_v1 = vsel %vm1124_vm0, %v12309_v53, 0.0  ;;  %v12661_v10 = vmul.f32 0.17677669, %v12563_v14 }
 0xb05   : > { %v12611_v36 = vpop.eup %8206  ;;  %v5302_v6 = vadd.f32 %v12604_v22, %v12597_v17  ;;  %8224 = vpow2.f32 %v4091_v32  ;;  %v5079_v34 = vmax.f32 %v16166_v25, %v4935_v28  ;;  %v12658_v32 = vmul.f32 0.17677669, %v12498_v63 }
 0xb06   : > { %v12618_v20 = vpop.eup %8208  ;;  %3571 = vadd.xlane.f32.xlu1 %v3570_v29  ;;  %8226 = vpow2.f32 %v4139_v31  ;;  %v3682_v2 = vsel %vm1124_vm0, %v12301_v0, 0.0  ;;  %v5064_v53 = vmax.f32 %v12630_v26, %v12647_v47  ;;  %v12673_v63 = vmul.f32 0.17677669, %v12582_v49 }
 0xb07   : > { %v12622_v23 = vpop.eup %8210  ;;  %v5318_v13 = vadd.f32 %v12618_v20, %v5302_v6  ;;  %4922 = vadd.xlane.f32.xlu0 %v4921_v50  ;;  %v12625_v40 = vpop.xlane.xlu1 %3765  ;;  %v3791_v49 = vsel %vm1124_vm0, %v12317_v16, 0.0 }
 0xb08   : > { %v12627_v7 = vpop.eup %8212  ;;  %v4167_v15 = vadd.f32 %v12622_v23, %v12611_v36  ;;  %v5005_v8 = vpop.xlane.xlu0 %5004 }
 0xb09   : > { %v12638_v58 = vpop.eup %8214  ;;  %v5334_v59 = vadd.f32 %v12627_v7, %v5318_v13  ;;  %v5047_v35 = vmul.f32 0.17677669, %v5005_v8 }
 0xb0a   : > { %v4183_v54 = vadd.f32 %v12638_v58, %v4167_v15  ;;  %3901 = vadd.xlane.f32.xlu1 %v3900_v24  ;;  %v12655_v41 = vpop.eup %8216  ;;  %v3929_v15 = vmax.f32 %v12658_v32, %v12651_v37 }
 0xb0b   : > { %v5095_v3 = vmax.f32 %v5079_v34, %v5047_v35  ;;  %3680 = vadd.xlane.f32.xlu0 %v3679_v4  ;;  %v12663_v5 = vpop.xlane.xlu1 %3544  ;;  %v12667_v9 = vpop.eup %8218  ;;  %8228 = vrcp.f32 %v5334_v59 }
 0xb0c   : > { %v4199_v38 = vadd.f32 %v12655_v41, %v4183_v54  ;;  %v12675_v14 = vpop.xlane.xlu0 %4677  ;;  %v12677_v31 = vpop.eup %8220  ;;  %v3945_v34 = vmax.f32 %v3929_v15, %v12673_v63 }
 0xb0d   : > { %v5111_v6 = vsub.f32 %v12472_v27, %v5095_v3  ;;  %v5159_v29 = vsub.f32 %v12470_v43, %v5095_v3  ;;  %v5207_v0 = vsub.f32 %v4935_v28, %v5095_v3  ;;  %v5255_v50 = vsub.f32 %v5047_v35, %v5095_v3 }
 0xb0e   : > { %v8223_v13 = vpop.eup %8222  ;;  %8230 = vrcp.f32 %v4199_v38  ;;  %v4168_v8 = vadd.f32 %v12677_v31, %v12667_v9  ;;  %4816 = vadd.xlane.f32.xlu1 %v4815_v1  ;;  %v5080_v27 = vmax.f32 %v5064_v53, %v12661_v10 }
 0xb0f   : > { %v12687_v4 = vpop.eup %8224  ;;  %v5129_v24 = vmul.f32 1.442695, %v5111_v6  ;;  %v5177_v43 = vmul.f32 1.442695, %v5159_v29  ;;  %4925 = vadd.xlane.f32.xlu0 %v4924_v45  ;;  %v3875_v28 = vpop.xlane.xlu1 %3874  ;;  %v12691_v59 = vmul.f32 %v8223_v13, %v12568_v12  ;;  %v5225_v35 = vmul.f32 1.442695, %v5207_v0 }
 0xb10   : > { %v4184_v25 = vadd.f32 %v12687_v4, %v4168_v8  ;;  %v5008_v54 = vpop.xlane.xlu0 %5007  ;;  %v12695_v1 = vmul.f32 0.17677669, %v3875_v28  ;;  %v12697_v16 = vpop.eup %8226  ;;  %v5273_v3 = vmul.f32 1.442695, %v5255_v50  ;;  %v12702_v45 = vmul.f32 %v8223_v13, %v12579_v11 }
 0xb11   : > { %8232 = vpow2.f32 %v5129_v24  ;;  %v12699_v53 = vmul.f32 0.17677669, %v5008_v54  ;;  %v12709_v6 = vmul.f32 %v8223_v13, %v12587_v33  ;;  %v3690_v29 = vmul.f32 0.17677669, %v12585_v21 }
 0xb12   : > { %v4200_v12 = vadd.f32 %v12697_v16, %v4184_v25  ;;  %8234 = vpow2.f32 %v5177_v43  ;;  %v12706_v38 = vmax.f32 %v3945_v34, %v12695_v1  ;;  %3792 = vadd.xlane.f32.xlu1 %v3791_v49  ;;  %v12718_v11 = vmul.f32 %v8223_v13, %v12553_v42  ;;  %v16168_v25 = vld [vmem:[#allocation32_spill] sm:$0xff] }
 0xb13   : > { %v12713_v0 = vmax.f32 %v5080_v27, %v12699_v53  ;;  %3683 = vadd.xlane.f32.xlu0 %v3682_v2  ;;  %v12715_v50 = vpop.xlane.xlu1 %3547  ;;  %8236 = vpow2.f32 %v5225_v35  ;;  %v4818_v33 = vsel %vm1124_vm0, %v12329_v30, 0.0  ;;  %v3578_v21 = vmul.f32 0.17677669, %v12527_v39 }
 0xb14   : > { %16167 = vst [vmem:[#allocation26_spill] sm:$0xff] %v12718_v11  ;;  %v12720_v15 = vpop.xlane.xlu0 %4898  ;;  %v3977_v8 = vsub.f32 %v12658_v32, %v12706_v38  ;;  %8238 = vrcp.f32 %v4200_v12  ;;  %v12728_v49 = vmul.f32 0.17677669, %v12625_v40  ;;  %v4703_v32 = vsel %vm1124_vm0, %v12311_v55, 0.0 }
 0xb15   : > { %v5112_v2 = vsub.f32 %v12630_v26, %v12713_v0  ;;  %v12732_v42 = vpop.eup %8228  ;;  %8240 = vpow2.f32 %v5273_v3  ;;  %v5160_v13 = vsub.f32 %v12647_v47, %v12713_v0  ;;  %v3930_v30 = vmax.f32 %v3578_v21, %v3690_v29 }
 0xb16   : > { %4819 = vadd.xlane.f32.xlu1 %v4818_v33  ;;  %v4025_v39 = vsub.f32 %v12651_v37, %v12706_v38  ;;  %v3997_v24 = vmul.f32 1.442695, %v3977_v8  ;;  %v5033_v47 = vsel %vm1124_vm0, %v12321_v52, 0.0  ;;  %v3794_v55 = vsel %vm1124_vm0, %v16168_v25, 0.0 }
 0xb17   : > { %4704 = vadd.xlane.f32.xlu0 %v4703_v32  ;;  %v3878_v40 = vpop.xlane.xlu1 %3877  ;;  %v3946_v43 = vmax.f32 %v3930_v30, %v12728_v49  ;;  %v5131_v28 = vmul.f32 1.442695, %v5112_v2  ;;  %v5179_v34 = vmul.f32 1.442695, %v5160_v13  ;;  %v12753_v37 = vmul.f32 %v12732_v42, %v12604_v22 }
 0xb18   : > { %v12740_v27 = vpop.eup %8230  ;;  %v12742_v26 = vpop.xlane.xlu0 %3656  ;;  %v12749_v35 = vmul.f32 0.17677669, %v3878_v40  ;;  %v4045_v12 = vmul.f32 1.442695, %v4025_v39  ;;  %v12765_v8 = vmul.f32 %v12732_v42, %v12618_v20  ;;  %8242 = vpow2.f32 %v3997_v24 }
 0xb19   : > { %v12757_v54 = vmul.f32 %v12740_v27, %v12622_v23  ;;  %v16169_v23 = vld [vmem:[#allocation59_spill] sm:$0xff]  ;;  %8244 = vpow2.f32 %v5131_v28  ;;  %v5208_v30 = vsub.f32 %v12661_v10, %v12713_v0  ;;  %v4073_v20 = vsub.f32 %v12673_v63, %v12706_v38 }
 0xb1a   : > { %3795 = vadd.xlane.f32.xlu1 %v3794_v55  ;;  %v12772_v22 = vmax.f32 %v3946_v43, %v12749_v35  ;;  %v3903_v13 = vsel %vm1124_vm0, %v16169_v23, 0.0  ;;  %8246 = vpow2.f32 %v5179_v34  ;;  %v16170_v43 = vld [vmem:[#allocation110_spill] sm:$0xff]  ;;  %v16171_v10 = vld [vmem:[#allocation103_spill] sm:$0xff] }
 0xb1b   : > { %v12759_v3 = vpop.eup %8232  ;;  %5034 = vadd.xlane.f32.xlu0 %v5033_v47  ;;  %v12761_v52 = vpop.xlane.xlu1 %4792  ;;  %v4706_v47 = vsel %vm1124_vm0, %v16170_v43, 0.0  ;;  %8248 = vpow2.f32 %v4045_v12  ;;  %v5036_v55 = vsel %vm1124_vm0, %v16171_v10, 0.0  ;;  %v4093_v10 = vmul.f32 1.442695, %v4073_v20 }
 0xb1c   : > { %v12767_v33 = vpop.eup %8234  ;;  %v12769_v2 = vpop.xlane.xlu0 %4901  ;;  %v3978_v40 = vsub.f32 %v3578_v21, %v12772_v22  ;;  %v4026_v24 = vsub.f32 %v3690_v29, %v12772_v22  ;;  %v4074_v29 = vsub.f32 %v12728_v49, %v12772_v22  ;;  %v12809_v49 = vmul.f32 %v12740_v27, %v12638_v58 }
 0xb1d   : > { %v5303_v32 = vadd.f32 %v12767_v33, %v12759_v3  ;;  %v12782_v39 = vpop.eup %8236 }
 0xb1e   : > { %3904 = vadd.xlane.f32.xlu1 %v3903_v13  ;;  %v8239_v25 = vpop.eup %8238  ;;  %v3999_v34 = vmul.f32 1.442695, %v3978_v40  ;;  %v4047_v21 = vmul.f32 1.442695, %v4026_v24  ;;  %v16172_v13 = vld [vmem:[#allocation60_spill] sm:$0xff] }
 0xb1f   : > { %v5319_v28 = vadd.f32 %v12782_v39, %v5303_v32  ;;  %4707 = vadd.xlane.f32.xlu0 %v4706_v47  ;;  %v12791_v63 = vpop.xlane.xlu1 %3768  ;;  %v12793_v23 = vpop.eup %8240  ;;  %v3906_v43 = vsel %vm1124_vm0, %v16172_v13, 0.0  ;;  %v5227_v32 = vmul.f32 1.442695, %v5208_v30  ;;  %v5256_v47 = vsub.f32 %v12699_v53, %v12713_v0 }
 0xb20   : > { %v12797_v11 = vpop.xlane.xlu0 %3659  ;;  %8250 = vpow2.f32 %v3999_v34  ;;  %v12805_v40 = vmul.f32 %v8239_v25, %v12677_v31  ;;  %v12812_v24 = vmul.f32 %v8239_v25, %v12687_v4  ;;  %v12815_v13 = vmul.f32 0.17677669, %v12606_v57  ;;  %v16173_v57 = vld [vmem:[#allocation116_spill] sm:$0xff] }
 0xb21   : > { %v5335_v12 = vadd.f32 %v12793_v23, %v5319_v28  ;;  %v4121_v53 = vsub.f32 %v12695_v1, %v12706_v38  ;;  %v12823_v31 = vmul.f32 %v12732_v42, %v12627_v7  ;;  %v4095_v58 = vmul.f32 1.442695, %v4074_v29  ;;  %v16174_v38 = vld [vmem:[#allocation33_spill] sm:$0xff] }
 0xb22   : > { %3907 = vadd.xlane.f32.xlu1 %v3906_v43  ;;  %v4122_v4 = vsub.f32 %v12749_v35, %v12772_v22  ;;  %v4927_v20 = vsel %vm1124_vm0, %v16173_v57, 0.0  ;;  %v4825_v28 = vmul.f32 0.17677669, %v12555_v46  ;;  %v4937_v1 = vmul.f32 0.17677669, %v12720_v15  ;;  %v12835_v7 = vpop.eup %8242 }
 0xb23   : > { %8252 = vrcp.f32 %v5335_v12  ;;  %5037 = vadd.xlane.f32.xlu0 %v5036_v55  ;;  %v12819_v0 = vpop.xlane.xlu1 %4795  ;;  %v5042_v55 = vsel %vm1124_vm0, %v16174_v38, 0.0  ;;  %v5275_v34 = vmul.f32 1.442695, %v5256_v47  ;;  %v12839_v35 = vmul.f32 %v12740_v27, %v12655_v41  ;;  %v16177_v47 = vld [vmem:[#allocation107_spill] sm:$0xff] }
 0xb24   : > { %8254 = vpow2.f32 %v4047_v21  ;;  %v12827_v30 = vpop.xlane.xlu0 %4680  ;;  %v12842_v22 = vmul.f32 %v8239_v25, %v12697_v16  ;;  %v12844_v21 = vpop.eup %8244  ;;  %v5065_v46 = vmax.f32 %v12815_v13, %v4825_v28  ;;  %v12848_v15 = vmul.f32 0.17677669, %v12675_v14 }
 0xb25   : > { %8256 = vpow2.f32 %v5227_v32  ;;  %v4141_v29 = vmul.f32 1.442695, %v4121_v53  ;;  %v12854_v12 = vmul.f32 %v12732_v42, %v12597_v17  ;;  %v12856_v41 = vpop.eup %8246  ;;  %v4143_v16 = vmul.f32 1.442695, %v4122_v4 }
 0xb26   : > { %8258 = vpow2.f32 %v4093_v10  ;;  %5043 = vadd.xlane.f32.xlu1 %v5042_v55  ;;  %16176 = vst [vmem:[#allocation90_spill] sm:$0xff] %v12856_v41  ;;  %v4930_v10 = vsel %vm1124_vm0, %v16177_v47, 0.0  ;;  %v12860_v57 = vpop.eup %8248  ;;  %v12863_v14 = vmul.f32 0.17677669, %v12599_v60  ;;  %v5081_v53 = vmax.f32 %v5065_v46, %v4937_v1 }
 0xb27   : > { %4928 = vadd.xlane.f32.xlu0 %v4927_v20  ;;  %v12850_v43 = vpop.xlane.xlu1 %3771  ;;  %16175 = vst [vmem:[#allocation78_spill] sm:$0xff] %v12854_v12  ;;  %8260 = vpow2.f32 %v4095_v58  ;;  %16178 = vst [vmem:[#allocation67_spill] sm:$0xff] %v12860_v57  ;;  %v12867_v38 = vmul.f32 %v12740_v27, %v12611_v36  ;;  %v12870_v17 = vmul.f32 0.17677669, %v12663_v5  ;;  %v12873_v42 = vmul.f32 0.17677669, %v12742_v26 }
 0xb28   : > { %v5011_v32 = vpop.xlane.xlu0 %5010  ;;  %8262 = vpow2.f32 %v5275_v34  ;;  %v12876_v58 = vmul.f32 %v8239_v25, %v12667_v9  ;;  %v5066_v60 = vmax.f32 %v12848_v15, %v12863_v14  ;;  %v12881_v4 = vmul.f32 0.17677669, %v12769_v2 }
 0xb29   : > { %v5049_v20 = vmul.f32 0.17677669, %v5011_v32  ;;  %16179 = vst [vmem:[#allocation86_spill] sm:$0xff] %v12867_v38  ;;  %8264 = vpow2.f32 %v4141_v29  ;;  %v5304_v5 = vadd.f32 %v12856_v41, %v12844_v21  ;;  %v4169_v9 = vadd.f32 %v12860_v57, %v12835_v7 }
 0xb2a   : > { %16180 = vst [vmem:[#allocation84_spill] sm:$0xff] %v12876_v58  ;;  %v12885_v27 = vpop.eup %8250  ;;  %8266 = vpow2.f32 %v4143_v16  ;;  %v12892_v26 = vmul.f32 0.17677669, %v12791_v63 }
 0xb2b   : > { %v5097_v55 = vmax.f32 %v5081_v53, %v5049_v20  ;;  %4931 = vadd.xlane.f32.xlu0 %v4930_v10  ;;  %v12883_v36 = vpop.xlane.xlu1 %3550  ;;  %v3931_v10 = vmax.f32 %v12870_v17, %v12873_v42  ;;  %v16181_v53 = vld [vmem:[#allocation57_spill] sm:$0xff] }
 0xb2c   : > { %v12894_v25 = vpop.xlane.xlu0 %4683  ;;  %v5039_v58 = vsel %vm1124_vm0, %v16181_v53, 0.0 }
 0xb2d   : > { %v8253_v2 = vpop.eup %8252  ;;  %v5113_v34 = vsub.f32 %v12815_v13, %v5097_v55  ;;  %v5161_v46 = vsub.f32 %v4825_v28, %v5097_v55  ;;  %v5209_v29 = vsub.f32 %v4937_v1, %v5097_v55  ;;  %v5257_v32 = vsub.f32 %v5049_v20, %v5097_v55 }
 0xb2e   : > { %v12897_v47 = vpop.eup %8254  ;;  %v12904_v16 = vmul.f32 %v8253_v2, %v12767_v33  ;;  %v12907_v63 = vmul.f32 %v8253_v2, %v12782_v39  ;;  %v5082_v13 = vmax.f32 %v5066_v60, %v12881_v4  ;;  %v3947_v33 = vmax.f32 %v3931_v10, %v12892_v26 }
 0xb2f   : > { %v12909_v38 = vpop.eup %8256  ;;  %v4170_v28 = vadd.f32 %v12897_v47, %v12885_v27  ;;  %v5133_v1 = vmul.f32 1.442695, %v5113_v34  ;;  %v5181_v20 = vmul.f32 1.442695, %v5161_v46  ;;  %5040 = vadd.xlane.f32.xlu0 %v5039_v58  ;;  %v3881_v55 = vpop.xlane.xlu1 %3880  ;;  %v5229_v51 = vmul.f32 1.442695, %v5209_v29 }
 0xb30   : > { %v12914_v12 = vpop.eup %8258  ;;  %v5320_v53 = vadd.f32 %v12909_v38, %v5304_v5  ;;  %v5014_v39 = vpop.xlane.xlu0 %5013  ;;  %v12918_v56 = vmul.f32 0.17677669, %v3881_v55  ;;  %v5277_v60 = vmul.f32 1.442695, %v5257_v32  ;;  %v12929_v5 = vmul.f32 %v8253_v2, %v12793_v23 }
 0xb31   : > { %v4185_v57 = vadd.f32 %v12914_v12, %v4169_v9  ;;  %8268 = vpow2.f32 %v5133_v1  ;;  %v12921_v41 = vmul.f32 0.17677669, %v5014_v39  ;;  %v12923_v34 = vpop.eup %8260  ;;  %v12932_v46 = vmul.f32 %v8253_v2, %v12759_v3  ;;  %v16185_v3 = vld [vmem:[#allocation65_spill] sm:$0xff] }
 0xb32   : > { %16182 = vst [vmem:[#allocation27_spill] sm:$0xff] %v12923_v34  ;;  %8270 = vpow2.f32 %v5181_v20  ;;  %v12926_v58 = vmax.f32 %v3947_v33, %v12918_v56  ;;  %v4186_v29 = vadd.f32 %v12923_v34, %v4170_v28  ;;  %v12936_v9 = vmul.f32 0.17677669, %v12797_v11  ;;  %v12943_v1 = vpop.eup %8262 }
 0xb33   : > { %16183 = vst [vmem:[#allocation75_spill] sm:$0xff] %v12932_v46  ;;  %v12939_v32 = vmax.f32 %v5082_v13, %v12921_v41  ;;  %v12941_v10 = vpop.xlane.xlu1 %3553  ;;  %16184 = vst [vmem:[#allocation28_spill] sm:$0xff] %v12943_v1  ;;  %8272 = vpow2.f32 %v5229_v51  ;;  %v4294_v2 = vmul.f32 %v12573_v19, %v16185_v3  ;;  %v12951_v28 = vpop.eup %8264  ;;  %v5336_v11 = vadd.f32 %v12943_v1, %v5320_v53  ;;  %v16187_v46 = vld [vmem:[#allocation70_spill] sm:$0xff] }
 0xb34   : > { %v12945_v20 = vpop.xlane.xlu0 %4904  ;;  %v3979_v23 = vsub.f32 %v12870_v17, %v12926_v58  ;;  %v3580_v13 = vmul.f32 0.17677669, %v12715_v50  ;;  %v12956_v55 = vmul.f32 0.17677669, %v12850_v43  ;;  %v12960_v33 = vpop.eup %8266  ;;  %v4201_v39 = vadd.f32 %v12951_v28, %v4185_v57 }
 0xb35   : > { %v5114_v51 = vsub.f32 %v12848_v15, %v12939_v32  ;;  %16186 = vst [vmem:[#allocation89_spill] sm:$0xff] %v12960_v33  ;;  %8274 = vpow2.f32 %v5277_v60  ;;  %v5162_v19 = vsub.f32 %v12863_v14, %v12939_v32  ;;  %v4202_v17 = vadd.f32 %v12960_v33, %v4186_v29 }
 0xb36   : > { %v3932_v53 = vmax.f32 %v3580_v13, %v12936_v9  ;;  %v4027_v50 = vsub.f32 %v12873_v42, %v12926_v58  ;;  %v4405_v15 = vmul.f32 %v12548_v62, %v16187_v46  ;;  %v4001_v1 = vmul.f32 1.442695, %v3979_v23 }
 0xb37   : > { %v3884_v43 = vpop.xlane.xlu1 %3883  ;;  %4327 = vrot.lane.b32.xlu1 %v4294_v2, %s8864_s12  ;;  %v5429_v57 = vmul.f32 %v12691_v59, %v16187_v46  ;;  %v12978_v14 = vmul.f32 %v12551_v61, %v16187_v46  ;;  %v12982_v60 = vmul.f32 %v12558_v48, %v16187_v46  ;;  %8276 = vrcp.f32 %v5336_v11 }
 0xb38   : > { %v12972_v34 = vpop.xlane.xlu0 %3662  ;;  %v3948_v42 = vmax.f32 %v3932_v53, %v12956_v55  ;;  %v5135_v29 = vmul.f32 1.442695, %v5114_v51  ;;  %v5210_v62 = vsub.f32 %v12881_v4, %v12939_v32  ;;  %8278 = vrcp.f32 %v4201_v39 }
 0xb39   : > { %v5183_v23 = vmul.f32 1.442695, %v5162_v19  ;;  %v4075_v59 = vsub.f32 %v12892_v26, %v12926_v58  ;;  %v12989_v2 = vmul.f32 0.17677669, %v3884_v43  ;;  %8280 = vrcp.f32 %v4202_v17 }
 0xb3a   : > { %v4049_v33 = vmul.f32 1.442695, %v4027_v50  ;;  %v4406_v11 = vmul.f32 %v12595_v44, %v16185_v3  ;;  %v13000_v4 = vmul.f32 %v12602_v18, %v16185_v3  ;;  %8282 = vpow2.f32 %v4001_v1 }
 0xb3b   : > { %v12991_v61 = vpop.eup %8268  ;;  %v12993_v48 = vpop.xlane.xlu1 %4798  ;;  %5461 = vrot.lane.b32.xlu1 %v5429_v57, %s8864_s12  ;;  %v13007_v39 = vmax.f32 %v3948_v42, %v12989_v2  ;;  %v13011_v19 = vmul.f32 %v12702_v45, %v16187_v46  ;;  %v13015_v17 = vmul.f32 %v12709_v6, %v16187_v46  ;;  %v13018_v44 = vmul.f32 0.17677669, %v12761_v52 }
 0xb3c   : > { %v13002_v51 = vpop.eup %8270  ;;  %v13004_v26 = vpop.xlane.xlu0 %4907  ;;  %8284 = vpow2.f32 %v5135_v29  ;;  %v5231_v1 = vmul.f32 1.442695, %v5210_v62  ;;  %v4097_v50 = vmul.f32 1.442695, %v4075_v59  ;;  %v5258_v52 = vsub.f32 %v12921_v41, %v12939_v32  ;;  %v16188_v59 = vld [vmem:[#allocation55_spill] sm:$0xff] }
 0xb3d   : > { %v5305_v18 = vadd.f32 %v13002_v51, %v12991_v61  ;;  %v13022_v53 = vpop.eup %8272  ;;  %8286 = vpow2.f32 %v5183_v23  ;;  %v3980_v43 = vsub.f32 %v3580_v13, %v13007_v39  ;;  %v4028_v45 = vsub.f32 %v12936_v9, %v13007_v39 }
 0xb3e   : > { %8288 = vpow2.f32 %v4049_v33  ;;  %v5430_v42 = vmul.f32 %v12753_v37, %v16185_v3  ;;  %v4123_v13 = vsub.f32 %v12918_v56, %v12926_v58  ;;  %v4295_v41 = vmul.f32 %v12757_v54, %v16188_v59  ;;  %v16189_v58 = vld [vmem:[#allocation46_spill] sm:$0xff] }
 0xb3f   : > { %v5321_v6 = vadd.f32 %v13022_v53, %v5305_v18  ;;  %v13030_v57 = vpop.xlane.xlu1 %3774  ;;  %4437 = vrot.lane.b32.xlu1 %v4405_v15, %s8865_s10  ;;  %v13035_v29 = vpop.eup %8274  ;;  %v4003_v62 = vmul.f32 1.442695, %v3980_v43  ;;  %v4051_v9 = vmul.f32 1.442695, %v4028_v45  ;;  %8290 = vpow2.f32 %v5231_v1 }
 0xb40   : > { %v13039_v23 = vpop.xlane.xlu0 %3665  ;;  %v4076_v33 = vsub.f32 %v12956_v55, %v13007_v39  ;;  %v5542_v37 = vmul.f32 %v12765_v8, %v16185_v3  ;;  %v13049_v15 = vmul.f32 0.17677669, %v12827_v30  ;;  %v13052_v56 = vmul.f32 0.17677669, %v12819_v0 }
 0xb41   : > { %v5337_v32 = vadd.f32 %v13035_v29, %v5321_v6  ;;  %8292 = vpow2.f32 %v4097_v50  ;;  %v13056_v18 = vmul.f32 %v12805_v40, %v16189_v58  ;;  %v13058_v54 = vpop.eup %8276  ;;  %v13061_v1 = vmul.f32 0.17677669, %v12894_v25 }
 0xb42   : > { %v5279_v55 = vmul.f32 1.442695, %v5258_v52  ;;  %8294 = vpow2.f32 %v4003_v62  ;;  %v13068_v8 = vmul.f32 %v12809_v49, %v16188_v59  ;;  %v13070_v0 = vpop.eup %8278  ;;  %v13073_v40 = vmul.f32 0.17677669, %v12945_v20 }
 0xb43   : > { %v13063_v43 = vpop.xlane.xlu1 %4801  ;;  %4439 = vrot.lane.b32.xlu1 %v4406_v11, %s8865_s10  ;;  %v4145_v30 = vmul.f32 1.442695, %v4123_v13  ;;  %8296 = vpow2.f32 %v4051_v9  ;;  %v13079_v25 = vmul.f32 %v12812_v24, %v16189_v58  ;;  %v13081_v45 = vpop.eup %8280  ;;  %v4099_v11 = vmul.f32 1.442695, %v4076_v33 }
 0xb44   : > { %v13075_v50 = vpop.xlane.xlu0 %4686  ;;  %8298 = vrcp.f32 %v5337_v32  ;;  %v4124_v49 = vsub.f32 %v12989_v2, %v13007_v39  ;;  %v13089_v20 = vmul.f32 %v12823_v31, %v16185_v3  ;;  %v13091_v6 = vpop.eup %8282  ;;  %v5067_v24 = vmax.f32 %v13049_v15, %v13018_v44 }
 0xb45   : > { %4325 = vrot.lane.b32.xlu0 %v12978_v14, %s8864_s12  ;;  %16190 = vst [vmem:[#allocation100_spill] sm:$0xff] %v13091_v6  ;;  %v13096_v52 = vmul.f32 0.17677669, %v12883_v36  ;;  %v13100_v13 = vmul.f32 %v12839_v35, %v16188_v59  ;;  %v13104_v2 = vmul.f32 %v12842_v22, %v16189_v58  ;;  %v5068_v31 = vmax.f32 %v13061_v1, %v13052_v56 }
 0xb46   : > { %v13106_v14 = vpop.eup %8284  ;;  %8300 = vpow2.f32 %v5279_v55  ;;  %v13111_v39 = vmul.f32 0.17677669, %v12972_v34  ;;  %v13118_v35 = vmul.f32 %v13058_v54, %v12844_v21  ;;  %v5083_v22 = vmax.f32 %v5067_v24, %v13073_v40 }
 0xb47   : > { %16191 = vst [vmem:[#allocation82_spill] sm:$0xff] %v13100_v13  ;;  %16192 = vst [vmem:[#allocation94_spill] sm:$0xff] %v13106_v14  ;;  %v13113_v62 = vpop.xlane.xlu1 %3777  ;;  %4329 = vrot.lane.b32.xlu1 %v4295_v41, %s8864_s12  ;;  %v13120_v36 = vpop.eup %8286  ;;  %8302 = vpow2.f32 %v4145_v30  ;;  %v13125_v32 = vmul.f32 %v12904_v16, %v16188_v59  ;;  %v13129_v34 = vmul.f32 %v12907_v63, %v16188_v59  ;;  %v4147_v41 = vmul.f32 1.442695, %v4124_v49  ;;  %v16196_v16 = vld [vmem:[#allocation90_spill] sm:$0xff] }
 0xb48   : > { %16193 = vst [vmem:[#allocation87_spill] sm:$0xff] %v13118_v35  ;;  %v5017_v9 = vpop.xlane.xlu0 %5016  ;;  %v13131_v33 = vpop.eup %8288  ;;  %8304 = vpow2.f32 %v4099_v11  ;;  %v13136_v55 = vmul.f32 %v13070_v0, %v12835_v7  ;;  %v13139_v30 = vmul.f32 0.17677669, %v12941_v10  ;;  %v5416_v24 = vmul.f32 %v13058_v54, %v16196_v16  ;;  %v16197_v35 = vld [vmem:[#allocation67_spill] sm:$0xff] }
 0xb49   : > { %16194 = vst [vmem:[#allocation96_spill] sm:$0xff] %v13131_v33  ;;  %v5051_v21 = vmul.f32 0.17677669, %v5017_v9  ;;  %5463 = vrot.lane.b32.xlu0 %v5430_v42, %s8864_s12  ;;  %v4281_v63 = vmul.f32 %v13070_v0, %v16197_v35  ;;  %v13147_v11 = vmul.f32 %v13081_v45, %v12885_v27  ;;  %v13149_v49 = vpop.eup %8290  ;;  %v5306_v42 = vadd.f32 %v13120_v36, %v13106_v14 }
 0xb4a   : > { %16195 = vst [vmem:[#allocation30_spill] sm:$0xff] %v13136_v55  ;;  %v3933_v7 = vmax.f32 %v13096_v52, %v13111_v39  ;;  %v13156_v10 = vmul.f32 0.17677669, %v13030_v57  ;;  %v4171_v27 = vadd.f32 %v13131_v33, %v13091_v6  ;;  %v5528_v3 = vmul.f32 %v13058_v54, %v12909_v38 }
 0xb4b   : > { %16198 = vst [vmem:[#allocation29_spill] sm:$0xff] %v13147_v11  ;;  %v5099_v9 = vmax.f32 %v5083_v22, %v5051_v21  ;;  %v13158_v16 = vpop.xlane.xlu1 %3556  ;;  %5575 = vrot.lane.b32.xlu1 %v5542_v37, %s8865_s10  ;;  %v13161_v35 = vpop.eup %8292  ;;  %v13166_v11 = vmul.f32 0.17677669, %v13004_v26  ;;  %v13174_v57 = vmul.f32 %v12929_v5, %v16188_v59  ;;  %8306 = vpow2.f32 %v4147_v41  ;;  %v16200_v59 = vld [vmem:[#allocation76_spill] sm:$0xff] }
 0xb4c   : > { %v13168_v55 = vpop.xlane.xlu0 %4689  ;;  %v13176_v22 = vpop.eup %8294  ;;  %v13186_v38 = vmul.f32 0.17677669, %v12993_v48  ;;  %v5432_v5 = vmul.f32 %v5416_v24, %v16189_v58  ;;  %v4187_v48 = vadd.f32 %v13161_v35, %v4171_v27 }
 0xb4d   : > { %16199 = vst [vmem:[#allocation99_spill] sm:$0xff] %v13174_v57  ;;  %v5115_v37 = vsub.f32 %v13049_v15, %v5099_v9  ;;  %v5163_v46 = vsub.f32 %v13018_v44, %v5099_v9  ;;  %v5211_v6 = vsub.f32 %v13073_v40, %v5099_v9  ;;  %5573 = vrot.lane.b32.xlu0 %v13011_v19, %s8865_s10  ;;  %v13183_v26 = vpop.eup %8296 }
 0xb4e   : > { %v5259_v13 = vsub.f32 %v5051_v21, %v5099_v9  ;;  %v13190_v57 = vmul.f32 %v4281_v63, %v16200_v59  ;;  %v13192_v41 = vpop.eup %8298  ;;  %v5322_v44 = vadd.f32 %v13149_v49, %v5306_v42  ;;  %v3949_v15 = vmax.f32 %v3933_v7, %v13156_v10 }
 0xb4f   : > { %v5137_v40 = vmul.f32 1.442695, %v5115_v37  ;;  %v5185_v14 = vmul.f32 1.442695, %v5163_v46  ;;  %v3887_v19 = vpop.xlane.xlu1 %3886  ;;  %4551 = vrot.lane.b32.xlu1 %v13000_v4, %s8866_s1  ;;  %v4172_v21 = vadd.f32 %v13183_v26, %v13176_v22  ;;  %v5233_v24 = vmul.f32 1.442695, %v5211_v6 }
 0xb50   : > { %v5020_v63 = vpop.xlane.xlu0 %5019  ;;  %v13201_v9 = vmul.f32 0.17677669, %v3887_v19  ;;  %v13203_v33 = vpop.eup %8300  ;;  %v5084_v42 = vmax.f32 %v5068_v31, %v13166_v11  ;;  %v13207_v7 = vmul.f32 0.17677669, %v13039_v23  ;;  %v5281_v6 = vmul.f32 1.442695, %v5259_v13 }
 0xb51   : > { %8308 = vpow2.f32 %v5137_v40  ;;  %v13209_v46 = vmul.f32 0.17677669, %v5020_v63  ;;  %4549 = vrot.lane.b32.xlu0 %v12982_v60, %s8866_s1  ;;  %v13213_v4 = vpop.eup %8302  ;;  %v13220_v37 = vmul.f32 %v13192_v41, %v12991_v61  ;;  %v5338_v23 = vadd.f32 %v13203_v33, %v5322_v44 }
 0xb52   : > { %8310 = vpow2.f32 %v5185_v14  ;;  %v13216_v27 = vmax.f32 %v3949_v15, %v13201_v9  ;;  %v13222_v31 = vpop.eup %8304  ;;  %v13231_v60 = vmul.f32 %v5528_v3, %v16189_v58  ;;  %v4282_v13 = vmul.f32 %v13081_v45, %v12897_v47  ;;  %v16202_v47 = vld [vmem:[#allocation27_spill] sm:$0xff] }
 0xb53   : > { %16201 = vst [vmem:[#allocation93_spill] sm:$0xff] %v13220_v37  ;;  %v5100_v40 = vmax.f32 %v5084_v42, %v13209_v46  ;;  %v13226_v19 = vpop.xlane.xlu1 %3559  ;;  %5685 = vrot.lane.b32.xlu1 %v13015_v17, %s8866_s1  ;;  %v4203_v61 = vadd.f32 %v13213_v4, %v4187_v48  ;;  %v4188_v14 = vadd.f32 %v13222_v31, %v4172_v21  ;;  %8312 = vpow2.f32 %v5233_v24  ;;  %v16204_v37 = vld [vmem:[#allocation28_spill] sm:$0xff] }
 0xb54   : > { %v13237_v15 = vpop.xlane.xlu0 %4910  ;;  %v4393_v44 = vmul.f32 %v13070_v0, %v12914_v12  ;;  %v3981_v3 = vsub.f32 %v13096_v52, %v13216_v27  ;;  %v4394_v48 = vmul.f32 %v13081_v45, %v16202_v47  ;;  %v3934_v21 = vmax.f32 %v13139_v30, %v13207_v7 }
 0xb55   : > { %v5116_v63 = vsub.f32 %v13061_v1, %v5100_v40  ;;  %v5164_v17 = vsub.f32 %v13052_v56, %v5100_v40  ;;  %4331 = vrot.lane.b32.xlu0 %v13056_v18, %s8864_s12  ;;  %8314 = vpow2.f32 %v5281_v6  ;;  %v13252_v24 = vmul.f32 0.17677669, %v13113_v62  ;;  %v13256_v56 = vpop.eup %8306 }
 0xb56   : > { %v4029_v12 = vsub.f32 %v13111_v39, %v13216_v27  ;;  %16203 = vst [vmem:[#allocation111_spill] sm:$0xff] %v13256_v56  ;;  %8316 = vrcp.f32 %v5338_v23  ;;  %v5212_v18 = vsub.f32 %v13166_v11, %v5100_v40  ;;  %v4204_v47 = vadd.f32 %v13256_v56, %v4188_v14  ;;  %v16205_v11 = vld [vmem:[#allocation64_spill] sm:$0xff] }
 0xb57   : > { %v5139_v1 = vmul.f32 1.442695, %v5116_v63  ;;  %v5187_v52 = vmul.f32 1.442695, %v5164_v17  ;;  %v3890_v42 = vpop.xlane.xlu1 %3889  ;;  %5467 = vrot.lane.b32.xlu1 %v5432_v5, %s8864_s12  ;;  %8318 = vrcp.f32 %v4203_v61  ;;  %v13262_v6 = vmul.f32 0.17677669, %v13063_v43 }
 0xb58   : > { %v13264_v62 = vpop.xlane.xlu0 %3668  ;;  %v5640_v39 = vmul.f32 %v13058_v54, %v16204_v37  ;;  %v5260_v23 = vsub.f32 %v13209_v46, %v5100_v40  ;;  %v4005_v63 = vmul.f32 1.442695, %v3981_v3  ;;  %v13272_v5 = vmul.f32 %v4282_v13, %v16205_v11 }
 0xb59   : > { %8320 = vpow2.f32 %v5139_v1  ;;  %5465 = vrot.lane.b32.xlu0 %v13125_v32, %s8864_s12  ;;  %v3950_v61 = vmax.f32 %v3934_v21, %v13252_v24  ;;  %v4053_v43 = vmul.f32 1.442695, %v4029_v12  ;;  %v3918_v14 = vmul.f32 0.17677669, %v3890_v42 }
 0xb5a   : > { %8322 = vpow2.f32 %v5187_v52  ;;  %v13278_v56 = vmul.f32 0.17677669, %v13075_v50  ;;  %v5235_v54 = vmul.f32 1.442695, %v5212_v18  ;;  %v4077_v46 = vsub.f32 %v13156_v10, %v13216_v27 }
 0xb5b   : > { %v13275_v17 = vpop.eup %8308  ;;  %v13282_v37 = vpop.xlane.xlu1 %4804  ;;  %4443 = vrot.lane.b32.xlu1 %v13079_v25, %s8865_s10  ;;  %v13287_v32 = vmul.f32 %v4393_v44, %v16200_v59  ;;  %8324 = vrcp.f32 %v4204_v47  ;;  %v3966_v3 = vmax.f32 %v3950_v61, %v3918_v14  ;;  %v13294_v50 = vmul.f32 %v4394_v48, %v16205_v11 }
 0xb5c   : > { %v13289_v40 = vpop.eup %8310  ;;  %v13291_v13 = vpop.xlane.xlu0 %4913  ;;  %v13297_v21 = vmul.f32 %v5640_v39, %v16189_v58  ;;  %v5283_v12 = vmul.f32 1.442695, %v5260_v23  ;;  %8326 = vpow2.f32 %v4005_v63  ;;  %v4505_v25 = vmul.f32 %v13070_v0, %v12951_v28 }
 0xb5d   : > { %v5307_v10 = vadd.f32 %v13289_v40, %v13275_v17  ;;  %4441 = vrot.lane.b32.xlu0 %v13068_v8, %s8865_s10  ;;  %v13305_v44 = vpop.eup %8312  ;;  %8328 = vpow2.f32 %v4053_v43  ;;  %v3982_v48 = vsub.f32 %v13139_v30, %v3966_v3  ;;  %v4030_v1 = vsub.f32 %v13207_v7, %v3966_v3  ;;  %v16206_v8 = vld [vmem:[#allocation89_spill] sm:$0xff] }
 0xb5e   : > { %v4078_v52 = vsub.f32 %v13252_v24, %v3966_v3  ;;  %8330 = vpow2.f32 %v5235_v54  ;;  %v4101_v42 = vmul.f32 1.442695, %v4077_v46  ;;  %v4506_v28 = vmul.f32 %v13081_v45, %v16206_v8 }
 0xb5f   : > { %v5323_v18 = vadd.f32 %v13305_v44, %v5307_v10  ;;  %v13311_v47 = vpop.xlane.xlu1 %3780  ;;  %4333 = vrot.lane.b32.xlu1 %v13190_v57, %s8864_s12  ;;  %v13317_v0 = vpop.eup %8314  ;;  %v13320_v30 = vmul.f32 0.17677669, %v13168_v55  ;;  %v4125_v7 = vsub.f32 %v13201_v9, %v13216_v27  ;;  %v4007_v24 = vmul.f32 1.442695, %v3982_v48 }
 0xb60   : > { %v4055_v39 = vmul.f32 1.442695, %v4030_v1  ;;  %v13324_v23 = vpop.xlane.xlu0 %3671  ;;  %v13326_v63 = vpop.eup %8316  ;;  %8332 = vpow2.f32 %v5283_v12  ;;  %v4126_v57 = vsub.f32 %v3918_v14, %v3966_v3  ;;  %v5417_v45 = vmul.f32 %v13192_v41, %v13002_v51 }
 0xb61   : > { %v5339_v61 = vadd.f32 %v13317_v0, %v5323_v18  ;;  %5687 = vrot.lane.b32.xlu0 %v13089_v20, %s8866_s1  ;;  %v13333_v55 = vpop.eup %8318  ;;  %v5069_v9 = vmax.f32 %v13278_v56, %v13186_v38  ;;  %8334 = vpow2.f32 %v4007_v24  ;;  %v4103_v27 = vmul.f32 1.442695, %v4078_v52  ;;  %v16210_v24 = vld [vmem:[#allocation94_spill] sm:$0xff] }
 0xb62   : > { %v5529_v43 = vmul.f32 %v13192_v41, %v13022_v53  ;;  %v13342_v14 = vmul.f32 0.17677669, %v13237_v15  ;;  %8336 = vpow2.f32 %v4101_v42  ;;  %v13349_v51 = vmul.f32 %v4505_v25, %v16200_v59 }
 0xb63   : > { %v13339_v54 = vpop.eup %8320  ;;  %v13344_v20 = vpop.xlane.xlu1 %4807  ;;  %5579 = vrot.lane.b32.xlu1 %v13231_v60, %s8865_s10  ;;  %v13352_v46 = vmul.f32 %v4506_v28, %v16205_v11  ;;  %v5070_v53 = vmax.f32 %v13320_v30, %v13262_v6  ;;  %v13359_v15 = vmul.f32 0.17677669, %v13158_v16  ;;  %v4149_v10 = vmul.f32 1.442695, %v4125_v7  ;;  %v16209_v28 = vld [vmem:[#allocation96_spill] sm:$0xff] }
 0xb64   : > { %16207 = vst [vmem:[#allocation104_spill] sm:$0xff] %v13339_v54  ;;  %v13354_v3 = vpop.eup %8322  ;;  %8338 = vpow2.f32 %v4055_v39  ;;  %v13361_v12 = vpop.xlane.xlu0 %4692  ;;  %v13364_v60 = vmul.f32 0.17677669, %v13264_v62  ;;  %v4151_v25 = vmul.f32 1.442695, %v4126_v57  ;;  %v13369_v48 = vmul.f32 %v5417_v45, %v16200_v59 }
 0xb65   : > { %8340 = vrcp.f32 %v5339_v61  ;;  %5577 = vrot.lane.b32.xlu0 %v13129_v34, %s8865_s10  ;;  %v13371_v1 = vpop.eup %8324  ;;  %v5308_v16 = vadd.f32 %v13354_v3, %v13339_v54  ;;  %v13376_v52 = vmul.f32 %v5529_v43, %v16200_v59  ;;  %v5641_v62 = vmul.f32 %v13192_v41, %v13035_v29  ;;  %v16214_v43 = vld [vmem:[#allocation100_spill] sm:$0xff] }
 0xb66   : > { %8342 = vpow2.f32 %v4103_v27  ;;  %v13380_v18 = vpop.eup %8326  ;;  %v5085_v42 = vmax.f32 %v5069_v9, %v13342_v14  ;;  %v5418_v8 = vmul.f32 %v13326_v63, %v13120_v36  ;;  %v4283_v7 = vmul.f32 %v13333_v55, %v16209_v28  ;;  %v16213_v27 = vld [vmem:[#allocation82_spill] sm:$0xff] }
 0xb67   : > { %16208 = vst [vmem:[#allocation31_spill] sm:$0xff] %v13380_v18  ;;  %v13383_v34 = vpop.xlane.xlu1 %3783  ;;  %4555 = vrot.lane.b32.xlu1 %v13104_v2, %s8866_s1  ;;  %v13393_v39 = vmul.f32 %v13326_v63, %v16210_v24  ;;  %v13395_v29 = vpop.eup %8328  ;;  %8344 = vpow2.f32 %v4149_v10  ;;  %v13398_v41 = vmul.f32 0.17677669, %v13226_v19  ;;  %v13401_v61 = vmul.f32 0.17677669, %v13291_v13 }
 0xb68   : > { %v5023_v2 = vpop.xlane.xlu0 %5022  ;;  %v5530_v36 = vmul.f32 %v13326_v63, %v13149_v49  ;;  %v13405_v57 = vpop.eup %8330  ;;  %v3935_v45 = vmax.f32 %v13359_v15, %v13364_v60  ;;  %8346 = vpow2.f32 %v4151_v25  ;;  %v13413_v19 = vmul.f32 %v13333_v55, %v16214_v43  ;;  %v16219_v43 = vld [vmem:[#allocation74_spill] sm:$0xff] }
 0xb69   : > { %16211 = vst [vmem:[#allocation106_spill] sm:$0xff] %v13393_v39  ;;  %16212 = vst [vmem:[#allocation97_spill] sm:$0xff] %v13405_v57  ;;  %v5053_v9 = vmul.f32 0.17677669, %v5023_v2  ;;  %4553 = vrot.lane.b32.xlu0 %v16213_v27, %s8866_s1  ;;  %v5324_v13 = vadd.f32 %v13405_v57, %v5308_v16  ;;  %v13417_v10 = vmul.f32 0.17677669, %v13282_v37  ;;  %v13420_v49 = vmul.f32 %v5641_v62, %v16200_v59 }
 0xb6a   : > { %16215 = vst [vmem:[#allocation32_spill] sm:$0xff] %v13413_v19  ;;  %v13424_v28 = vmul.f32 %v13371_v1, %v13176_v22  ;;  %v13426_v25 = vpop.eup %8332  ;;  %v4173_v24 = vadd.f32 %v13395_v29, %v13380_v18  ;;  %v16218_v16 = vld [vmem:[#allocation99_spill] sm:$0xff]  ;;  %v5434_v37 = vmul.f32 %v5418_v8, %v16205_v11  ;;  %v13436_v62 = vmul.f32 %v4283_v7, %v16219_v43 }
 0xb6b   : > { %16217 = vst [vmem:[#allocation110_spill] sm:$0xff] %v13426_v25  ;;  %v5101_v2 = vmax.f32 %v5085_v42, %v5053_v9  ;;  %v13430_v27 = vpop.xlane.xlu1 %3562  ;;  %5689 = vrot.lane.b32.xlu1 %v16218_v16, %s8866_s1  ;;  %v13438_v19 = vpop.eup %8334  ;;  %v5086_v22 = vmax.f32 %v5070_v53, %v13401_v61  ;;  %v13445_v39 = vmul.f32 0.17677669, %v13311_v47  ;;  %v13450_v59 = vmul.f32 %v5530_v36, %v16205_v11 }
 0xb6c   : > { %16216 = vst [vmem:[#allocation59_spill] sm:$0xff] %v13424_v28  ;;  %v13442_v28 = vmul.f32 0.17677669, %v13324_v23  ;;  %v13447_v42 = vpop.xlane.xlu0 %4695  ;;  %v13452_v16 = vpop.eup %8336  ;;  %v4284_v47 = vmul.f32 %v13371_v1, %v13183_v26  ;;  %v5340_v53 = vadd.f32 %v13426_v25, %v5324_v13  ;;  %v4395_v18 = vmul.f32 %v13333_v55, %v13161_v35 }
 0xb6d   : > { %v5117_v8 = vsub.f32 %v13278_v56, %v5101_v2  ;;  %v5165_v7 = vsub.f32 %v13186_v38, %v5101_v2  ;;  %v5213_v58 = vsub.f32 %v13342_v14, %v5101_v2  ;;  %4335 = vrot.lane.b32.xlu0 %v13272_v5, %s8864_s12  ;;  %v5261_v36 = vsub.f32 %v5053_v9, %v5101_v2 }
 0xb6e   : > { %v13461_v23 = vpop.eup %8338  ;;  %v5642_v56 = vmul.f32 %v13326_v63, %v13203_v33  ;;  %v4189_v14 = vadd.f32 %v13452_v16, %v4173_v24  ;;  %v3936_v35 = vmax.f32 %v13398_v41, %v13442_v28  ;;  %v3951_v9 = vmax.f32 %v3935_v45, %v13445_v39 }
 0xb6f   : > { %v13468_v38 = vpop.eup %8340  ;;  %v4174_v5 = vadd.f32 %v13461_v23, %v13438_v19  ;;  %v5141_v54 = vmul.f32 1.442695, %v5117_v8  ;;  %v5189_v26 = vmul.f32 1.442695, %v5165_v7  ;;  %v3893_v57 = vpop.xlane.xlu1 %3892  ;;  %5471 = vrot.lane.b32.xlu1 %v5434_v37, %s8864_s12  ;;  %v5237_v33 = vmul.f32 1.442695, %v5213_v58 }
 0xb70   : > { %v13474_v13 = vpop.eup %8342  ;;  %v5026_v63 = vpop.xlane.xlu0 %5025  ;;  %v13479_v2 = vmul.f32 0.17677669, %v3893_v57  ;;  %v4396_v37 = vmul.f32 %v13371_v1, %v13222_v31  ;;  %v5285_v7 = vmul.f32 1.442695, %v5261_v36  ;;  %v13493_v58 = vmul.f32 %v13468_v38, %v13275_v17 }
 0xb71   : > { %v4190_v24 = vadd.f32 %v13474_v13, %v4174_v5  ;;  %8348 = vpow2.f32 %v5141_v54  ;;  %v5054_v25 = vmul.f32 0.17677669, %v5026_v63  ;;  %5469 = vrot.lane.b32.xlu0 %v13369_v48, %s8864_s12  ;;  %v13486_v8 = vpop.eup %8344  ;;  %v13499_v48 = vmul.f32 0.17677669, %v13344_v20 }
 0xb72   : > { %8350 = vpow2.f32 %v5189_v26  ;;  %v13489_v45 = vmax.f32 %v3951_v9, %v13479_v2  ;;  %16220 = vst [vmem:[#allocation103_spill] sm:$0xff] %v13493_v58  ;;  %v13495_v57 = vpop.eup %8346  ;;  %v4205_v54 = vadd.f32 %v13486_v8, %v4189_v14  ;;  %v16221_v9 = vld [vmem:[#allocation68_spill] sm:$0xff] }
 0xb73   : > { %8352 = vrcp.f32 %v5340_v53  ;;  %v5102_v31 = vmax.f32 %v5086_v22, %v5054_v25  ;;  %v13501_v5 = vpop.xlane.xlu1 %3565  ;;  %4447 = vrot.lane.b32.xlu1 %v13294_v50, %s8865_s10  ;;  %v4206_v36 = vadd.f32 %v13495_v57, %v4190_v24  ;;  %v13509_v53 = vmul.f32 %v4284_v47, %v16221_v9 }
 0xb74   : > { %8354 = vpow2.f32 %v5237_v33  ;;  %v4917_v26 = vpop.xlane.xlu0 %4916  ;;  %v3983_v17 = vsub.f32 %v13359_v15, %v13489_v45  ;;  %v4031_v63 = vsub.f32 %v13364_v60, %v13489_v45  ;;  %v13519_v50 = vmul.f32 0.17677669, %v13383_v34 }
 0xb75   : > { %v5118_v14 = vsub.f32 %v13320_v30, %v5102_v31  ;;  %v5166_v20 = vsub.f32 %v13262_v6, %v5102_v31  ;;  %v5214_v22 = vsub.f32 %v13401_v61, %v5102_v31  ;;  %4445 = vrot.lane.b32.xlu0 %v13287_v32, %s8865_s10  ;;  %8356 = vpow2.f32 %v5285_v7 }
 0xb76   : > { %v5262_v15 = vsub.f32 %v5054_v25, %v5102_v31  ;;  %v13522_v47 = vmul.f32 %v4395_v18, %v16219_v43  ;;  %8358 = vrcp.f32 %v4205_v54  ;;  %v4009_v6 = vmul.f32 1.442695, %v3983_v17 }
 0xb77   : > { %v5143_v30 = vmul.f32 1.442695, %v5118_v14  ;;  %v5191_v33 = vmul.f32 1.442695, %v5166_v20  ;;  %v3896_v24 = vpop.xlane.xlu1 %3895  ;;  %4337 = vrot.lane.b32.xlu1 %v13436_v62, %s8864_s12  ;;  %8360 = vrcp.f32 %v4206_v36  ;;  %v13527_v60 = vmul.f32 0.17677669, %v13361_v12 }
 0xb78   : > { %v5239_v32 = vmul.f32 1.442695, %v5214_v22  ;;  %v4079_v34 = vsub.f32 %v13445_v39, %v13489_v45  ;;  %v3675_v61 = vpop.xlane.xlu0 %3674  ;;  %v4057_v18 = vmul.f32 1.442695, %v4031_v63  ;;  %v13534_v25 = vmul.f32 %v5642_v56, %v16205_v11 }
 0xb79   : > { %8362 = vpow2.f32 %v5143_v30  ;;  %5691 = vrot.lane.b32.xlu0 %v13297_v21, %s8866_s1  ;;  %v4507_v62 = vmul.f32 %v13333_v55, %v13213_v4  ;;  %v3952_v7 = vmax.f32 %v3936_v35, %v13519_v50  ;;  %v5287_v12 = vmul.f32 1.442695, %v5262_v15  ;;  %v16222_v4 = vld [vmem:[#allocation111_spill] sm:$0xff] }
 0xb7a   : > { %8364 = vpow2.f32 %v5191_v33  ;;  %v13539_v54 = vmul.f32 0.17677669, %v3896_v24  ;;  %v4127_v39 = vsub.f32 %v13479_v2, %v13489_v45  ;;  %v13550_v21 = vmul.f32 %v4396_v37, %v16221_v9 }
 0xb7b   : > { %v13541_v31 = vpop.eup %8348  ;;  %8366 = vpow2.f32 %v4009_v6  ;;  %v13545_v36 = vpop.xlane.xlu1 %4810  ;;  %5583 = vrot.lane.b32.xlu1 %v13450_v59, %s8865_s10  ;;  %v4508_v55 = vmul.f32 %v13371_v1, %v16222_v4  ;;  %v5071_v35 = vmax.f32 %v13527_v60, %v13417_v10  ;;  %v4105_v17 = vmul.f32 1.442695, %v4079_v34 }
 0xb7c   : > { %v13554_v56 = vpop.eup %8350  ;;  %8368 = vpow2.f32 %v5239_v32  ;;  %v4920_v14 = vpop.xlane.xlu0 %4919  ;;  %v3968_v2 = vmax.f32 %v3952_v7, %v13539_v54  ;;  %v13564_v37 = vmul.f32 0.17677669, %v13447_v42  ;;  %v13569_v1 = vmul.f32 %v4507_v62, %v16219_v43 }
 0xb7d   : > { %v13559_v45 = vpop.eup %8352  ;;  %v5309_v59 = vadd.f32 %v13554_v56, %v13541_v31  ;;  %8370 = vpow2.f32 %v4057_v18  ;;  %5581 = vrot.lane.b32.xlu0 %v13376_v52, %s8865_s10  ;;  %v4153_v42 = vmul.f32 1.442695, %v4127_v39  ;;  %v5419_v52 = vmul.f32 %v13468_v38, %v13289_v40 }
 0xb7e   : > { %v13571_v20 = vpop.eup %8354  ;;  %8372 = vpow2.f32 %v5287_v12  ;;  %v3984_v22 = vsub.f32 %v13398_v41, %v3968_v2  ;;  %v4032_v63 = vsub.f32 %v13442_v28, %v3968_v2  ;;  %v4080_v15 = vsub.f32 %v13519_v50, %v3968_v2 }
 0xb7f   : > { %v5325_v30 = vadd.f32 %v13571_v20, %v5309_v59  ;;  %v3787_v33 = vpop.xlane.xlu1 %3786  ;;  %4559 = vrot.lane.b32.xlu1 %v13352_v46, %s8866_s1  ;;  %v5531_v6 = vmul.f32 %v13468_v38, %v13305_v44  ;;  %v13583_v24 = vpop.eup %8356  ;;  %v13585_v41 = vmul.f32 0.17677669, %v4917_v26  ;;  %8374 = vpow2.f32 %v4105_v17 }
 0xb80   : > { %v4011_v28 = vmul.f32 1.442695, %v3984_v22  ;;  %v4059_v50 = vmul.f32 1.442695, %v4032_v63  ;;  %v3678_v32 = vpop.xlane.xlu0 %3677  ;;  %v13587_v34 = vpop.eup %8358  ;;  %v4128_v46 = vsub.f32 %v13539_v54, %v3968_v2  ;;  %v5420_v40 = vmul.f32 %v13559_v45, %v13354_v3  ;;  %v16224_v63 = vld [vmem:[#allocation97_spill] sm:$0xff] }
 0xb81   : > { %v5341_v18 = vadd.f32 %v13583_v24, %v5325_v30  ;;  %4557 = vrot.lane.b32.xlu0 %v13349_v51, %s8866_s1  ;;  %v13596_v44 = vmul.f32 %v4508_v55, %v16221_v9  ;;  %v13598_v26 = vpop.eup %8360  ;;  %v13601_v62 = vmul.f32 0.17677669, %v13430_v27  ;;  %v13603_v7 = vmul.f32 0.17677669, %v3675_v61 }
 0xb82   : > { %8376 = vpow2.f32 %v4011_v28  ;;  %v4107_v12 = vmul.f32 1.442695, %v4080_v15  ;;  %v5072_v51 = vmax.f32 %v13564_v37, %v13499_v48  ;;  %v5435_v3 = vmul.f32 %v5419_v52, %v16219_v43  ;;  %v16225_v28 = vld [vmem:[#allocation104_spill] sm:$0xff] }
 0xb83   : > { %v13605_v39 = vpop.eup %8362  ;;  %8378 = vpow2.f32 %v4153_v42  ;;  %v13609_v54 = vpop.xlane.xlu1 %4813  ;;  %5693 = vrot.lane.b32.xlu1 %v13420_v49, %s8866_s1  ;;  %v5643_v27 = vmul.f32 %v13468_v38, %v13317_v0  ;;  %v5087_v4 = vmax.f32 %v5071_v35, %v13585_v41  ;;  %v13620_v55 = vmul.f32 0.17677669, %v13501_v5 }
 0xb84   : > { %v13616_v61 = vpop.eup %8364  ;;  %8380 = vpow2.f32 %v4059_v50  ;;  %v13622_v17 = vpop.xlane.xlu0 %4698  ;;  %v13625_v2 = vmul.f32 %v5531_v6, %v16219_v43  ;;  %v4155_v0 = vmul.f32 1.442695, %v4128_v46  ;;  %v5436_v38 = vmul.f32 %v5420_v40, %v16221_v9 }
 0xb85   : > { %v13627_v59 = vpop.eup %8366  ;;  %8382 = vrcp.f32 %v5341_v18  ;;  %v5310_v49 = vadd.f32 %v13616_v61, %v13605_v39  ;;  %4339 = vrot.lane.b32.xlu0 %v13509_v53, %s8864_s12  ;;  %v3937_v35 = vmax.f32 %v13601_v62, %v13603_v7  ;;  %v4285_v22 = vmul.f32 %v13587_v34, %v13395_v29 }
 0xb86   : > { %16223 = vst [vmem:[#allocation60_spill] sm:$0xff] %v13627_v59  ;;  %v13634_v5 = vpop.eup %8368  ;;  %8384 = vpow2.f32 %v4107_v12  ;;  %v5532_v15 = vmul.f32 %v13559_v45, %v16224_v63  ;;  %v13645_v52 = vmul.f32 0.17677669, %v4920_v14  ;;  %v13651_v6 = vmul.f32 %v5643_v27, %v16219_v43 }
 0xb87   : > { %v13642_v30 = vpop.eup %8370  ;;  %v5326_v42 = vadd.f32 %v13634_v5, %v5310_v49  ;;  %v13647_v53 = vpop.xlane.xlu1 %3789  ;;  %5475 = vrot.lane.b32.xlu1 %v5436_v38, %s8864_s12  ;;  %v13655_v50 = vmul.f32 %v13559_v45, %v16225_v28  ;;  %v13661_v46 = vmul.f32 0.17677669, %v3678_v32  ;;  %v13664_v14 = vmul.f32 0.17677669, %v13545_v36  ;;  %v16227_v38 = vld [vmem:[#allocation31_spill] sm:$0xff]  ;;  %v16229_v32 = vld [vmem:[#allocation98_spill] sm:$0xff] }
 0xb88   : > { %v13657_v29 = vpop.eup %8372  ;;  %v4175_v18 = vadd.f32 %v13642_v30, %v13627_v59  ;;  %v13666_v40 = vmul.f32 0.17677669, %v3787_v33  ;;  %v5029_v12 = vpop.xlane.xlu0 %5028  ;;  %8386 = vpow2.f32 %v4155_v0  ;;  %v13672_v63 = vmul.f32 %v13587_v34, %v16227_v38 }
 0xb89   : > { %16226 = vst [vmem:[#allocation116_spill] sm:$0xff] %v13655_v50  ;;  %v5342_v27 = vadd.f32 %v13657_v29, %v5326_v42  ;;  %v5055_v49 = vmul.f32 0.17677669, %v5029_v12  ;;  %5473 = vrot.lane.b32.xlu0 %v5435_v3, %s8864_s12  ;;  %v13674_v28 = vpop.eup %8374  ;;  %v4301_v50 = vmul.f32 %v4285_v22, %v16229_v32  ;;  %v4286_v36 = vmul.f32 %v13598_v26, %v13461_v23 }
 0xb8a   : > { %16228 = vst [vmem:[#allocation33_spill] sm:$0xff] %v13672_v63  ;;  %v4397_v33 = vmul.f32 %v13587_v34, %v13452_v16  ;;  %v13683_v0 = vmul.f32 %v13598_v26, %v13438_v19  ;;  %v4191_v3 = vadd.f32 %v13674_v28, %v4175_v18  ;;  %v5088_v42 = vmax.f32 %v5072_v51, %v13645_v52  ;;  %v16231_v18 = vld [vmem:[#allocation110_spill] sm:$0xff] }
 0xb8b   : > { %v5103_v12 = vmax.f32 %v5087_v4, %v5055_v49  ;;  %v13687_v38 = vpop.xlane.xlu1 %3568  ;;  %4451 = vrot.lane.b32.xlu1 %v13550_v21, %s8865_s10  ;;  %v5548_v22 = vmul.f32 %v5532_v15, %v16221_v9  ;;  %v3953_v19 = vmax.f32 %v3937_v35, %v13666_v40  ;;  %v5644_v51 = vmul.f32 %v13559_v45, %v16231_v18  ;;  %v16232_v18 = vld [vmem:[#allocation83_spill] sm:$0xff] }
 0xb8c   : > { %16230 = vst [vmem:[#allocation107_spill] sm:$0xff] %v13683_v0  ;;  %v13692_v23 = vpop.eup %8376  ;;  %v13697_v0 = vpop.xlane.xlu0 %4701  ;;  %v4398_v4 = vmul.f32 %v13598_v26, %v13474_v13  ;;  %8388 = vrcp.f32 %v5342_v27  ;;  %v13713_v45 = vmul.f32 0.17677669, %v13609_v54  ;;  %v13716_v13 = vmul.f32 %v4286_v36, %v16232_v18 }
 0xb8d   : > { %v13703_v63 = vpop.eup %8378  ;;  %v5119_v21 = vsub.f32 %v13527_v60, %v5103_v12  ;;  %v5167_v15 = vsub.f32 %v13417_v10, %v5103_v12  ;;  %v5215_v58 = vsub.f32 %v13585_v41, %v5103_v12  ;;  %4449 = vrot.lane.b32.xlu0 %v13522_v47, %s8865_s10  ;;  %v5263_v16 = vsub.f32 %v5055_v49, %v5103_v12 }
 0xb8e   : > { %v13710_v35 = vpop.eup %8380  ;;  %v13719_v27 = vmul.f32 %v4397_v33, %v16229_v32  ;;  %v4207_v10 = vadd.f32 %v13703_v63, %v4191_v3  ;;  %v13730_v49 = vmul.f32 0.17677669, %v13622_v17  ;;  %v13735_v59 = vmul.f32 %v5644_v51, %v16221_v9 }
 0xb8f   : > { %v13721_v60 = vpop.eup %8382  ;;  %v4176_v41 = vadd.f32 %v13710_v35, %v13692_v23  ;;  %v5145_v47 = vmul.f32 1.442695, %v5119_v21  ;;  %v5193_v43 = vmul.f32 1.442695, %v5167_v15  ;;  %v3899_v11 = vpop.xlane.xlu1 %3898  ;;  %4341 = vrot.lane.b32.xlu1 %v4301_v50, %s8864_s12  ;;  %v5241_v36 = vmul.f32 1.442695, %v5215_v58 }
 0xb90   : > { %v13727_v54 = vpop.eup %8384  ;;  %v5032_v33 = vpop.xlane.xlu0 %5031  ;;  %v13732_v12 = vmul.f32 0.17677669, %v3899_v11  ;;  %v4509_v50 = vmul.f32 %v13587_v34, %v13486_v8  ;;  %v5289_v17 = vmul.f32 1.442695, %v5263_v16  ;;  %v13745_v11 = vmul.f32 %v13721_v60, %v13541_v31 }
 0xb91   : > { %v4192_v3 = vadd.f32 %v13727_v54, %v4176_v41  ;;  %8390 = vpow2.f32 %v5145_v47  ;;  %v5056_v21 = vmul.f32 0.17677669, %v5032_v33  ;;  %5695 = vrot.lane.b32.xlu0 %v13534_v25, %s8866_s1  ;;  %v13753_v25 = vmul.f32 %v4398_v4, %v16232_v18 }
 0xb92   : > { %8392 = vpow2.f32 %v5193_v43  ;;  %v3969_v58 = vmax.f32 %v3953_v19, %v13732_v12  ;;  %16233 = vst [vmem:[#allocation57_spill] sm:$0xff] %v13745_v11  ;;  %v13747_v51 = vpop.eup %8386  ;;  %v4510_v43 = vmul.f32 %v13598_v26, %v13495_v57  ;;  %v13759_v31 = vmul.f32 0.17677669, %v13647_v53 }
 0xb93   : > { %8394 = vrcp.f32 %v4207_v10  ;;  %v5104_v15 = vmax.f32 %v5088_v42, %v5056_v21  ;;  %v13749_v41 = vpop.xlane.xlu1 %3571  ;;  %5587 = vrot.lane.b32.xlu1 %v5548_v22, %s8865_s10  ;;  %v4208_v8 = vadd.f32 %v13747_v51, %v4192_v3  ;;  %v5073_v57 = vmax.f32 %v13730_v49, %v13664_v14 }
 0xb94   : > { %8396 = vpow2.f32 %v5241_v36  ;;  %v4923_v34 = vpop.xlane.xlu0 %4922  ;;  %v3985_v16 = vsub.f32 %v13601_v62, %v3969_v58  ;;  %v4033_v4 = vsub.f32 %v13603_v7, %v3969_v58  ;;  %v13771_v53 = vmul.f32 %v4509_v50, %v16229_v32 }
 0xb95   : > { %v5120_v42 = vsub.f32 %v13564_v37, %v5104_v15  ;;  %v5168_v19 = vsub.f32 %v13499_v48, %v5104_v15  ;;  %v5216_v22 = vsub.f32 %v13645_v52, %v5104_v15  ;;  %5585 = vrot.lane.b32.xlu0 %v13625_v2, %s8865_s10  ;;  %8398 = vpow2.f32 %v5289_v17 }
 0xb96   : > { %v5264_v26 = vsub.f32 %v5056_v21, %v5104_v15  ;;  %v13773_v62 = vpop.eup %8388  ;;  %v4013_v48 = vmul.f32 1.442695, %v3985_v16  ;;  %v4081_v52 = vsub.f32 %v13666_v40, %v3969_v58  ;;  %8400 = vrcp.f32 %v4208_v8 }
 0xb97   : > { %v5147_v37 = vmul.f32 1.442695, %v5120_v42  ;;  %v5195_v10 = vmul.f32 1.442695, %v5168_v19  ;;  %v3902_v47 = vpop.xlane.xlu1 %3901  ;;  %4563 = vrot.lane.b32.xlu1 %v13596_v44, %s8866_s1  ;;  %v5243_v7 = vmul.f32 1.442695, %v5216_v22  ;;  %v5421_v36 = vmul.f32 %v13721_v60, %v13554_v56 }
 0xb98   : > { %v3681_v2 = vpop.xlane.xlu0 %3680  ;;  %v13781_v33 = vmul.f32 %v4510_v43, %v16232_v18  ;;  %v16234_v3 = vmax.f32 %v13620_v55, %v13661_v46  ;;  %v4061_v40 = vmul.f32 1.442695, %v4033_v4  ;;  %v4129_v50 = vsub.f32 %v13732_v12, %v3969_v58 }
 0xb99   : > { %8402 = vpow2.f32 %v5147_v37  ;;  %4561 = vrot.lane.b32.xlu0 %v13569_v1, %s8866_s1  ;;  %v5291_v44 = vmul.f32 1.442695, %v5264_v26  ;;  %v3922_v17 = vmul.f32 0.17677669, %v3902_v47  ;;  %v5422_v56 = vmul.f32 %v13773_v62, %v13616_v61 }
 0xb9a   : > { %v3954_v21 = vmax.f32 %v16234_v3, %v13759_v31  ;;  %8404 = vpow2.f32 %v5195_v10  ;;  %v13795_v43 = vmul.f32 0.17677669, %v13697_v0  ;;  %v13798_v8 = vmul.f32 0.17677669, %v13687_v38 }
 0xb9b   : > { %v13792_v15 = vpop.eup %8390  ;;  %8406 = vpow2.f32 %v4013_v48  ;;  %v4109_v16 = vmul.f32 1.442695, %v4081_v52  ;;  %v4817_v12 = vpop.xlane.xlu1 %4816  ;;  %5697 = vrot.lane.b32.xlu1 %v13651_v6, %s8866_s1  ;;  %v5437_v61 = vmul.f32 %v5421_v36, %v16229_v32  ;;  %v5533_v0 = vmul.f32 %v13721_v60, %v13571_v20 }
 0xb9c   : > { %v13802_v1 = vpop.eup %8392  ;;  %8408 = vpow2.f32 %v5243_v7  ;;  %v4926_v58 = vpop.xlane.xlu0 %4925  ;;  %v3970_v42 = vmax.f32 %v3954_v21, %v3922_v17  ;;  %v4157_v22 = vmul.f32 1.442695, %v4129_v50  ;;  %v5438_v6 = vmul.f32 %v5422_v56, %v16232_v18 }
 0xb9d   : > { %v13807_v19 = vpop.eup %8394  ;;  %v5311_v38 = vadd.f32 %v13802_v1, %v13792_v15  ;;  %8410 = vpow2.f32 %v4061_v40  ;;  %4343 = vrot.lane.b32.xlu0 %v13716_v13, %s8864_s12  ;;  %v13820_v48 = vmul.f32 0.17677669, %v4923_v34  ;;  %v13822_v52 = vmul.f32 0.17677669, %v3681_v2 }
 0xb9e   : > { %v13814_v4 = vpop.eup %8396  ;;  %8412 = vpow2.f32 %v5291_v44  ;;  %v3986_v26 = vsub.f32 %v13620_v55, %v3970_v42  ;;  %v4034_v37 = vsub.f32 %v13661_v46, %v3970_v42  ;;  %v4082_v20 = vsub.f32 %v13759_v31, %v3970_v42 }
 0xb9f   : > { %v5327_v10 = vadd.f32 %v13814_v4, %v5311_v38  ;;  %8414 = vpow2.f32 %v4109_v16  ;;  %v3793_v47 = vpop.xlane.xlu1 %3792  ;;  %5479 = vrot.lane.b32.xlu1 %v5438_v6, %s8864_s12  ;;  %v13825_v13 = vpop.eup %8398  ;;  %v4130_v3 = vsub.f32 %v3922_v17, %v3970_v42  ;;  %v5645_v46 = vmul.f32 %v13721_v60, %v13583_v24 }
 0xba0   : > { %v4015_v7 = vmul.f32 1.442695, %v3986_v26  ;;  %v4063_v36 = vmul.f32 1.442695, %v4034_v37  ;;  %v3684_v55 = vpop.xlane.xlu0 %3683  ;;  %v5074_v34 = vmax.f32 %v13795_v43, %v13713_v45  ;;  %8416 = vpow2.f32 %v4157_v22  ;;  %v13835_v21 = vpop.eup %8400 }
 0xba1   : > { %v5343_v31 = vadd.f32 %v13825_v13, %v5327_v10  ;;  %5477 = vrot.lane.b32.xlu0 %v5437_v61, %s8864_s12  ;;  %v4287_v2 = vmul.f32 %v13807_v19, %v13642_v30  ;;  %v13837_v40 = vmul.f32 0.17677669, %v4926_v58  ;;  %v4111_v50 = vmul.f32 1.442695, %v4082_v20 }
 0xba2   : > { %8418 = vpow2.f32 %v4015_v7  ;;  %v5534_v24 = vmul.f32 %v13773_v62, %v13634_v5  ;;  %v5089_v44 = vmax.f32 %v5073_v57, %v13820_v48  ;;  %v3939_v17 = vmax.f32 %v13798_v8, %v13822_v52 }
 0xba3   : > { %v13841_v60 = vpop.eup %8402  ;;  %v13850_v30 = vmul.f32 0.17677669, %v13749_v41  ;;  %v4820_v56 = vpop.xlane.xlu1 %4819  ;;  %4455 = vrot.lane.b32.xlu1 %v13753_v25, %s8865_s10  ;;  %v5549_v16 = vmul.f32 %v5533_v0, %v16229_v32  ;;  %8420 = vpow2.f32 %v4063_v36  ;;  %v4159_v58 = vmul.f32 1.442695, %v4130_v3  ;;  %v16235_v25 = vld [vmem:[#allocation91_spill] sm:$0xff] }
 0xba4   : > { %v13855_v5 = vpop.eup %8404  ;;  %v13857_v42 = vmul.f32 0.17677669, %v3684_v55  ;;  %v4705_v61 = vpop.xlane.xlu0 %4704  ;;  %v13860_v57 = vmul.f32 %v5645_v46, %v16229_v32  ;;  %8422 = vrcp.f32 %v5343_v31  ;;  %v13866_v22 = vmul.f32 0.17677669, %v3793_v47 }
 0xba5   : > { %v13862_v38 = vpop.eup %8406  ;;  %v5312_v41 = vadd.f32 %v13855_v5, %v13841_v60  ;;  %4453 = vrot.lane.b32.xlu0 %v13719_v27, %s8865_s10  ;;  %v4303_v0 = vmul.f32 %v4287_v2, %v16235_v25  ;;  %v13874_v26 = vmax.f32 %v5074_v34, %v13837_v40  ;;  %8424 = vpow2.f32 %v4111_v50  ;;  %v16237_v50 = vld [vmem:[#allocation60_spill] sm:$0xff] }
 0xba6   : > { %v13871_v6 = vpop.eup %8408  ;;  %v13876_v37 = vmul.f32 0.17677669, %v4817_v12  ;;  %v5550_v20 = vmul.f32 %v5534_v24, %v16232_v18  ;;  %v4288_v27 = vmul.f32 %v13835_v21, %v13710_v35  ;;  %v4399_v36 = vmul.f32 %v13807_v19, %v13674_v28 }
 0xba7   : > { %v13879_v10 = vpop.eup %8410  ;;  %v5328_v47 = vadd.f32 %v13871_v6, %v5312_v41  ;;  %v3796_v7 = vpop.xlane.xlu1 %3795  ;;  %4345 = vrot.lane.b32.xlu1 %v4303_v0, %s8864_s12  ;;  %v13889_v3 = vmul.f32 %v13773_v62, %v13605_v39  ;;  %8426 = vpow2.f32 %v4159_v58  ;;  %v3940_v46 = vmax.f32 %v13850_v30, %v13857_v42 }
 0xba8   : > { %v13891_v12 = vpop.eup %8412  ;;  %v4177_v55 = vadd.f32 %v13879_v10, %v13862_v38  ;;  %v5035_v31 = vpop.xlane.xlu0 %5034  ;;  %v5646_v35 = vmul.f32 %v13773_v62, %v13657_v29  ;;  %v3955_v39 = vmax.f32 %v3939_v17, %v13866_v22  ;;  %v13907_v24 = vmul.f32 %v13807_v19, %v16237_v50 }
 0xba9   : > { %16236 = vst [vmem:[#allocation90_spill] sm:$0xff] %v13889_v3  ;;  %v13899_v34 = vpop.eup %8414  ;;  %v5344_v28 = vadd.f32 %v13891_v12, %v5328_v47  ;;  %v5057_v2 = vmul.f32 0.17677669, %v5035_v31  ;;  %5699 = vrot.lane.b32.xlu0 %v13735_v59, %s8866_s1  ;;  %v13910_v41 = vmul.f32 0.17677669, %v4705_v61  ;;  %v13914_v29 = vmul.f32 %v13835_v21, %v13727_v54  ;;  %v16240_v31 = vld [vmem:[#allocation72_spill] sm:$0xff] }
 0xbaa   : > { %16238 = vst [vmem:[#allocation67_spill] sm:$0xff] %v13907_v24  ;;  %v4193_v58 = vadd.f32 %v13899_v34, %v4177_v55  ;;  %v13918_v62 = vmul.f32 %v13835_v21, %v13692_v23  ;;  %v13920_v17 = vpop.eup %8416  ;;  %v13922_v59 = vmul.f32 0.17677669, %v4820_v56  ;;  %v4304_v55 = vmul.f32 %v4288_v27, %v16240_v31 }
 0xbab   : > { %v5105_v0 = vmax.f32 %v5089_v44, %v5057_v2  ;;  %v3905_v47 = vpop.xlane.xlu1 %3904  ;;  %5591 = vrot.lane.b32.xlu1 %v5550_v20, %s8865_s10  ;;  %v13927_v61 = vmul.f32 %v4399_v36, %v16235_v25  ;;  %8428 = vrcp.f32 %v5344_v28 }
 0xbac   : > { %16239 = vst [vmem:[#allocation27_spill] sm:$0xff] %v13918_v62  ;;  %v13929_v50 = vpop.eup %8418  ;;  %v4209_v54 = vadd.f32 %v13920_v17, %v4193_v58  ;;  %v4708_v23 = vpop.xlane.xlu0 %4707  ;;  %v13932_v62 = vmul.f32 0.17677669, %v3796_v7  ;;  %v13934_v24 = vmul.f32 0.17677669, %v3905_v47  ;;  %v13948_v58 = vmul.f32 %v5646_v35, %v16232_v18 }
 0xbad   : > { %v5121_v44 = vsub.f32 %v13730_v49, %v5105_v0  ;;  %v5169_v56 = vsub.f32 %v13664_v14, %v5105_v0  ;;  %v5217_v20 = vsub.f32 %v13820_v48, %v5105_v0  ;;  %v5265_v27 = vsub.f32 %v5057_v2, %v5105_v0  ;;  %5589 = vrot.lane.b32.xlu0 %v5549_v16, %s8865_s10  ;;  %v13940_v36 = vpop.eup %8420 }
 0xbae   : > { %8430 = vrcp.f32 %v4209_v54  ;;  %v13945_v7 = vmax.f32 %v3955_v39, %v13934_v24  ;;  %v13950_v49 = vpop.eup %8422  ;;  %v4178_v14 = vadd.f32 %v13940_v36, %v13929_v50  ;;  %v13958_v39 = vmul.f32 0.17677669, %v4708_v23 }
 0xbaf   : > { %v5149_v48 = vmul.f32 1.442695, %v5121_v44  ;;  %v5197_v2 = vmul.f32 1.442695, %v5169_v56  ;;  %v5245_v16 = vmul.f32 1.442695, %v5217_v20  ;;  %v3908_v0 = vpop.xlane.xlu1 %3907  ;;  %4567 = vrot.lane.b32.xlu1 %v13781_v33, %s8866_s1  ;;  %v13956_v47 = vpop.eup %8424  ;;  %v3956_v56 = vmax.f32 %v3940_v46, %v13932_v62 }
 0xbb0   : > { %v5293_v54 = vmul.f32 1.442695, %v5265_v27  ;;  %v5038_v28 = vpop.xlane.xlu0 %5037  ;;  %v3987_v35 = vsub.f32 %v13798_v8, %v13945_v7  ;;  %v4035_v3 = vsub.f32 %v13822_v52, %v13945_v7  ;;  %v4194_v44 = vadd.f32 %v13956_v47, %v4178_v14 }
 0xbb1   : > { %8432 = vpow2.f32 %v5149_v48  ;;  %v5058_v20 = vmul.f32 0.17677669, %v5038_v28  ;;  %4565 = vrot.lane.b32.xlu0 %v13771_v53, %s8866_s1  ;;  %v13968_v33 = vpop.eup %8426  ;;  %v4083_v27 = vsub.f32 %v13866_v22, %v13945_v7  ;;  %v5423_v8 = vmul.f32 %v13950_v49, %v13802_v1 }
 0xbb2   : > { %8434 = vpow2.f32 %v5197_v2  ;;  %v4017_v23 = vmul.f32 1.442695, %v3987_v35  ;;  %v4210_v52 = vadd.f32 %v13968_v33, %v4194_v44  ;;  %v4065_v46 = vmul.f32 1.442695, %v4035_v3 }
 0xbb3   : > { %8436 = vpow2.f32 %v5245_v16  ;;  %v5106_v14 = vmax.f32 %v13874_v26, %v5058_v20  ;;  %v5044_v28 = vpop.xlane.xlu1 %5043  ;;  %5701 = vrot.lane.b32.xlu1 %v13860_v57, %s8866_s1  ;;  %v5076_v53 = vmax.f32 %v13958_v39, %v13922_v59  ;;  %v4131_v22 = vsub.f32 %v13934_v24, %v13945_v7 }
 0xbb4   : > { %8438 = vpow2.f32 %v5293_v54  ;;  %v4929_v48 = vpop.xlane.xlu0 %4928  ;;  %v3924_v2 = vmul.f32 0.17677669, %v3908_v0  ;;  %v4113_v54 = vmul.f32 1.442695, %v4083_v27  ;;  %v13988_v24 = vmul.f32 0.17677669, %v5044_v28 }
 0xbb5   : > { %8440 = vrcp.f32 %v4210_v52  ;;  %v5122_v1 = vsub.f32 %v13795_v43, %v5106_v14  ;;  %v5170_v16 = vsub.f32 %v13713_v45, %v5106_v14  ;;  %v5218_v26 = vsub.f32 %v13837_v40, %v5106_v14  ;;  %4347 = vrot.lane.b32.xlu0 %v4304_v55, %s8864_s12  ;;  %v13986_v3 = vpop.eup %8428 }
 0xbb6   : > { %v5266_v57 = vsub.f32 %v5058_v20, %v5106_v14  ;;  %8442 = vpow2.f32 %v4017_v23  ;;  %v3972_v35 = vmax.f32 %v3956_v56, %v3924_v2  ;;  %v13994_v40 = vmul.f32 0.17677669, %v4929_v48 }
 0xbb7   : > { %v5151_v44 = vmul.f32 1.442695, %v5122_v1  ;;  %v5199_v11 = vmul.f32 1.442695, %v5170_v16  ;;  %8444 = vpow2.f32 %v4065_v46  ;;  %v13990_v7 = vpop.permute.xlu1 %4327  ;;  %v5247_v45 = vmul.f32 1.442695, %v5218_v26 }
 0xbb8   : > { %v13992_v43 = vpop.eup %8430  ;;  %v5295_v0 = vmul.f32 1.442695, %v5266_v57  ;;  %v3988_v55 = vsub.f32 %v13850_v30, %v3972_v35  ;;  %v4932_v52 = vpop.xlane.xlu0 %4931  ;;  %v4036_v20 = vsub.f32 %v13857_v42, %v3972_v35  ;;  %v4084_v56 = vsub.f32 %v13932_v62, %v3972_v35 }
 0xbb9   : > { %8446 = vpow2.f32 %v5151_v44  ;;  %v4132_v23 = vsub.f32 %v3924_v2, %v3972_v35  ;;  %v4948_v14 = vmul.f32 0.17677669, %v4932_v52  ;;  %v5439_v46 = vmul.f32 %v5423_v8, %v16235_v25 }
 0xbba   : > { %8448 = vpow2.f32 %v5199_v11  ;;  %v4019_v27 = vmul.f32 1.442695, %v3988_v55  ;;  %v4161_v1 = vmul.f32 1.442695, %v4131_v22  ;;  %v4067_v48 = vmul.f32 1.442695, %v4036_v20 }
 0xbbb   : > { %v14000_v28 = vpop.eup %8432  ;;  %8450 = vpow2.f32 %v4113_v54  ;;  %v14002_v16 = vpop.permute.xlu1 %5461  ;;  %v4416_v30 = vmul.f32 %v13914_v29, %v16240_v31  ;;  %v16241_v11 = vmax.f32 %v13910_v41, %v13876_v37  ;;  %v5092_v62 = vmax.f32 %v5076_v53, %v4948_v14  ;;  %5481 = vrot.lane.b32.xlu0 %v5439_v46, %s8864_s12 }
 0xbbc   : > { %v14006_v26 = vpop.eup %8434  ;;  %8452 = vpow2.f32 %v5247_v45  ;;  %v5041_v8 = vpop.xlane.xlu0 %5040  ;;  %v5424_v22 = vmul.f32 %v13986_v3, %v13855_v5  ;;  %v4115_v57 = vmul.f32 1.442695, %v4084_v56  ;;  %v4163_v44 = vmul.f32 1.442695, %v4132_v23 }
 0xbbd   : > { %v5091_v42 = vmax.f32 %v16241_v11, %v13994_v40  ;;  %v14015_v2 = vpop.eup %8436  ;;  %v5313_v29 = vadd.f32 %v14006_v26, %v14000_v28  ;;  %8454 = vpow2.f32 %v5295_v0  ;;  %v14019_v54 = vmul.f32 0.17677669, %v5041_v8 }
 0xbbe   : > { %v14021_v35 = vpop.eup %8438  ;;  %8456 = vpow2.f32 %v4019_v27  ;;  %v5108_v53 = vmax.f32 %v5092_v62, %v13988_v24  ;;  %v5440_v45 = vmul.f32 %v5424_v22, %v16240_v31  ;;  %v5535_v0 = vmul.f32 %v13950_v49, %v13814_v4 }
 0xbbf   : > { %v14025_v55 = vpop.eup %8440  ;;  %v5329_v5 = vadd.f32 %v14015_v2, %v5313_v29  ;;  %8458 = vpow2.f32 %v4067_v48  ;;  %v5107_v52 = vmax.f32 %v5091_v42, %v14019_v54  ;;  %v14029_v20 = vpop.permute.xlu1 %4437  ;;  %4457 = vrot.lane.b32.xlu0 %v13927_v61, %s8865_s10 }
 0xbc0   : > { %v14033_v56 = vpop.eup %8442  ;;  %8460 = vpow2.f32 %v4161_v1  ;;  %v5124_v23 = vsub.f32 %v13958_v39, %v5108_v53  ;;  %v5172_v27 = vsub.f32 %v13922_v59, %v5108_v53  ;;  %v5220_v46 = vsub.f32 %v4948_v14, %v5108_v53  ;;  %5483 = vrot.lane.b32.xlu1 %v5440_v45, %s8864_s12  ;;  %v14040_v48 = vpop.permute.xlu0 %4325 }
 0xbc1   : > { %v14042_v11 = vpop.eup %8444  ;;  %v5345_v42 = vadd.f32 %v14021_v35, %v5329_v5  ;;  %8462 = vpow2.f32 %v4115_v57  ;;  %v5268_v4 = vsub.f32 %v13988_v24, %v5108_v53  ;;  %v5123_v1 = vsub.f32 %v13910_v41, %v5107_v52 }
 0xbc2   : > { %8464 = vpow2.f32 %v4163_v44  ;;  %v5155_v39 = vmul.f32 1.442695, %v5124_v23  ;;  %v5203_v59 = vmul.f32 1.442695, %v5172_v27  ;;  %v5251_v14 = vmul.f32 1.442695, %v5220_v46 }
 0xbc3   : > { %v14047_v62 = vpop.eup %8446  ;;  %8466 = vrcp.f32 %v5345_v42  ;;  %v4179_v61 = vadd.f32 %v14042_v11, %v14033_v56  ;;  %v5299_v8 = vmul.f32 1.442695, %v5268_v4  ;;  %v5171_v22 = vsub.f32 %v13876_v37, %v5107_v52  ;;  %v14052_v29 = vpop.permute.xlu1 %4439  ;;  %5703 = vrot.lane.b32.xlu0 %v13948_v58, %s8866_s1 }
 0xbc4   : > { %v14054_v57 = vpop.eup %8448  ;;  %8468 = vpow2.f32 %v5155_v39  ;;  %v5153_v24 = vmul.f32 1.442695, %v5123_v1  ;;  %v5219_v41 = vsub.f32 %v13994_v40, %v5107_v52  ;;  %4459 = vrot.lane.b32.xlu1 %v4416_v30, %s8865_s10  ;;  %v14060_v44 = vpop.permute.xlu0 %5463  ;;  %v4289_v53 = vmul.f32 %v13992_v43, %v13879_v10  ;;  %v16242_v39 = vld [vmem:[#allocation113_spill] sm:$0xff] }
 0xbc5   : > { %v14064_v45 = vpop.eup %8450  ;;  %v5314_v37 = vadd.f32 %v14054_v57, %v14047_v62  ;;  %8470 = vpow2.f32 %v5203_v59  ;;  %v5201_v5 = vmul.f32 1.442695, %v5171_v22  ;;  %v5267_v40 = vsub.f32 %v14019_v54, %v5107_v52 }
 0xbc6   : > { %v14068_v23 = vpop.eup %8452  ;;  %8472 = vpow2.f32 %v5251_v14  ;;  %v4511_v58 = vmul.f32 %v13807_v19, %v13703_v63  ;;  %v4195_v10 = vadd.f32 %v14064_v45, %v4179_v61  ;;  %v5551_v46 = vmul.f32 %v5535_v0, %v16235_v25 }
 0xbc7   : > { %v14073_v30 = vpop.eup %8454  ;;  %v5330_v27 = vadd.f32 %v14068_v23, %v5314_v37  ;;  %8474 = vpow2.f32 %v5299_v8  ;;  %v14078_v42 = vpop.permute.xlu1 %4329  ;;  %v5249_v1 = vmul.f32 1.442695, %v5219_v41  ;;  %v4305_v54 = vmul.f32 %v4289_v53, %v16242_v39 }
 0xbc8   : > { %v14080_v4 = vpop.eup %8456  ;;  %8476 = vpow2.f32 %v5153_v24  ;;  %v14083_v52 = vpop.permute.xlu0 %5573  ;;  %5593 = vrot.lane.b32.xlu0 %v5551_v46, %s8865_s10  ;;  %v5536_v0 = vmul.f32 %v13986_v3, %v13871_v6  ;;  %v5297_v61 = vmul.f32 1.442695, %v5267_v40  ;;  %v4527_v24 = vmul.f32 %v4511_v58, %v16235_v25 }
 0xbc9   : > { %v14085_v63 = vpop.eup %8458  ;;  %v5346_v19 = vadd.f32 %v14073_v30, %v5330_v27  ;;  %8478 = vpow2.f32 %v5201_v5  ;;  %4349 = vrot.lane.b32.xlu1 %v4305_v54, %s8864_s12  ;;  %v4290_v41 = vmul.f32 %v14025_v55, %v13940_v36  ;;  %v4512_v27 = vmul.f32 %v13835_v21, %v13747_v51  ;;  %v16243_v54 = vld [vmem:[#allocation73_spill] sm:$0xff] }
 0xbca   : > { %v14091_v59 = vpop.eup %8460  ;;  %v4180_v14 = vadd.f32 %v14085_v63, %v14080_v4  ;;  %v5552_v5 = vmul.f32 %v5536_v0, %v16240_v31 }
 0xbcb   : > { %v14096_v8 = vpop.eup %8462  ;;  %8480 = vrcp.f32 %v5346_v19  ;;  %v4211_v22 = vadd.f32 %v14091_v59, %v4195_v10  ;;  %v14102_v53 = vpop.permute.xlu1 %5575  ;;  %v4306_v19 = vmul.f32 %v4290_v41, %v16243_v54 }
 0xbcc   : > { %v14104_v6 = vpop.eup %8464  ;;  %v4196_v37 = vadd.f32 %v14096_v8, %v4180_v14  ;;  %8482 = vpow2.f32 %v5249_v1  ;;  %v14108_v40 = vpop.permute.xlu0 %4549  ;;  %4569 = vrot.lane.b32.xlu0 %v4527_v24, %s8866_s1  ;;  %v4528_v14 = vmul.f32 %v4512_v27, %v16240_v31 }
 0xbcd   : > { %v14112_v10 = vpop.eup %8466  ;;  %8484 = vpow2.f32 %v5297_v61  ;;  %5595 = vrot.lane.b32.xlu1 %v5552_v5, %s8865_s10  ;;  %v4401_v5 = vmul.f32 %v13992_v43, %v13899_v34 }
 0xbce   : > { %v14115_v58 = vpop.eup %8468  ;;  %v4212_v36 = vadd.f32 %v14104_v6, %v4196_v37  ;;  %v5425_v46 = vmul.f32 %v14112_v10, %v14006_v26  ;;  %8486 = vrcp.f32 %v4211_v22  ;;  %v5647_v26 = vmul.f32 %v13950_v49, %v13825_v13 }
 0xbcf   : > { %v14121_v1 = vpop.eup %8470  ;;  %v14124_v51 = vpop.permute.xlu1 %4551  ;;  %v14151_v13 = vmul.f32 %v13950_v49, %v13792_v15 }
 0xbd0   : > { %v14126_v21 = vpop.eup %8472  ;;  %8488 = vrcp.f32 %v4212_v36  ;;  %v5316_v0 = vadd.f32 %v14121_v1, %v14115_v58  ;;  %v14131_v61 = vpop.permute.xlu0 %4331  ;;  %4351 = vrot.lane.b32.xlu0 %v4306_v19, %s8864_s12  ;;  %v5441_v22 = vmul.f32 %v5425_v46, %v16242_v39  ;;  %v14155_v46 = vmul.f32 %v13986_v3, %v13841_v60 }
 0xbd1   : > { %v14135_v24 = vpop.eup %8474  ;;  %4571 = vrot.lane.b32.xlu1 %v4528_v14, %s8866_s1  ;;  %v14159_v19 = vmul.f32 %v13992_v43, %v13862_v38  ;;  %v5663_v15 = vmul.f32 %v5647_v26, %v16235_v25  ;;  %v14173_v60 = vmul.f32 %v14112_v10, %v14000_v28  ;;  %v5648_v28 = vmul.f32 %v13986_v3, %v13891_v12 }
 0xbd2   : > { %v14139_v41 = vpop.eup %8476  ;;  %v5332_v37 = vadd.f32 %v14126_v21, %v5316_v0  ;;  %16244 = vst [vmem:[#allocation28_spill] sm:$0xff] %v14155_v46  ;;  %v14163_v0 = vmul.f32 %v14025_v55, %v13929_v50 }
 0xbd3   : > { %v14145_v27 = vpop.eup %8478  ;;  %v14147_v36 = vpop.permute.xlu1 %5685  ;;  %16245 = vst [vmem:[#allocation89_spill] sm:$0xff] %v14159_v19  ;;  %16247 = vst [vmem:[#allocation94_spill] sm:$0xff] %v14173_v60  ;;  %v5664_v3 = vmul.f32 %v5648_v28, %v16240_v31  ;;  %v4513_v28 = vmul.f32 %v13992_v43, %v13920_v17 }
 0xbd4   : > { %16246 = vst [vmem:[#allocation96_spill] sm:$0xff] %v14163_v0  ;;  %v5348_v34 = vadd.f32 %v14135_v24, %v5332_v37  ;;  %v5315_v14 = vadd.f32 %v14145_v27, %v14139_v41  ;;  %v14169_v49 = vpop.permute.xlu0 %5465  ;;  %5485 = vrot.lane.b32.xlu0 %v5441_v22, %s8864_s12  ;;  %v4417_v37 = vmul.f32 %v4401_v5, %v16242_v39 }
 0xbd5   : > { %v14175_v46 = vpop.eup %8480  ;;  %5705 = vrot.lane.b32.xlu1 %v5663_v15, %s8866_s1  ;;  %v4402_v15 = vmul.f32 %v14025_v55, %v13956_v47  ;;  %v5537_v47 = vmul.f32 %v14112_v10, %v14015_v2  ;;  %v4529_v17 = vmul.f32 %v4513_v28, %v16242_v39 }
 0xbd6   : > { %v14178_v38 = vpop.eup %8482  ;;  %8490 = vrcp.f32 %v5348_v34  ;;  %v5426_v50 = vmul.f32 %v14175_v46, %v14054_v57  ;;  %v14205_v12 = vmul.f32 %v14175_v46, %v14047_v62 }
 0xbd7   : > { %v5331_v26 = vadd.f32 %v14178_v38, %v5315_v14  ;;  %v14187_v60 = vpop.permute.xlu1 %5467  ;;  %v14189_v0 = vpop.eup %8484  ;;  %v5553_v2 = vmul.f32 %v5537_v47, %v16242_v39 }
 0xbd8   : > { %v14191_v22 = vpop.permute.xlu0 %4441  ;;  %v5442_v34 = vmul.f32 %v5426_v50, %v16243_v54  ;;  %v14196_v19 = vpop.eup %8486  ;;  %4461 = vrot.lane.b32.xlu0 %v4417_v37, %s8865_s10  ;;  %16248 = vst [vmem:[#allocation82_spill] sm:$0xff] %v14205_v12  ;;  %v16263_v12 = vld [vmem:[#allocation183_spill] sm:$0xff] }
 0xbd9   : > { %v5347_v57 = vadd.f32 %v14189_v0, %v5331_v26  ;;  %v4418_v26 = vmul.f32 %v4402_v15, %v16243_v54  ;;  %v4291_v37 = vmul.f32 %v14196_v19, %v14042_v11 }
 0xbda   : > { %v14200_v5 = vpop.eup %8488  ;;  %5487 = vrot.lane.b32.xlu1 %v5442_v34, %s8864_s12  ;;  %v14219_v34 = vmul.f32 %v14196_v19, %v14033_v56  ;;  %v16251_v56 = vld [vmem:[#allocation108_spill] sm:$0xff] }
 0xbdb   : > { %8492 = vrcp.f32 %v5347_v57  ;;  %v14210_v14 = vpop.permute.xlu1 %4443  ;;  %v14223_v62 = vmul.f32 %v14200_v5, %v14080_v4  ;;  %v5538_v4 = vmul.f32 %v14175_v46, %v14068_v23  ;;  %v4292_v43 = vmul.f32 %v14200_v5, %v14085_v63 }
 0xbdc   : > { %v14212_v50 = vpop.permute.xlu0 %5687  ;;  %16249 = vst [vmem:[#allocation100_spill] sm:$0xff] %v14219_v34  ;;  %5707 = vrot.lane.b32.xlu0 %v5664_v3, %s8866_s1  ;;  %v4307_v34 = vmul.f32 %v4291_v37, %v16251_v56  ;;  %v4514_v23 = vmul.f32 %v14025_v55, %v13968_v33  ;;  %v5649_v33 = vmul.f32 %v14112_v10, %v14021_v35 }
 0xbdd   : > { %16250 = vst [vmem:[#allocation99_spill] sm:$0xff] %v14223_v62  ;;  %v5554_v37 = vmul.f32 %v5538_v4, %v16243_v54  ;;  %v5650_v10 = vmul.f32 %v14175_v46, %v14073_v30  ;;  %v16255_v30 = vld [vmem:[#allocation202_spill] sm:$0xff] }
 0xbde   : > { %4463 = vrot.lane.b32.xlu1 %v4418_v26, %s8865_s10  ;;  %v4530_v4 = vmul.f32 %v4514_v23, %v16243_v54  ;;  %v3395_v46 = vmul.f32 %v16255_v30, %v16251_v56 }
 0xbdf   : > { %v14230_v15 = vpop.permute.xlu1 %4333 }
 0xbe0   : > { %v14232_v11 = vpop.eup %8490  ;;  %v14234_v57 = vpop.permute.xlu0 %5577  ;;  %5597 = vrot.lane.b32.xlu0 %v5553_v2, %s8865_s10 }
 0xbe1   : > { %v14243_v3 = vmul.f32 %v14232_v11, %v14115_v58 }
 0xbe2   : > { %4353 = vrot.lane.b32.xlu1 %v4307_v34, %s8864_s12  ;;  %v16254_v34 = vld [vmem:[#allocation80_spill] sm:$0xff] }
 0xbe3   : > { %16252 = vst [vmem:[#allocation68_spill] sm:$0xff] %v14243_v3  ;;  %v14248_v47 = vpop.permute.xlu1 %5579  ;;  %v4308_v28 = vmul.f32 %v4292_v43, %v16254_v34  ;;  %v5665_v43 = vmul.f32 %v5649_v33, %v16242_v39 }
 0xbe4   : > { %v14250_v26 = vpop.permute.xlu0 %4553  ;;  %4573 = vrot.lane.b32.xlu0 %v4529_v17, %s8866_s1 }
 0xbe5   : > { %v8493_v2 = vpop.eup %8492 }
 0xbe6   : > { %5599 = vrot.lane.b32.xlu1 %v5554_v37, %s8865_s10  ;;  %v14258_v58 = vmul.f32 %v8493_v2, %v14139_v41  ;;  %v5427_v63 = vmul.f32 %v8493_v2, %v14145_v27  ;;  %v4403_v41 = vmul.f32 %v14196_v19, %v14064_v45  ;;  %v5428_v37 = vmul.f32 %v14232_v11, %v14121_v1 }
 0xbe7   : > { %v14262_v3 = vpop.permute.xlu1 %4555  ;;  %v5666_v1 = vmul.f32 %v5650_v10, %v16243_v54 }
 0xbe8   : > { %16253 = vst [vmem:[#allocation111_spill] sm:$0xff] %v14258_v58  ;;  %v14264_v62 = vpop.permute.xlu0 %4335  ;;  %4355 = vrot.lane.b32.xlu0 %v4308_v28, %s8864_s12  ;;  %v5443_v55 = vmul.f32 %v5427_v63, %v16251_v56  ;;  %v4419_v35 = vmul.f32 %v4403_v41, %v16251_v56  ;;  %v5444_v28 = vmul.f32 %v5428_v37, %v16254_v34 }
 0xbe9   : > { %v4404_v63 = vmul.f32 %v14200_v5, %v14096_v8 }
 0xbea   : > { %4575 = vrot.lane.b32.xlu1 %v4530_v4, %s8866_s1 }
 0xbeb   : > { %v14274_v17 = vpop.permute.xlu1 %5689  ;;  %v4420_v41 = vmul.f32 %v4404_v63, %v16254_v34 }
 0xbec   : > { %v14276_v27 = vpop.permute.xlu0 %5469  ;;  %5489 = vrot.lane.b32.xlu0 %v5443_v55, %s8864_s12  ;;  %v5539_v55 = vmul.f32 %v8493_v2, %v14178_v38  ;;  %v16256_v38 = vld [vmem:[#allocation200_spill] sm:$0xff] }
 0xbed   : > { %v3396_v10 = vmul.f32 %v16256_v38, %v16254_v34 }
 0xbee   : > { %5709 = vrot.lane.b32.xlu1 %v5665_v43, %s8866_s1  ;;  %v5555_v8 = vmul.f32 %v5539_v55, %v16251_v56 }
 0xbef   : > { %v14286_v23 = vpop.permute.xlu1 %5471 }
 0xbf0   : > { %v14288_v45 = vpop.permute.xlu0 %4445  ;;  %4465 = vrot.lane.b32.xlu0 %v4419_v35, %s8865_s10  ;;  %v4515_v35 = vmul.f32 %v14196_v19, %v14091_v59  ;;  %v16257_v59 = vld [vmem:[#allocation167_spill] sm:$0xff]  ;;  %v16258_v19 = vld [vmem:[#allocation172_spill] sm:$0xff] }
 0xbf1   : > { %v3110_v55 = vmul.f32 %v16258_v19, %v16257_v59  ;;  %v16261_v59 = vld [vmem:[#allocation65_spill] sm:$0xff] }
 0xbf2   : > { %5491 = vrot.lane.b32.xlu1 %v5444_v28, %s8864_s12  ;;  %v5540_v28 = vmul.f32 %v14232_v11, %v14126_v21  ;;  %v4531_v30 = vmul.f32 %v4515_v35, %v16251_v56  ;;  %v5651_v21 = vmul.f32 %v8493_v2, %v14189_v0 }
 0xbf3   : > { %v14296_v4 = vpop.permute.xlu1 %4447 }
 0xbf4   : > { %v14298_v33 = vpop.permute.xlu0 %5691  ;;  %5711 = vrot.lane.b32.xlu0 %v5666_v1, %s8866_s1  ;;  %v5667_v2 = vmul.f32 %v5651_v21, %v16251_v56 }
 0xbf6   : > { %3441 = vrot.lane.b32.xlu1 %v3395_v46, %s8866_s1  ;;  %v4516_v46 = vmul.f32 %v14200_v5, %v14104_v6  ;;  %v5652_v6 = vmul.f32 %v14232_v11, %v14135_v24  ;;  %v16259_v5 = vld [vmem:[#allocation70_spill] sm:$0xff]  ;;  %v16264_v11 = vld [vmem:[#allocation36_spill] sm:$0xff] }
 0xbf7   : > { %v14306_v43 = vpop.permute.xlu1 %4337 }
 0xbf8   : > { %v14308_v37 = vpop.permute.xlu0 %5581  ;;  %4467 = vrot.lane.b32.xlu0 %v4420_v41, %s8865_s10  ;;  %v5556_v41 = vmul.f32 %v5540_v28, %v16254_v34  ;;  %v4532_v35 = vmul.f32 %v4516_v46, %v16254_v34  ;;  %v16262_v28 = vld [vmem:[#allocation173_spill] sm:$0xff]  ;;  %v5668_v24 = vmul.f32 %v5652_v6, %v16254_v34 }
 0xbf9   : > { %v16269_v6 = vld [vmem:[#allocation21_spill] sm:$0xff] }
 0xbfa   : > { %5601 = vrot.lane.b32.xlu1 %v5555_v8, %s8865_s10 }
 0xbfb   : > { %v14319_v1 = vpop.permute.xlu1 %5583 }
 0xbfc   : > { %v14321_v63 = vpop.permute.xlu0 %4557  ;;  %3443 = vrot.lane.b32.xlu0 %v3396_v10, %s8866_s1  ;;  %v16260_v10 = vld [vmem:[#allocation190_spill] sm:$0xff] }
 0xbfd   : > { %v3125_v58 = vmul.f32 %v16260_v10, %v16259_v5 }
 0xbfe   : > { %4577 = vrot.lane.b32.xlu1 %v4531_v30, %s8866_s1  ;;  %v3126_v30 = vmul.f32 %v3110_v55, %v16261_v59  ;;  %v16266_v55 = vld [vmem:[#allocation188_spill] sm:$0xff] }
 0xbff   : > { %v14332_v8 = vpop.permute.xlu1 %4559  ;;  %v3237_v0 = vadd.f32 %v16262_v28, %v3125_v58  ;;  %v16267_v58 = vld [vmem:[#allocation115_spill] sm:$0xff]  ;;  %v16268_v28 = vld [vmem:[#allocation53_spill] sm:$0xff] }
 0xc00   : > { %v14334_v38 = vpop.permute.xlu0 %4339  ;;  %5603 = vrot.lane.b32.xlu0 %v5556_v41, %s8865_s10  ;;  %v3238_v46 = vadd.f32 %v16263_v12, %v3126_v30  ;;  %v16265_v41 = vld [vmem:[#allocation35_spill] sm:$0xff]  ;;  %v4262_v21 = vmul.f32 %v16267_v58, %v16261_v59 }
 0xc01   : > { %v3349_v10 = vadd.f32 %v16264_v11, %v3237_v0  ;;  %v4261_v39 = vmul.f32 %v16265_v41, %v16259_v5 }
 0xc02   : > { %4579 = vrot.lane.b32.xlu1 %v4532_v35, %s8866_s1  ;;  %v3350_v35 = vadd.f32 %v16266_v55, %v3238_v46  ;;  %v4374_v11 = vadd.f32 %v13990_v7, %v4262_v21 }
 0xc03   : > { %v14346_v19 = vpop.permute.xlu1 %5693  ;;  %v3461_v12 = vadd.f32 %v16268_v28, %v3349_v10  ;;  %v4373_v30 = vadd.f32 %v14040_v48, %v4261_v39  ;;  %v16272_v28 = vld [vmem:[#allocation55_spill] sm:$0xff] }
 0xc04   : > { %v14349_v54 = vpop.permute.xlu0 %5473  ;;  %5713 = vrot.lane.b32.xlu0 %v5667_v2, %s8866_s1  ;;  %v3462_v0 = vadd.f32 %v16269_v6, %v3350_v35  ;;  %v16270_v2 = vld [vmem:[#allocation26_spill] sm:$0xff]  ;;  %v4486_v48 = vadd.f32 %v14052_v29, %v4374_v11 }
 0xc05   : > { %v5397_v46 = vmul.f32 %v16270_v2, %v16259_v5  ;;  %v4485_v55 = vadd.f32 %v14029_v20, %v4373_v30  ;;  %v16274_v29 = vld [vmem:[#allocation46_spill] sm:$0xff] }
 0xc06   : > { %5715 = vrot.lane.b32.xlu1 %v5668_v24, %s8866_s1  ;;  %v16271_v24 = vld [vmem:[#allocation78_spill] sm:$0xff]  ;;  %v4598_v21 = vadd.f32 %v14124_v51, %v4486_v48 }
 0xc07   : > { %v14362_v56 = vpop.permute.xlu1 %5475  ;;  %v5398_v10 = vmul.f32 %v16271_v24, %v16261_v59  ;;  %v5509_v39 = vadd.f32 %v14002_v16, %v5397_v46  ;;  %v4597_v7 = vadd.f32 %v14108_v40, %v4485_v55  ;;  %v16276_v11 = vld [vmem:[#allocation170_spill] sm:$0xff]  ;;  %v16277_v46 = vld [vmem:[#allocation184_spill] sm:$0xff] }
 0xc08   : > { %v14366_v41 = vpop.permute.xlu0 %4449  ;;  %5765 = vrot.lane.b32.xlu0 %v3461_v12, %s8866_s1  ;;  %v16273_v12 = vld [vmem:[#allocation191_spill] sm:$0xff] }
 0xc09   : > { %v5510_v58 = vadd.f32 %v14060_v44, %v5398_v10  ;;  %v3127_v30 = vmul.f32 %v16273_v12, %v16272_v28  ;;  %v5621_v6 = vadd.f32 %v14083_v52, %v5509_v39  ;;  %v16278_v10 = vld [vmem:[#allocation43_spill] sm:$0xff]  ;;  %v16279_v39 = vld [vmem:[#allocation86_spill] sm:$0xff]  ;;  %v16282_v12 = vld [vmem:[#allocation45_spill] sm:$0xff] }
 0xc0a   : > { %5767 = vrot.lane.b32.xlu1 %v3462_v0, %s8866_s1  ;;  %v16275_v0 = vld [vmem:[#allocation192_spill] sm:$0xff] }
 0xc0b   : > { %v14378_v35 = vpop.permute.xlu1 %4451  ;;  %v3128_v16 = vmul.f32 %v16275_v0, %v16274_v29  ;;  %v5622_v40 = vadd.f32 %v14102_v53, %v5510_v58  ;;  %v3239_v44 = vadd.f32 %v16276_v11, %v3127_v30  ;;  %v5733_v51 = vadd.f32 %v14147_v36, %v5621_v6  ;;  %v16280_v53 = vld [vmem:[#allocation34_spill] sm:$0xff]  ;;  %v16283_v0 = vld [vmem:[#allocation63_spill] sm:$0xff] }
 0xc0c   : > { %v14382_v20 = vpop.permute.xlu0 %5695  ;;  %5829 = vrot.lane.b32.xlu0 %v4597_v7, %s8865_s10  ;;  %v4263_v7 = vmul.f32 %v16279_v39, %v16272_v28 }
 0xc0d   : > { %v3240_v55 = vadd.f32 %v16277_v46, %v3128_v16  ;;  %v5734_v24 = vadd.f32 %v14212_v50, %v5622_v40  ;;  %v3351_v48 = vadd.f32 %v16278_v10, %v3239_v44  ;;  %v16284_v44 = vld [vmem:[#allocation75_spill] sm:$0xff] }
 0xc0e   : > { %5831 = vrot.lane.b32.xlu1 %v4598_v21, %s8865_s10  ;;  %v16281_v21 = vld [vmem:[#allocation84_spill] sm:$0xff]  ;;  %v4375_v50 = vadd.f32 %v14078_v42, %v4263_v7  ;;  %v16287_v42 = vld [vmem:[#allocation87_spill] sm:$0xff] }
 0xc0f   : > { %v14394_v2 = vpop.permute.xlu1 %4341  ;;  %v3352_v58 = vadd.f32 %v16280_v53, %v3240_v55  ;;  %v4264_v36 = vmul.f32 %v16281_v21, %v16274_v29  ;;  %v3463_v30 = vadd.f32 %v16282_v12, %v3351_v48  ;;  %v16285_v55 = vld [vmem:[#allocation169_spill] sm:$0xff]  ;;  %v5400_v48 = vmul.f32 %v16287_v42, %v16274_v29 }
 0xc10   : > { %v14398_v52 = vpop.permute.xlu0 %5585  ;;  %5893 = vrot.lane.b32.xlu0 %v5733_v51, %s8864_s12  ;;  %v5399_v51 = vmul.f32 %v16284_v44, %v16272_v28  ;;  %v4487_v46 = vadd.f32 %v14191_v22, %v4375_v50  ;;  %v16289_v12 = vld [vmem:[#allocation193_spill] sm:$0xff] }
 0xc11   : > { %v3464_v16 = vadd.f32 %v16283_v0, %v3352_v58  ;;  %v4376_v40 = vadd.f32 %v14131_v61, %v4264_v36  ;;  %v5512_v22 = vadd.f32 %v14187_v60, %v5400_v48  ;;  %v16288_v36 = vld [vmem:[#allocation76_spill] sm:$0xff]  ;;  %v16296_v48 = vld [vmem:[#allocation29_spill] sm:$0xff] }
 0xc12   : > { %5895 = vrot.lane.b32.xlu1 %v5734_v24, %s8864_s12  ;;  %v16286_v24 = vld [vmem:[#allocation178_spill] sm:$0xff]  ;;  %v5511_v61 = vadd.f32 %v14169_v49, %v5399_v51  ;;  %v4599_v7 = vadd.f32 %v14250_v26, %v4487_v46  ;;  %v16291_v26 = vld [vmem:[#allocation165_spill] sm:$0xff] }
 0xc13   : > { %v14410_v6 = vpop.permute.xlu1 %5587  ;;  %v3114_v10 = vmul.f32 %v16286_v24, %v16285_v55  ;;  %v4488_v39 = vadd.f32 %v14210_v14, %v4376_v40  ;;  %v16290_v14 = vld [vmem:[#allocation64_spill] sm:$0xff]  ;;  %v5624_v49 = vadd.f32 %v14248_v47, %v5512_v22  ;;  %v16292_v40 = vld [vmem:[#allocation175_spill] sm:$0xff]  ;;  %v16294_v24 = vld [vmem:[#allocation30_spill] sm:$0xff] }
 0xc14   : > { %v14414_v11 = vpop.permute.xlu0 %4561  ;;  %5769 = vrot.lane.b32.xlu0 %v3463_v30, %s8866_s1  ;;  %v3129_v30 = vmul.f32 %v16289_v12, %v16288_v36  ;;  %v5623_v50 = vadd.f32 %v14234_v57, %v5511_v61  ;;  %v16293_v57 = vld [vmem:[#allocation37_spill] sm:$0xff]  ;;  %v16295_v47 = vld [vmem:[#allocation38_spill] sm:$0xff] }
 0xc15   : > { %v4600_v58 = vadd.f32 %v14262_v3, %v4488_v39  ;;  %v3130_v0 = vmul.f32 %v3114_v10, %v16290_v14  ;;  %v5736_v51 = vadd.f32 %v14298_v33, %v5624_v49  ;;  %v4265_v10 = vmul.f32 %v16294_v24, %v16288_v36  ;;  %v16297_v39 = vld [vmem:[#allocation61_spill] sm:$0xff]  ;;  %v16298_v22 = vld [vmem:[#allocation54_spill] sm:$0xff] }
 0xc16   : > { %5771 = vrot.lane.b32.xlu1 %v3464_v16, %s8866_s1  ;;  %v3241_v16 = vadd.f32 %v16291_v26, %v3129_v30  ;;  %v5735_v60 = vadd.f32 %v14274_v17, %v5623_v50  ;;  %v4266_v17 = vmul.f32 %v16296_v48, %v16290_v14  ;;  %v16299_v50 = vld [vmem:[#allocation93_spill] sm:$0xff]  ;;  %v16300_v26 = vld [vmem:[#allocation171_spill] sm:$0xff] }
 0xc17   : > { %v14428_v53 = vpop.permute.xlu1 %4563  ;;  %v3242_v44 = vadd.f32 %v16292_v40, %v3130_v0  ;;  %v4377_v33 = vadd.f32 %v14230_v15, %v4265_v10  ;;  %v5401_v0 = vmul.f32 %v16299_v50, %v16288_v36  ;;  %v16302_v15 = vld [vmem:[#allocation106_spill] sm:$0xff] }
 0xc18   : > { %v14432_v21 = vpop.permute.xlu0 %4343  ;;  %5833 = vrot.lane.b32.xlu0 %v4599_v7, %s8865_s10  ;;  %v3353_v55 = vadd.f32 %v16293_v57, %v3241_v16  ;;  %v4378_v12 = vadd.f32 %v14264_v62, %v4266_v17  ;;  %v16301_v16 = vld [vmem:[#allocation180_spill] sm:$0xff]  ;;  %v5402_v40 = vmul.f32 %v16302_v15, %v16290_v14  ;;  %v16303_v10 = vld [vmem:[#allocation74_spill] sm:$0xff]  ;;  %v16312_v15 = vld [vmem:[#allocation23_spill] sm:$0xff] }
 0xc19   : > { %v3354_v42 = vadd.f32 %v16295_v47, %v3242_v44  ;;  %v4489_v49 = vadd.f32 %v14288_v45, %v4377_v33  ;;  %v5513_v62 = vadd.f32 %v14276_v27, %v5401_v0  ;;  %v16304_v47 = vld [vmem:[#allocation194_spill] sm:$0xff] }
 0xc1a   : > { %5835 = vrot.lane.b32.xlu1 %v4600_v58, %s8865_s10  ;;  %v3465_v61 = vadd.f32 %v16297_v39, %v3353_v55  ;;  %v4490_v44 = vadd.f32 %v14296_v4, %v4378_v12  ;;  %v5514_v45 = vadd.f32 %v14286_v23, %v5402_v40  ;;  %v16308_v12 = vld [vmem:[#allocation32_spill] sm:$0xff] }
 0xc1b   : > { %v14443_v3 = vpop.permute.xlu1 %5697  ;;  %v3466_v58 = vadd.f32 %v16298_v22, %v3354_v42  ;;  %v3131_v42 = vmul.f32 %v16304_v47, %v16303_v10  ;;  %v5625_v48 = vadd.f32 %v14308_v37, %v5513_v62  ;;  %v16307_v37 = vld [vmem:[#allocation20_spill] sm:$0xff]  ;;  %v4267_v50 = vmul.f32 %v16308_v12, %v16303_v10  ;;  %v16314_v47 = vld [vmem:[#allocation174_spill] sm:$0xff] }
 0xc1c   : > { %v14447_v46 = vpop.permute.xlu0 %5477  ;;  %5897 = vrot.lane.b32.xlu0 %v5735_v60, %s8864_s12  ;;  %v3116_v60 = vmul.f32 %v16301_v16, %v16300_v26  ;;  %v4602_v55 = vadd.f32 %v14332_v8, %v4490_v44  ;;  %v5626_v27 = vadd.f32 %v14319_v1, %v5514_v45  ;;  %v16306_v8 = vld [vmem:[#allocation177_spill] sm:$0xff]  ;;  %v16309_v1 = vld [vmem:[#allocation42_spill] sm:$0xff] }
 0xc1d   : > { %v5737_v23 = vadd.f32 %v14346_v19, %v5625_v48  ;;  %v16311_v19 = vld [vmem:[#allocation52_spill] sm:$0xff] }
 0xc1e   : > { %5899 = vrot.lane.b32.xlu1 %v5736_v51, %s8864_s12  ;;  %v4601_v51 = vadd.f32 %v14321_v63, %v4489_v49  ;;  %v3132_v4 = vmul.f32 %v3116_v60, %v16221_v9  ;;  %v16305_v63 = vld [vmem:[#allocation179_spill] sm:$0xff]  ;;  %v5738_v33 = vadd.f32 %v14382_v20, %v5626_v27  ;;  %v4379_v60 = vadd.f32 %v14306_v43, %v4267_v50 }
 0xc1f   : > { %v14459_v7 = vpop.permute.xlu1 %5479  ;;  %v3243_v17 = vadd.f32 %v16305_v63, %v3131_v42  ;;  %v16310_v49 = vld [vmem:[#allocation59_spill] sm:$0xff]  ;;  %v16315_v42 = vld [vmem:[#allocation182_spill] sm:$0xff] }
 0xc20   : > { %v14463_v30 = vpop.permute.xlu0 %4453  ;;  %5773 = vrot.lane.b32.xlu0 %v3465_v61, %s8866_s1  ;;  %v3244_v61 = vadd.f32 %v16306_v8, %v3132_v4  ;;  %v4268_v26 = vmul.f32 %v16310_v49, %v16221_v9  ;;  %v3118_v48 = vmul.f32 %v16315_v42, %v16314_v47  ;;  %v16316_v4 = vld [vmem:[#allocation116_spill] sm:$0xff] }
 0xc21   : > { %v5404_v27 = vmul.f32 %v16316_v4, %v16221_v9  ;;  %v16320_v49 = vld [vmem:[#allocation40_spill] sm:$0xff] }
 0xc22   : > { %5775 = vrot.lane.b32.xlu1 %v3466_v58, %s8866_s1  ;;  %v3355_v58 = vadd.f32 %v16307_v37, %v3243_v17  ;;  %v3356_v0 = vadd.f32 %v16309_v1, %v3244_v61  ;;  %v4380_v44 = vadd.f32 %v14334_v38, %v4268_v26  ;;  %v16317_v61 = vld [vmem:[#allocation195_spill] sm:$0xff] }
 0xc23   : > { %v14477_v57 = vpop.permute.xlu1 %4455 }
 0xc24   : > { %v5700_v24 = vpop.permute.xlu0 %5699  ;;  %5837 = vrot.lane.b32.xlu0 %v4601_v51, %s8865_s10  ;;  %v3467_v16 = vadd.f32 %v16311_v19, %v3355_v58  ;;  %v3468_v40 = vadd.f32 %v16312_v15, %v3356_v0  ;;  %v16313_v51 = vld [vmem:[#allocation103_spill] sm:$0xff]  ;;  %v4492_v43 = vadd.f32 %v14378_v35, %v4380_v44  ;;  %v3134_v35 = vmul.f32 %v3118_v48, %v16232_v18 }
 0xc25   : > { %v5403_v45 = vmul.f32 %v16313_v51, %v16303_v10 }
 0xc26   : > { %5839 = vrot.lane.b32.xlu1 %v4602_v55, %s8865_s10  ;;  %v4491_v55 = vadd.f32 %v14366_v41, %v4379_v60  ;;  %v4604_v41 = vadd.f32 %v14428_v53, %v4492_v43  ;;  %v16319_v53 = vld [vmem:[#allocation181_spill] sm:$0xff]  ;;  %v16323_v60 = vld [vmem:[#allocation107_spill] sm:$0xff]  ;;  %v16327_v43 = vld [vmem:[#allocation176_spill] sm:$0xff] }
 0xc27   : > { %v14490_v39 = vpop.permute.xlu1 %4345  ;;  %v5515_v38 = vadd.f32 %v14349_v54, %v5403_v45  ;;  %v16318_v54 = vld [vmem:[#allocation168_spill] sm:$0xff]  ;;  %v3246_v50 = vadd.f32 %v16319_v53, %v3134_v35  ;;  %v4270_v15 = vmul.f32 %v16323_v60, %v16232_v18  ;;  %v16337_v60 = vld [vmem:[#allocation58_spill] sm:$0xff] }
 0xc28   : > { %v5590_v22 = vpop.permute.xlu0 %5589  ;;  %5901 = vrot.lane.b32.xlu0 %v5737_v23, %s8864_s12  ;;  %v4603_v63 = vadd.f32 %v14414_v11, %v4491_v55  ;;  %v5516_v23 = vadd.f32 %v14362_v56, %v5404_v27  ;;  %v16326_v55 = vld [vmem:[#allocation24_spill] sm:$0xff] }
 0xc29   : > { %v5627_v37 = vadd.f32 %v14398_v52, %v5515_v38  ;;  %v16321_v52 = vld [vmem:[#allocation33_spill] sm:$0xff]  ;;  %v4382_v42 = vadd.f32 %v14432_v21, %v4270_v15  ;;  %v16328_v38 = vld [vmem:[#allocation163_spill] sm:$0xff] }
 0xc2a   : > { %5903 = vrot.lane.b32.xlu1 %v5738_v33, %s8864_s12  ;;  %v3133_v33 = vmul.f32 %v16317_v61, %v16229_v32  ;;  %v5628_v58 = vadd.f32 %v14410_v6, %v5516_v23  ;;  %v4269_v19 = vmul.f32 %v16321_v52, %v16229_v32 }
 0xc2b   : > { %v5592_v20 = vpop.permute.xlu1 %5591  ;;  %v5739_v56 = vadd.f32 %v14443_v3, %v5627_v37  ;;  %v16324_v3 = vld [vmem:[#allocation69_spill] sm:$0xff] }
 0xc2c   : > { %v4566_v62 = vpop.permute.xlu0 %4565  ;;  %5777 = vrot.lane.b32.xlu0 %v3467_v16, %s8866_s1  ;;  %v3245_v11 = vadd.f32 %v16318_v54, %v3133_v33  ;;  %v5740_v1 = vadd.f32 %v5700_v24, %v5628_v58  ;;  %v16322_v16 = vld [vmem:[#allocation19_spill] sm:$0xff]  ;;  %v4381_v44 = vadd.f32 %v14394_v2, %v4269_v19  ;;  %v16325_v24 = vld [vmem:[#allocation57_spill] sm:$0xff]  ;;  %v16329_v2 = vld [vmem:[#allocation90_spill] sm:$0xff] }
 0xc2d   : > { %v3358_v6 = vadd.f32 %v16322_v16, %v3246_v50  ;;  %v5405_v51 = vmul.f32 %v16325_v24, %v16229_v32  ;;  %v5406_v23 = vmul.f32 %v16329_v2, %v16232_v18  ;;  %v16335_v19 = vld [vmem:[#allocation49_spill] sm:$0xff]  ;;  %v16336_v16 = vld [vmem:[#allocation27_spill] sm:$0xff] }
 0xc2e   : > { %5779 = vrot.lane.b32.xlu1 %v3468_v40, %s8866_s1  ;;  %v3357_v26 = vadd.f32 %v16320_v49, %v3245_v11  ;;  %v4493_v27 = vadd.f32 %v14463_v30, %v4381_v44  ;;  %v16330_v30 = vld [vmem:[#allocation196_spill] sm:$0xff]  ;;  %v16338_v44 = vld [vmem:[#allocation79_spill] sm:$0xff] }
 0xc2f   : > { %v4568_v17 = vpop.permute.xlu1 %4567  ;;  %v3470_v47 = vadd.f32 %v16326_v55, %v3358_v6  ;;  %v5517_v4 = vadd.f32 %v14447_v46, %v5405_v51  ;;  %v5518_v37 = vadd.f32 %v14459_v7, %v5406_v23  ;;  %v3135_v58 = vmul.f32 %v16330_v30, %v16235_v25  ;;  %v16333_v7 = vld [vmem:[#allocation164_spill] sm:$0xff]  ;;  %v16344_v30 = vld [vmem:[#allocation25_spill] sm:$0xff] }
 0xc30   : > { %v4348_v8 = vpop.permute.xlu0 %4347  ;;  %5841 = vrot.lane.b32.xlu0 %v4603_v63, %s8865_s10  ;;  %v3469_v40 = vadd.f32 %v16324_v3, %v3357_v26  ;;  %v3120_v63 = vmul.f32 %v16328_v38, %v16327_v43  ;;  %v4605_v33 = vadd.f32 %v4566_v62, %v4493_v27  ;;  %v16334_v26 = vld [vmem:[#allocation41_spill] sm:$0xff]  ;;  %v4272_v6 = vmul.f32 %v16336_v16, %v16240_v31  ;;  %v16350_v16 = vld [vmem:[#allocation71_spill] sm:$0xff] }
 0xc31   : > { %v5629_v61 = vadd.f32 %v5590_v22, %v5517_v4  ;;  %v16332_v22 = vld [vmem:[#allocation67_spill] sm:$0xff] }
 0xc32   : > { %5843 = vrot.lane.b32.xlu1 %v4604_v41, %s8865_s10  ;;  %v4494_v41 = vadd.f32 %v14477_v57, %v4382_v42  ;;  %v3136_v11 = vmul.f32 %v3120_v63, %v16240_v31  ;;  %v16331_v57 = vld [vmem:[#allocation166_spill] sm:$0xff]  ;;  %v4271_v62 = vmul.f32 %v16332_v22, %v16235_v25  ;;  %v4384_v51 = vadd.f32 %v4348_v8, %v4272_v6  ;;  %v16340_v63 = vld [vmem:[#allocation199_spill] sm:$0xff] }
 0xc33   : > { %v5702_v12 = vpop.permute.xlu1 %5701  ;;  %v3247_v53 = vadd.f32 %v16331_v57, %v3135_v58  ;;  %v16346_v57 = vld [vmem:[#allocation197_spill] sm:$0xff] }
 0xc34   : > { %v5482_v0 = vpop.permute.xlu0 %5481  ;;  %5905 = vrot.lane.b32.xlu0 %v5739_v56, %s8864_s12  ;;  %v4606_v46 = vadd.f32 %v4568_v17, %v4494_v41  ;;  %v5741_v54 = vadd.f32 %v5702_v12, %v5629_v61  ;;  %v5630_v56 = vadd.f32 %v5592_v20, %v5518_v37  ;;  %v3248_v17 = vadd.f32 %v16333_v7, %v3136_v11  ;;  %v16341_v41 = vld [vmem:[#allocation187_spill] sm:$0xff] }
 0xc35   : > { %v3359_v52 = vadd.f32 %v16334_v26, %v3247_v53  ;;  %v4383_v12 = vadd.f32 %v14490_v39, %v4271_v62  ;;  %v16348_v26 = vld [vmem:[#allocation44_spill] sm:$0xff] }
 0xc36   : > { %5907 = vrot.lane.b32.xlu1 %v5740_v1, %s8864_s12  ;;  %v3360_v20 = vadd.f32 %v16335_v19, %v3248_v17  ;;  %v16347_v17 = vld [vmem:[#allocation186_spill] sm:$0xff] }
 0xc37   : > { %v14542_v45 = vpop.permute.xlu1 %5483  ;;  %v3471_v15 = vadd.f32 %v16337_v60, %v3359_v52 }
 0xc38   : > { %v4458_v48 = vpop.permute.xlu0 %4457  ;;  %5781 = vrot.lane.b32.xlu0 %v3469_v40, %s8866_s1  ;;  %v3472_v24 = vadd.f32 %v16338_v44, %v3360_v20 }
 0xc39   : > { %v4495_v3 = vadd.f32 %v4458_v48, %v4383_v12  ;;  %v16339_v48 = vld [vmem:[#allocation113_spill] sm:$0xff] }
 0xc3a   : > { %5783 = vrot.lane.b32.xlu1 %v3470_v47, %s8866_s1  ;;  %v5407_v47 = vmul.f32 %v14151_v13, %v16235_v25  ;;  %v3137_v2 = vmul.f32 %v16340_v63, %v16339_v48  ;;  %v16349_v12 = vld [vmem:[#allocation89_spill] sm:$0xff] }
 0xc3b   : > { %v4460_v21 = vpop.permute.xlu1 %4459  ;;  %v4273_v19 = vmul.f32 %v16349_v12, %v16339_v48  ;;  %v16360_v12 = vld [vmem:[#allocation185_spill] sm:$0xff] }
 0xc3c   : > { %v5704_v35 = vpop.permute.xlu0 %5703  ;;  %5845 = vrot.lane.b32.xlu0 %v4605_v33, %s8865_s10  ;;  %v4496_v42 = vadd.f32 %v4460_v21, %v4384_v51  ;;  %v5519_v27 = vadd.f32 %v5482_v0, %v5407_v47  ;;  %v3249_v61 = vadd.f32 %v16341_v41, %v3137_v2  ;;  %v16342_v21 = vld [vmem:[#allocation48_spill] sm:$0xff] }
 0xc3d   : > { %v5742_v1 = vadd.f32 %v5704_v35, %v5630_v56  ;;  %v16343_v0 = vld [vmem:[#allocation28_spill] sm:$0xff]  ;;  %v16345_v56 = vld [vmem:[#allocation73_spill] sm:$0xff] }
 0xc3e   : > { %5847 = vrot.lane.b32.xlu1 %v4606_v46, %s8865_s10  ;;  %v3361_v37 = vadd.f32 %v16342_v21, %v3249_v61  ;;  %v5408_v46 = vmul.f32 %v16343_v0, %v16240_v31  ;;  %v3138_v53 = vmul.f32 %v16346_v57, %v16345_v56  ;;  %v16353_v41 = vld [vmem:[#allocation108_spill] sm:$0xff]  ;;  %v16356_v0 = vld [vmem:[#allocation189_spill] sm:$0xff] }
 0xc3f   : > { %v4350_v50 = vpop.permute.xlu1 %4349 }
 0xc40   : > { %v5594_v49 = vpop.permute.xlu0 %5593  ;;  %5909 = vrot.lane.b32.xlu0 %v5741_v54, %s8864_s12  ;;  %v3473_v58 = vadd.f32 %v16344_v30, %v3361_v37  ;;  %v5520_v11 = vadd.f32 %v14542_v45, %v5408_v46  ;;  %v4385_v60 = vadd.f32 %v4350_v50, %v4273_v19 }
 0xc41   : > { %v5631_v8 = vadd.f32 %v5594_v49, %v5519_v27 }
 0xc42   : > { %5911 = vrot.lane.b32.xlu1 %v5742_v1, %s8864_s12  ;;  %v3250_v1 = vadd.f32 %v16347_v17, %v3138_v53 }
 0xc43   : > { %v5596_v40 = vpop.permute.xlu1 %5595 }
 0xc44   : > { %v4570_v55 = vpop.permute.xlu0 %4569  ;;  %5785 = vrot.lane.b32.xlu0 %v3471_v15, %s8866_s1  ;;  %v5632_v22 = vadd.f32 %v5596_v40, %v5520_v11  ;;  %v3362_v52 = vadd.f32 %v16348_v26, %v3250_v1  ;;  %v16351_v15 = vld [vmem:[#allocation96_spill] sm:$0xff]  ;;  %v16359_v1 = vld [vmem:[#allocation198_spill] sm:$0xff] }
 0xc45   : > { %v4607_v39 = vadd.f32 %v4570_v55, %v4495_v3  ;;  %v4274_v3 = vmul.f32 %v16351_v15, %v16345_v56 }
 0xc46   : > { %5787 = vrot.lane.b32.xlu1 %v3472_v24, %s8866_s1  ;;  %v3474_v6 = vadd.f32 %v16350_v16, %v3362_v52 }
 0xc47   : > { %v4572_v4 = vpop.permute.xlu1 %4571 }
 0xc48   : > { %v4352_v43 = vpop.permute.xlu0 %4351  ;;  %v4608_v38 = vadd.f32 %v4572_v4, %v4496_v42  ;;  %5849 = vrot.lane.b32.xlu0 %v4607_v39, %s8865_s10  ;;  %v16352_v39 = vld [vmem:[#allocation94_spill] sm:$0xff] }
 0xc49   : > { %v4386_v24 = vadd.f32 %v4352_v43, %v4274_v3  ;;  %v5409_v47 = vmul.f32 %v16352_v39, %v16339_v48  ;;  %v16354_v43 = vld [vmem:[#allocation201_spill] sm:$0xff] }
 0xc4a   : > { %5851 = vrot.lane.b32.xlu1 %v4608_v38, %s8865_s10  ;;  %v3139_v61 = vmul.f32 %v16354_v43, %v16353_v41 }
 0xc4b   : > { %v5706_v23 = vpop.permute.xlu1 %5705 }
 0xc4c   : > { %v5486_v33 = vpop.permute.xlu0 %5485  ;;  %v5743_v13 = vadd.f32 %v5706_v23, %v5631_v8  ;;  %v3251_v46 = vadd.f32 %v16356_v0, %v3139_v61 }
 0xc4d   : > { %v5521_v27 = vadd.f32 %v5486_v33, %v5409_v47 }
 0xc4e   : > { %5913 = vrot.lane.b32.xlu0 %v5743_v13, %s8864_s12  ;;  %v16355_v13 = vld [vmem:[#allocation82_spill] sm:$0xff] }
 0xc4f   : > { %v5488_v35 = vpop.permute.xlu1 %5487  ;;  %v5410_v21 = vmul.f32 %v16355_v13, %v16345_v56 }
 0xc50   : > { %v4462_v54 = vpop.permute.xlu0 %4461 }
 0xc51   : > { %v4497_v40 = vadd.f32 %v4462_v54, %v4385_v60  ;;  %v5522_v30 = vadd.f32 %v5488_v35, %v5410_v21  ;;  %v16362_v60 = vld [vmem:[#allocation22_spill] sm:$0xff] }
 0xc52   : > { %5789 = vrot.lane.b32.xlu0 %v3473_v58, %s8866_s1  ;;  %v16357_v58 = vld [vmem:[#allocation39_spill] sm:$0xff] }
 0xc53   : > { %v4464_v62 = vpop.permute.xlu1 %4463  ;;  %v3363_v54 = vadd.f32 %v16357_v58, %v3251_v46 }
 0xc54   : > { %v5708_v7 = vpop.permute.xlu0 %5707  ;;  %v4498_v42 = vadd.f32 %v4464_v62, %v4386_v24 }
 0xc55   : > { %v5744_v49 = vadd.f32 %v5708_v7, %v5632_v22  ;;  %v16358_v7 = vld [vmem:[#allocation100_spill] sm:$0xff] }
 0xc56   : > { %v4275_v17 = vmul.f32 %v16358_v7, %v16353_v41 }
 0xc57   : > { %5915 = vrot.lane.b32.xlu1 %v5744_v49, %s8864_s12  ;;  %v4354_v20 = vpop.permute.xlu1 %4353  ;;  %v3140_v49 = vmul.f32 %v16359_v1, %v16254_v34 }
 0xc58   : > { %v5598_v45 = vpop.permute.xlu0 %5597  ;;  %v4387_v52 = vadd.f32 %v4354_v20, %v4275_v17  ;;  %v16364_v20 = vld [vmem:[#allocation111_spill] sm:$0xff]  ;;  %v16367_v17 = vld [vmem:[#allocation92_spill] sm:$0xff] }
 0xc59   : > { %v5633_v63 = vadd.f32 %v5598_v45, %v5521_v27  ;;  %v3252_v19 = vadd.f32 %v16360_v12, %v3140_v49  ;;  %v16361_v45 = vld [vmem:[#allocation99_spill] sm:$0xff]  ;;  %v1927_v1 = vmul.f32 %v16367_v17, %v16272_v28  ;;  %v16368_v49 = vld [vmem:[#allocation128_spill] sm:$0xff] }
 0xc5a   : > { %v4276_v16 = vmul.f32 %v16361_v45, %v16254_v34  ;;  %v16370_v45 = vld [vmem:[#allocation112_spill] sm:$0xff] }
 0xc5b   : > { %5791 = vrot.lane.b32.xlu1 %v3474_v6, %s8866_s1  ;;  %v5600_v44 = vpop.permute.xlu1 %5599  ;;  %v3364_v15 = vadd.f32 %v16362_v60, %v3252_v19 }
 0xc5c   : > { %v4574_v51 = vpop.permute.xlu0 %4573  ;;  %v5634_v11 = vadd.f32 %v5600_v44, %v5522_v30 }
 0xc5d   : > { %v4609_v55 = vadd.f32 %v4574_v51, %v4497_v40 }
 0xc5f   : > { %5853 = vrot.lane.b32.xlu0 %v4609_v55, %s8865_s10  ;;  %v4576_v4 = vpop.permute.xlu1 %4575  ;;  %v16363_v55 = vld [vmem:[#allocation68_spill] sm:$0xff] }
 0xc60   : > { %v4356_v38 = vpop.permute.xlu0 %4355  ;;  %v4610_v50 = vadd.f32 %v4576_v4, %v4498_v42  ;;  %v5412_v39 = vmul.f32 %v16363_v55, %v16254_v34  ;;  %v5411_v42 = vmul.f32 %v16364_v20, %v16353_v41  ;;  %v16375_v55 = vld [vmem:[#allocation101_spill] sm:$0xff] }
 0xc61   : > { %v4388_v40 = vadd.f32 %v4356_v38, %v4276_v16  ;;  %v2039_v16 = vadd.f32 %v16370_v45, %v1927_v1  ;;  %v16386_v45 = vld [vmem:[#allocation124_spill] sm:$0xff] }
 0xc62   : > { %5855 = vrot.lane.b32.xlu1 %v4610_v50, %s8865_s10 }
 0xc63   : > { %v5710_v2 = vpop.permute.xlu1 %5709 }
 0xc64   : > { %v5490_v8 = vpop.permute.xlu0 %5489  ;;  %v5745_v23 = vadd.f32 %v5710_v2, %v5633_v63 }
 0xc65   : > { %v5523_v2 = vadd.f32 %v5490_v8, %v5411_v42 }
 0xc66   : > { %5917 = vrot.lane.b32.xlu0 %v5745_v23, %s8864_s12 }
 0xc67   : > { %v5492_v37 = vpop.permute.xlu1 %5491 }
 0xc68   : > { %v4466_v33 = vpop.permute.xlu0 %4465  ;;  %v5524_v27 = vadd.f32 %v5492_v37, %v5412_v39  ;;  %v16376_v39 = vld [vmem:[#allocation95_spill] sm:$0xff] }
 0xc69   : > { %v4499_v6 = vadd.f32 %v4466_v33, %v4387_v52 }
 0xc6b   : > { %v3442_v57 = vpop.permute.xlu1 %3441 }
 0xc6c   : > { %v5712_v53 = vpop.permute.xlu0 %5711  ;;  %v3475_v22 = vadd.f32 %v3442_v57, %v3363_v54 }
 0xc6d   : > { %v5746_v62 = vadd.f32 %v5712_v53, %v5634_v11  ;;  %v16365_v11 = vld [vmem:[#allocation77_spill] sm:$0xff] }
 0xc6e   : > { %5793 = vrot.lane.b32.xlu0 %v3475_v22, %s8866_s1  ;;  %v1925_v57 = vmul.f32 %v16365_v11, %v16259_v5  ;;  %v16372_v5 = vld [vmem:[#allocation109_spill] sm:$0xff] }
 0xc6f   : > { %5919 = vrot.lane.b32.xlu1 %v5746_v62, %s8864_s12  ;;  %v5602_v26 = vpop.permute.xlu1 %5601  ;;  %v16366_v62 = vld [vmem:[#allocation126_spill] sm:$0xff] }
 0xc70   : > { %v4468_v35 = vpop.permute.xlu0 %4467  ;;  %v5635_v23 = vadd.f32 %v5602_v26, %v5523_v2  ;;  %v2037_v7 = vadd.f32 %v16366_v62, %v1925_v57  ;;  %v16379_v2 = vld [vmem:[#allocation56_spill] sm:$0xff] }
 0xc71   : > { %v4500_v47 = vadd.f32 %v4468_v35, %v4388_v40  ;;  %v16369_v35 = vld [vmem:[#allocation85_spill] sm:$0xff] }
 0xc72   : > { %v2149_v26 = vadd.f32 %v16368_v49, %v2037_v7  ;;  %v1926_v12 = vmul.f32 %v16369_v35, %v16261_v59  ;;  %v8590_v7 = vld [vmem:[%s9205_s28] sm:$0xff]  ;;  %v16385_v35 = vld [vmem:[#allocation136_spill] sm:$0xff] }
 0xc73   : > { %v4578_v3 = vpop.permute.xlu1 %4577  ;;  %v16384_v49 = vld [vmem:[#allocation119_spill] sm:$0xff] }
 0xc74   : > { %v3444_v44 = vpop.permute.xlu0 %3443  ;;  %v4611_v24 = vadd.f32 %v4578_v3, %v4499_v6  ;;  %v16371_v6 = vld [vmem:[#allocation130_spill] sm:$0xff]  ;;  %v16373_v3 = vld [vmem:[#allocation81_spill] sm:$0xff] }
 0xc75   : > { %v3476_v51 = vadd.f32 %v3444_v44, %v3364_v15  ;;  %v2261_v60 = vadd.f32 %v16371_v6, %v2149_v26  ;;  %v2038_v15 = vadd.f32 %v16372_v5, %v1926_v12  ;;  %v1928_v40 = vmul.f32 %v16373_v3, %v16274_v29  ;;  %v16374_v44 = vld [vmem:[#allocation132_spill] sm:$0xff] }
 0xc76   : > { %5857 = vrot.lane.b32.xlu0 %v4611_v24, %s8865_s10  ;;  %v2151_v28 = vadd.f32 %v16374_v44, %v2039_v16  ;;  %v16388_v44 = vld [vmem:[#allocation140_spill] sm:$0xff] }
 0xc77   : > { %5795 = vrot.lane.b32.xlu1 %v3476_v51, %s8866_s1  ;;  %v4580_v4 = vpop.permute.xlu1 %4579  ;;  %v2150_v59 = vadd.f32 %v16375_v55, %v2038_v15  ;;  %v8591_v15 = vld [vmem:[%s9205_s28 + $0x10] sm:$0xff] }
 0xc78   : > { %v5604_v50 = vpop.permute.xlu0 %5603  ;;  %v4612_v63 = vadd.f32 %v4580_v4, %v4500_v47  ;;  %v1930_v47 = vmul.f32 %v16376_v39, %v16290_v14  ;;  %v16377_v4 = vld [vmem:[#allocation121_spill] sm:$0xff] }
 0xc79   : > { %v5636_v38 = vadd.f32 %v5604_v50, %v5524_v27  ;;  %v2040_v27 = vadd.f32 %v16377_v4, %v1928_v40  ;;  %v16378_v50 = vld [vmem:[#allocation134_spill] sm:$0xff] }
 0xc7b   : > { %5859 = vrot.lane.b32.xlu1 %v4612_v63, %s8865_s10  ;;  %v5716_v43 = vpop.permute.xlu1 %5715  ;;  %v2263_v63 = vadd.f32 %v16378_v50, %v2151_v28  ;;  %v8593_v50 = vld [vmem:[%s9205_s28 + $0x18] sm:$0xff]  ;;  %s15253_s10 = scalar_lea.vmem [#allocation13], %s7111_s30  ;;  %s7133_s30 = sshll.u32 %s8971_s24, 11 }
 0xc7c   : > { %v5714_v61 = vpop.permute.xlu0 %5713  ;;  %v5748_v13 = vadd.f32 %v5716_v43, %v5636_v38  ;;  %v2262_v38 = vadd.f32 %v16379_v2, %v2150_v59  ;;  %v16389_v59 = vld [vmem:[#allocation105_spill] sm:$0xff]  ;;  %v16392_v2 = vld [vmem:[#allocation142_spill] sm:$0xff]  ;;  %s6978_s1 = sshll.u32 %s15253_s10, 4  ;;  %s6965_s24 = scalar_lea.sflag [#allocation4], %s9199_s27  ;;  %s15315_s1 = int_to_ptr.vmem [resolvable:$true] %s6978_s1 }
 0xc7d   : > { %v5747_v21 = vadd.f32 %v5714_v61, %v5635_v23  ;;  %v16380_v23 = vld [vmem:[#allocation120_spill] sm:$0xff]  ;;  %v16381_v61 = vld [vmem:[#allocation118_spill] sm:$0xff]  ;;  %v1932_v39 = vmul.f32 %v16389_v59, %v16221_v9  ;;  %s8776_s15 = scalar_lea.vmem %s15315_s1, 2048 }
 0xc7e   : > { %v2042_v43 = vadd.f32 %v16380_v23, %v1930_v47  ;;  %p8777_p7 = scmp.ne.s32.totalorder %s15315_s1, %s8776_s15 }
 0xc7f   : > { %5921 = vrot.lane.b32.xlu0 %v5747_v21, %s8864_s12  ;;  %5923 = vrot.lane.b32.xlu1 %v5748_v13, %s8864_s12  ;;  %v5768_v0 = vpop.permute.xlu1 %5767  ;;  %v2152_v13 = vadd.f32 %v16381_v61, %v2040_v27  ;;  %v16382_v21 = vld [vmem:[#allocation102_spill] sm:$0xff]  ;;  %v16391_v27 = vld [vmem:[#allocation125_spill] sm:$0xff]  ;;  %s16430_s12 = sld [smem:[#allocation205_spill]] }
 0xc80   : > { %v5766_v46 = vpop.permute.xlu0 %5765  ;;  %v5942_v62 = vsel %vm1124_vm0, %v2262_v38, %v5768_v0  ;;  %v16387_v0 = vld [vmem:[#allocation138_spill] sm:$0xff]  ;;  %p8778_p12 = pnand %p8777_p7, %p16436_p4 }
 0xc81   : > { %v5941_v24 = vsel %vm1124_vm0, %v2261_v60, %v5766_v46  ;;  %v1929_v46 = vmul.f32 %v16382_v21, %v16288_v36  ;;  %v2264_v26 = vadd.f32 %v16384_v49, %v2152_v13  ;;  %v16394_v13 = vld [vmem:[#allocation144_spill] sm:$0xff] }
 0xc82   : > { %p8779_p1 = pneg %p8778_p12 }
 0xc83   : > { %v5832_v33 = vpop.permute.xlu1 %5831  ;;  %v2041_v12 = vadd.f32 %v16385_v35, %v1929_v46 }
 0xc84   : > { %v5830_v30 = vpop.permute.xlu0 %5829  ;;  %v5959_v36 = vsel %vm5957_vm1, %v5942_v62, %v5832_v33 }
 0xc85   : > { %v5958_v20 = vsel %vm5957_vm1, %v5941_v24, %v5830_v30  ;;  %v16383_v30 = vld [vmem:[#allocation123_spill] sm:$0xff]  ;;  %v2153_v60 = vadd.f32 %v16387_v0, %v2041_v12  ;;  %v8592_v24 = vld [vmem:[%s9205_s28 + $0x8] sm:$0xff]  ;;  %v16397_v0 = vld [vmem:[#allocation117_spill] sm:$0xff] }
 0xc86   : > { %v2154_v57 = vadd.f32 %v16383_v30, %v2042_v43  ;;  %v8594_v43 = vld [vmem:[%s9205_s28 + $0x28] sm:$0xff]  ;;  %v8595_v30 = vld [vmem:[%s9205_s28 + $0x20] sm:$0xff] }
 0xc87   : > { %v5896_v37 = vpop.permute.xlu1 %5895  ;;  %v2265_v28 = vadd.f32 %v16388_v44, %v2153_v60  ;;  %v1934_v60 = vmul.f32 %v16397_v0, %v16232_v18  ;;  %v16402_v18 = vld [vmem:[#allocation150_spill] sm:$0xff] }
 0xc88   : > { %v5894_v58 = vpop.permute.xlu0 %5893  ;;  %v2266_v16 = vadd.f32 %v16386_v45, %v2154_v57  ;;  %v5976_v6 = vsel %vm5974_vm2, %v5959_v36, %v5896_v37 }
 0xc89   : > { %v5975_v29 = vsel %vm5974_vm2, %v5958_v20, %v5894_v58  ;;  %v14681_v37 = vadd.f32 %v8592_v24, %v5976_v6  ;;  %v16400_v24 = vld [vmem:[#allocation148_spill] sm:$0xff] }
 0xc8a   : > { %v14662_v17 = vadd.f32 %v8590_v7, %v5975_v29  ;;  %v16396_v7 = vld [vmem:[#allocation146_spill] sm:$0xff] }
 0xc8b   : > { %v5772_v54 = vpop.permute.xlu1 %5771 }
 0xc8c   : > { %v5770_v8 = vpop.permute.xlu0 %5769 }
 0xc8d   : > { %v5943_v14 = vsel %vm1124_vm0, %v2263_v63, %v5770_v8 }
 0xc8f   : > { %v5836_v53 = vpop.permute.xlu1 %5835 }
 0xc90   : > { %v5834_v22 = vpop.permute.xlu0 %5833 }
 0xc91   : > { %v5960_v58 = vsel %vm5957_vm1, %v5943_v14, %v5834_v22  ;;  %v5944_v22 = vsel %vm1124_vm0, %v2264_v26, %v5772_v54  ;;  %v16395_v14 = vld [vmem:[#allocation129_spill] sm:$0xff] }
 0xc92   : > { %v5961_v40 = vsel %vm5957_vm1, %v5944_v22, %v5836_v53  ;;  %v8597_v22 = vld [vmem:[%s9205_s28 + $0x30] sm:$0xff] }
 0xc93   : > { %v5900_v52 = vpop.permute.xlu1 %5899 }
 0xc94   : > { %v5898_v19 = vpop.permute.xlu0 %5897  ;;  %v5978_v55 = vsel %vm5974_vm2, %v5961_v40, %v5900_v52  ;;  %v2044_v52 = vadd.f32 %v16391_v27, %v1932_v39 }
 0xc95   : > { %v5977_v8 = vsel %vm5974_vm2, %v5960_v58, %v5898_v19  ;;  %v14695_v63 = vadd.f32 %v8593_v50, %v5978_v55 }
 0xc96   : > { %v14675_v3 = vadd.f32 %v8591_v15, %v5977_v8  ;;  %v16398_v15 = vld [vmem:[#allocation122_spill] sm:$0xff] }
 0xc97   : > { %v5776_v51 = vpop.permute.xlu1 %5775  ;;  %v1933_v40 = vmul.f32 %v16398_v15, %v16229_v32 }
 0xc98   : > { %v5774_v42 = vpop.permute.xlu0 %5773  ;;  %v5946_v33 = vsel %vm1124_vm0, %v2266_v16, %v5776_v51  ;;  %v16390_v51 = vld [vmem:[#allocation114_spill] sm:$0xff] }
 0xc99   : > { %v1931_v47 = vmul.f32 %v16390_v51, %v16303_v10  ;;  %v5945_v20 = vsel %vm1124_vm0, %v2265_v28, %v5774_v42  ;;  %v16393_v42 = vld [vmem:[#allocation127_spill] sm:$0xff]  ;;  %v8596_v16 = vld [vmem:[%s9205_s28 + $0x38] sm:$0xff]  ;;  %v2045_v55 = vadd.f32 %v16400_v24, %v1933_v40  ;;  %v16412_v40 = vld [vmem:[#allocation141_spill] sm:$0xff] }
 0xc9a   : > { %v2156_v61 = vadd.f32 %v16393_v42, %v2044_v52  ;;  %v16403_v51 = vld [vmem:[#allocation135_spill] sm:$0xff] }
 0xc9b   : > { %v5840_v11 = vpop.permute.xlu1 %5839  ;;  %v2043_v38 = vadd.f32 %v16392_v2, %v1931_v47  ;;  %v2157_v39 = vadd.f32 %v16402_v18, %v2045_v55  ;;  %v16413_v18 = vld [vmem:[#allocation47_spill] sm:$0xff] }
 0xc9c   : > { %v5838_v1 = vpop.permute.xlu0 %5837  ;;  %v5963_v54 = vsel %vm5957_vm1, %v5946_v33, %v5840_v11  ;;  %v2268_v11 = vadd.f32 %v16395_v14, %v2156_v61  ;;  %v8599_v61 = vld [vmem:[%s9205_s28 + $0x40] sm:$0xff] }
 0xc9d   : > { %v5962_v9 = vsel %vm5957_vm1, %v5945_v20, %v5838_v1  ;;  %v2155_v21 = vadd.f32 %v16394_v13, %v2043_v38  ;;  %v16404_v20 = vld [vmem:[#allocation152_spill] sm:$0xff] }
 0xc9e   : > { %6009 = vadd.xlane.f32.xlu0 %v14662_v17 }
 0xc9f   : > { %v5904_v5 = vpop.permute.xlu1 %5903  ;;  %v2267_v58 = vadd.f32 %v16396_v7, %v2155_v21  ;;  %v16405_v21 = vld [vmem:[#allocation66_spill] sm:$0xff]  ;;  %v16407_v7 = vld [vmem:[#allocation155_spill] sm:$0xff] }
 0xca0   : > { %v5902_v19 = vpop.permute.xlu0 %5901  ;;  %v5980_v53 = vsel %vm5974_vm2, %v5963_v54, %v5904_v5  ;;  %v16401_v54 = vld [vmem:[#allocation133_spill] sm:$0xff] }
 0xca1   : > { %v5979_v23 = vsel %vm5974_vm2, %v5962_v9, %v5902_v19  ;;  %v14701_v10 = vadd.f32 %v8594_v43, %v5980_v53  ;;  %v16399_v19 = vld [vmem:[#allocation131_spill] sm:$0xff]  ;;  %v8598_v43 = vld [vmem:[%s9205_s28 + $0x48] sm:$0xff] }
 0xca2   : > { %6013 = vadd.xlane.f32.xlu0 %v14675_v3  ;;  %v14709_v57 = vadd.f32 %v8595_v30, %v5979_v23  ;;  %v2046_v44 = vadd.f32 %v16399_v19, %v1934_v60  ;;  %v8600_v19 = vld [vmem:[%s9205_s28 + $0x50] sm:$0xff] }
 0xca3   : > { %6011 = vadd.xlane.f32.xlu1 %v14681_v37  ;;  %v5780_v4 = vpop.permute.xlu1 %5779 }
 0xca4   : > { %v5778_v29 = vpop.permute.xlu0 %5777  ;;  %v5948_v1 = vsel %vm1124_vm0, %v2268_v11, %v5780_v4  ;;  %v2158_v59 = vadd.f32 %v16401_v54, %v2046_v44  ;;  %v2269_v4 = vadd.f32 %v16404_v20, %v2157_v39  ;;  %v16406_v11 = vld [vmem:[#allocation154_spill] sm:$0xff]  ;;  %v1937_v39 = vmul.f32 %v16413_v18, %v16339_v48 }
 0xca5   : > { %v5947_v49 = vsel %vm1124_vm0, %v2267_v58, %v5778_v29  ;;  %v8601_v54 = vld [vmem:[%s9205_s28 + $0x58] sm:$0xff] }
 0xca6   : > { %6015 = vadd.xlane.f32.xlu0 %v14695_v63  ;;  %v2270_v47 = vadd.f32 %v16403_v51, %v2158_v59  ;;  %v16414_v51 = vld [vmem:[#allocation157_spill] sm:$0xff]  ;;  %v16428_v18 = vld [vmem:[#allocation162_spill] sm:$0xff] }
 0xca7   : > { %6019 = vadd.xlane.f32.xlu1 %v14701_v10  ;;  %v5844_v46 = vpop.permute.xlu1 %5843 }
 0xca8   : > { %v5842_v62 = vpop.permute.xlu0 %5841  ;;  %v5965_v26 = vsel %vm5957_vm1, %v5948_v1, %v5844_v46  ;;  %v1935_v46 = vmul.f32 %v16405_v21, %v16235_v25  ;;  %v16408_v1 = vld [vmem:[#allocation51_spill] sm:$0xff] }
 0xca9   : > { %v5964_v12 = vsel %vm5957_vm1, %v5947_v49, %v5842_v62  ;;  %v1936_v49 = vmul.f32 %v16408_v1, %v16240_v31  ;;  %v8602_v21 = vld [vmem:[%s9205_s28 + $0x60] sm:$0xff] }
 0xcaa   : > { %6017 = vadd.xlane.f32.xlu0 %v14709_v57  ;;  %v2047_v30 = vadd.f32 %v16406_v11, %v1935_v46 }
 0xcab   : > { %v5908_v35 = vpop.permute.xlu1 %5907 }
 0xcac   : > { %v5906_v36 = vpop.permute.xlu0 %5905  ;;  %v5982_v8 = vsel %vm5974_vm2, %v5965_v26, %v5908_v35  ;;  %v2159_v58 = vadd.f32 %v16407_v7, %v2047_v30  ;;  %v16409_v35 = vld [vmem:[#allocation156_spill] sm:$0xff] }
 0xcad   : > { %v5981_v45 = vsel %vm5974_vm2, %v5964_v12, %v5906_v36  ;;  %v14720_v6 = vadd.f32 %v8596_v16, %v5982_v8  ;;  %v16410_v36 = vld [vmem:[#allocation137_spill] sm:$0xff]  ;;  %v16411_v16 = vld [vmem:[#allocation139_spill] sm:$0xff] }
 0xcae   : > { %v14725_v5 = vadd.f32 %v8597_v22, %v5981_v45  ;;  %v2271_v12 = vadd.f32 %v16409_v35, %v2159_v58  ;;  %v2048_v25 = vadd.f32 %v16410_v36, %v1936_v49  ;;  %v16421_v36 = vld [vmem:[#allocation88_spill] sm:$0xff] }
 0xcaf   : > { %v5784_v33 = vpop.permute.xlu1 %5783  ;;  %6023 = vadd.xlane.f32.xlu1 %v14720_v6 }
 0xcb0   : > { %6021 = vadd.xlane.f32.xlu0 %v14725_v5  ;;  %v5782_v28 = vpop.permute.xlu0 %5781  ;;  %v5950_v27 = vsel %vm1124_vm0, %v2270_v47, %v5784_v33  ;;  %v2160_v0 = vadd.f32 %v16411_v16, %v2048_v25  ;;  %v2049_v47 = vadd.f32 %v16414_v51, %v1937_v39  ;;  %v1940_v25 = vmul.f32 %v16421_v36, %v16254_v34 }
 0xcb1   : > { %v5949_v52 = vsel %vm1124_vm0, %v2269_v4, %v5782_v28 }
 0xcb2   : > { %v2272_v33 = vadd.f32 %v16412_v40, %v2160_v0  ;;  %v16423_v0 = vld [vmem:[#allocation149_spill] sm:$0xff] }
 0xcb3   : > { %v5848_v53 = vpop.permute.xlu1 %5847 }
 0xcb4   : > { %v5846_v32 = vpop.permute.xlu0 %5845  ;;  %v5967_v50 = vsel %vm5957_vm1, %v5950_v27, %v5848_v53  ;;  %v16416_v27 = vld [vmem:[#allocation159_spill] sm:$0xff] }
 0xcb5   : > { %v5966_v29 = vsel %vm5957_vm1, %v5949_v52, %v5846_v32  ;;  %v16415_v32 = vld [vmem:[#allocation158_spill] sm:$0xff] }
 0xcb6   : > { %v2161_v20 = vadd.f32 %v16415_v32, %v2049_v47 }
 0xcb7   : > { %v5912_v9 = vpop.permute.xlu1 %5911 }
 0xcb8   : > { %v5910_v2 = vpop.permute.xlu0 %5909  ;;  %v5984_v38 = vsel %vm5974_vm2, %v5967_v50, %v5912_v9  ;;  %v2273_v52 = vadd.f32 %v16416_v27, %v2161_v20  ;;  %v16417_v9 = vld [vmem:[#allocation50_spill] sm:$0xff]  ;;  %v8604_v27 = vld [vmem:[%s9205_s28 + $0x70] sm:$0xff] }
 0xcb9   : > { %v5983_v23 = vsel %vm5974_vm2, %v5966_v29, %v5910_v2  ;;  %v14744_v42 = vadd.f32 %v8598_v43, %v5984_v38  ;;  %v1938_v29 = vmul.f32 %v16417_v9, %v16345_v56  ;;  %v16418_v43 = vld [vmem:[#allocation143_spill] sm:$0xff] }
 0xcba   : > { %v14747_v13 = vadd.f32 %v8599_v61, %v5983_v23 }
 0xcbb   : > { %6027 = vadd.xlane.f32.xlu1 %v14744_v42  ;;  %v5788_v62 = vpop.permute.xlu1 %5787  ;;  %v2050_v61 = vadd.f32 %v16418_v43, %v1938_v29  ;;  %v6230_v29 = vld [vmem:[#allocation10] sm:$0xff] }
 0xcbc   : > { %6025 = vadd.xlane.f32.xlu0 %v14747_v13  ;;  %v5786_v14 = vpop.permute.xlu0 %5785  ;;  %v5952_v44 = vsel %vm1124_vm0, %v2272_v33, %v5788_v62  ;;  %v16420_v62 = vld [vmem:[#allocation147_spill] sm:$0xff] }
 0xcbd   : > { %v5951_v8 = vsel %vm1124_vm0, %v2271_v12, %v5786_v14  ;;  %v16419_v14 = vld [vmem:[#allocation145_spill] sm:$0xff]  ;;  %v16425_v33 = vld [vmem:[#allocation151_spill] sm:$0xff] }
 0xcbe   : > { %v2162_v11 = vadd.f32 %v16419_v14, %v2050_v61 }
 0xcbf   : > { %v5852_v45 = vpop.permute.xlu1 %5851 }
 0xcc0   : > { %v5850_v26 = vpop.permute.xlu0 %5849  ;;  %v5969_v28 = vsel %vm5957_vm1, %v5952_v44, %v5852_v45  ;;  %v2274_v7 = vadd.f32 %v16420_v62, %v2162_v11  ;;  %v16426_v44 = vld [vmem:[#allocation161_spill] sm:$0xff] }
 0xcc1   : > { %v5968_v60 = vsel %vm5957_vm1, %v5951_v8, %v5850_v26  ;;  %v8603_v26 = vld [vmem:[%s9205_s28 + $0x68] sm:$0xff]  ;;  %v16422_v8 = vld [vmem:[#allocation62_spill] sm:$0xff] }
 0xcc2   : > { %v1939_v45 = vmul.f32 %v16422_v8, %v16353_v41 }
 0xcc4   : > { %v5914_v22 = vpop.permute.xlu0 %5913 }
 0xcc5   : > { %v5985_v15 = vsel %vm5974_vm2, %v5968_v60, %v5914_v22  ;;  %v2052_v60 = vadd.f32 %v16423_v0, %v1940_v25  ;;  %v16424_v22 = vld [vmem:[#allocation160_spill] sm:$0xff] }
 0xcc6   : > { %v14765_v31 = vadd.f32 %v8600_v19, %v5985_v15  ;;  %v2051_v15 = vadd.f32 %v16424_v22, %v1939_v45 }
 0xcc7   : > { %v2164_v19 = vadd.f32 %v16425_v33, %v2052_v60  ;;  %v6232_v33 = vld [vmem:[#allocation10 + $0x10] sm:$0xff] }
 0xcc8   : > { %6029 = vadd.xlane.f32.xlu0 %v14765_v31  ;;  %v5790_v53 = vpop.permute.xlu0 %5789 }
 0xcc9   : > { %v5916_v24 = vpop.permute.xlu1 %5915  ;;  %v5953_v50 = vsel %vm1124_vm0, %v2273_v52, %v5790_v53 }
 0xcca   : > { %v5986_v55 = vsel %vm5974_vm2, %v5969_v28, %v5916_v24  ;;  %v2163_v28 = vadd.f32 %v16426_v44, %v2051_v15 }
 0xccb   : > { %v14772_v59 = vadd.f32 %v8601_v54, %v5986_v55  ;;  %v16427_v55 = vld [vmem:[#allocation153_spill] sm:$0xff] }
 0xccc   : > { %v2276_v54 = vadd.f32 %v16427_v55, %v2164_v19  ;;  %v2275_v34 = vadd.f32 %v16428_v18, %v2163_v28  ;;  %v6233_v19 = vld [vmem:[#allocation10 + $0x18] sm:$0xff] }
 0xccd   : > { %6031 = vadd.xlane.f32.xlu1 %v14772_v59  ;;  %v5792_v23 = vpop.permute.xlu1 %5791  ;;  %v7674_v44 = vpack.c.bf16 %v6233_v19, %v6232_v33  ;;  %v6543_v33 = vld [vmem:[#allocation11 + $0x8] sm:$0xff] }
 0xcce   : > { %v5954_v56 = vsel %vm1124_vm0, %v2274_v7, %v5792_v23 }
 0xcd1   : > { %v5854_v4 = vpop.permute.xlu0 %5853 }
 0xcd2   : > { %v5970_v2 = vsel %vm5957_vm1, %v5953_v50, %v5854_v4  ;;  %v8605_v50 = vld [vmem:[%s9205_s28 + $0x78] sm:$0xff]  ;;  %s16429_s28 = sld [smem:[#allocation204_spill]] }
 0xcd4   : > { %v5856_v30 = vpop.permute.xlu1 %5855 }
 0xcd5   : > { %v5971_v58 = vsel %vm5957_vm1, %v5954_v56, %v5856_v30 }
 0xcd8   : > { %v5918_v38 = vpop.permute.xlu0 %5917 }
 0xcd9   : > { %v5987_v48 = vsel %vm5974_vm2, %v5970_v2, %v5918_v38  ;;  %v6231_v2 = vld [vmem:[#allocation10 + $0x8] sm:$0xff] }
 0xcda   : > { %v14787_v46 = vadd.f32 %v8602_v21, %v5987_v48  ;;  %v7670_v38 = vpack.c.bf16 %v6231_v2, %v6230_v29  ;;  %v6240_v29 = vld [vmem:[#allocation10 + $0x50] sm:$0xff] }
 0xcdc   : > { %6033 = vadd.xlane.f32.xlu0 %v14787_v46  ;;  %7671 = vmatprep.subr.bf16.mxu1 %v7670_v38 }
 0xcdd   : > { %7673 = vmatpush3.bf16.msra.mxu1 %v7670_v38 }
 0xcde   : > { %7675 = vmatprep.subr.bf16.mxu1 %v7674_v44 }
 0xce0   : > { %v5794_v12 = vpop.permute.xlu0 %5793 }
 0xce1   : > { %v5920_v1 = vpop.permute.xlu1 %5919  ;;  %v5955_v39 = vsel %vm1124_vm0, %v2275_v34, %v5794_v12  ;;  %7677 = vmatpush3.bf16.msra.mxu1 %v7674_v44 }
 0xce2   : > { %v5988_v49 = vsel %vm5974_vm2, %v5971_v58, %v5920_v1 }
 0xce3   : > { %v14796_v35 = vadd.f32 %v8603_v26, %v5988_v49 }
 0xce5   : > { %6035 = vadd.xlane.f32.xlu1 %v14796_v35 }
 0xce8   : > { %v5858_v40 = vpop.permute.xlu0 %5857 }
 0xce9   : > { %v5796_v16 = vpop.permute.xlu1 %5795  ;;  %v5972_v53 = vsel %vm5957_vm1, %v5955_v39, %v5858_v40 }
 0xcea   : > { %v5956_v41 = vsel %vm1124_vm0, %v2276_v54, %v5796_v16 }
 0xced   : > { %v5860_v24 = vpop.permute.xlu1 %5859 }
 0xcee   : > { %v5973_v51 = vsel %vm5957_vm1, %v5956_v41, %v5860_v24  ;;  %v6235_v24 = vld [vmem:[#allocation10 + $0x28] sm:$0xff] }
 0xcf1   : > { %v5922_v47 = vpop.permute.xlu0 %5921  ;;  %v5924_v32 = vpop.permute.xlu1 %5923 }
 0xcf2   : > { %v5989_v20 = vsel %vm5974_vm2, %v5972_v53, %v5922_v47  ;;  %v5990_v4 = vsel %vm5974_vm2, %v5973_v51, %v5924_v32  ;;  %v6236_v51 = vld [vmem:[#allocation10 + $0x30] sm:$0xff]  ;;  %v6237_v47 = vld [vmem:[#allocation10 + $0x38] sm:$0xff]  ;;  %v6238_v32 = vld [vmem:[#allocation10 + $0x40] sm:$0xff] }
 0xcf3   : > { %v14816_v52 = vadd.f32 %v8604_v27, %v5989_v20  ;;  %v14819_v9 = vadd.f32 %v8605_v50, %v5990_v4  ;;  %v7682_v4 = vpack.c.bf16 %v6237_v47, %v6236_v51 }
 0xcf5   : > { %6037 = vadd.xlane.f32.xlu0 %v14816_v52  ;;  %6039 = vadd.xlane.f32.xlu1 %v14819_v9 }
 0xd2b   : > { %v6010_v23 = vpop.xlane.xlu0 %6009 }
 0xd2c   : > { %v6042_v48 = vmul.f32 0.0078125, %v6010_v23 }
 0xd2e   : > { %v14824_v43 = vsub.f32 %v14662_v17, %v6042_v48 }
 0xd2f   : > { %v6014_v61 = vpop.xlane.xlu0 %6013 }
 0xd30   : > { %v6044_v21 = vmul.f32 0.0078125, %v6014_v61  ;;  %v6074_v14 = vmul.f32 %v14824_v43, %v14824_v43  ;;  %v6012_v11 = vpop.xlane.xlu1 %6011  ;;  %v6242_v61 = vld [vmem:[#allocation10 + $0x60] sm:$0xff] }
 0xd31   : > { %v6043_v30 = vmul.f32 0.0078125, %v6012_v11 }
 0xd32   : > { %v14829_v62 = vsub.f32 %v14675_v3, %v6044_v21  ;;  %6090 = vadd.xlane.f32.xlu0 %v6074_v14  ;;  %v6243_v21 = vld [vmem:[#allocation10 + $0x68] sm:$0xff] }
 0xd33   : > { %v6016_v7 = vpop.xlane.xlu0 %6015  ;;  %v14832_v56 = vsub.f32 %v14681_v37, %v6043_v30  ;;  %v7694_v30 = vpack.c.bf16 %v6243_v21, %v6242_v61 }
 0xd34   : > { %v6045_v58 = vmul.f32 0.0078125, %v6016_v7  ;;  %v6076_v17 = vmul.f32 %v14829_v62, %v14829_v62  ;;  %v6020_v1 = vpop.xlane.xlu1 %6019  ;;  %v6244_v7 = vld [vmem:[#allocation10 + $0x70] sm:$0xff] }
 0xd35   : > { %v6047_v49 = vmul.f32 0.0078125, %v6020_v1  ;;  %v6075_v26 = vmul.f32 %v14832_v56, %v14832_v56 }
 0xd36   : > { %v14839_v12 = vsub.f32 %v14695_v63, %v6045_v58  ;;  %6094 = vadd.xlane.f32.xlu0 %v6076_v17 }
 0xd37   : > { %v6018_v3 = vpop.xlane.xlu0 %6017  ;;  %6092 = vadd.xlane.f32.xlu1 %v6075_v26  ;;  %v14842_v25 = vsub.f32 %v14701_v10, %v6047_v49 }
 0xd38   : > { %v6046_v36 = vmul.f32 0.0078125, %v6018_v3  ;;  %v6077_v37 = vmul.f32 %v14839_v12, %v14839_v12 }
 0xd39   : > { %v6079_v60 = vmul.f32 %v14842_v25, %v14842_v25 }
 0xd3a   : > { %v14847_v8 = vsub.f32 %v14709_v57, %v6046_v36 }
 0xd3b   : > { %6096 = vadd.xlane.f32.xlu1 %v6077_v37 }
 0xd3c   : > { %v6078_v45 = vmul.f32 %v14847_v8, %v14847_v8  ;;  %v6024_v16 = vpop.xlane.xlu1 %6023 }
 0xd3d   : > { %v6022_v63 = vpop.xlane.xlu0 %6021  ;;  %v6049_v0 = vmul.f32 0.0078125, %v6024_v16 }
 0xd3e   : > { %v6048_v22 = vmul.f32 0.0078125, %v6022_v63  ;;  %6098 = vadd.xlane.f32.xlu0 %v6078_v45 }
 0xd3f   : > { %v14854_v10 = vsub.f32 %v14720_v6, %v6049_v0  ;;  %6100 = vadd.xlane.f32.xlu1 %v6079_v60  ;;  %v6234_v6 = vld [vmem:[#allocation10 + $0x20] sm:$0xff] }
 0xd40   : > { %v14857_v15 = vsub.f32 %v14725_v5, %v6048_v22  ;;  %v7678_v5 = vpack.c.bf16 %v6235_v24, %v6234_v6 }
 0xd41   : > { %v6081_v57 = vmul.f32 %v14854_v10, %v14854_v10 }
 0xd42   : > { %v6080_v40 = vmul.f32 %v14857_v15, %v14857_v15  ;;  %7679 = vmatprep.subr.bf16.mxu1 %v7678_v5 }
 0xd43   : > { %6104 = vadd.xlane.f32.xlu1 %v6081_v57  ;;  %7681 = vmatpush3.bf16.msra.mxu1 %v7678_v5 }
 0xd44   : > { %6102 = vadd.xlane.f32.xlu0 %v6080_v40  ;;  %7683 = vmatprep.subr.bf16.mxu1 %v7682_v4  ;;  %v6542_v40 = vld [vmem:[#allocation11] sm:$0xff] }
 0xd45   : > { %v7702_v19 = vpack.c.bf16 %v6543_v33, %v6542_v40 }
 0xd47   : > { %7685 = vmatpush3.bf16.msra.mxu1 %v7682_v4  ;;  %7703 = vmatprep.subr.bf16.mxu0 %v7702_v19 }
 0xd48   : > { %v6028_v28 = vpop.xlane.xlu1 %6027  ;;  %7705 = vmatpush3.bf16.msra.mxu0 %v7702_v19 }
 0xd49   : > { %v6026_v55 = vpop.xlane.xlu0 %6025  ;;  %v6051_v54 = vmul.f32 0.0078125, %v6028_v28 }
 0xd4a   : > { %v6050_v18 = vmul.f32 0.0078125, %v6026_v55 }
 0xd4b   : > { %v14864_v34 = vsub.f32 %v14744_v42, %v6051_v54  ;;  %v6239_v42 = vld [vmem:[#allocation10 + $0x48] sm:$0xff] }
 0xd4c   : > { %v14867_v39 = vsub.f32 %v14747_v13, %v6050_v18  ;;  %v7686_v50 = vpack.c.bf16 %v6239_v42, %v6238_v32  ;;  %v6241_v13 = vld [vmem:[#allocation10 + $0x58] sm:$0xff] }
 0xd4d   : > { %v6083_v41 = vmul.f32 %v14864_v34, %v14864_v34  ;;  %v7690_v38 = vpack.c.bf16 %v6241_v13, %v6240_v29 }
 0xd4e   : > { %v6082_v53 = vmul.f32 %v14867_v39, %v14867_v39  ;;  %7687 = vmatprep.subr.bf16.mxu1 %v7686_v50 }
 0xd4f   : > { %6108 = vadd.xlane.f32.xlu1 %v6083_v41  ;;  %7689 = vmatpush3.bf16.msra.mxu1 %v7686_v50 }
 0xd50   : > { %6106 = vadd.xlane.f32.xlu0 %v6082_v53  ;;  %7691 = vmatprep.subr.bf16.mxu1 %v7690_v38 }
 0xd53   : > { %7693 = vmatpush3.bf16.msra.mxu1 %v7690_v38  ;;  %v14912_v38 = vld [vmem:[%s16430_s12] ss:$0 sm:$0xff]  ;;  %s16434_s12 = sld [smem:[#allocation209_spill]] }
 0xd54   : > { %7695 = vmatprep.subr.bf16.mxu1 %v7694_v30 }
 0xd55   : > { %v6030_v20 = vpop.xlane.xlu0 %6029 }
 0xd56   : > { %v6052_v27 = vmul.f32 0.0078125, %v6030_v20 }
 0xd57   : > { %7697 = vmatpush3.bf16.msra.mxu1 %v7694_v30 }
 0xd58   : > { %v14874_v2 = vsub.f32 %v14765_v31, %v6052_v27  ;;  %v6245_v31 = vld [vmem:[#allocation10 + $0x78] sm:$0xff]  ;;  %v14906_v27 = vld [vmem:[%s16429_s28] ss:$0 sm:$0xff]  ;;  %s16433_s28 = sld [smem:[#allocation208_spill]] }
 0xd59   : > { %v7698_v17 = vpack.c.bf16 %v6245_v31, %v6244_v7 }
 0xd5a   : > { %v6032_v23 = vpop.xlane.xlu1 %6031  ;;  %v6084_v48 = vmul.f32 %v14874_v2, %v14874_v2 }
 0xd5b   : > { %v6053_v14 = vmul.f32 0.0078125, %v6032_v23  ;;  %7699 = vmatprep.subr.bf16.mxu1 %v7698_v17 }
 0xd5c   : > { %6110 = vadd.xlane.f32.xlu0 %v6084_v48  ;;  %7701 = vmatpush3.bf16.msra.mxu1 %v7698_v17 }
 0xd5d   : > { %v14879_v11 = vsub.f32 %v14772_v59, %v6053_v14  ;;  %7734 = vmatprep.subr.bf16.mxu1 %v7702_v19 }
 0xd5f   : > { %v6085_v58 = vmul.f32 %v14879_v11, %v14879_v11 }
 0xd61   : > { %6112 = vadd.xlane.f32.xlu1 %v6085_v58 }
 0xd69   : > { %v6034_v1 = vpop.xlane.xlu0 %6033 }
 0xd6a   : > { %v6054_v49 = vmul.f32 0.0078125, %v6034_v1 }
 0xd6c   : > { %v14884_v26 = vsub.f32 %v14787_v46, %v6054_v49 }
 0xd6e   : > { %v6086_v59 = vmul.f32 %v14884_v26, %v14884_v26 }
 0xd70   : > { %6114 = vadd.xlane.f32.xlu0 %v6086_v59 }
 0xd72   : > { %v6036_v3 = vpop.xlane.xlu1 %6035 }
 0xd73   : > { %v6055_v36 = vmul.f32 0.0078125, %v6036_v3 }
 0xd75   : > { %v14889_v37 = vsub.f32 %v14796_v35, %v6055_v36 }
 0xd77   : > { %v6087_v45 = vmul.f32 %v14889_v37, %v14889_v37 }
 0xd79   : > { %6116 = vadd.xlane.f32.xlu1 %v6087_v45 }
 0xd82   : > { %v6038_v16 = vpop.xlane.xlu0 %6037  ;;  %v6040_v63 = vpop.xlane.xlu1 %6039 }
 0xd83   : > { %v6056_v0 = vmul.f32 0.0078125, %v6038_v16  ;;  %v6057_v60 = vmul.f32 0.0078125, %v6040_v63 }
 0xd85   : > { %v14894_v46 = vsub.f32 %v14816_v52, %v6056_v0  ;;  %v14897_v22 = vsub.f32 %v14819_v9, %v6057_v60 }
 0xd87   : > { %v6088_v57 = vmul.f32 %v14894_v46, %v14894_v46  ;;  %v6089_v35 = vmul.f32 %v14897_v22, %v14897_v22 }
 0xd89   : > { %6118 = vadd.xlane.f32.xlu0 %v6088_v57  ;;  %6120 = vadd.xlane.f32.xlu1 %v6089_v35 }
 0xdbf   : > { %v6091_v44 = vpop.xlane.xlu0 %6090 }
 0xdc0   : > { %v6122_v52 = vmul.f32 0.0078125, %v6091_v44 }
 0xdc2   : > { %v6138_v28 = vadd.f32 1e-05, %v6122_v52 }
 0xdc3   : > { %v6095_v6 = vpop.xlane.xlu0 %6094 }
 0xdc4   : > { %8494 = vrsqrt.f32 %v6138_v28  ;;  %v6124_v9 = vmul.f32 0.0078125, %v6095_v6  ;;  %v6093_v24 = vpop.xlane.xlu1 %6092 }
 0xdc5   : > { %v6123_v55 = vmul.f32 0.0078125, %v6093_v24 }
 0xdc6   : > { %v6140_v54 = vadd.f32 1e-05, %v6124_v9 }
 0xdc7   : > { %v6139_v5 = vadd.f32 1e-05, %v6123_v55 }
 0xdc8   : > { %8496 = vrsqrt.f32 %v6140_v54  ;;  %v6097_v18 = vpop.xlane.xlu1 %6096 }
 0xdc9   : > { %8498 = vrsqrt.f32 %v6139_v5  ;;  %v6125_v41 = vmul.f32 0.0078125, %v6097_v18 }
 0xdcb   : > { %v6099_v53 = vpop.xlane.xlu0 %6098  ;;  %v6141_v51 = vadd.f32 1e-05, %v6125_v41 }
 0xdcc   : > { %v6126_v47 = vmul.f32 0.0078125, %v6099_v53  ;;  %v6101_v32 = vpop.xlane.xlu1 %6100 }
 0xdcd   : > { %8500 = vrsqrt.f32 %v6141_v51  ;;  %v6127_v20 = vmul.f32 0.0078125, %v6101_v32 }
 0xdce   : > { %v8495_v4 = vpop.eup %8494  ;;  %v6142_v42 = vadd.f32 1e-05, %v6126_v47 }
 0xdcf   : > { %v6143_v50 = vadd.f32 1e-05, %v6127_v20  ;;  %v6170_v29 = vmul.f32 %v8495_v4, %v14824_v43 }
 0xdd0   : > { %8502 = vrsqrt.f32 %v6142_v42  ;;  %v6105_v13 = vpop.xlane.xlu1 %6104 }
 0xdd1   : > { %8504 = vrsqrt.f32 %v6143_v50  ;;  %v6103_v23 = vpop.xlane.xlu0 %6102  ;;  %v6129_v48 = vmul.f32 0.0078125, %v6105_v13  ;;  %v6192_v61 = vmul.f32 %v14906_v27, %v6170_v29 }
 0xdd2   : > { %v8497_v21 = vpop.eup %8496  ;;  %v6128_v14 = vmul.f32 0.0078125, %v6103_v23 }
 0xdd3   : > { %v8499_v30 = vpop.eup %8498  ;;  %v6145_v7 = vadd.f32 1e-05, %v6129_v48  ;;  %v14916_v31 = vadd.f32 %v14912_v38, %v6192_v61  ;;  %v6172_v43 = vmul.f32 %v8497_v21, %v14829_v62 }
 0xdd4   : > { %v6171_v58 = vmul.f32 %v8499_v30, %v14832_v56  ;;  %v6144_v17 = vadd.f32 1e-05, %v6128_v14 }
 0xdd5   : > { %8506 = vrsqrt.f32 %v6145_v7  ;;  %7494 = vmatprep.mubr.f32.mxu1 %v14916_v31  ;;  %v6194_v1 = vmul.f32 %v14906_v27, %v6172_v43 }
 0xdd6   : > { %8508 = vrsqrt.f32 %v6144_v17  ;;  %v6193_v49 = vmul.f32 %v14906_v27, %v6171_v58 }
 0xdd7   : > { %v8501_v59 = vpop.eup %8500  ;;  %v14928_v45 = vadd.f32 %v14912_v38, %v6194_v1 }
 0xdd8   : > { %v14924_v3 = vadd.f32 %v14912_v38, %v6193_v49  ;;  %v6173_v36 = vmul.f32 %v8501_v59, %v14839_v12 }
 0xdda   : > { %v8503_v62 = vpop.eup %8502  ;;  %7495 = vmatmul.mubr.f32.vlgmr.msra.gmra.mrb[16].mxu1 %v14924_v3  ;;  %v6195_v56 = vmul.f32 %v14906_v27, %v6173_v36 }
 0xddb   : > { %v8505_v16 = vpop.eup %8504  ;;  %7497 = vmatprep.mubr.f32.mxu1 %v14928_v45  ;;  %v6174_v63 = vmul.f32 %v8503_v62, %v14847_v8  ;;  %7742 = vmatpush3.bf16.msra.mxu1 %v7702_v19 }
 0xddc   : > { %v6109_v0 = vpop.xlane.xlu1 %6108  ;;  %v14935_v60 = vadd.f32 %v14912_v38, %v6195_v56  ;;  %v6175_v12 = vmul.f32 %v8505_v16, %v14842_v25 }
 0xddd   : > { %v6107_v57 = vpop.xlane.xlu0 %6106  ;;  %v6131_v35 = vmul.f32 0.0078125, %v6109_v0  ;;  %v6196_v40 = vmul.f32 %v14906_v27, %v6174_v63 }
 0xdde   : > { %v6130_v33 = vmul.f32 0.0078125, %v6107_v57  ;;  %7498 = vmatmul.mubr.f32.gmra.mrb[18].mxu1 %v14935_v60  ;;  %v6197_v44 = vmul.f32 %v14906_v27, %v6175_v12 }
 0xddf   : > { %v8507_v52 = vpop.eup %8506  ;;  %v6147_v28 = vadd.f32 1e-05, %v6131_v35  ;;  %v14942_v8 = vadd.f32 %v14912_v38, %v6196_v40 }
 0xde0   : > { %v8509_v19 = vpop.eup %8508  ;;  %v6146_v6 = vadd.f32 1e-05, %v6130_v33  ;;  %v14945_v9 = vadd.f32 %v14912_v38, %v6197_v44  ;;  %v6177_v25 = vmul.f32 %v8507_v52, %v14854_v10 }
 0xde1   : > { %8510 = vrsqrt.f32 %v6147_v28  ;;  %7500 = vmatprep.mubr.f32.mxu1 %v14942_v8  ;;  %v6176_v24 = vmul.f32 %v8509_v19, %v14857_v15 }
 0xde2   : > { %8512 = vrsqrt.f32 %v6146_v6  ;;  %7501 = vmatmul.mubr.f32.gmra.mrb[20].mxu1 %v14945_v9  ;;  %v6199_v55 = vmul.f32 %v14906_v27, %v6177_v25 }
 0xde3   : > { %v6198_v54 = vmul.f32 %v14906_v27, %v6176_v24 }
 0xde4   : > { %v14954_v5 = vadd.f32 %v14912_v38, %v6199_v55  ;;  %v6544_v55 = vld [vmem:[#allocation11 + $0x10] sm:$0xff] }
 0xde5   : > { %v14957_v18 = vadd.f32 %v14912_v38, %v6198_v54  ;;  %v6545_v54 = vld [vmem:[#allocation11 + $0x18] sm:$0xff] }
 0xde7   : > { %7503 = vmatprep.mubr.f32.mxu1 %v14957_v18 }
 0xde8   : > { %7504 = vmatmul.mubr.f32.gmra.mrb[22].mxu1 %v14954_v5 }
 0xde9   : > { %v6111_v10 = vpop.xlane.xlu0 %6110 }
 0xdea   : > { %v6132_v41 = vmul.f32 0.0078125, %v6111_v10  ;;  %v6546_v10 = vld [vmem:[#allocation11 + $0x20] sm:$0xff] }
 0xdeb   : > { %v8511_v15 = vpop.eup %8510 }
 0xdec   : > { %v8513_v53 = vpop.eup %8512  ;;  %v6148_v51 = vadd.f32 1e-05, %v6132_v41  ;;  %v6179_v47 = vmul.f32 %v8511_v15, %v14864_v34  ;;  %v6547_v41 = vld [vmem:[#allocation11 + $0x28] sm:$0xff]  ;;  %v6548_v15 = vld [vmem:[#allocation11 + $0x30] sm:$0xff] }
 0xded   : > { %v6178_v32 = vmul.f32 %v8513_v53, %v14867_v39  ;;  %v6549_v53 = vld [vmem:[#allocation11 + $0x38] sm:$0xff] }
 0xdee   : > { %8514 = vrsqrt.f32 %v6148_v51  ;;  %v6113_v20 = vpop.xlane.xlu1 %6112  ;;  %v6201_v4 = vmul.f32 %v14906_v27, %v6179_v47  ;;  %v6551_v51 = vld [vmem:[#allocation11 + $0x48] sm:$0xff] }
 0xdef   : > { %v6133_v42 = vmul.f32 0.0078125, %v6113_v20  ;;  %v6200_v50 = vmul.f32 %v14906_v27, %v6178_v32  ;;  %v6552_v32 = vld [vmem:[#allocation11 + $0x50] sm:$0xff]  ;;  %v6553_v20 = vld [vmem:[#allocation11 + $0x58] sm:$0xff] }
 0xdf0   : > { %v14966_v29 = vadd.f32 %v14912_v38, %v6201_v4  ;;  %v7722_v4 = vpack.c.bf16 %v6553_v20, %v6552_v32 }
 0xdf1   : > { %v6149_v13 = vadd.f32 1e-05, %v6133_v42  ;;  %v14969_v23 = vadd.f32 %v14912_v38, %v6200_v50  ;;  %v6554_v42 = vld [vmem:[#allocation11 + $0x60] sm:$0xff]  ;;  %v6555_v50 = vld [vmem:[#allocation11 + $0x68] sm:$0xff] }
 0xdf3   : > { %8516 = vrsqrt.f32 %v6149_v13  ;;  %7506 = vmatprep.mubr.f32.mxu1 %v14969_v23  ;;  %v7726_v13 = vpack.c.bf16 %v6555_v50, %v6554_v42 }
 0xdf4   : > { %7507 = vmatmul.mubr.f32.gmra.mrb[24].mxu1 %v14966_v29 }
 0xdf8   : > { %v8515_v34 = vpop.eup %8514 }
 0xdf9   : > { %v6180_v39 = vmul.f32 %v8515_v34, %v14874_v2  ;;  %v6556_v34 = vld [vmem:[#allocation11 + $0x70] sm:$0xff] }
 0xdfb   : > { %v6202_v48 = vmul.f32 %v14906_v27, %v6180_v39  ;;  %v6557_v39 = vld [vmem:[#allocation11 + $0x78] sm:$0xff] }
 0xdfd   : > { %v8517_v61 = vpop.eup %8516  ;;  %v14976_v21 = vadd.f32 %v14912_v38, %v6202_v48  ;;  %v6115_v14 = vpop.xlane.xlu0 %6114  ;;  %v7730_v48 = vpack.c.bf16 %v6557_v39, %v6556_v34 }
 0xdfe   : > { %v6134_v30 = vmul.f32 0.0078125, %v6115_v14  ;;  %v6181_v7 = vmul.f32 %v8517_v61, %v14879_v11  ;;  %v15012_v61 = vld [vmem:[%s16431_s7] ss:$0 sm:$0xff] }
 0xdff   : > { %7509 = vmatprep.mubr.f32.mxu1 %v14976_v21 }
 0xe00   : > { %v6150_v43 = vadd.f32 1e-05, %v6134_v30  ;;  %v6203_v58 = vmul.f32 %v14906_v27, %v6181_v7 }
 0xe02   : > { %8518 = vrsqrt.f32 %v6150_v43  ;;  %v14982_v17 = vadd.f32 %v14912_v38, %v6203_v58 }
 0xe04   : > { %7510 = vmatmul.mubr.f32.gmra.mrb[26].mxu1 %v14982_v17 }
 0xe06   : > { %v6117_v2 = vpop.xlane.xlu1 %6116 }
 0xe07   : > { %v6135_v1 = vmul.f32 0.0078125, %v6117_v2 }
 0xe09   : > { %v6151_v49 = vadd.f32 1e-05, %v6135_v1 }
 0xe0b   : > { %8520 = vrsqrt.f32 %v6151_v49 }
 0xe0c   : > { %v8519_v59 = vpop.eup %8518 }
 0xe0d   : > { %v6182_v36 = vmul.f32 %v8519_v59, %v14884_v26 }
 0xe0f   : > { %v6204_v11 = vmul.f32 %v14906_v27, %v6182_v36 }
 0xe11   : > { %v14988_v62 = vadd.f32 %v14912_v38, %v6204_v11 }
 0xe13   : > { %7512 = vmatprep.mubr.f32.mxu1 %v14988_v62 }
 0xe15   : > { %v8521_v56 = vpop.eup %8520 }
 0xe16   : > { %v6119_v16 = vpop.xlane.xlu0 %6118  ;;  %v6121_v63 = vpop.xlane.xlu1 %6120  ;;  %v6183_v0 = vmul.f32 %v8521_v56, %v14889_v37 }
 0xe17   : > { %v6136_v12 = vmul.f32 0.0078125, %v6119_v16  ;;  %v6137_v57 = vmul.f32 0.0078125, %v6121_v63 }
 0xe18   : > { %v6205_v35 = vmul.f32 %v14906_v27, %v6183_v0 }
 0xe19   : > { %v6152_v40 = vadd.f32 1e-05, %v6136_v12  ;;  %v6153_v33 = vadd.f32 1e-05, %v6137_v57 }
 0xe1a   : > { %v14994_v26 = vadd.f32 %v14912_v38, %v6205_v35 }
 0xe1b   : > { %8522 = vrsqrt.f32 %v6152_v40 }
 0xe1c   : > { %8524 = vrsqrt.f32 %v6153_v33  ;;  %7513 = vmatmul.mubr.f32.gmra.mrb[28].mxu1 %v14994_v26 }
 0xe25   : > { %v8523_v44 = vpop.eup %8522 }
 0xe26   : > { %v8525_v52 = vpop.eup %8524  ;;  %v6184_v28 = vmul.f32 %v8523_v44, %v14894_v46  ;;  %v7706_v46 = vpack.c.bf16 %v6545_v54, %v6544_v55 }
 0xe27   : > { %v6185_v19 = vmul.f32 %v8525_v52, %v14897_v22  ;;  %v7710_v22 = vpack.c.bf16 %v6547_v41, %v6546_v10 }
 0xe28   : > { %v6206_v37 = vmul.f32 %v14906_v27, %v6184_v28  ;;  %7707 = vmatprep.subr.bf16.mxu0 %v7706_v46  ;;  %7735 = vmatprep.subr.bf16.mxu1 %v7706_v46 }
 0xe29   : > { %v6207_v6 = vmul.f32 %v14906_v27, %v6185_v19  ;;  %7709 = vmatpush3.bf16.msra.mxu0 %v7706_v46  ;;  %7743 = vmatpush3.bf16.msra.mxu1 %v7706_v46  ;;  %v7714_v27 = vpack.c.bf16 %v6549_v53, %v6548_v15 }
 0xe2a   : > { %v15002_v25 = vadd.f32 %v14912_v38, %v6206_v37  ;;  %7711 = vmatprep.subr.bf16.mxu0 %v7710_v22  ;;  %7736 = vmatprep.subr.bf16.mxu1 %v7710_v22 }
 0xe2b   : > { %v15005_v24 = vadd.f32 %v14912_v38, %v6207_v6  ;;  %v6550_v38 = vld [vmem:[#allocation11 + $0x40] sm:$0xff] }
 0xe2c   : > { %7515 = vmatprep.mubr.f32.mxu1 %v15002_v25  ;;  %v7718_v47 = vpack.c.bf16 %v6551_v51, %v6550_v38 }
 0xe2d   : > { %7516 = vmatmul.mubr.f32.gmra.mrb[30].mxu1 %v15005_v24  ;;  %7713 = vmatpush3.bf16.msra.mxu0 %v7710_v22 }
 0xe2e   : > { %7744 = vmatpush3.bf16.msra.mxu1 %v7710_v22  ;;  %7715 = vmatprep.subr.bf16.mxu0 %v7714_v27 }
 0xe2f   : > { %7737 = vmatprep.subr.bf16.mxu1 %v7714_v27 }
 0xe31   : > { %7717 = vmatpush3.bf16.msra.mxu0 %v7714_v27 }
 0xe32   : > { %7745 = vmatpush3.bf16.msra.mxu1 %v7714_v27  ;;  %7719 = vmatprep.subr.bf16.mxu0 %v7718_v47 }
 0xe33   : > { %7738 = vmatprep.subr.bf16.mxu1 %v7718_v47 }
 0xe35   : > { %7721 = vmatpush3.bf16.msra.mxu0 %v7718_v47 }
 0xe36   : > { %7746 = vmatpush3.bf16.msra.mxu1 %v7718_v47  ;;  %7723 = vmatprep.subr.bf16.mxu0 %v7722_v4 }
 0xe37   : > { %7739 = vmatprep.subr.bf16.mxu1 %v7722_v4 }
 0xe39   : > { %7725 = vmatpush3.bf16.msra.mxu0 %v7722_v4 }
 0xe3a   : > { %7747 = vmatpush3.bf16.msra.mxu1 %v7722_v4  ;;  %7727 = vmatprep.subr.bf16.mxu0 %v7726_v13 }
 0xe3b   : > { %7740 = vmatprep.subr.bf16.mxu1 %v7726_v13 }
 0xe3d   : > { %7729 = vmatpush3.bf16.msra.mxu0 %v7726_v13 }
 0xe3e   : > { %7748 = vmatpush3.bf16.msra.mxu1 %v7726_v13  ;;  %7731 = vmatprep.subr.bf16.mxu0 %v7730_v48 }
 0xe3f   : > { %7741 = vmatprep.subr.bf16.mxu1 %v7730_v48 }
 0xe41   : > { %7733 = vmatpush3.bf16.msra.mxu0 %v7730_v48 }
 0xe42   : > { %7749 = vmatpush3.bf16.msra.mxu1 %v7730_v48 }
 0xead   : > { %v7496_v14 = vpop.f32.mrb[16].mxu1 }
 0xeae   : > { %v15015_v30 = vadd.f32 %v7496_v14, %v15012_v61  ;;  %v6319_v7 = vpop.f32.mrb[17].mxu1 }
 0xeaf   : > { %v6320_v43 = vadd.f32 %v15012_v61, %v6319_v7 }
 0xeb0   : > { %v6415_v58 = vmul.f32 0.044715, %v15015_v30 }
 0xeb1   : > { %v6414_v2 = vmul.f32 0.044715, %v6320_v43  ;;  %v7499_v1 = vpop.f32.mrb[18].mxu1 }
 0xeb2   : > { %v6431_v49 = vmul.f32 %v6415_v58, %v15015_v30  ;;  %v15021_v59 = vadd.f32 %v7499_v1, %v15012_v61  ;;  %v6329_v36 = vpop.f32.mrb[19].mxu1 }
 0xeb3   : > { %v6430_v11 = vmul.f32 %v6414_v2, %v6320_v43  ;;  %v15024_v56 = vadd.f32 %v15012_v61, %v6329_v36 }
 0xeb4   : > { %v6447_v16 = vmul.f32 %v6431_v49, %v15015_v30  ;;  %v6417_v63 = vmul.f32 0.044715, %v15021_v59 }
 0xeb5   : > { %v6416_v0 = vmul.f32 0.044715, %v15024_v56  ;;  %v7502_v12 = vpop.f32.mrb[20].mxu1  ;;  %v6446_v57 = vmul.f32 %v6430_v11, %v6320_v43 }
 0xeb6   : > { %v6463_v35 = vadd.f32 %v6447_v16, %v15015_v30  ;;  %v6433_v40 = vmul.f32 %v6417_v63, %v15021_v59  ;;  %v15032_v33 = vadd.f32 %v7502_v12, %v15012_v61  ;;  %v6339_v44 = vpop.f32.mrb[21].mxu1 }
 0xeb7   : > { %v6432_v52 = vmul.f32 %v6416_v0, %v15024_v56  ;;  %v15036_v28 = vadd.f32 %v15012_v61, %v6339_v44  ;;  %v6462_v19 = vadd.f32 %v6446_v57, %v6320_v43  ;;  %v6398_v0 = vmul.f32 0.5, %v6320_v43 }
 0xeb8   : > { %v6479_v37 = vmul.f32 0.7978846, %v6463_v35  ;;  %v6419_v6 = vmul.f32 0.044715, %v15032_v33  ;;  %v6449_v55 = vmul.f32 %v6433_v40, %v15021_v59  ;;  %v6399_v35 = vmul.f32 0.5, %v15015_v30 }
 0xeb9   : > { %v6418_v54 = vmul.f32 0.044715, %v15036_v28  ;;  %v6478_v10 = vmul.f32 0.7978846, %v6462_v19  ;;  %v6448_v46 = vmul.f32 %v6432_v52, %v15024_v56  ;;  %v6400_v30 = vmul.f32 0.5, %v15024_v56 }
 0xeba   : > { %8526 = vtanh.f32 %v6479_v37  ;;  %v6435_v41 = vmul.f32 %v6419_v6, %v15032_v33  ;;  %v6465_v22 = vadd.f32 %v6449_v55, %v15021_v59 }
 0xebb   : > { %v6434_v15 = vmul.f32 %v6418_v54, %v15036_v28  ;;  %v7505_v53 = vpop.f32.mrb[22].mxu1  ;;  %8528 = vtanh.f32 %v6478_v10  ;;  %v6464_v27 = vadd.f32 %v6448_v46, %v15024_v56  ;;  %v6403_v56 = vmul.f32 0.5, %v15032_v33 }
 0xebc   : > { %v15047_v38 = vadd.f32 %v7505_v53, %v15012_v61  ;;  %v6349_v51 = vpop.f32.mrb[23].mxu1  ;;  %v6481_v47 = vmul.f32 0.7978846, %v6465_v22  ;;  %v6451_v32 = vmul.f32 %v6435_v41, %v15032_v33 }
 0xebd   : > { %v15051_v20 = vadd.f32 %v15012_v61, %v6349_v51  ;;  %v6480_v4 = vmul.f32 0.7978846, %v6464_v27  ;;  %v6450_v42 = vmul.f32 %v6434_v15, %v15036_v28  ;;  %v6401_v15 = vmul.f32 0.5, %v15021_v59 }
 0xebe   : > { %v6421_v50 = vmul.f32 0.044715, %v15047_v38  ;;  %8530 = vtanh.f32 %v6481_v47  ;;  %v6467_v13 = vadd.f32 %v6451_v32, %v15032_v33 }
 0xebf   : > { %v6420_v34 = vmul.f32 0.044715, %v15051_v20  ;;  %8532 = vtanh.f32 %v6480_v4  ;;  %v6466_v39 = vadd.f32 %v6450_v42, %v15036_v28 }
 0xec0   : > { %v6437_v48 = vmul.f32 %v6421_v50, %v15047_v38  ;;  %v6483_v14 = vmul.f32 0.7978846, %v6467_v13  ;;  %v6402_v13 = vmul.f32 0.5, %v15036_v28  ;;  %v6404_v28 = vmul.f32 0.5, %v15051_v20 }
 0xec1   : > { %v6436_v7 = vmul.f32 %v6420_v34, %v15051_v20  ;;  %v6482_v58 = vmul.f32 0.7978846, %v6466_v39 }
 0xec2   : > { %8534 = vtanh.f32 %v6483_v14  ;;  %v6453_v2 = vmul.f32 %v6437_v48, %v15047_v38 }
 0xec3   : > { %8536 = vtanh.f32 %v6482_v58  ;;  %v6452_v1 = vmul.f32 %v6436_v7, %v15051_v20 }
 0xec4   : > { %v8527_v49 = vpop.eup %8526  ;;  %v6469_v36 = vadd.f32 %v6453_v2, %v15047_v38 }
 0xec5   : > { %v8529_v11 = vpop.eup %8528  ;;  %v6511_v16 = vadd.f32 1.0, %v8527_v49  ;;  %v6468_v63 = vadd.f32 %v6452_v1, %v15051_v20 }
 0xec6   : > { %v6510_v12 = vadd.f32 1.0, %v8529_v11  ;;  %v6485_v57 = vmul.f32 0.7978846, %v6469_v36 }
 0xec7   : > { %v7508_v40 = vpop.f32.mrb[24].mxu1  ;;  %v6484_v44 = vmul.f32 0.7978846, %v6468_v63  ;;  %v6527_v10 = vmul.f32 %v6511_v16, %v6399_v35  ;;  %v6405_v16 = vmul.f32 0.5, %v15047_v38 }
 0xec8   : > { %v8531_v52 = vpop.eup %8530  ;;  %v15066_v19 = vadd.f32 %v7508_v40, %v15012_v61  ;;  %v6359_v37 = vpop.f32.mrb[25].mxu1  ;;  %v6526_v6 = vmul.f32 %v6510_v12, %v6398_v0  ;;  %8538 = vtanh.f32 %v6485_v57 }
 0xec9   : > { %v8533_v55 = vpop.eup %8532  ;;  %v6360_v54 = vadd.f32 %v15012_v61, %v6359_v37  ;;  %v6513_v46 = vadd.f32 1.0, %v8531_v52  ;;  %8540 = vtanh.f32 %v6484_v44 }
 0xeca   : > { %v6423_v43 = vmul.f32 0.044715, %v15066_v19  ;;  %7550 = vmatprep.mubr.f32.mxu0 %v6526_v6  ;;  %v6512_v41 = vadd.f32 1.0, %v8533_v55 }
 0xecb   : > { %v6422_v22 = vmul.f32 0.044715, %v6360_v54  ;;  %7551 = vmatmul.mubr.f32.vlgmr.msra.gmra.mrb[32].mxu0 %v6527_v10  ;;  %v6529_v4 = vmul.f32 %v6513_v46, %v6401_v15  ;;  %v6406_v46 = vmul.f32 0.5, %v6360_v54 }
 0xecc   : > { %v8535_v53 = vpop.eup %8534  ;;  %v6439_v27 = vmul.f32 %v6423_v43, %v15066_v19  ;;  %v6528_v51 = vmul.f32 %v6512_v41, %v6400_v30  ;;  %v6407_v41 = vmul.f32 0.5, %v15066_v19 }
 0xecd   : > { %v8537_v47 = vpop.eup %8536  ;;  %v6438_v32 = vmul.f32 %v6422_v22, %v6360_v54  ;;  %v6515_v42 = vadd.f32 1.0, %v8535_v53 }
 0xece   : > { %v6455_v50 = vmul.f32 %v6439_v27, %v15066_v19  ;;  %7553 = vmatprep.mubr.f32.mxu0 %v6528_v51  ;;  %v6514_v34 = vadd.f32 1.0, %v8537_v47 }
 0xecf   : > { %7554 = vmatmul.mubr.f32.gmra.mrb[34].mxu0 %v6529_v4  ;;  %v6454_v39 = vmul.f32 %v6438_v32, %v6360_v54  ;;  %v6531_v14 = vmul.f32 %v6515_v42, %v6403_v56 }
 0xed0   : > { %v6471_v59 = vadd.f32 %v6455_v50, %v15066_v19  ;;  %v6530_v48 = vmul.f32 %v6514_v34, %v6402_v13 }
 0xed1   : > { %v6470_v7 = vadd.f32 %v6454_v39, %v6360_v54 }
 0xed2   : > { %v8539_v58 = vpop.eup %8538  ;;  %v6487_v2 = vmul.f32 0.7978846, %v6471_v59  ;;  %7556 = vmatprep.mubr.f32.mxu0 %v6530_v48 }
 0xed3   : > { %v8541_v1 = vpop.eup %8540  ;;  %7557 = vmatmul.mubr.f32.gmra.mrb[36].mxu0 %v6531_v14  ;;  %v6517_v49 = vadd.f32 1.0, %v8539_v58  ;;  %v6486_v36 = vmul.f32 0.7978846, %v6470_v7 }
 0xed4   : > { %8542 = vtanh.f32 %v6487_v2  ;;  %v6516_v11 = vadd.f32 1.0, %v8541_v1 }
 0xed5   : > { %8544 = vtanh.f32 %v6486_v36  ;;  %v6533_v0 = vmul.f32 %v6517_v49, %v6405_v16 }
 0xed6   : > { %v6532_v33 = vmul.f32 %v6516_v11, %v6404_v28 }
 0xed7   : > { %v7511_v63 = vpop.f32.mrb[26].mxu1 }
 0xed8   : > { %v6375_v12 = vadd.f32 %v7511_v63, %v15012_v61  ;;  %v6369_v57 = vpop.f32.mrb[27].mxu1  ;;  %7559 = vmatprep.mubr.f32.mxu0 %v6532_v33 }
 0xed9   : > { %v6370_v35 = vadd.f32 %v15012_v61, %v6369_v57  ;;  %7560 = vmatmul.mubr.f32.gmra.mrb[38].mxu0 %v6533_v0 }
 0xeda   : > { %v6425_v40 = vmul.f32 0.044715, %v6375_v12  ;;  %v6409_v56 = vmul.f32 0.5, %v6375_v12 }
 0xedb   : > { %v6424_v44 = vmul.f32 0.044715, %v6370_v35  ;;  %v6408_v13 = vmul.f32 0.5, %v6370_v35 }
 0xedc   : > { %v6441_v52 = vmul.f32 %v6425_v40, %v6375_v12 }
 0xedd   : > { %v6440_v37 = vmul.f32 %v6424_v44, %v6370_v35 }
 0xede   : > { %v8543_v6 = vpop.eup %8542  ;;  %v6457_v20 = vmul.f32 %v6441_v52, %v6375_v12 }
 0xedf   : > { %v8545_v55 = vpop.eup %8544  ;;  %v6519_v10 = vadd.f32 1.0, %v8543_v6  ;;  %v6456_v38 = vmul.f32 %v6440_v37, %v6370_v35 }
 0xee0   : > { %v6518_v43 = vadd.f32 1.0, %v8545_v55  ;;  %v6473_v30 = vadd.f32 %v6457_v20, %v6375_v12 }
 0xee1   : > { %v6472_v22 = vadd.f32 %v6456_v38, %v6370_v35  ;;  %v6535_v27 = vmul.f32 %v6519_v10, %v6407_v41 }
 0xee2   : > { %v6534_v15 = vmul.f32 %v6518_v43, %v6406_v46  ;;  %v6489_v53 = vmul.f32 0.7978846, %v6473_v30 }
 0xee3   : > { %v6488_v51 = vmul.f32 0.7978846, %v6472_v22 }
 0xee4   : > { %7562 = vmatprep.mubr.f32.mxu1 %v6534_v15  ;;  %8546 = vtanh.f32 %v6489_v53 }
 0xee5   : > { %7563 = vmatmul.mubr.f32.vlgmr.msra.gmra.mrb[32].mxu1 %v6535_v27  ;;  %8548 = vtanh.f32 %v6488_v51 }
 0xeee   : > { %v8547_v47 = vpop.eup %8546 }
 0xeef   : > { %v8549_v32 = vpop.eup %8548  ;;  %v7514_v4 = vpop.f32.mrb[28].mxu1  ;;  %v6521_v42 = vadd.f32 1.0, %v8547_v47 }
 0xef0   : > { %v6385_v50 = vadd.f32 %v7514_v4, %v15012_v61  ;;  %v6379_v54 = vpop.f32.mrb[29].mxu1  ;;  %v6520_v34 = vadd.f32 1.0, %v8549_v32 }
 0xef1   : > { %v6380_v19 = vadd.f32 %v15012_v61, %v6379_v54  ;;  %v6537_v14 = vmul.f32 %v6521_v42, %v6409_v56 }
 0xef2   : > { %v6427_v39 = vmul.f32 0.044715, %v6385_v50  ;;  %v6536_v59 = vmul.f32 %v6520_v34, %v6408_v13  ;;  %v6411_v38 = vmul.f32 0.5, %v6385_v50 }
 0xef3   : > { %v6426_v48 = vmul.f32 0.044715, %v6380_v19  ;;  %v6410_v20 = vmul.f32 0.5, %v6380_v19 }
 0xef4   : > { %v6443_v7 = vmul.f32 %v6427_v39, %v6385_v50  ;;  %7565 = vmatprep.mubr.f32.mxu1 %v6536_v59 }
 0xef5   : > { %v6442_v58 = vmul.f32 %v6426_v48, %v6380_v19  ;;  %7566 = vmatmul.mubr.f32.gmra.mrb[34].mxu1 %v6537_v14 }
 0xef6   : > { %v6459_v2 = vmul.f32 %v6443_v7, %v6385_v50 }
 0xef7   : > { %v6458_v1 = vmul.f32 %v6442_v58, %v6380_v19 }
 0xef8   : > { %v6475_v49 = vadd.f32 %v6459_v2, %v6385_v50  ;;  %v7124_v50 = vld [vmem:[%s16432_s23] ss:$0 sm:$0xff]  ;;  %s15313_s23 = scalar_lea.hbm %s16435_s14, %s7133_s30 }
 0xef9   : > { %v6474_v36 = vadd.f32 %v6458_v1, %v6380_v19 }
 0xefa   : > { %v6491_v28 = vmul.f32 0.7978846, %v6475_v49 }
 0xefb   : > { %v6490_v11 = vmul.f32 0.7978846, %v6474_v36 }
 0xefc   : > { %8550 = vtanh.f32 %v6491_v28 }
 0xefd   : > { %8552 = vtanh.f32 %v6490_v11 }
 0xf00   : > { %v7517_v16 = vpop.f32.mrb[30].mxu1 }
 0xf01   : > { %v6395_v33 = vadd.f32 %v7517_v16, %v15012_v61  ;;  %v6389_v63 = vpop.f32.mrb[31].mxu1 }
 0xf02   : > { %v6390_v0 = vadd.f32 %v15012_v61, %v6389_v63 }
 0xf03   : > { %v6429_v12 = vmul.f32 0.044715, %v6395_v33  ;;  %v6413_v32 = vmul.f32 0.5, %v6395_v33 }
 0xf04   : > { %v6428_v57 = vmul.f32 0.044715, %v6390_v0  ;;  %v6412_v51 = vmul.f32 0.5, %v6390_v0 }
 0xf05   : > { %v6445_v35 = vmul.f32 %v6429_v12, %v6395_v33 }
 0xf06   : > { %v8551_v40 = vpop.eup %8550  ;;  %v6444_v44 = vmul.f32 %v6428_v57, %v6390_v0 }
 0xf07   : > { %v8553_v52 = vpop.eup %8552  ;;  %v6523_v37 = vadd.f32 1.0, %v8551_v40  ;;  %v6461_v6 = vmul.f32 %v6445_v35, %v6395_v33 }
 0xf08   : > { %v6522_v55 = vadd.f32 1.0, %v8553_v52  ;;  %v6460_v10 = vmul.f32 %v6444_v44, %v6390_v0 }
 0xf09   : > { %v6477_v46 = vadd.f32 %v6461_v6, %v6395_v33  ;;  %v6539_v41 = vmul.f32 %v6523_v37, %v6411_v38 }
 0xf0a   : > { %v6538_v43 = vmul.f32 %v6522_v55, %v6410_v20  ;;  %v6476_v30 = vadd.f32 %v6460_v10, %v6390_v0 }
 0xf0b   : > { %v6493_v22 = vmul.f32 0.7978846, %v6477_v46 }
 0xf0c   : > { %7568 = vmatprep.mubr.f32.mxu1 %v6538_v43  ;;  %v6492_v15 = vmul.f32 0.7978846, %v6476_v30 }
 0xf0d   : > { %7569 = vmatmul.mubr.f32.gmra.mrb[36].mxu1 %v6539_v41  ;;  %8554 = vtanh.f32 %v6493_v22 }
 0xf0e   : > { %8556 = vtanh.f32 %v6492_v15 }
 0xf17   : > { %v8555_v61 = vpop.eup %8554 }
 0xf18   : > { %v8557_v53 = vpop.eup %8556  ;;  %v6525_v27 = vadd.f32 1.0, %v8555_v61 }
 0xf19   : > { %v6524_v47 = vadd.f32 1.0, %v8557_v53 }
 0xf1a   : > { %v6541_v42 = vmul.f32 %v6525_v27, %v6413_v32 }
 0xf1b   : > { %v6540_v4 = vmul.f32 %v6524_v47, %v6412_v51 }
 0xf1d   : > { %7571 = vmatprep.mubr.f32.mxu1 %v6540_v4 }
 0xf1e   : > { %7572 = vmatmul.mubr.f32.gmra.mrb[38].mxu1 %v6541_v42 }
 0xf9e   : > { %v7552_v54 = vpop.f32.mrb[32].mxu0 }
 0xf9f   : > { %v6637_v13 = vadd.f32 %v7552_v54, %v7124_v50  ;;  %v6631_v34 = vpop.f32.mrb[33].mxu0 }
 0xfa0   : > { %v6632_v19 = vadd.f32 %v7124_v50, %v6631_v34 }
 0xfa1   : > { %v15090_v56 = vadd.f32 %v6637_v13, %v14924_v3 }
 0xfa2   : > { %v15093_v39 = vadd.f32 %v6632_v19, %v14916_v31  ;;  %v7555_v59 = vpop.f32.mrb[34].mxu0 }
 0xfa3   : > { %v6647_v48 = vadd.f32 %v7555_v59, %v7124_v50  ;;  %6730 = vadd.xlane.f32.xlu1 %v15090_v56  ;;  %v6641_v14 = vpop.f32.mrb[35].mxu0 }
 0xfa4   : > { %v6642_v7 = vadd.f32 %v7124_v50, %v6641_v14  ;;  %6728 = vadd.xlane.f32.xlu0 %v15093_v39 }
 0xfa5   : > { %v15098_v58 = vadd.f32 %v6647_v48, %v14935_v60 }
 0xfa6   : > { %v15101_v2 = vadd.f32 %v6642_v7, %v14928_v45  ;;  %v7558_v1 = vpop.f32.mrb[36].mxu0 }
 0xfa7   : > { %v6657_v3 = vadd.f32 %v7558_v1, %v7124_v50  ;;  %6734 = vadd.xlane.f32.xlu1 %v15098_v58  ;;  %v6651_v31 = vpop.f32.mrb[37].mxu0 }
 0xfa8   : > { %v6652_v49 = vadd.f32 %v7124_v50, %v6651_v31  ;;  %6732 = vadd.xlane.f32.xlu0 %v15101_v2 }
 0xfa9   : > { %v15106_v36 = vadd.f32 %v6657_v3, %v14945_v9 }
 0xfaa   : > { %v15109_v28 = vadd.f32 %v6652_v49, %v14942_v8 }
 0xfab   : > { %6738 = vadd.xlane.f32.xlu1 %v15106_v36 }
 0xfac   : > { %v7561_v60 = vpop.f32.mrb[38].mxu0  ;;  %6736 = vadd.xlane.f32.xlu0 %v15109_v28 }
 0xfad   : > { %v6667_v45 = vadd.f32 %v7561_v60, %v7124_v50  ;;  %v6661_v11 = vpop.f32.mrb[39].mxu0 }
 0xfae   : > { %v6662_v16 = vadd.f32 %v7124_v50, %v6661_v11 }
 0xfaf   : > { %v15114_v33 = vadd.f32 %v6667_v45, %v14954_v5 }
 0xfb0   : > { %v15117_v63 = vadd.f32 %v6662_v16, %v14957_v18 }
 0xfb1   : > { %6742 = vadd.xlane.f32.xlu1 %v15114_v33 }
 0xfb2   : > { %6740 = vadd.xlane.f32.xlu0 %v15117_v63 }
 0xfb8   : > { %v7564_v8 = vpop.f32.mrb[32].mxu1 }
 0xfb9   : > { %v6677_v9 = vadd.f32 %v7564_v8, %v7124_v50  ;;  %v6671_v0 = vpop.f32.mrb[33].mxu1 }
 0xfba   : > { %v6672_v12 = vadd.f32 %v7124_v50, %v6671_v0 }
 0xfbb   : > { %v15122_v57 = vadd.f32 %v6677_v9, %v14966_v29 }
 0xfbc   : > { %v15125_v35 = vadd.f32 %v6672_v12, %v14969_v23 }
 0xfbd   : > { %6746 = vadd.xlane.f32.xlu1 %v15122_v57 }
 0xfbe   : > { %6744 = vadd.xlane.f32.xlu0 %v15125_v35 }
 0xfc8   : > { %v7567_v5 = vpop.f32.mrb[34].mxu1 }
 0xfc9   : > { %v6687_v18 = vadd.f32 %v7567_v5, %v7124_v50  ;;  %v6681_v40 = vpop.f32.mrb[35].mxu1 }
 0xfca   : > { %v6682_v44 = vadd.f32 %v7124_v50, %v6681_v40 }
 0xfcb   : > { %v15130_v52 = vadd.f32 %v6687_v18, %v14982_v17 }
 0xfcc   : > { %v15133_v37 = vadd.f32 %v6682_v44, %v14976_v21 }
 0xfcd   : > { %6750 = vadd.xlane.f32.xlu1 %v15130_v52 }
 0xfce   : > { %6748 = vadd.xlane.f32.xlu0 %v15133_v37 }
 0xfe0   : > { %v7570_v29 = vpop.f32.mrb[36].mxu1 }
 0xfe1   : > { %v6697_v23 = vadd.f32 %v7570_v29, %v7124_v50  ;;  %v6691_v6 = vpop.f32.mrb[37].mxu1 }
 0xfe2   : > { %v6692_v20 = vadd.f32 %v7124_v50, %v6691_v6 }
 0xfe3   : > { %v15138_v55 = vadd.f32 %v6697_v23, %v14994_v26 }
 0xfe4   : > { %v15141_v10 = vadd.f32 %v6692_v20, %v14988_v62 }
 0xfe5   : > { %6754 = vadd.xlane.f32.xlu1 %v15138_v55 }
 0xfe6   : > { %6752 = vadd.xlane.f32.xlu0 %v15141_v10 }
 0xff1   : > { %v7573_v21 = vpop.f32.mrb[38].mxu1 }
 0xff2   : > { %v6707_v17 = vadd.f32 %v7573_v21, %v7124_v50  ;;  %v6701_v38 = vpop.f32.mrb[39].mxu1 }
 0xff3   : > { %v6702_v46 = vadd.f32 %v7124_v50, %v6701_v38 }
 0xff4   : > { %v15146_v43 = vadd.f32 %v6707_v17, %v15005_v24 }
 0xff5   : > { %v15149_v30 = vadd.f32 %v6702_v46, %v15002_v25 }
 0xff6   : > { %6758 = vadd.xlane.f32.xlu1 %v15146_v43 }
 0xff7   : > { %6756 = vadd.xlane.f32.xlu0 %v15149_v30 }
0x1030   : > { %v6731_v62 = vpop.xlane.xlu1 %6730 }
0x1031   : > { %v6761_v26 = vmul.f32 0.0078125, %v6731_v62  ;;  %v6729_v41 = vpop.xlane.xlu0 %6728 }
0x1032   : > { %v6760_v22 = vmul.f32 0.0078125, %v6729_v41 }
0x1033   : > { %v15154_v15 = vsub.f32 %v15090_v56, %v6761_v26 }
0x1034   : > { %v15157_v61 = vsub.f32 %v15093_v39, %v6760_v22  ;;  %v6735_v53 = vpop.xlane.xlu1 %6734 }
0x1035   : > { %v6763_v24 = vmul.f32 0.0078125, %v6735_v53  ;;  %v6733_v27 = vpop.xlane.xlu0 %6732  ;;  %v6793_v25 = vmul.f32 %v15154_v15, %v15154_v15 }
0x1036   : > { %v6762_v51 = vmul.f32 0.0078125, %v6733_v27  ;;  %v6792_v47 = vmul.f32 %v15157_v61, %v15157_v61 }
0x1037   : > { %v15164_v32 = vsub.f32 %v15098_v58, %v6763_v24  ;;  %6810 = vadd.xlane.f32.xlu1 %v6793_v25 }
0x1038   : > { %v15167_v4 = vsub.f32 %v15101_v2, %v6762_v51  ;;  %v6739_v42 = vpop.xlane.xlu1 %6738  ;;  %6808 = vadd.xlane.f32.xlu0 %v6792_v47 }
0x1039   : > { %v6765_v50 = vmul.f32 0.0078125, %v6739_v42  ;;  %v6737_v54 = vpop.xlane.xlu0 %6736  ;;  %v6795_v13 = vmul.f32 %v15164_v32, %v15164_v32 }
0x103a   : > { %v6764_v34 = vmul.f32 0.0078125, %v6737_v54  ;;  %v6794_v19 = vmul.f32 %v15167_v4, %v15167_v4 }
0x103b   : > { %v15174_v56 = vsub.f32 %v15106_v36, %v6765_v50  ;;  %6814 = vadd.xlane.f32.xlu1 %v6795_v13 }
0x103c   : > { %v15177_v39 = vsub.f32 %v15109_v28, %v6764_v34  ;;  %6812 = vadd.xlane.f32.xlu0 %v6794_v19 }
0x103d   : > { %v6797_v59 = vmul.f32 %v15174_v56, %v15174_v56 }
0x103e   : > { %v6743_v48 = vpop.xlane.xlu1 %6742  ;;  %v6796_v14 = vmul.f32 %v15177_v39, %v15177_v39 }
0x103f   : > { %v6767_v7 = vmul.f32 0.0078125, %v6743_v48  ;;  %v6741_v58 = vpop.xlane.xlu0 %6740  ;;  %6818 = vadd.xlane.f32.xlu1 %v6797_v59 }
0x1040   : > { %v6766_v2 = vmul.f32 0.0078125, %v6741_v58  ;;  %6816 = vadd.xlane.f32.xlu0 %v6796_v14  ;;  %v15236_v58 = vld [vmem:[%s16433_s28] ss:$0 sm:$0xff]  ;;  %s8780_s28 = sshll.u32 %s8867_s17, 4  ;;  %s8781_s28 = int_to_ptr.vmem [resolvable:$false] %s8780_s28 }
0x1041   : > { %v15184_v1 = vsub.f32 %v15114_v33, %v6767_v7  ;;  %s8782_s25 = scalar_lea.vmem %s8781_s28, 4096  ;;  %p8783_p13 = scmp.lt.s32.totalorder %s15315_s1, %s8781_s28 }
0x1042   : > { %v15187_v3 = vsub.f32 %v15117_v63, %v6766_v2  ;;  %p8784_p0 = scmp.lt.s32.totalorder %s8782_s25, %s8776_s15 }
0x1043   : > { %v6799_v31 = vmul.f32 %v15184_v1, %v15184_v1 }
0x1044   : > { %v6798_v49 = vmul.f32 %v15187_v3, %v15187_v3  ;;  %p8785_p2 = por %p8784_p0, %p8783_p13 }
0x1045   : > { %6822 = vadd.xlane.f32.xlu1 %v6799_v31 }
0x1046   : > { %6820 = vadd.xlane.f32.xlu0 %v6798_v49  ;;  %p8786_p8 = pnand %p8785_p2, %p8779_p1 }
0x104a   : > { %v6747_v36 = vpop.xlane.xlu1 %6746 }
0x104b   : > { %v6769_v28 = vmul.f32 0.0078125, %v6747_v36  ;;  %v6745_v60 = vpop.xlane.xlu0 %6744 }
0x104c   : > { %v6768_v45 = vmul.f32 0.0078125, %v6745_v60  ;;  %v15242_v60 = vld [vmem:[%s16434_s12] ss:$0 sm:$0xff] }
0x104d   : > { %v15194_v11 = vsub.f32 %v15122_v57, %v6769_v28 }
0x104e   : > { %v15197_v16 = vsub.f32 %v15125_v35, %v6768_v45 }
0x104f   : > { %v6801_v33 = vmul.f32 %v15194_v11, %v15194_v11 }
0x1050   : > { %v6800_v63 = vmul.f32 %v15197_v16, %v15197_v16 }
0x1051   : > { %6826 = vadd.xlane.f32.xlu1 %v6801_v33 }
0x1052   : > { %6824 = vadd.xlane.f32.xlu0 %v6800_v63 }
0x105a   : > { %v6751_v8 = vpop.xlane.xlu1 %6750 }
0x105b   : > { %v6771_v9 = vmul.f32 0.0078125, %v6751_v8  ;;  %v6749_v0 = vpop.xlane.xlu0 %6748 }
0x105c   : > { %v6770_v12 = vmul.f32 0.0078125, %v6749_v0 }
0x105d   : > { %v15204_v5 = vsub.f32 %v15130_v52, %v6771_v9 }
0x105e   : > { %v15207_v57 = vsub.f32 %v15133_v37, %v6770_v12 }
0x105f   : > { %v6803_v35 = vmul.f32 %v15204_v5, %v15204_v5 }
0x1060   : > { %v6802_v18 = vmul.f32 %v15207_v57, %v15207_v57 }
0x1061   : > { %6830 = vadd.xlane.f32.xlu1 %v6803_v35 }
0x1062   : > { %6828 = vadd.xlane.f32.xlu0 %v6802_v18 }
0x1072   : > { %v6755_v40 = vpop.xlane.xlu1 %6754 }
0x1073   : > { %v6773_v44 = vmul.f32 0.0078125, %v6755_v40  ;;  %v6753_v29 = vpop.xlane.xlu0 %6752 }
0x1074   : > { %v6772_v23 = vmul.f32 0.0078125, %v6753_v29 }
0x1075   : > { %v15214_v6 = vsub.f32 %v15138_v55, %v6773_v44 }
0x1076   : > { %v15217_v52 = vsub.f32 %v15141_v10, %v6772_v23 }
0x1077   : > { %v6805_v37 = vmul.f32 %v15214_v6, %v15214_v6 }
0x1078   : > { %v6804_v20 = vmul.f32 %v15217_v52, %v15217_v52 }
0x1079   : > { %6834 = vadd.xlane.f32.xlu1 %v6805_v37 }
0x107a   : > { %6832 = vadd.xlane.f32.xlu0 %v6804_v20 }
0x1083   : > { %v6759_v21 = vpop.xlane.xlu1 %6758 }
0x1084   : > { %v6775_v17 = vmul.f32 0.0078125, %v6759_v21  ;;  %v6757_v38 = vpop.xlane.xlu0 %6756 }
0x1085   : > { %v6774_v46 = vmul.f32 0.0078125, %v6757_v38 }
0x1086   : > { %v15224_v62 = vsub.f32 %v15146_v43, %v6775_v17 }
0x1087   : > { %v15227_v55 = vsub.f32 %v15149_v30, %v6774_v46 }
0x1088   : > { %v6807_v10 = vmul.f32 %v15224_v62, %v15224_v62 }
0x1089   : > { %v6806_v26 = vmul.f32 %v15227_v55, %v15227_v55 }
0x108a   : > { %6838 = vadd.xlane.f32.xlu1 %v6807_v10 }
0x108b   : > { %6836 = vadd.xlane.f32.xlu0 %v6806_v26 }
0x10c4   : > { %v6811_v41 = vpop.xlane.xlu1 %6810 }
0x10c5   : > { %v6841_v22 = vmul.f32 0.0078125, %v6811_v41  ;;  %v6809_v53 = vpop.xlane.xlu0 %6808 }
0x10c6   : > { %v6840_v24 = vmul.f32 0.0078125, %v6809_v53 }
0x10c7   : > { %v6857_v27 = vadd.f32 1e-05, %v6841_v22 }
0x10c8   : > { %v6856_v25 = vadd.f32 1e-05, %v6840_v24  ;;  %v6815_v51 = vpop.xlane.xlu1 %6814 }
0x10c9   : > { %8558 = vrsqrt.f32 %v6857_v27  ;;  %v6843_v43 = vmul.f32 0.0078125, %v6815_v51  ;;  %v6813_v47 = vpop.xlane.xlu0 %6812 }
0x10ca   : > { %8560 = vrsqrt.f32 %v6856_v25  ;;  %v6842_v30 = vmul.f32 0.0078125, %v6813_v47 }
0x10cb   : > { %v6859_v42 = vadd.f32 1e-05, %v6843_v43 }
0x10cc   : > { %v6858_v50 = vadd.f32 1e-05, %v6842_v30  ;;  %v6819_v54 = vpop.xlane.xlu1 %6818 }
0x10cd   : > { %8562 = vrsqrt.f32 %v6859_v42  ;;  %v6845_v13 = vmul.f32 0.0078125, %v6819_v54  ;;  %v6817_v34 = vpop.xlane.xlu0 %6816 }
0x10ce   : > { %8564 = vrsqrt.f32 %v6858_v50  ;;  %v6844_v19 = vmul.f32 0.0078125, %v6817_v34 }
0x10cf   : > { %v6861_v59 = vadd.f32 1e-05, %v6845_v13 }
0x10d0   : > { %v6860_v48 = vadd.f32 1e-05, %v6844_v19 }
0x10d1   : > { %8566 = vrsqrt.f32 %v6861_v59 }
0x10d2   : > { %8568 = vrsqrt.f32 %v6860_v48  ;;  %v6823_v14 = vpop.xlane.xlu1 %6822 }
0x10d3   : > { %v8559_v7 = vpop.eup %8558  ;;  %v6847_v2 = vmul.f32 0.0078125, %v6823_v14  ;;  %v6821_v31 = vpop.xlane.xlu0 %6820 }
0x10d4   : > { %v8561_v49 = vpop.eup %8560  ;;  %v6889_v36 = vmul.f32 %v8559_v7, %v15154_v15  ;;  %v6846_v28 = vmul.f32 0.0078125, %v6821_v31 }
0x10d5   : > { %v6888_v45 = vmul.f32 %v8561_v49, %v15157_v61  ;;  %v6863_v33 = vadd.f32 1e-05, %v6847_v2 }
0x10d6   : > { %v6911_v63 = vmul.f32 %v15236_v58, %v6889_v36  ;;  %v6862_v8 = vadd.f32 1e-05, %v6846_v28 }
0x10d7   : > { %v8563_v9 = vpop.eup %8562  ;;  %v6910_v0 = vmul.f32 %v15236_v58, %v6888_v45  ;;  %8570 = vrsqrt.f32 %v6863_v33 }
0x10d8   : > { %v8565_v12 = vpop.eup %8564  ;;  %v6933_v15 = vadd.f32 %v15242_v60, %v6911_v63  ;;  %v6891_v35 = vmul.f32 %v8563_v9, %v15164_v32  ;;  %8572 = vrsqrt.f32 %v6862_v8 }
0x10d9   : > { %v6932_v18 = vadd.f32 %v15242_v60, %v6910_v0  ;;  %v6890_v40 = vmul.f32 %v8565_v12, %v15167_v4 }
0x10da   : > { %6949 = vst [vmem:[%s15253_s10 + $0x8] sm:$0xff] %v6933_v15  ;;  %v6913_v61 = vmul.f32 %v15236_v58, %v6891_v35 }
0x10db   : > { %v8567_v44 = vpop.eup %8566  ;;  %6948 = vst [vmem:[%s15253_s10] sm:$0xff] %v6932_v18  ;;  %v6912_v29 = vmul.f32 %v15236_v58, %v6890_v40 }
0x10dc   : > { %v8569_v32 = vpop.eup %8568  ;;  %v6935_v23 = vadd.f32 %v15242_v60, %v6913_v61  ;;  %v6893_v37 = vmul.f32 %v8567_v44, %v15174_v56 }
0x10dd   : > { %v6934_v4 = vadd.f32 %v15242_v60, %v6912_v29  ;;  %v6892_v20 = vmul.f32 %v8569_v32, %v15177_v39 }
0x10de   : > { %6951 = vst [vmem:[%s15253_s10 + $0x18] sm:$0xff] %v6935_v23  ;;  %v6915_v21 = vmul.f32 %v15236_v58, %v6893_v37  ;;  %v6827_v17 = vpop.xlane.xlu1 %6826 }
0x10df   : > { %6950 = vst [vmem:[%s15253_s10 + $0x10] sm:$0xff] %v6934_v4  ;;  %v6914_v38 = vmul.f32 %v15236_v58, %v6892_v20  ;;  %v6849_v46 = vmul.f32 0.0078125, %v6827_v17  ;;  %v6825_v10 = vpop.xlane.xlu0 %6824 }
0x10e0   : > { %v6937_v26 = vadd.f32 %v15242_v60, %v6915_v21  ;;  %v6848_v41 = vmul.f32 0.0078125, %v6825_v10 }
0x10e1   : > { %v8571_v56 = vpop.eup %8570  ;;  %v6936_v22 = vadd.f32 %v15242_v60, %v6914_v38  ;;  %v6865_v53 = vadd.f32 1e-05, %v6849_v46 }
0x10e2   : > { %v8573_v39 = vpop.eup %8572  ;;  %6953 = vst [vmem:[%s15253_s10 + $0x28] sm:$0xff] %v6937_v26  ;;  %v6895_v24 = vmul.f32 %v8571_v56, %v15184_v1  ;;  %v6864_v27 = vadd.f32 1e-05, %v6848_v41 }
0x10e3   : > { %6952 = vst [vmem:[%s15253_s10 + $0x20] sm:$0xff] %v6936_v22  ;;  %v6894_v25 = vmul.f32 %v8573_v39, %v15187_v3  ;;  %8574 = vrsqrt.f32 %v6865_v53 }
0x10e4   : > { %v6917_v51 = vmul.f32 %v15236_v58, %v6895_v24  ;;  %8576 = vrsqrt.f32 %v6864_v27 }
0x10e5   : > { %v6916_v43 = vmul.f32 %v15236_v58, %v6894_v25 }
0x10e6   : > { %v6939_v47 = vadd.f32 %v15242_v60, %v6917_v51 }
0x10e7   : > { %v6938_v30 = vadd.f32 %v15242_v60, %v6916_v43 }
0x10e8   : > { %6955 = vst [vmem:[%s15253_s10 + $0x38] sm:$0xff] %v6939_v47 }
0x10e9   : > { %6954 = vst [vmem:[%s15253_s10 + $0x30] sm:$0xff] %v6938_v30 }
0x10ed   : > { %v8575_v42 = vpop.eup %8574 }
0x10ee   : > { %v8577_v50 = vpop.eup %8576  ;;  %v6897_v1 = vmul.f32 %v8575_v42, %v15194_v11  ;;  %v6831_v54 = vpop.xlane.xlu1 %6830 }
0x10ef   : > { %v6896_v3 = vmul.f32 %v8577_v50, %v15197_v16  ;;  %v6851_v13 = vmul.f32 0.0078125, %v6831_v54  ;;  %v6829_v34 = vpop.xlane.xlu0 %6828 }
0x10f0   : > { %v6919_v19 = vmul.f32 %v15236_v58, %v6897_v1  ;;  %v6850_v59 = vmul.f32 0.0078125, %v6829_v34 }
0x10f1   : > { %v6918_v48 = vmul.f32 %v15236_v58, %v6896_v3  ;;  %v6867_v14 = vadd.f32 1e-05, %v6851_v13 }
0x10f2   : > { %v6941_v7 = vadd.f32 %v15242_v60, %v6919_v19  ;;  %v6866_v2 = vadd.f32 1e-05, %v6850_v59 }
0x10f3   : > { %v6940_v31 = vadd.f32 %v15242_v60, %v6918_v48  ;;  %8578 = vrsqrt.f32 %v6867_v14 }
0x10f4   : > { %6957 = vst [vmem:[%s15253_s10 + $0x48] sm:$0xff] %v6941_v7  ;;  %8580 = vrsqrt.f32 %v6866_v2 }
0x10f5   : > { %6956 = vst [vmem:[%s15253_s10 + $0x40] sm:$0xff] %v6940_v31 }
0x10fd   : > { %v8579_v11 = vpop.eup %8578 }
0x10fe   : > { %v8581_v16 = vpop.eup %8580  ;;  %v6899_v49 = vmul.f32 %v8579_v11, %v15204_v5 }
0x10ff   : > { %v6898_v36 = vmul.f32 %v8581_v16, %v15207_v57 }
0x1100   : > { %v6921_v28 = vmul.f32 %v15236_v58, %v6899_v49 }
0x1101   : > { %v6920_v45 = vmul.f32 %v15236_v58, %v6898_v36 }
0x1102   : > { %v6943_v33 = vadd.f32 %v15242_v60, %v6921_v28 }
0x1103   : > { %v6942_v63 = vadd.f32 %v15242_v60, %v6920_v45 }
0x1104   : > { %6959 = vst [vmem:[%s15253_s10 + $0x58] sm:$0xff] %v6943_v33 }
0x1105   : > { %6958 = vst [vmem:[%s15253_s10 + $0x50] sm:$0xff] %v6942_v63 }
0x1106   : > { %v6835_v8 = vpop.xlane.xlu1 %6834 }
0x1107   : > { %v6853_v9 = vmul.f32 0.0078125, %v6835_v8  ;;  %v6833_v0 = vpop.xlane.xlu0 %6832 }
0x1108   : > { %v6852_v12 = vmul.f32 0.0078125, %v6833_v0 }
0x1109   : > { %v6869_v15 = vadd.f32 1e-05, %v6853_v9 }
0x110a   : > { %v6868_v35 = vadd.f32 1e-05, %v6852_v12 }
0x110b   : > { %8582 = vrsqrt.f32 %v6869_v15 }
0x110c   : > { %8584 = vrsqrt.f32 %v6868_v35 }
0x1115   : > { %v8583_v5 = vpop.eup %8582 }
0x1116   : > { %v8585_v57 = vpop.eup %8584  ;;  %v6901_v18 = vmul.f32 %v8583_v5, %v15214_v6 }
0x1117   : > { %v6900_v40 = vmul.f32 %v8585_v57, %v15217_v52  ;;  %v6839_v61 = vpop.xlane.xlu1 %6838 }
0x1118   : > { %v6923_v44 = vmul.f32 %v15236_v58, %v6901_v18  ;;  %v6855_v29 = vmul.f32 0.0078125, %v6839_v61  ;;  %v6837_v32 = vpop.xlane.xlu0 %6836 }
0x1119   : > { %v6922_v23 = vmul.f32 %v15236_v58, %v6900_v40  ;;  %v6854_v37 = vmul.f32 0.0078125, %v6837_v32 }
0x111a   : > { %v6945_v4 = vadd.f32 %v15242_v60, %v6923_v44  ;;  %v6871_v20 = vadd.f32 1e-05, %v6855_v29 }
0x111b   : > { %v6944_v21 = vadd.f32 %v15242_v60, %v6922_v23  ;;  %v6870_v17 = vadd.f32 1e-05, %v6854_v37 }
0x111c   : > { %6961 = vst [vmem:[%s15253_s10 + $0x68] sm:$0xff] %v6945_v4  ;;  %8586 = vrsqrt.f32 %v6871_v20 }
0x111d   : > { %6960 = vst [vmem:[%s15253_s10 + $0x60] sm:$0xff] %v6944_v21  ;;  %8588 = vrsqrt.f32 %v6870_v17 }
0x1126   : > { %v8587_v6 = vpop.eup %8586 }
0x1127   : > { %v8589_v52 = vpop.eup %8588  ;;  %v6903_v38 = vmul.f32 %v8587_v6, %v15224_v62 }
0x1128   : > { %v6902_v46 = vmul.f32 %v8589_v52, %v15227_v55 }
0x1129   : > { %v6925_v10 = vmul.f32 %v15236_v58, %v6903_v38 }
0x112a   : > { %v6924_v26 = vmul.f32 %v15236_v58, %v6902_v46 }
0x112b   : > { %v6947_v41 = vadd.f32 %v15242_v60, %v6925_v10 }
0x112c   : > { %v6946_v62 = vadd.f32 %v15242_v60, %v6924_v26 }
0x112d   : > { %6963 = vst [vmem:[%s15253_s10 + $0x78] sm:$0xff] %v6947_v41 }
0x112e   : > { %6962 = vst [vmem:[%s15253_s10 + $0x70] sm:$0xff] %v6946_v62 }
0x112f   : > { %8789 = shalt.err (!%p8786_p8)
}
0x1130   : > { %s8790_s13 = scalar_lea.hbm %s15313_s23, 2048  ;;  %s8794_s30 = scalar_lea.hbm %s16435_s14, 4096 }
0x1131   : > { %p8791_p6 = scmp.ne.s32.totalorder %s15313_s23, %s8790_s13  ;;  %p8795_p3 = scmp.lt.u32.totalorder %s15313_s23, %s16435_s14 }
0x1132   : > { %p8796_p5 = scmp.lt.u32.totalorder %s8794_s30, %s8790_s13  ;;  %p8798_p7 = scmp.lt.u32.totalorder %s8790_s13, %s15313_s23 }
0x1133   : > { %p8792_p10 = pnand %p8791_p6, %p16436_p4 }
0x1134   : > { %p8797_p9 = por %p8796_p5, %p8795_p3 }
0x1135   : > { %p8793_p11 = pneg %p8792_p10 }
0x1136   : > { %p8799_p12 = por %p8798_p7, %p8797_p9 }
0x1138   : > { %p8800_p1 = pnand %p8799_p12, %p8793_p11 }
0x113a   : > { %8803 = shalt.err (!%p8800_p1)
}
0x113b   : > { %s8868_s15 = smov 128   ;;  %s8869_s17 = smov 8  }
0x113c   : > { %7772 = dma.vmem_to_hbm [thread:$0]  (%p16436_p4), %s15315_s1, 2048, %s15313_s23, %s6965_s24, %s8868_s15, %s8868_s15, %s8869_s17  }
0x113d PF: > { %s6993_s28 = sand.u32 1, %s8842_s18   ;;  %p16437_p13 = scmp.ne.s32.totalorder %s15637_s22, 0 }
0x113e   : > { %p16438_p0 = scmp.ge.s32.totalorder %s8854_s21, 2  ;;  %s6994_s25 = scalar_lea.sflag [#allocation4], %s6993_s28 }
0x1140   : > { %p7795_p2 = pnand %p16438_p0, %p16437_p13 }
0x1142   : > { %8837 = dma.done.wait (!%p7795_p2), %s6994_s25, 2048  }
0x1143   : > { %8839 = vsyncadd (!%p7795_p2), %s6994_s25, 4294965248  ;;  %p31_p8 = scmp.ge.s32.totalorder %s9123_s26, 4   ;;  %s16439_s18 = smov %s8846_s19 }
0x1144   : > { %s16440_s19 = smov %s8850_s20  ;;  %s16441_s20 = smov %s9135_s8 }
0x1145   : > { %s16442_s21 = smov %s9123_s26  ;;  %33 = sbr.rel (!%p31_p8) target bundleno = 17 (0x11), region = 145 }
0x114c   :  { %6999 = vsyncpa [#allocation3], 1 }
0x114d   :  { %7001 = vsyncpa [#allocation3 + $0x1], 1 }
0x114e   :  { %7002 = vsyncpa [#allocation6], 1 }
0x114f   :  { %7003 = vsyncpa [#allocation9], 1 }
0x1150   :  { %7004 = vsyncpa [#allocation12], 1 }
0x1151   :  { %7005 = vsyncpa [#allocation4], 1 }
0x1152   :  { %7007 = vsyncpa [#allocation4 + $0x1], 1 }

</bundles_post_ra>
